<compile_context>
chip_gen: v5e
topology: v5e:2x2
jax: 0.10.0
libtpu: 0.0.40
codegen_flags: <defaults>
</compile_context>

<pallas_src>
import functools
import math

import jax
import jax.numpy as jnp
from jax.experimental import pallas as pl
from jax.experimental.pallas import tpu as pltpu

LANE = 128


def _round_up(x, m):
    return ((x + m - 1) // m) * m


def _default_vmem_limit():
    """Generation-aware VMEM budget: ~3/4 of physical VMEM, capped at 100 MiB.
    v5e/v6e (128 MiB) -> 96 MiB; v7x (64 MiB) -> 48 MiB."""
    cap = 128 * 1024 * 1024
    try:
        info = pltpu.get_tpu_info()
        cap = int(getattr(info, "vmem_capacity_bytes", cap))
    except Exception:
        pass
    return int(min(100 * 1024 * 1024, cap * 3 // 4))


VMEM_LIMIT = _default_vmem_limit()


def _pick_tile(total, target, aligns=(256, 128)):
    """Largest divisor of `total` that is <= target and aligned (prefer 256 for
    the 256-wide MXU on v6e/v7x, fall back to 128); else `total` itself."""
    if total <= target:
        return total
    for align in aligns:
        t = (target // align) * align
        while t >= align:
            if total % t == 0:
                return t
            t -= align
    return total


def _pick_rb(h, w, need_even):
    """Row-chunk size for the in-kernel conv loop: divisor of h (even when the
    2x2 pool is fused) with rb*w around 1-2k matmul rows."""
    best = None
    for rb in range(1, h + 1):
        if h % rb:
            continue
        if need_even and rb % 2:
            continue
        if best is None or rb * w <= 2048:
            best = rb
    return best


# ----------------------------------------------------------------------------
# Kernels
# ----------------------------------------------------------------------------
def conv_bn_relu_pool_kernel(x_ref, w_ref, shift_ref, o_ref, *,
                             H, W, Cin, Cp, RB, pool):
    # x_ref:     (1, H+2, W+2, Cin) bf16  halo-padded NHWC image (one per step)
    # w_ref:     (9, Cin, Cp)       bf16  3x3 taps, BN scale folded, Cout->Cp
    # shift_ref: (1, Cp)            f32   folded conv-bias + BN shift
    # o_ref:     (1, Ho, Wo, Cp)    bf16  (pooled if pool=True)
    n_chunks = H // RB
    Wo = W // 2 if pool else W
    for c in range(n_chunks):
        r0 = c * RB
        acc = jnp.zeros((RB * W, Cp), jnp.float32)
        for kh in range(3):
            for kw in range(3):
                tap = x_ref[0, r0 + kh:r0 + kh + RB, kw:kw + W, :]
                tap = tap.reshape(RB * W, Cin)
                acc = acc + jnp.dot(tap, w_ref[kh * 3 + kw],
                                    preferred_element_type=jnp.float32)
        y = jnp.maximum(acc + shift_ref[...], 0.0)           # BN shift + ReLU
        if pool:
            # Fused 2x2 max pool, stride 2 (pure VPU max before the store).
            y = y.reshape(RB // 2, 2, Wo, 2, Cp)
            y = jnp.maximum(y[:, 0], y[:, 1])                # pool H pairs
            y = jnp.maximum(y[:, :, 0], y[:, :, 1])          # pool W pairs
            o_ref[0, r0 // 2:r0 // 2 + RB // 2, :, :] = y.astype(o_ref.dtype)
        else:
            y = y.reshape(RB, W, Cp)
            o_ref[0, r0:r0 + RB, :, :] = y.astype(o_ref.dtype)


def linear_kernel(x_ref, w_ref, b_ref, o_ref, acc_ref, *, relu):
    # x_ref: (N, TK) bf16, w_ref: (TK, TO) bf16, b_ref: (1, TO) f32,
    # o_ref: (N, TO), acc_ref: (N, TO) f32 scratch.  grid = (O tiles, K tiles)
    k = pl.program_id(1)

    @pl.when(k == 0)
    def _init():
        acc_ref[...] = jnp.zeros_like(acc_ref)

    acc_ref[...] += jnp.dot(x_ref[...], w_ref[...],
                            preferred_element_type=jnp.float32)

    @pl.when(k == pl.num_programs(1) - 1)
    def _finalize():
        y = acc_ref[...] + b_ref[...]
        if relu:
            y = jnp.maximum(y, 0.0)
        o_ref[...] = y.astype(o_ref.dtype)


# ----------------------------------------------------------------------------
# Wrappers
# ----------------------------------------------------------------------------
def conv_bn_relu_pool(x_nhwc, c_true, w, b, bn, pool, eps=1e-5):
    """Fused Conv3x3(pad=1) -> BN -> ReLU -> [MaxPool2x2].
    x_nhwc: (N, H, W, *); only the first c_true channels are valid.
    Returns (N, Ho, Wo, Cp) bf16, Cout padded to 128 lanes (pad lanes exactly 0)."""
    N, H, W, _ = x_nhwc.shape
    Cin = c_true
    Cout = w.shape[-1]
    Cp = _round_up(Cout, LANE)
    pool2 = (pool == 2)
    # TODO(synk): max-pool sizes other than 1/2 are not supported.
    Ho, Wo = (H // 2, W // 2) if pool2 else (H, W)

    # True-channel slice + 1-pixel halo pad, one XLA op; bf16 for MXU streaming.
    xp = jnp.pad(x_nhwc[..., :Cin].astype(jnp.bfloat16),
                 ((0, 0), (1, 1), (1, 1), (0, 0)))

    if bn is not None:
        gamma, beta, mean, var = bn
        scale = gamma / jnp.sqrt(var + eps)
        shift = beta + (b - mean) * scale
    else:
        scale = jnp.ones((Cout,), jnp.float32)
        shift = b.astype(jnp.float32)

    # Fold BN scale into the weight columns (static at inference); pad Cout->Cp
    # with zero columns so padded output lanes stay exactly zero after ReLU.
    wf = (w.astype(jnp.float32) * scale).reshape(9, Cin, Cout)
    wf = jnp.pad(wf, ((0, 0), (0, 0), (0, Cp - Cout))).astype(jnp.bfloat16)
    shift_p = jnp.pad(shift.astype(jnp.float32), (0, Cp - Cout)).reshape(1, Cp)

    RB = _pick_rb(H, W, need_even=pool2)

    kernel = functools.partial(conv_bn_relu_pool_kernel,
                               H=H, W=W, Cin=Cin, Cp=Cp, RB=RB, pool=pool2)
    # TODO(synk): mark wf/shift_p with pipeline_mode=pl.Buffered(1) once stable,
    # to drop the never-re-DMA'd second weight buffer on v7x.
    out = pl.pallas_call(
        kernel,
        out_shape=jax.ShapeDtypeStruct((N, Ho, Wo, Cp), jnp.bfloat16),
        grid=(N,),
        in_specs=[
            pl.BlockSpec((1, H + 2, W + 2, Cin), lambda n: (n, 0, 0, 0)),
            pl.BlockSpec((9, Cin, Cp), lambda n: (0, 0, 0)),
            pl.BlockSpec((1, Cp), lambda n: (0, 0)),
        ],
        out_specs=pl.BlockSpec((1, Ho, Wo, Cp), lambda n: (n, 0, 0, 0)),
        compiler_params=pltpu.CompilerParams(
            dimension_semantics=("parallel",),
            vmem_limit_bytes=VMEM_LIMIT),
    )(xp, wf, shift_p)
    return out


def linear(x, w, b, relu, out_dtype=jnp.float32):
    """x: (N, K) (padded activation lanes, if any, must be zero).
    w: (K_true, O) with K_true <= K.  Returns (N, O_pad), O_pad = ceil128(O);
    padded output lanes are exactly zero."""
    N, K = x.shape
    K_true, O = w.shape
    Op = _round_up(O, LANE)
    Kp = _round_up(K, 256)

    # Pad weight rows to the (256-aligned) activation width and columns to a
    # full lane group; padded rows/cols are zero so padded lanes never leak.
    wp = jnp.zeros((Kp, Op), jnp.float32).at[:K_true, :O].set(w).astype(jnp.bfloat16)
    bp = jnp.pad(b.astype(jnp.float32), (0, Op - O)).reshape(1, Op)
    xb = jnp.pad(x.astype(jnp.bfloat16), ((0, 0), (0, Kp - K)))

    TK = _pick_tile(Kp, 2048, (256, LANE))
    TO = _pick_tile(Op, 1024, (256, LANE))
    grid = (Op // TO, Kp // TK)            # K (reduction) is the last grid axis

    return pl.pallas_call(
        functools.partial(linear_kernel, relu=relu),
        out_shape=jax.ShapeDtypeStruct((N, Op), out_dtype),
        grid=grid,
        in_specs=[
            pl.BlockSpec((N, TK), lambda o, k: (0, k)),
            pl.BlockSpec((TK, TO), lambda o, k: (k, o)),
            pl.BlockSpec((1, TO), lambda o, k: (0, o)),
        ],
        out_specs=pl.BlockSpec((N, TO), lambda o, k: (0, o)),
        scratch_shapes=[pltpu.VMEM((N, TO), jnp.float32)],
        compiler_params=pltpu.CompilerParams(
            dimension_semantics=("parallel", "arbitrary"),
            vmem_limit_bytes=VMEM_LIMIT),
    )(xb, wp, bp)


# ----------------------------------------------------------------------------
# Parameter init (matches VGG.initialize_weights / PyTorch defaults)
# ----------------------------------------------------------------------------
def init_params(key, input_size, num_classes, conv_channels, max_pool_sizes,
                fc_layers, conv_batch_norm):
    params = {"conv": [], "fc": [], "end": [], "num_classes": num_classes}
    in_ch = 3
    cur = input_size
    for ch, mp in zip(conv_channels, max_pool_sizes):
        key, k1 = jax.random.split(key)
        n = 3 * 3 * ch
        w = jax.random.normal(k1, (3, 3, in_ch, ch), jnp.float32) * math.sqrt(2.0 / n)
        b = jnp.zeros((ch,), jnp.float32)
        bn = None
        if conv_batch_norm:
            bn = (jnp.ones((ch,), jnp.float32),   # gamma
                  jnp.zeros((ch,), jnp.float32),  # beta
                  jnp.zeros((ch,), jnp.float32),  # running_mean
                  jnp.ones((ch,), jnp.float32))   # running_var
        params["conv"].append({"w": w, "b": b, "bn": bn, "pool": mp})
        in_ch = ch
        if mp == 2:
            cur //= 2

    fc_in = cur * cur * conv_channels[-1]
    for width in fc_layers[:-1]:
        key, k1 = jax.random.split(key)
        w = jax.random.normal(k1, (fc_in, width), jnp.float32) * 0.01
        b = jnp.zeros((width,), jnp.float32)
        params["fc"].append((w, b))
        fc_in = width

    key, k1, k2 = jax.random.split(key, 3)
    w1 = jax.random.normal(k1, (fc_in, fc_layers[-1]), jnp.float32) * 0.01
    b1 = jnp.zeros((fc_layers[-1],), jnp.float32)
    w2 = jax.random.normal(k2, (fc_layers[-1], num_classes), jnp.float32) * 0.01
    b2 = jnp.zeros((num_classes,), jnp.float32)
    params["end"] = [(w1, b1), (w2, b2)]
    return params


# ----------------------------------------------------------------------------
# Full VGG forward (return_hidden=False path)
# ----------------------------------------------------------------------------
def vgg_forward(params, x_nchw):
    x = jnp.transpose(x_nchw, (0, 2, 3, 1)).astype(jnp.float32)  # NCHW -> NHWC
    c_true = x.shape[-1]

    # ConvBlocks: Conv(3x3, pad=1) -> [BatchNorm] -> ReLU -> [MaxPool2d(2)],
    # all fused into a single kernel per block.
    for blk in params["conv"]:
        x = conv_bn_relu_pool(x, c_true, blk["w"], blk["b"], blk["bn"], blk["pool"])
        c_true = blk["w"].shape[-1]

    N, H, W, _ = x.shape
    C = c_true
    # Flatten WITHOUT transposing the activation back to NCHW: feed the
    # (h, w, c)-ordered features and permute the first FC weight's rows to the
    # PyTorch (c, h, w) flatten order instead (static, folded at compile time).
    feat = x[..., :C].reshape(N, H * W * C)

    fcs = list(params["fc"]) + list(params["end"])
    relus = [True] * len(params["fc"]) + [False, False]   # Dropout = identity
    n_fc = len(fcs)
    first = True
    for idx, ((w, b), relu) in enumerate(zip(fcs, relus)):
        if first:
            w = w.reshape(C, H * W, -1).transpose(1, 0, 2).reshape(H * W * C, -1)
            first = False
        out_dtype = jnp.float32 if idx == n_fc - 1 else jnp.bfloat16
        feat = linear(feat, w, b, relu, out_dtype=out_dtype)
    return feat[:, :params["num_classes"]].astype(jnp.float32)


if __name__ == "__main__":
    cfg = dict(
        input_size=16,
        num_classes=10,
        conv_channels=[8, 16],
        max_pool_sizes=[2, 2],
        fc_layers=[32, 16],
        conv_batch_norm=True,
    )
    key = jax.random.PRNGKey(0)
    kp, kx = jax.random.split(key)
    params = init_params(kp, **cfg)

    x = jax.random.normal(kx, (2, 3, cfg["input_size"], cfg["input_size"]),
                          jnp.float32)

    fwd = jax.jit(lambda inp: vgg_forward(params, inp))
    out = fwd(x)
    out = jax.block_until_ready(out)
    assert out.shape == (2, cfg["num_classes"]), out.shape
    assert bool(jnp.all(jnp.isfinite(out)))
    print("KERNEL_OK")
</pallas_src>

<mosaic_0001>
module attributes {stable_mosaic.version = 11 : i64} {
  func.func @conv_bn_relu_pool_kernel(%arg0: i32, %arg1: memref<1x10x10x8xbf16, #tpu.memory_space<vmem>>, %arg2: memref<9x8x128xbf16, #tpu.memory_space<vmem>>, %arg3: memref<1x128xf32, #tpu.memory_space<vmem>>, %arg4: memref<1x4x4x128xbf16, #tpu.memory_space<vmem>>) attributes {dimension_semantics = [#tpu.dimension_semantics<parallel>], iteration_bounds = array<i64: 2>, scalar_prefetch = 0 : i64, scratch_operands = 0 : i64, tpu.core_type = #tpu.core_type<tc>, window_params = [{transform_indices = @transform_0, window_bounds = array<i64: 1, 10, 10, 8>}, {pipeline_mode = #tpu.pipeline_mode<synchronous>, transform_indices = @transform_1, window_bounds = array<i64: 9, 8, 128>}, {pipeline_mode = #tpu.pipeline_mode<synchronous>, transform_indices = @transform_2, window_bounds = array<i64: 1, 128>}, {transform_indices = @transform_3, window_bounds = array<i64: 1, 4, 4, 128>}]} {
    %cst = arith.constant 0.000000e+00 : f32
    %0 = vector.broadcast %cst : f32 to vector<64x128xf32>
    %c0 = arith.constant 0 : index
    %c0_0 = arith.constant 0 : index
    %c0_1 = arith.constant 0 : index
    %c0_2 = arith.constant 0 : index
    %1 = vector.load %arg1[%c0, %c0_0, %c0_1, %c0_2] : memref<1x10x10x8xbf16, #tpu.memory_space<vmem>>, vector<1x8x8x8xbf16>
    %2 = vector.shape_cast %1 : vector<1x8x8x8xbf16> to vector<8x8x8xbf16>
    %3 = vector.shape_cast %2 : vector<8x8x8xbf16> to vector<64x8xbf16>
    %c0_3 = arith.constant 0 : index
    %c0_4 = arith.constant 0 : index
    %c0_5 = arith.constant 0 : index
    %4 = vector.load %arg2[%c0_3, %c0_4, %c0_5] : memref<9x8x128xbf16, #tpu.memory_space<vmem>>, vector<1x8x128xbf16>
    %5 = vector.shape_cast %4 : vector<1x8x128xbf16> to vector<8x128xbf16>
    %cst_6 = arith.constant dense<0.000000e+00> : vector<64x128xf32>
    %6 = tpu.matmul %3, %5, %cst_6 {dimension_numbers = #tpu.dot_dimension_numbers<[1], [0], [0], [1], [0, 0, 1, 1], [], []>} : vector<64x8xbf16>, vector<8x128xbf16>, vector<64x128xf32> -> vector<64x128xf32>
    %7 = arith.addf %0, %6 : vector<64x128xf32>
    %c0_7 = arith.constant 0 : index
    %c0_8 = arith.constant 0 : index
    %c1 = arith.constant 1 : index
    %c0_9 = arith.constant 0 : index
    %8 = vector.load %arg1[%c0_7, %c0_8, %c1, %c0_9] : memref<1x10x10x8xbf16, #tpu.memory_space<vmem>>, vector<1x8x8x8xbf16>
    %9 = vector.shape_cast %8 : vector<1x8x8x8xbf16> to vector<8x8x8xbf16>
    %10 = vector.shape_cast %9 : vector<8x8x8xbf16> to vector<64x8xbf16>
    %c1_10 = arith.constant 1 : index
    %c0_11 = arith.constant 0 : index
    %c0_12 = arith.constant 0 : index
    %11 = vector.load %arg2[%c1_10, %c0_11, %c0_12] : memref<9x8x128xbf16, #tpu.memory_space<vmem>>, vector<1x8x128xbf16>
    %12 = vector.shape_cast %11 : vector<1x8x128xbf16> to vector<8x128xbf16>
    %cst_13 = arith.constant dense<0.000000e+00> : vector<64x128xf32>
    %13 = tpu.matmul %10, %12, %cst_13 {dimension_numbers = #tpu.dot_dimension_numbers<[1], [0], [0], [1], [0, 0, 1, 1], [], []>} : vector<64x8xbf16>, vector<8x128xbf16>, vector<64x128xf32> -> vector<64x128xf32>
    %14 = arith.addf %7, %13 : vector<64x128xf32>
    %c0_14 = arith.constant 0 : index
    %c0_15 = arith.constant 0 : index
    %c2 = arith.constant 2 : index
    %c0_16 = arith.constant 0 : index
    %15 = vector.load %arg1[%c0_14, %c0_15, %c2, %c0_16] : memref<1x10x10x8xbf16, #tpu.memory_space<vmem>>, vector<1x8x8x8xbf16>
    %16 = vector.shape_cast %15 : vector<1x8x8x8xbf16> to vector<8x8x8xbf16>
    %17 = vector.shape_cast %16 : vector<8x8x8xbf16> to vector<64x8xbf16>
    %c2_17 = arith.constant 2 : index
    %c0_18 = arith.constant 0 : index
    %c0_19 = arith.constant 0 : index
    %18 = vector.load %arg2[%c2_17, %c0_18, %c0_19] : memref<9x8x128xbf16, #tpu.memory_space<vmem>>, vector<1x8x128xbf16>
    %19 = vector.shape_cast %18 : vector<1x8x128xbf16> to vector<8x128xbf16>
    %cst_20 = arith.constant dense<0.000000e+00> : vector<64x128xf32>
    %20 = tpu.matmul %17, %19, %cst_20 {dimension_numbers = #tpu.dot_dimension_numbers<[1], [0], [0], [1], [0, 0, 1, 1], [], []>} : vector<64x8xbf16>, vector<8x128xbf16>, vector<64x128xf32> -> vector<64x128xf32>
    %21 = arith.addf %14, %20 : vector<64x128xf32>
    %c0_21 = arith.constant 0 : index
    %c1_22 = arith.constant 1 : index
    %c0_23 = arith.constant 0 : index
    %c0_24 = arith.constant 0 : index
    %22 = vector.load %arg1[%c0_21, %c1_22, %c0_23, %c0_24] : memref<1x10x10x8xbf16, #tpu.memory_space<vmem>>, vector<1x8x8x8xbf16>
    %23 = vector.shape_cast %22 : vector<1x8x8x8xbf16> to vector<8x8x8xbf16>
    %24 = vector.shape_cast %23 : vector<8x8x8xbf16> to vector<64x8xbf16>
    %c3 = arith.constant 3 : index
    %c0_25 = arith.constant 0 : index
    %c0_26 = arith.constant 0 : index
    %25 = vector.load %arg2[%c3, %c0_25, %c0_26] : memref<9x8x128xbf16, #tpu.memory_space<vmem>>, vector<1x8x128xbf16>
    %26 = vector.shape_cast %25 : vector<1x8x128xbf16> to vector<8x128xbf16>
    %cst_27 = arith.constant dense<0.000000e+00> : vector<64x128xf32>
    %27 = tpu.matmul %24, %26, %cst_27 {dimension_numbers = #tpu.dot_dimension_numbers<[1], [0], [0], [1], [0, 0, 1, 1], [], []>} : vector<64x8xbf16>, vector<8x128xbf16>, vector<64x128xf32> -> vector<64x128xf32>
    %28 = arith.addf %21, %27 : vector<64x128xf32>
    %c0_28 = arith.constant 0 : index
    %c1_29 = arith.constant 1 : index
    %c1_30 = arith.constant 1 : index
    %c0_31 = arith.constant 0 : index
    %29 = vector.load %arg1[%c0_28, %c1_29, %c1_30, %c0_31] : memref<1x10x10x8xbf16, #tpu.memory_space<vmem>>, vector<1x8x8x8xbf16>
    %30 = vector.shape_cast %29 : vector<1x8x8x8xbf16> to vector<8x8x8xbf16>
    %31 = vector.shape_cast %30 : vector<8x8x8xbf16> to vector<64x8xbf16>
    %c4 = arith.constant 4 : index
    %c0_32 = arith.constant 0 : index
    %c0_33 = arith.constant 0 : index
    %32 = vector.load %arg2[%c4, %c0_32, %c0_33] : memref<9x8x128xbf16, #tpu.memory_space<vmem>>, vector<1x8x128xbf16>
    %33 = vector.shape_cast %32 : vector<1x8x128xbf16> to vector<8x128xbf16>
    %cst_34 = arith.constant dense<0.000000e+00> : vector<64x128xf32>
    %34 = tpu.matmul %31, %33, %cst_34 {dimension_numbers = #tpu.dot_dimension_numbers<[1], [0], [0], [1], [0, 0, 1, 1], [], []>} : vector<64x8xbf16>, vector<8x128xbf16>, vector<64x128xf32> -> vector<64x128xf32>
    %35 = arith.addf %28, %34 : vector<64x128xf32>
    %c0_35 = arith.constant 0 : index
    %c1_36 = arith.constant 1 : index
    %c2_37 = arith.constant 2 : index
    %c0_38 = arith.constant 0 : index
    %36 = vector.load %arg1[%c0_35, %c1_36, %c2_37, %c0_38] : memref<1x10x10x8xbf16, #tpu.memory_space<vmem>>, vector<1x8x8x8xbf16>
    %37 = vector.shape_cast %36 : vector<1x8x8x8xbf16> to vector<8x8x8xbf16>
    %38 = vector.shape_cast %37 : vector<8x8x8xbf16> to vector<64x8xbf16>
    %c5 = arith.constant 5 : index
    %c0_39 = arith.constant 0 : index
    %c0_40 = arith.constant 0 : index
    %39 = vector.load %arg2[%c5, %c0_39, %c0_40] : memref<9x8x128xbf16, #tpu.memory_space<vmem>>, vector<1x8x128xbf16>
    %40 = vector.shape_cast %39 : vector<1x8x128xbf16> to vector<8x128xbf16>
    %cst_41 = arith.constant dense<0.000000e+00> : vector<64x128xf32>
    %41 = tpu.matmul %38, %40, %cst_41 {dimension_numbers = #tpu.dot_dimension_numbers<[1], [0], [0], [1], [0, 0, 1, 1], [], []>} : vector<64x8xbf16>, vector<8x128xbf16>, vector<64x128xf32> -> vector<64x128xf32>
    %42 = arith.addf %35, %41 : vector<64x128xf32>
    %c0_42 = arith.constant 0 : index
    %c2_43 = arith.constant 2 : index
    %c0_44 = arith.constant 0 : index
    %c0_45 = arith.constant 0 : index
    %43 = vector.load %arg1[%c0_42, %c2_43, %c0_44, %c0_45] : memref<1x10x10x8xbf16, #tpu.memory_space<vmem>>, vector<1x8x8x8xbf16>
    %44 = vector.shape_cast %43 : vector<1x8x8x8xbf16> to vector<8x8x8xbf16>
    %45 = vector.shape_cast %44 : vector<8x8x8xbf16> to vector<64x8xbf16>
    %c6 = arith.constant 6 : index
    %c0_46 = arith.constant 0 : index
    %c0_47 = arith.constant 0 : index
    %46 = vector.load %arg2[%c6, %c0_46, %c0_47] : memref<9x8x128xbf16, #tpu.memory_space<vmem>>, vector<1x8x128xbf16>
    %47 = vector.shape_cast %46 : vector<1x8x128xbf16> to vector<8x128xbf16>
    %cst_48 = arith.constant dense<0.000000e+00> : vector<64x128xf32>
    %48 = tpu.matmul %45, %47, %cst_48 {dimension_numbers = #tpu.dot_dimension_numbers<[1], [0], [0], [1], [0, 0, 1, 1], [], []>} : vector<64x8xbf16>, vector<8x128xbf16>, vector<64x128xf32> -> vector<64x128xf32>
    %49 = arith.addf %42, %48 : vector<64x128xf32>
    %c0_49 = arith.constant 0 : index
    %c2_50 = arith.constant 2 : index
    %c1_51 = arith.constant 1 : index
    %c0_52 = arith.constant 0 : index
    %50 = vector.load %arg1[%c0_49, %c2_50, %c1_51, %c0_52] : memref<1x10x10x8xbf16, #tpu.memory_space<vmem>>, vector<1x8x8x8xbf16>
    %51 = vector.shape_cast %50 : vector<1x8x8x8xbf16> to vector<8x8x8xbf16>
    %52 = vector.shape_cast %51 : vector<8x8x8xbf16> to vector<64x8xbf16>
    %c7 = arith.constant 7 : index
    %c0_53 = arith.constant 0 : index
    %c0_54 = arith.constant 0 : index
    %53 = vector.load %arg2[%c7, %c0_53, %c0_54] : memref<9x8x128xbf16, #tpu.memory_space<vmem>>, vector<1x8x128xbf16>
    %54 = vector.shape_cast %53 : vector<1x8x128xbf16> to vector<8x128xbf16>
    %cst_55 = arith.constant dense<0.000000e+00> : vector<64x128xf32>
    %55 = tpu.matmul %52, %54, %cst_55 {dimension_numbers = #tpu.dot_dimension_numbers<[1], [0], [0], [1], [0, 0, 1, 1], [], []>} : vector<64x8xbf16>, vector<8x128xbf16>, vector<64x128xf32> -> vector<64x128xf32>
    %56 = arith.addf %49, %55 : vector<64x128xf32>
    %c0_56 = arith.constant 0 : index
    %c2_57 = arith.constant 2 : index
    %c2_58 = arith.constant 2 : index
    %c0_59 = arith.constant 0 : index
    %57 = vector.load %arg1[%c0_56, %c2_57, %c2_58, %c0_59] : memref<1x10x10x8xbf16, #tpu.memory_space<vmem>>, vector<1x8x8x8xbf16>
    %58 = vector.shape_cast %57 : vector<1x8x8x8xbf16> to vector<8x8x8xbf16>
    %59 = vector.shape_cast %58 : vector<8x8x8xbf16> to vector<64x8xbf16>
    %c8 = arith.constant 8 : index
    %c0_60 = arith.constant 0 : index
    %c0_61 = arith.constant 0 : index
    %60 = vector.load %arg2[%c8, %c0_60, %c0_61] : memref<9x8x128xbf16, #tpu.memory_space<vmem>>, vector<1x8x128xbf16>
    %61 = vector.shape_cast %60 : vector<1x8x128xbf16> to vector<8x128xbf16>
    %cst_62 = arith.constant dense<0.000000e+00> : vector<64x128xf32>
    %62 = tpu.matmul %59, %61, %cst_62 {dimension_numbers = #tpu.dot_dimension_numbers<[1], [0], [0], [1], [0, 0, 1, 1], [], []>} : vector<64x8xbf16>, vector<8x128xbf16>, vector<64x128xf32> -> vector<64x128xf32>
    %63 = arith.addf %56, %62 : vector<64x128xf32>
    %c0_63 = arith.constant 0 : index
    %c0_64 = arith.constant 0 : index
    %64 = vector.load %arg3[%c0_63, %c0_64] : memref<1x128xf32, #tpu.memory_space<vmem>>, vector<1x128xf32>
    %65 = vector.broadcast %64 : vector<1x128xf32> to vector<64x128xf32>
    %66 = arith.addf %63, %65 : vector<64x128xf32>
    %cst_65 = arith.constant 0.000000e+00 : f32
    %67 = vector.broadcast %cst_65 : f32 to vector<64x128xf32>
    %68 = arith.maximumf %66, %67 : vector<64x128xf32>
    %69 = vector.shape_cast %68 : vector<64x128xf32> to vector<4x2x4x2x128xf32>
    %70 = vector.extract_strided_slice %69 {offsets = [0, 0, 0, 0, 0], sizes = [4, 1, 4, 2, 128], strides = [1, 1, 1, 1, 1]} : vector<4x2x4x2x128xf32> to vector<4x1x4x2x128xf32>
    %71 = vector.shape_cast %70 : vector<4x1x4x2x128xf32> to vector<4x4x2x128xf32>
    %72 = vector.extract_strided_slice %69 {offsets = [0, 1, 0, 0, 0], sizes = [4, 1, 4, 2, 128], strides = [1, 1, 1, 1, 1]} : vector<4x2x4x2x128xf32> to vector<4x1x4x2x128xf32>
    %73 = vector.shape_cast %72 : vector<4x1x4x2x128xf32> to vector<4x4x2x128xf32>
    %74 = arith.maximumf %71, %73 : vector<4x4x2x128xf32>
    %75 = vector.extract_strided_slice %74 {offsets = [0, 0, 0, 0], sizes = [4, 4, 1, 128], strides = [1, 1, 1, 1]} : vector<4x4x2x128xf32> to vector<4x4x1x128xf32>
    %76 = vector.shape_cast %75 : vector<4x4x1x128xf32> to vector<4x4x128xf32>
    %77 = vector.extract_strided_slice %74 {offsets = [0, 0, 1, 0], sizes = [4, 4, 1, 128], strides = [1, 1, 1, 1]} : vector<4x4x2x128xf32> to vector<4x4x1x128xf32>
    %78 = vector.shape_cast %77 : vector<4x4x1x128xf32> to vector<4x4x128xf32>
    %79 = arith.maximumf %76, %78 : vector<4x4x128xf32>
    %80 = arith.truncf %79 : vector<4x4x128xf32> to vector<4x4x128xbf16>
    %c0_66 = arith.constant 0 : index
    %c0_67 = arith.constant 0 : index
    %c0_68 = arith.constant 0 : index
    %c0_69 = arith.constant 0 : index
    %81 = vector.load %arg4[%c0_66, %c0_67, %c0_68, %c0_69] : memref<1x4x4x128xbf16, #tpu.memory_space<vmem>>, vector<1x4x4x128xbf16>
    %82 = vector.shape_cast %81 : vector<1x4x4x128xbf16> to vector<4x4x128xbf16>
    %83 = vector.shape_cast %80 : vector<4x4x128xbf16> to vector<1x4x4x128xbf16>
    tpu.vector_store %arg4[%c0_66, %c0_67, %c0_68, %c0_69], %83 {strides = array<i32>} : memref<1x4x4x128xbf16, #tpu.memory_space<vmem>>, vector<1x4x4x128xbf16>,
    return
  }
  func.func @transform_0(%arg0: i32) -> (i32, i32, i32, i32) {
    %c0_i32 = arith.constant 0 : i32
    %c0_i32_0 = arith.constant 0 : i32
    %c0_i32_1 = arith.constant 0 : i32
    %c0_i32_2 = arith.constant 0 : i32
    return %arg0, %c0_i32, %c0_i32_0, %c0_i32_1 : i32, i32, i32, i32
  }
  func.func @transform_1(%arg0: i32) -> (i32, i32, i32) {
    %c0_i32 = arith.constant 0 : i32
    %c0_i32_0 = arith.constant 0 : i32
    %c0_i32_1 = arith.constant 0 : i32
    %c0_i32_2 = arith.constant 0 : i32
    return %c0_i32, %c0_i32_0, %c0_i32_1 : i32, i32, i32
  }
  func.func @transform_2(%arg0: i32) -> (i32, i32) {
    %c0_i32 = arith.constant 0 : i32
    %c0_i32_0 = arith.constant 0 : i32
    %c0_i32_1 = arith.constant 0 : i32
    return %c0_i32, %c0_i32_0 : i32, i32
  }
  func.func @transform_3(%arg0: i32) -> (i32, i32, i32, i32) {
    %c0_i32 = arith.constant 0 : i32
    %c0_i32_0 = arith.constant 0 : i32
    %c0_i32_1 = arith.constant 0 : i32
    %c0_i32_2 = arith.constant 0 : i32
    return %arg0, %c0_i32, %c0_i32_0, %c0_i32_1 : i32, i32, i32, i32
  }
}

module attributes {stable_mosaic.version = 11 : i64} {
  func.func @conv_bn_relu_pool_kernel(%arg0: i32, %arg1: memref<1x18x18x3xbf16, #tpu.memory_space<vmem>>, %arg2: memref<9x3x128xbf16, #tpu.memory_space<vmem>>, %arg3: memref<1x128xf32, #tpu.memory_space<vmem>>, %arg4: memref<1x8x8x128xbf16, #tpu.memory_space<vmem>>) attributes {dimension_semantics = [#tpu.dimension_semantics<parallel>], iteration_bounds = array<i64: 2>, scalar_prefetch = 0 : i64, scratch_operands = 0 : i64, tpu.core_type = #tpu.core_type<tc>, window_params = [{transform_indices = @transform_0, window_bounds = array<i64: 1, 18, 18, 3>}, {pipeline_mode = #tpu.pipeline_mode<synchronous>, transform_indices = @transform_1, window_bounds = array<i64: 9, 3, 128>}, {pipeline_mode = #tpu.pipeline_mode<synchronous>, transform_indices = @transform_2, window_bounds = array<i64: 1, 128>}, {transform_indices = @transform_3, window_bounds = array<i64: 1, 8, 8, 128>}]} {
    %cst = arith.constant 0.000000e+00 : f32
    %0 = vector.broadcast %cst : f32 to vector<256x128xf32>
    %c0 = arith.constant 0 : index
    %c0_0 = arith.constant 0 : index
    %c0_1 = arith.constant 0 : index
    %c0_2 = arith.constant 0 : index
    %1 = vector.load %arg1[%c0, %c0_0, %c0_1, %c0_2] : memref<1x18x18x3xbf16, #tpu.memory_space<vmem>>, vector<1x16x16x3xbf16>
    %2 = vector.shape_cast %1 : vector<1x16x16x3xbf16> to vector<16x16x3xbf16>
    %3 = vector.shape_cast %2 : vector<16x16x3xbf16> to vector<256x3xbf16>
    %c0_3 = arith.constant 0 : index
    %c0_4 = arith.constant 0 : index
    %c0_5 = arith.constant 0 : index
    %4 = vector.load %arg2[%c0_3, %c0_4, %c0_5] : memref<9x3x128xbf16, #tpu.memory_space<vmem>>, vector<1x3x128xbf16>
    %5 = vector.shape_cast %4 : vector<1x3x128xbf16> to vector<3x128xbf16>
    %cst_6 = arith.constant dense<0.000000e+00> : vector<256x128xf32>
    %6 = tpu.matmul %3, %5, %cst_6 {dimension_numbers = #tpu.dot_dimension_numbers<[1], [0], [0], [1], [0, 0, 1, 1], [], []>} : vector<256x3xbf16>, vector<3x128xbf16>, vector<256x128xf32> -> vector<256x128xf32>
    %7 = arith.addf %0, %6 : vector<256x128xf32>
    %c0_7 = arith.constant 0 : index
    %c0_8 = arith.constant 0 : index
    %c1 = arith.constant 1 : index
    %c0_9 = arith.constant 0 : index
    %8 = vector.load %arg1[%c0_7, %c0_8, %c1, %c0_9] : memref<1x18x18x3xbf16, #tpu.memory_space<vmem>>, vector<1x16x16x3xbf16>
    %9 = vector.shape_cast %8 : vector<1x16x16x3xbf16> to vector<16x16x3xbf16>
    %10 = vector.shape_cast %9 : vector<16x16x3xbf16> to vector<256x3xbf16>
    %c1_10 = arith.constant 1 : index
    %c0_11 = arith.constant 0 : index
    %c0_12 = arith.constant 0 : index
    %11 = vector.load %arg2[%c1_10, %c0_11, %c0_12] : memref<9x3x128xbf16, #tpu.memory_space<vmem>>, vector<1x3x128xbf16>
    %12 = vector.shape_cast %11 : vector<1x3x128xbf16> to vector<3x128xbf16>
    %cst_13 = arith.constant dense<0.000000e+00> : vector<256x128xf32>
    %13 = tpu.matmul %10, %12, %cst_13 {dimension_numbers = #tpu.dot_dimension_numbers<[1], [0], [0], [1], [0, 0, 1, 1], [], []>} : vector<256x3xbf16>, vector<3x128xbf16>, vector<256x128xf32> -> vector<256x128xf32>
    %14 = arith.addf %7, %13 : vector<256x128xf32>
    %c0_14 = arith.constant 0 : index
    %c0_15 = arith.constant 0 : index
    %c2 = arith.constant 2 : index
    %c0_16 = arith.constant 0 : index
    %15 = vector.load %arg1[%c0_14, %c0_15, %c2, %c0_16] : memref<1x18x18x3xbf16, #tpu.memory_space<vmem>>, vector<1x16x16x3xbf16>
    %16 = vector.shape_cast %15 : vector<1x16x16x3xbf16> to vector<16x16x3xbf16>
    %17 = vector.shape_cast %16 : vector<16x16x3xbf16> to vector<256x3xbf16>
    %c2_17 = arith.constant 2 : index
    %c0_18 = arith.constant 0 : index
    %c0_19 = arith.constant 0 : index
    %18 = vector.load %arg2[%c2_17, %c0_18, %c0_19] : memref<9x3x128xbf16, #tpu.memory_space<vmem>>, vector<1x3x128xbf16>
    %19 = vector.shape_cast %18 : vector<1x3x128xbf16> to vector<3x128xbf16>
    %cst_20 = arith.constant dense<0.000000e+00> : vector<256x128xf32>
    %20 = tpu.matmul %17, %19, %cst_20 {dimension_numbers = #tpu.dot_dimension_numbers<[1], [0], [0], [1], [0, 0, 1, 1], [], []>} : vector<256x3xbf16>, vector<3x128xbf16>, vector<256x128xf32> -> vector<256x128xf32>
    %21 = arith.addf %14, %20 : vector<256x128xf32>
    %c0_21 = arith.constant 0 : index
    %c1_22 = arith.constant 1 : index
    %c0_23 = arith.constant 0 : index
    %c0_24 = arith.constant 0 : index
    %22 = vector.load %arg1[%c0_21, %c1_22, %c0_23, %c0_24] : memref<1x18x18x3xbf16, #tpu.memory_space<vmem>>, vector<1x16x16x3xbf16>
    %23 = vector.shape_cast %22 : vector<1x16x16x3xbf16> to vector<16x16x3xbf16>
    %24 = vector.shape_cast %23 : vector<16x16x3xbf16> to vector<256x3xbf16>
    %c3 = arith.constant 3 : index
    %c0_25 = arith.constant 0 : index
    %c0_26 = arith.constant 0 : index
    %25 = vector.load %arg2[%c3, %c0_25, %c0_26] : memref<9x3x128xbf16, #tpu.memory_space<vmem>>, vector<1x3x128xbf16>
    %26 = vector.shape_cast %25 : vector<1x3x128xbf16> to vector<3x128xbf16>
    %cst_27 = arith.constant dense<0.000000e+00> : vector<256x128xf32>
    %27 = tpu.matmul %24, %26, %cst_27 {dimension_numbers = #tpu.dot_dimension_numbers<[1], [0], [0], [1], [0, 0, 1, 1], [], []>} : vector<256x3xbf16>, vector<3x128xbf16>, vector<256x128xf32> -> vector<256x128xf32>
    %28 = arith.addf %21, %27 : vector<256x128xf32>
    %c0_28 = arith.constant 0 : index
    %c1_29 = arith.constant 1 : index
    %c1_30 = arith.constant 1 : index
    %c0_31 = arith.constant 0 : index
    %29 = vector.load %arg1[%c0_28, %c1_29, %c1_30, %c0_31] : memref<1x18x18x3xbf16, #tpu.memory_space<vmem>>, vector<1x16x16x3xbf16>
    %30 = vector.shape_cast %29 : vector<1x16x16x3xbf16> to vector<16x16x3xbf16>
    %31 = vector.shape_cast %30 : vector<16x16x3xbf16> to vector<256x3xbf16>
    %c4 = arith.constant 4 : index
    %c0_32 = arith.constant 0 : index
    %c0_33 = arith.constant 0 : index
    %32 = vector.load %arg2[%c4, %c0_32, %c0_33] : memref<9x3x128xbf16, #tpu.memory_space<vmem>>, vector<1x3x128xbf16>
    %33 = vector.shape_cast %32 : vector<1x3x128xbf16> to vector<3x128xbf16>
    %cst_34 = arith.constant dense<0.000000e+00> : vector<256x128xf32>
    %34 = tpu.matmul %31, %33, %cst_34 {dimension_numbers = #tpu.dot_dimension_numbers<[1], [0], [0], [1], [0, 0, 1, 1], [], []>} : vector<256x3xbf16>, vector<3x128xbf16>, vector<256x128xf32> -> vector<256x128xf32>
    %35 = arith.addf %28, %34 : vector<256x128xf32>
    %c0_35 = arith.constant 0 : index
    %c1_36 = arith.constant 1 : index
    %c2_37 = arith.constant 2 : index
    %c0_38 = arith.constant 0 : index
    %36 = vector.load %arg1[%c0_35, %c1_36, %c2_37, %c0_38] : memref<1x18x18x3xbf16, #tpu.memory_space<vmem>>, vector<1x16x16x3xbf16>
    %37 = vector.shape_cast %36 : vector<1x16x16x3xbf16> to vector<16x16x3xbf16>
    %38 = vector.shape_cast %37 : vector<16x16x3xbf16> to vector<256x3xbf16>
    %c5 = arith.constant 5 : index
    %c0_39 = arith.constant 0 : index
    %c0_40 = arith.constant 0 : index
    %39 = vector.load %arg2[%c5, %c0_39, %c0_40] : memref<9x3x128xbf16, #tpu.memory_space<vmem>>, vector<1x3x128xbf16>
    %40 = vector.shape_cast %39 : vector<1x3x128xbf16> to vector<3x128xbf16>
    %cst_41 = arith.constant dense<0.000000e+00> : vector<256x128xf32>
    %41 = tpu.matmul %38, %40, %cst_41 {dimension_numbers = #tpu.dot_dimension_numbers<[1], [0], [0], [1], [0, 0, 1, 1], [], []>} : vector<256x3xbf16>, vector<3x128xbf16>, vector<256x128xf32> -> vector<256x128xf32>
    %42 = arith.addf %35, %41 : vector<256x128xf32>
    %c0_42 = arith.constant 0 : index
    %c2_43 = arith.constant 2 : index
    %c0_44 = arith.constant 0 : index
    %c0_45 = arith.constant 0 : index
    %43 = vector.load %arg1[%c0_42, %c2_43, %c0_44, %c0_45] : memref<1x18x18x3xbf16, #tpu.memory_space<vmem>>, vector<1x16x16x3xbf16>
    %44 = vector.shape_cast %43 : vector<1x16x16x3xbf16> to vector<16x16x3xbf16>
    %45 = vector.shape_cast %44 : vector<16x16x3xbf16> to vector<256x3xbf16>
    %c6 = arith.constant 6 : index
    %c0_46 = arith.constant 0 : index
    %c0_47 = arith.constant 0 : index
    %46 = vector.load %arg2[%c6, %c0_46, %c0_47] : memref<9x3x128xbf16, #tpu.memory_space<vmem>>, vector<1x3x128xbf16>
    %47 = vector.shape_cast %46 : vector<1x3x128xbf16> to vector<3x128xbf16>
    %cst_48 = arith.constant dense<0.000000e+00> : vector<256x128xf32>
    %48 = tpu.matmul %45, %47, %cst_48 {dimension_numbers = #tpu.dot_dimension_numbers<[1], [0], [0], [1], [0, 0, 1, 1], [], []>} : vector<256x3xbf16>, vector<3x128xbf16>, vector<256x128xf32> -> vector<256x128xf32>
    %49 = arith.addf %42, %48 : vector<256x128xf32>
    %c0_49 = arith.constant 0 : index
    %c2_50 = arith.constant 2 : index
    %c1_51 = arith.constant 1 : index
    %c0_52 = arith.constant 0 : index
    %50 = vector.load %arg1[%c0_49, %c2_50, %c1_51, %c0_52] : memref<1x18x18x3xbf16, #tpu.memory_space<vmem>>, vector<1x16x16x3xbf16>
    %51 = vector.shape_cast %50 : vector<1x16x16x3xbf16> to vector<16x16x3xbf16>
    %52 = vector.shape_cast %51 : vector<16x16x3xbf16> to vector<256x3xbf16>
    %c7 = arith.constant 7 : index
    %c0_53 = arith.constant 0 : index
    %c0_54 = arith.constant 0 : index
    %53 = vector.load %arg2[%c7, %c0_53, %c0_54] : memref<9x3x128xbf16, #tpu.memory_space<vmem>>, vector<1x3x128xbf16>
    %54 = vector.shape_cast %53 : vector<1x3x128xbf16> to vector<3x128xbf16>
    %cst_55 = arith.constant dense<0.000000e+00> : vector<256x128xf32>
    %55 = tpu.matmul %52, %54, %cst_55 {dimension_numbers = #tpu.dot_dimension_numbers<[1], [0], [0], [1], [0, 0, 1, 1], [], []>} : vector<256x3xbf16>, vector<3x128xbf16>, vector<256x128xf32> -> vector<256x128xf32>
    %56 = arith.addf %49, %55 : vector<256x128xf32>
    %c0_56 = arith.constant 0 : index
    %c2_57 = arith.constant 2 : index
    %c2_58 = arith.constant 2 : index
    %c0_59 = arith.constant 0 : index
    %57 = vector.load %arg1[%c0_56, %c2_57, %c2_58, %c0_59] : memref<1x18x18x3xbf16, #tpu.memory_space<vmem>>, vector<1x16x16x3xbf16>
    %58 = vector.shape_cast %57 : vector<1x16x16x3xbf16> to vector<16x16x3xbf16>
    %59 = vector.shape_cast %58 : vector<16x16x3xbf16> to vector<256x3xbf16>
    %c8 = arith.constant 8 : index
    %c0_60 = arith.constant 0 : index
    %c0_61 = arith.constant 0 : index
    %60 = vector.load %arg2[%c8, %c0_60, %c0_61] : memref<9x3x128xbf16, #tpu.memory_space<vmem>>, vector<1x3x128xbf16>
    %61 = vector.shape_cast %60 : vector<1x3x128xbf16> to vector<3x128xbf16>
    %cst_62 = arith.constant dense<0.000000e+00> : vector<256x128xf32>
    %62 = tpu.matmul %59, %61, %cst_62 {dimension_numbers = #tpu.dot_dimension_numbers<[1], [0], [0], [1], [0, 0, 1, 1], [], []>} : vector<256x3xbf16>, vector<3x128xbf16>, vector<256x128xf32> -> vector<256x128xf32>
    %63 = arith.addf %56, %62 : vector<256x128xf32>
    %c0_63 = arith.constant 0 : index
    %c0_64 = arith.constant 0 : index
    %64 = vector.load %arg3[%c0_63, %c0_64] : memref<1x128xf32, #tpu.memory_space<vmem>>, vector<1x128xf32>
    %65 = vector.broadcast %64 : vector<1x128xf32> to vector<256x128xf32>
    %66 = arith.addf %63, %65 : vector<256x128xf32>
    %cst_65 = arith.constant 0.000000e+00 : f32
    %67 = vector.broadcast %cst_65 : f32 to vector<256x128xf32>
    %68 = arith.maximumf %66, %67 : vector<256x128xf32>
    %69 = vector.shape_cast %68 : vector<256x128xf32> to vector<8x2x8x2x128xf32>
    %70 = vector.extract_strided_slice %69 {offsets = [0, 0, 0, 0, 0], sizes = [8, 1, 8, 2, 128], strides = [1, 1, 1, 1, 1]} : vector<8x2x8x2x128xf32> to vector<8x1x8x2x128xf32>
    %71 = vector.shape_cast %70 : vector<8x1x8x2x128xf32> to vector<8x8x2x128xf32>
    %72 = vector.extract_strided_slice %69 {offsets = [0, 1, 0, 0, 0], sizes = [8, 1, 8, 2, 128], strides = [1, 1, 1, 1, 1]} : vector<8x2x8x2x128xf32> to vector<8x1x8x2x128xf32>
    %73 = vector.shape_cast %72 : vector<8x1x8x2x128xf32> to vector<8x8x2x128xf32>
    %74 = arith.maximumf %71, %73 : vector<8x8x2x128xf32>
    %75 = vector.extract_strided_slice %74 {offsets = [0, 0, 0, 0], sizes = [8, 8, 1, 128], strides = [1, 1, 1, 1]} : vector<8x8x2x128xf32> to vector<8x8x1x128xf32>
    %76 = vector.shape_cast %75 : vector<8x8x1x128xf32> to vector<8x8x128xf32>
    %77 = vector.extract_strided_slice %74 {offsets = [0, 0, 1, 0], sizes = [8, 8, 1, 128], strides = [1, 1, 1, 1]} : vector<8x8x2x128xf32> to vector<8x8x1x128xf32>
    %78 = vector.shape_cast %77 : vector<8x8x1x128xf32> to vector<8x8x128xf32>
    %79 = arith.maximumf %76, %78 : vector<8x8x128xf32>
    %80 = arith.truncf %79 : vector<8x8x128xf32> to vector<8x8x128xbf16>
    %c0_66 = arith.constant 0 : index
    %c0_67 = arith.constant 0 : index
    %c0_68 = arith.constant 0 : index
    %c0_69 = arith.constant 0 : index
    %81 = vector.load %arg4[%c0_66, %c0_67, %c0_68, %c0_69] : memref<1x8x8x128xbf16, #tpu.memory_space<vmem>>, vector<1x8x8x128xbf16>
    %82 = vector.shape_cast %81 : vector<1x8x8x128xbf16> to vector<8x8x128xbf16>
    %83 = vector.shape_cast %80 : vector<8x8x128xbf16> to vector<1x8x8x128xbf16>
    tpu.vector_store %arg4[%c0_66, %c0_67, %c0_68, %c0_69], %83 {strides = array<i32>} : memref<1x8x8x128xbf16, #tpu.memory_space<vmem>>, vector<1x8x8x128xbf16>,
    return
  }
  func.func @transform_0(%arg0: i32) -> (i32, i32, i32, i32) {
    %c0_i32 = arith.constant 0 : i32
    %c0_i32_0 = arith.constant 0 : i32
    %c0_i32_1 = arith.constant 0 : i32
    %c0_i32_2 = arith.constant 0 : i32
    return %arg0, %c0_i32, %c0_i32_0, %c0_i32_1 : i32, i32, i32, i32
  }
  func.func @transform_1(%arg0: i32) -> (i32, i32, i32) {
    %c0_i32 = arith.constant 0 : i32
    %c0_i32_0 = arith.constant 0 : i32
    %c0_i32_1 = arith.constant 0 : i32
    %c0_i32_2 = arith.constant 0 : i32
    return %c0_i32, %c0_i32_0, %c0_i32_1 : i32, i32, i32
  }
  func.func @transform_2(%arg0: i32) -> (i32, i32) {
    %c0_i32 = arith.constant 0 : i32
    %c0_i32_0 = arith.constant 0 : i32
    %c0_i32_1 = arith.constant 0 : i32
    return %c0_i32, %c0_i32_0 : i32, i32
  }
  func.func @transform_3(%arg0: i32) -> (i32, i32, i32, i32) {
    %c0_i32 = arith.constant 0 : i32
    %c0_i32_0 = arith.constant 0 : i32
    %c0_i32_1 = arith.constant 0 : i32
    %c0_i32_2 = arith.constant 0 : i32
    return %arg0, %c0_i32, %c0_i32_0, %c0_i32_1 : i32, i32, i32, i32
  }
}

module attributes {stable_mosaic.version = 11 : i64} {
  func.func @linear_kernel(%arg0: i32, %arg1: i32, %arg2: memref<2x256xbf16, #tpu.memory_space<vmem>>, %arg3: memref<256x128xbf16, #tpu.memory_space<vmem>>, %arg4: memref<1x128xf32, #tpu.memory_space<vmem>>, %arg5: memref<2x128xbf16, #tpu.memory_space<vmem>>, %arg6: memref<2x128xf32, #tpu.memory_space<vmem>>) attributes {dimension_semantics = [#tpu.dimension_semantics<parallel>, #tpu.dimension_semantics<arbitrary>], iteration_bounds = array<i64: 1, 1>, scalar_prefetch = 0 : i64, scratch_operands = 1 : i64, tpu.core_type = #tpu.core_type<tc>, window_params = [{transform_indices = @transform_0, window_bounds = array<i64: 2, 256>}, {transform_indices = @transform_1, window_bounds = array<i64: 256, 128>}, {transform_indices = @transform_2, window_bounds = array<i64: 1, 128>}, {transform_indices = @transform_3, window_bounds = array<i64: 2, 128>}]} {
    %c0_i32 = arith.constant 0 : i32
    %0 = arith.cmpi eq, %arg1, %c0_i32 : i32
    %1 = arith.extui %0 : i1 to i32
    %c0_i32_0 = arith.constant 0 : i32
    %2 = arith.cmpi ne, %1, %c0_i32_0 : i32
    scf.if %2 {
      %cst_10 = arith.constant 0.000000e+00 : f32
      %12 = vector.broadcast %cst_10 : f32 to vector<2x128xf32>
      %c0_11 = arith.constant 0 : index
      %c0_12 = arith.constant 0 : index
      %13 = vector.load %arg6[%c0_11, %c0_12] : memref<2x128xf32, #tpu.memory_space<vmem>>, vector<2x128xf32>
      tpu.vector_store %arg6[%c0_11, %c0_12], %12 {strides = array<i32>} : memref<2x128xf32, #tpu.memory_space<vmem>>, vector<2x128xf32>,
    } else {
    }
    %c0 = arith.constant 0 : index
    %c0_1 = arith.constant 0 : index
    %3 = vector.load %arg6[%c0, %c0_1] : memref<2x128xf32, #tpu.memory_space<vmem>>, vector<2x128xf32>
    %c0_2 = arith.constant 0 : index
    %c0_3 = arith.constant 0 : index
    %4 = vector.load %arg2[%c0_2, %c0_3] : memref<2x256xbf16, #tpu.memory_space<vmem>>, vector<2x256xbf16>
    %c0_4 = arith.constant 0 : index
    %c0_5 = arith.constant 0 : index
    %5 = vector.load %arg3[%c0_4, %c0_5] : memref<256x128xbf16, #tpu.memory_space<vmem>>, vector<256x128xbf16>
    %cst = arith.constant dense<0.000000e+00> : vector<2x128xf32>
    %6 = tpu.matmul %4, %5, %cst {dimension_numbers = #tpu.dot_dimension_numbers<[1], [0], [0], [1], [0, 0, 1, 1], [], []>} : vector<2x256xbf16>, vector<256x128xbf16>, vector<2x128xf32> -> vector<2x128xf32>
    %7 = arith.addf %3, %6 : vector<2x128xf32>
    %c0_6 = arith.constant 0 : index
    %c0_7 = arith.constant 0 : index
    %8 = vector.load %arg6[%c0_6, %c0_7] : memref<2x128xf32, #tpu.memory_space<vmem>>, vector<2x128xf32>
    tpu.vector_store %arg6[%c0_6, %c0_7], %7 {strides = array<i32>} : memref<2x128xf32, #tpu.memory_space<vmem>>, vector<2x128xf32>,
    %c0_i32_8 = arith.constant 0 : i32
    %9 = arith.cmpi eq, %arg1, %c0_i32_8 : i32
    %10 = arith.extui %9 : i1 to i32
    %c0_i32_9 = arith.constant 0 : i32
    %11 = arith.cmpi ne, %10, %c0_i32_9 : i32
    scf.if %11 {
      %c0_10 = arith.constant 0 : index
      %c0_11 = arith.constant 0 : index
      %12 = vector.load %arg6[%c0_10, %c0_11] : memref<2x128xf32, #tpu.memory_space<vmem>>, vector<2x128xf32>
      %c0_12 = arith.constant 0 : index
      %c0_13 = arith.constant 0 : index
      %13 = vector.load %arg4[%c0_12, %c0_13] : memref<1x128xf32, #tpu.memory_space<vmem>>, vector<1x128xf32>
      %14 = vector.broadcast %13 : vector<1x128xf32> to vector<2x128xf32>
      %15 = arith.addf %12, %14 : vector<2x128xf32>
      %cst_14 = arith.constant 0.000000e+00 : f32
      %16 = vector.broadcast %cst_14 : f32 to vector<2x128xf32>
      %17 = arith.maximumf %15, %16 : vector<2x128xf32>
      %18 = arith.truncf %17 : vector<2x128xf32> to vector<2x128xbf16>
      %c0_15 = arith.constant 0 : index
      %c0_16 = arith.constant 0 : index
      %19 = vector.load %arg5[%c0_15, %c0_16] : memref<2x128xbf16, #tpu.memory_space<vmem>>, vector<2x128xbf16>
      tpu.vector_store %arg5[%c0_15, %c0_16], %18 {strides = array<i32>} : memref<2x128xbf16, #tpu.memory_space<vmem>>, vector<2x128xbf16>,
    } else {
    }
    return
  }
  func.func @transform_0(%arg0: i32, %arg1: i32) -> (i32, i32) {
    %c0_i32 = arith.constant 0 : i32
    %c0_i32_0 = arith.constant 0 : i32
    return %c0_i32, %arg1 : i32, i32
  }
  func.func @transform_1(%arg0: i32, %arg1: i32) -> (i32, i32) {
    %c0_i32 = arith.constant 0 : i32
    return %arg1, %arg0 : i32, i32
  }
  func.func @transform_2(%arg0: i32, %arg1: i32) -> (i32, i32) {
    %c0_i32 = arith.constant 0 : i32
    %c0_i32_0 = arith.constant 0 : i32
    return %c0_i32, %arg0 : i32, i32
  }
  func.func @transform_3(%arg0: i32, %arg1: i32) -> (i32, i32) {
    %c0_i32 = arith.constant 0 : i32
    %c0_i32_0 = arith.constant 0 : i32
    return %c0_i32, %arg0 : i32, i32
  }
}

module attributes {stable_mosaic.version = 11 : i64} {
  func.func @linear_kernel(%arg0: i32, %arg1: i32, %arg2: memref<2x256xbf16, #tpu.memory_space<vmem>>, %arg3: memref<256x128xbf16, #tpu.memory_space<vmem>>, %arg4: memref<1x128xf32, #tpu.memory_space<vmem>>, %arg5: memref<2x128xbf16, #tpu.memory_space<vmem>>, %arg6: memref<2x128xf32, #tpu.memory_space<vmem>>) attributes {dimension_semantics = [#tpu.dimension_semantics<parallel>, #tpu.dimension_semantics<arbitrary>], iteration_bounds = array<i64: 1, 1>, scalar_prefetch = 0 : i64, scratch_operands = 1 : i64, tpu.core_type = #tpu.core_type<tc>, window_params = [{transform_indices = @transform_0, window_bounds = array<i64: 2, 256>}, {transform_indices = @transform_1, window_bounds = array<i64: 256, 128>}, {transform_indices = @transform_2, window_bounds = array<i64: 1, 128>}, {transform_indices = @transform_3, window_bounds = array<i64: 2, 128>}]} {
    %c0_i32 = arith.constant 0 : i32
    %0 = arith.cmpi eq, %arg1, %c0_i32 : i32
    %1 = arith.extui %0 : i1 to i32
    %c0_i32_0 = arith.constant 0 : i32
    %2 = arith.cmpi ne, %1, %c0_i32_0 : i32
    scf.if %2 {
      %cst_10 = arith.constant 0.000000e+00 : f32
      %12 = vector.broadcast %cst_10 : f32 to vector<2x128xf32>
      %c0_11 = arith.constant 0 : index
      %c0_12 = arith.constant 0 : index
      %13 = vector.load %arg6[%c0_11, %c0_12] : memref<2x128xf32, #tpu.memory_space<vmem>>, vector<2x128xf32>
      tpu.vector_store %arg6[%c0_11, %c0_12], %12 {strides = array<i32>} : memref<2x128xf32, #tpu.memory_space<vmem>>, vector<2x128xf32>,
    } else {
    }
    %c0 = arith.constant 0 : index
    %c0_1 = arith.constant 0 : index
    %3 = vector.load %arg6[%c0, %c0_1] : memref<2x128xf32, #tpu.memory_space<vmem>>, vector<2x128xf32>
    %c0_2 = arith.constant 0 : index
    %c0_3 = arith.constant 0 : index
    %4 = vector.load %arg2[%c0_2, %c0_3] : memref<2x256xbf16, #tpu.memory_space<vmem>>, vector<2x256xbf16>
    %c0_4 = arith.constant 0 : index
    %c0_5 = arith.constant 0 : index
    %5 = vector.load %arg3[%c0_4, %c0_5] : memref<256x128xbf16, #tpu.memory_space<vmem>>, vector<256x128xbf16>
    %cst = arith.constant dense<0.000000e+00> : vector<2x128xf32>
    %6 = tpu.matmul %4, %5, %cst {dimension_numbers = #tpu.dot_dimension_numbers<[1], [0], [0], [1], [0, 0, 1, 1], [], []>} : vector<2x256xbf16>, vector<256x128xbf16>, vector<2x128xf32> -> vector<2x128xf32>
    %7 = arith.addf %3, %6 : vector<2x128xf32>
    %c0_6 = arith.constant 0 : index
    %c0_7 = arith.constant 0 : index
    %8 = vector.load %arg6[%c0_6, %c0_7] : memref<2x128xf32, #tpu.memory_space<vmem>>, vector<2x128xf32>
    tpu.vector_store %arg6[%c0_6, %c0_7], %7 {strides = array<i32>} : memref<2x128xf32, #tpu.memory_space<vmem>>, vector<2x128xf32>,
    %c0_i32_8 = arith.constant 0 : i32
    %9 = arith.cmpi eq, %arg1, %c0_i32_8 : i32
    %10 = arith.extui %9 : i1 to i32
    %c0_i32_9 = arith.constant 0 : i32
    %11 = arith.cmpi ne, %10, %c0_i32_9 : i32
    scf.if %11 {
      %c0_10 = arith.constant 0 : index
      %c0_11 = arith.constant 0 : index
      %12 = vector.load %arg6[%c0_10, %c0_11] : memref<2x128xf32, #tpu.memory_space<vmem>>, vector<2x128xf32>
      %c0_12 = arith.constant 0 : index
      %c0_13 = arith.constant 0 : index
      %13 = vector.load %arg4[%c0_12, %c0_13] : memref<1x128xf32, #tpu.memory_space<vmem>>, vector<1x128xf32>
      %14 = vector.broadcast %13 : vector<1x128xf32> to vector<2x128xf32>
      %15 = arith.addf %12, %14 : vector<2x128xf32>
      %16 = arith.truncf %15 : vector<2x128xf32> to vector<2x128xbf16>
      %c0_14 = arith.constant 0 : index
      %c0_15 = arith.constant 0 : index
      %17 = vector.load %arg5[%c0_14, %c0_15] : memref<2x128xbf16, #tpu.memory_space<vmem>>, vector<2x128xbf16>
      tpu.vector_store %arg5[%c0_14, %c0_15], %16 {strides = array<i32>} : memref<2x128xbf16, #tpu.memory_space<vmem>>, vector<2x128xbf16>,
    } else {
    }
    return
  }
  func.func @transform_0(%arg0: i32, %arg1: i32) -> (i32, i32) {
    %c0_i32 = arith.constant 0 : i32
    %c0_i32_0 = arith.constant 0 : i32
    return %c0_i32, %arg1 : i32, i32
  }
  func.func @transform_1(%arg0: i32, %arg1: i32) -> (i32, i32) {
    %c0_i32 = arith.constant 0 : i32
    return %arg1, %arg0 : i32, i32
  }
  func.func @transform_2(%arg0: i32, %arg1: i32) -> (i32, i32) {
    %c0_i32 = arith.constant 0 : i32
    %c0_i32_0 = arith.constant 0 : i32
    return %c0_i32, %arg0 : i32, i32
  }
  func.func @transform_3(%arg0: i32, %arg1: i32) -> (i32, i32) {
    %c0_i32 = arith.constant 0 : i32
    %c0_i32_0 = arith.constant 0 : i32
    return %c0_i32, %arg0 : i32, i32
  }
}

module attributes {stable_mosaic.version = 11 : i64} {
  func.func @linear_kernel(%arg0: i32, %arg1: i32, %arg2: memref<2x256xbf16, #tpu.memory_space<vmem>>, %arg3: memref<256x128xbf16, #tpu.memory_space<vmem>>, %arg4: memref<1x128xf32, #tpu.memory_space<vmem>>, %arg5: memref<2x128xf32, #tpu.memory_space<vmem>>, %arg6: memref<2x128xf32, #tpu.memory_space<vmem>>) attributes {dimension_semantics = [#tpu.dimension_semantics<parallel>, #tpu.dimension_semantics<arbitrary>], iteration_bounds = array<i64: 1, 1>, scalar_prefetch = 0 : i64, scratch_operands = 1 : i64, tpu.core_type = #tpu.core_type<tc>, window_params = [{transform_indices = @transform_0, window_bounds = array<i64: 2, 256>}, {transform_indices = @transform_1, window_bounds = array<i64: 256, 128>}, {transform_indices = @transform_2, window_bounds = array<i64: 1, 128>}, {transform_indices = @transform_3, window_bounds = array<i64: 2, 128>}]} {
    %c0_i32 = arith.constant 0 : i32
    %0 = arith.cmpi eq, %arg1, %c0_i32 : i32
    %1 = arith.extui %0 : i1 to i32
    %c0_i32_0 = arith.constant 0 : i32
    %2 = arith.cmpi ne, %1, %c0_i32_0 : i32
    scf.if %2 {
      %cst_10 = arith.constant 0.000000e+00 : f32
      %12 = vector.broadcast %cst_10 : f32 to vector<2x128xf32>
      %c0_11 = arith.constant 0 : index
      %c0_12 = arith.constant 0 : index
      %13 = vector.load %arg6[%c0_11, %c0_12] : memref<2x128xf32, #tpu.memory_space<vmem>>, vector<2x128xf32>
      tpu.vector_store %arg6[%c0_11, %c0_12], %12 {strides = array<i32>} : memref<2x128xf32, #tpu.memory_space<vmem>>, vector<2x128xf32>,
    } else {
    }
    %c0 = arith.constant 0 : index
    %c0_1 = arith.constant 0 : index
    %3 = vector.load %arg6[%c0, %c0_1] : memref<2x128xf32, #tpu.memory_space<vmem>>, vector<2x128xf32>
    %c0_2 = arith.constant 0 : index
    %c0_3 = arith.constant 0 : index
    %4 = vector.load %arg2[%c0_2, %c0_3] : memref<2x256xbf16, #tpu.memory_space<vmem>>, vector<2x256xbf16>
    %c0_4 = arith.constant 0 : index
    %c0_5 = arith.constant 0 : index
    %5 = vector.load %arg3[%c0_4, %c0_5] : memref<256x128xbf16, #tpu.memory_space<vmem>>, vector<256x128xbf16>
    %cst = arith.constant dense<0.000000e+00> : vector<2x128xf32>
    %6 = tpu.matmul %4, %5, %cst {dimension_numbers = #tpu.dot_dimension_numbers<[1], [0], [0], [1], [0, 0, 1, 1], [], []>} : vector<2x256xbf16>, vector<256x128xbf16>, vector<2x128xf32> -> vector<2x128xf32>
    %7 = arith.addf %3, %6 : vector<2x128xf32>
    %c0_6 = arith.constant 0 : index
    %c0_7 = arith.constant 0 : index
    %8 = vector.load %arg6[%c0_6, %c0_7] : memref<2x128xf32, #tpu.memory_space<vmem>>, vector<2x128xf32>
    tpu.vector_store %arg6[%c0_6, %c0_7], %7 {strides = array<i32>} : memref<2x128xf32, #tpu.memory_space<vmem>>, vector<2x128xf32>,
    %c0_i32_8 = arith.constant 0 : i32
    %9 = arith.cmpi eq, %arg1, %c0_i32_8 : i32
    %10 = arith.extui %9 : i1 to i32
    %c0_i32_9 = arith.constant 0 : i32
    %11 = arith.cmpi ne, %10, %c0_i32_9 : i32
    scf.if %11 {
      %c0_10 = arith.constant 0 : index
      %c0_11 = arith.constant 0 : index
      %12 = vector.load %arg6[%c0_10, %c0_11] : memref<2x128xf32, #tpu.memory_space<vmem>>, vector<2x128xf32>
      %c0_12 = arith.constant 0 : index
      %c0_13 = arith.constant 0 : index
      %13 = vector.load %arg4[%c0_12, %c0_13] : memref<1x128xf32, #tpu.memory_space<vmem>>, vector<1x128xf32>
      %14 = vector.broadcast %13 : vector<1x128xf32> to vector<2x128xf32>
      %15 = arith.addf %12, %14 : vector<2x128xf32>
      %c0_14 = arith.constant 0 : index
      %c0_15 = arith.constant 0 : index
      %16 = vector.load %arg5[%c0_14, %c0_15] : memref<2x128xf32, #tpu.memory_space<vmem>>, vector<2x128xf32>
      tpu.vector_store %arg5[%c0_14, %c0_15], %15 {strides = array<i32>} : memref<2x128xf32, #tpu.memory_space<vmem>>, vector<2x128xf32>,
    } else {
    }
    return
  }
  func.func @transform_0(%arg0: i32, %arg1: i32) -> (i32, i32) {
    %c0_i32 = arith.constant 0 : i32
    %c0_i32_0 = arith.constant 0 : i32
    return %c0_i32, %arg1 : i32, i32
  }
  func.func @transform_1(%arg0: i32, %arg1: i32) -> (i32, i32) {
    %c0_i32 = arith.constant 0 : i32
    return %arg1, %arg0 : i32, i32
  }
  func.func @transform_2(%arg0: i32, %arg1: i32) -> (i32, i32) {
    %c0_i32 = arith.constant 0 : i32
    %c0_i32_0 = arith.constant 0 : i32
    return %c0_i32, %arg0 : i32, i32
  }
  func.func @transform_3(%arg0: i32, %arg1: i32) -> (i32, i32) {
    %c0_i32 = arith.constant 0 : i32
    %c0_i32_0 = arith.constant 0 : i32
    return %c0_i32, %arg0 : i32, i32
  }
}

</mosaic_0001>

<bundles_post_ra>
// kernel: _lambda_.7
= control target key start
LH: loop header
LB: loop body
LE: loop exit
PB: predicated region body
PF: predicated region fallthrough
CT: control target
= control target key end

     0   :  { %v281_v19 = vmov 0.0   ;;  %s359_s1 = inlined_call_operand.vmem [shape: bf16[256,128], index: 1, kind: input, shape index: {}]   ;;  %s360_s0 = inlined_call_operand.vmem [shape: bf16[2,256], index: 0, kind: input, shape index: {}]   ;;  %s361_s2 = inlined_call_operand.vmem [shape: f32[1,128], index: 2, kind: input, shape index: {}]   ;;  %s362_s3 = inlined_call_operand.vmem [shape: bf16[2,128], index: 3, kind: output, shape index: {}]  }
   0x1   :  { %v270_v0 = vld [vmem:[%s359_s1 + $0x38] sm:$0xff]  ;;  %v269_v2 = vld [vmem:[%s359_s1 + $0x30] sm:$0xff]  ;;  %v20_v4 = vld [vmem:[%s360_s0] sm:$0x3]  ;;  %18 = vst [vmem:[#allocation2] sm:$0x3] %v281_v19 }
   0x2   :  { %v278_v1 = vld [vmem:[%s359_s1 + $0x78] sm:$0xff]  ;;  %155 = vmatpush.bf16.msra.mxu0 %v270_v0  ;;  %v277_v3 = vld [vmem:[%s359_s1 + $0x70] sm:$0xff]  ;;  %v268_v5 = vld [vmem:[%s359_s1 + $0x28] sm:$0xff]  ;;  %54 = vst [vmem:[#allocation1] ss:$9 sm:$0xff] %v20_v4 }
   0x3   :  { %168 = vmatpush.bf16.msra.mxu1 %v278_v1  ;;  %v276_v6 = vld [vmem:[%s359_s1 + $0x68] sm:$0xff]  ;;  %v267_v7 = vld [vmem:[%s359_s1 + $0x20] sm:$0xff]  ;;  %v266_v9 = vld [vmem:[%s359_s1 + $0x18] sm:$0xff] }
   0x4   :  { %v275_v8 = vld [vmem:[%s359_s1 + $0x60] sm:$0xff]  ;;  %v274_v10 = vld [vmem:[%s359_s1 + $0x58] sm:$0xff]  ;;  %v265_v11 = vld [vmem:[%s359_s1 + $0x10] sm:$0xff] }
   0x5   :  { %v273_v12 = vld [vmem:[%s359_s1 + $0x50] sm:$0xff]  ;;  %v264_v13 = vld [vmem:[%s359_s1 + $0x8] sm:$0xff]  ;;  %v263_v15 = vld [vmem:[%s359_s1] sm:$0xff] }
   0x6   :  { %156 = vmatpush.bf16.msra.mxu0 %v269_v2  ;;  %v272_v14 = vld [vmem:[%s359_s1 + $0x48] sm:$0xff]  ;;  %v271_v16 = vld [vmem:[%s359_s1 + $0x40] sm:$0xff] }
   0x7   :  { %169 = vmatpush.bf16.msra.mxu1 %v277_v3  ;;  %v280_v27 = vld [vmem:[%s361_s2] ss:$0 sm:$0xff] }
   0x8   :  { %v19_v21 = vld [vmem:[#allocation2] sm:$0x3] }
   0x9   :  { %v55_v17 = vld [vmem:[#allocation1] sm:$0xff]  ;;  %v56_v18 = vld [vmem:[#allocation1 + $0x9] sm:$0xff] }
   0xa   :  { %157 = vmatpush.bf16.msra.mxu0 %v268_v5 }
   0xb   :  { %170 = vmatpush.bf16.msra.mxu1 %v276_v6 }
   0xe   :  { %158 = vmatpush.bf16.msra.mxu0 %v267_v7 }
   0xf   :  { %171 = vmatpush.bf16.msra.mxu1 %v275_v8 }
  0x12   :  { %159 = vmatpush.bf16.msra.mxu0 %v266_v9 }
  0x13   :  { %172 = vmatpush.bf16.msra.mxu1 %v274_v10 }
  0x16   :  { %160 = vmatpush.bf16.msra.mxu0 %v265_v11 }
  0x17   :  { %173 = vmatpush.bf16.msra.mxu1 %v273_v12 }
  0x1a   :  { %161 = vmatpush.bf16.msra.mxu0 %v264_v13 }
  0x1b   :  { %174 = vmatpush.bf16.msra.mxu1 %v272_v14 }
  0x1e   :  { %162 = vmatpush.bf16.msra.mxu0 %v263_v15 }
  0x1f   :  { %175 = vmatpush.bf16.msra.mxu1 %v271_v16 }
  0x21   :  { %163 = vmatmul.bf16.vlgmr.msra.gmra.mxu0 %v55_v17 }
  0x22   :  { %176 = vmatmul.bf16.vlgmr.msra.gmra.mxu1 %v56_v18 }
  0x9e   :  { %v164_v20 = vpop.f32.mrf.mxu0 }
  0x9f   :  { %v177_v22 = vpop.f32.mrf.mxu1 }
  0xa0   :  { %v178_v23 = vadd.f32 %v177_v22, %v164_v20 }
  0xa2   :  { %v181_v24 = vadd.f32 %v178_v23, %v19_v21 }
  0xa4   :  { %182 = vst [vmem:[#allocation2] sm:$0x3] %v181_v24 }
  0xa6   :  { %v166_v25 = vpop.f32.mrf.mxu0 }
  0xa7   :  { %v179_v26 = vpop.f32.mrf.mxu1 }
  0xab   :  { %v186_v28 = vld [vmem:[#allocation2] sm:$0x3] }
  0xac   :  { %v191_v29 = vadd.f32 %v280_v27, %v186_v28 }
  0xae   :  { %v192_v30 = vmax.f32 %v191_v29, 0.0 }
  0xb0   :  { %v193_v31 = vpack.c.bf16 %v192_v30, %v192_v30 }
  0xb2   :  { %194 = vst [vmem:[%s362_s3] sm:$0x1] %v193_v31 }

// kernel: _lambda_.8
= control target key start
LH: loop header
LB: loop body
LE: loop exit
PB: predicated region body
PF: predicated region fallthrough
CT: control target
= control target key end

     0   :  { %v280_v19 = vmov 0.0   ;;  %s358_s1 = inlined_call_operand.vmem [shape: bf16[256,128], index: 1, kind: input, shape index: {}]   ;;  %s359_s0 = inlined_call_operand.vmem [shape: bf16[2,256], index: 0, kind: input, shape index: {}]   ;;  %s360_s2 = inlined_call_operand.vmem [shape: f32[1,128], index: 2, kind: input, shape index: {}]   ;;  %s361_s3 = inlined_call_operand.vmem [shape: bf16[2,128], index: 3, kind: output, shape index: {}]  }
   0x1   :  { %v269_v0 = vld [vmem:[%s358_s1 + $0x38] sm:$0xff]  ;;  %v268_v2 = vld [vmem:[%s358_s1 + $0x30] sm:$0xff]  ;;  %v20_v4 = vld [vmem:[%s359_s0] sm:$0x3]  ;;  %18 = vst [vmem:[#allocation2] sm:$0x3] %v280_v19 }
   0x2   :  { %v277_v1 = vld [vmem:[%s358_s1 + $0x78] sm:$0xff]  ;;  %155 = vmatpush.bf16.msra.mxu0 %v269_v0  ;;  %v276_v3 = vld [vmem:[%s358_s1 + $0x70] sm:$0xff]  ;;  %v267_v5 = vld [vmem:[%s358_s1 + $0x28] sm:$0xff]  ;;  %54 = vst [vmem:[#allocation1] ss:$9 sm:$0xff] %v20_v4 }
   0x3   :  { %168 = vmatpush.bf16.msra.mxu1 %v277_v1  ;;  %v275_v6 = vld [vmem:[%s358_s1 + $0x68] sm:$0xff]  ;;  %v266_v7 = vld [vmem:[%s358_s1 + $0x20] sm:$0xff]  ;;  %v265_v9 = vld [vmem:[%s358_s1 + $0x18] sm:$0xff] }
   0x4   :  { %v274_v8 = vld [vmem:[%s358_s1 + $0x60] sm:$0xff]  ;;  %v273_v10 = vld [vmem:[%s358_s1 + $0x58] sm:$0xff]  ;;  %v264_v11 = vld [vmem:[%s358_s1 + $0x10] sm:$0xff] }
   0x5   :  { %v272_v12 = vld [vmem:[%s358_s1 + $0x50] sm:$0xff]  ;;  %v263_v13 = vld [vmem:[%s358_s1 + $0x8] sm:$0xff]  ;;  %v262_v15 = vld [vmem:[%s358_s1] sm:$0xff] }
   0x6   :  { %156 = vmatpush.bf16.msra.mxu0 %v268_v2  ;;  %v271_v14 = vld [vmem:[%s358_s1 + $0x48] sm:$0xff]  ;;  %v270_v16 = vld [vmem:[%s358_s1 + $0x40] sm:$0xff] }
   0x7   :  { %169 = vmatpush.bf16.msra.mxu1 %v276_v3  ;;  %v279_v27 = vld [vmem:[%s360_s2] ss:$0 sm:$0xff] }
   0x8   :  { %v19_v21 = vld [vmem:[#allocation2] sm:$0x3] }
   0x9   :  { %v55_v17 = vld [vmem:[#allocation1] sm:$0xff]  ;;  %v56_v18 = vld [vmem:[#allocation1 + $0x9] sm:$0xff] }
   0xa   :  { %157 = vmatpush.bf16.msra.mxu0 %v267_v5 }
   0xb   :  { %170 = vmatpush.bf16.msra.mxu1 %v275_v6 }
   0xe   :  { %158 = vmatpush.bf16.msra.mxu0 %v266_v7 }
   0xf   :  { %171 = vmatpush.bf16.msra.mxu1 %v274_v8 }
  0x12   :  { %159 = vmatpush.bf16.msra.mxu0 %v265_v9 }
  0x13   :  { %172 = vmatpush.bf16.msra.mxu1 %v273_v10 }
  0x16   :  { %160 = vmatpush.bf16.msra.mxu0 %v264_v11 }
  0x17   :  { %173 = vmatpush.bf16.msra.mxu1 %v272_v12 }
  0x1a   :  { %161 = vmatpush.bf16.msra.mxu0 %v263_v13 }
  0x1b   :  { %174 = vmatpush.bf16.msra.mxu1 %v271_v14 }
  0x1e   :  { %162 = vmatpush.bf16.msra.mxu0 %v262_v15 }
  0x1f   :  { %175 = vmatpush.bf16.msra.mxu1 %v270_v16 }
  0x21   :  { %163 = vmatmul.bf16.vlgmr.msra.gmra.mxu0 %v55_v17 }
  0x22   :  { %176 = vmatmul.bf16.vlgmr.msra.gmra.mxu1 %v56_v18 }
  0x9e   :  { %v164_v20 = vpop.f32.mrf.mxu0 }
  0x9f   :  { %v177_v22 = vpop.f32.mrf.mxu1 }
  0xa0   :  { %v178_v23 = vadd.f32 %v177_v22, %v164_v20 }
  0xa2   :  { %v181_v24 = vadd.f32 %v178_v23, %v19_v21 }
  0xa4   :  { %182 = vst [vmem:[#allocation2] sm:$0x3] %v181_v24 }
  0xa6   :  { %v166_v25 = vpop.f32.mrf.mxu0 }
  0xa7   :  { %v179_v26 = vpop.f32.mrf.mxu1 }
  0xab   :  { %v186_v28 = vld [vmem:[#allocation2] sm:$0x3] }
  0xac   :  { %v191_v29 = vadd.f32 %v279_v27, %v186_v28 }
  0xae   :  { %v192_v30 = vpack.c.bf16 %v191_v29, %v191_v29 }
  0xb0   :  { %193 = vst [vmem:[%s361_s3] sm:$0x1] %v192_v30 }

// kernel: _lambda_.6
= control target key start
LH: loop header
LB: loop body
LE: loop exit
PB: predicated region body
PF: predicated region fallthrough
CT: control target
= control target key end

     0   :  { %s2057_s12 = smov 0   ;;  %s2505_s0 = inlined_call_operand.vmem [shape: bf16[2,10,10,8], index: 0, kind: input, shape index: {}]   ;;  %s2506_s1 = inlined_call_operand.vmem [shape: bf16[9,8,128], index: 1, kind: input, shape index: {}]   ;;  %s2507_s2 = inlined_call_operand.vmem [shape: f32[1,128], index: 2, kind: input, shape index: {}]   ;;  %s2508_s3 = inlined_call_operand.vmem [shape: bf16[2,4,4,128], index: 3, kind: output, shape index: {}]  }
   0x1 LB: > { %s1797_s13 = sadd.s32 4294967295, %s2035_s12   ;;  %p1801_p0 = scmp.ge.s32.totalorder %s2035_s12, 1  ;;  %s2035_s12 = sphi %s2057_s12, %s13_s12  }
   0x2   : > { %p137_p1 = scmp.lt.s32.totalorder %s2035_s12, 3 }
   0x4   : > { %p138_p2 = pnand %p1801_p0, %p137_p1 }
   0x5   : > { %p161_p3 = scmp.lt.s32.totalorder (!%p138_p2), %s1797_s13, 1 }
   0x6   : > { %141 = sbr.rel (%p138_p2) target bundleno = 351 (0x15f), region = 32 }
   0xb   : > { %v1805_v0 = vld [vmem:[%s2506_s1 + $0x4] sm:$0xf]  ;;  %vm331_vm0 = vcmask 1043456   ;;  %v1838_v2 = vld [vmem:[%s2506_s1 + $0x8] sm:$0xf]  ;;  %s2514_s13 = smov (!%p161_p3, %s1797_s13), 1 }
   0xc   : > { %v333_v1 = vsel %vm331_vm0, %v1805_v0, 0  ;;  %v514_v3 = vsel %vm331_vm0, %v1838_v2, 0  ;;  %s2019_s18 = smul.u32 80, %s2514_s13  ;;  %v1851_v4 = vld [vmem:[%s2506_s1 + $0xc] sm:$0xf]  ;;  %vm318_vm3 = vcmask 64512  }
   0xd   : > { %2016 = vmatpush.bf16.msra.mxu1 %v333_v1  ;;  %2017 = vmatpush.bf16.msra.mxu2 %v333_v1  ;;  %v180_v5 = vld [vmem:[%s2506_s1] sm:$0xf]  ;;  %v597_v6 = vsel %vm331_vm0, %v1851_v4, 0  ;;  %v1888_v8 = vld [vmem:[%s2506_s1 + $0x10] sm:$0xf]  ;;  %vm452_vm5 = vcmask 1042432  }
   0xe   : > { %2018 = vmatpush.bf16.msra.mxu3 %v333_v1  ;;  %342 = vmatpush.bf16.msra.mxu0 %v333_v1  ;;  %v397_v7 = vsel %vm331_vm0, %v180_v5, 0  ;;  %s2090_s27 = scalar_lea.vmem %s2505_s0, %s2019_s18  ;;  %vm189_vm1 = vsmask.f32 3328  ;;  %vm190_vm2 = vsmask.f32 7440  ;;  %v791_v9 = vsel %vm331_vm0, %v1888_v8, 0 }
   0xf   : > { %v174_v10 = vld [vmem:[%s2090_s27 + $0x10] sm:$0xf]  ;;  %v175_v11 = vld [vmem:[%s2090_s27 + $0x18] sm:$0xf]  ;;  %v2096_v12 = vld [vmem:[%s2090_s27 + $0x14] sm:$0x1] }
  0x10   : > { %v2099_v13 = vld [vmem:[%s2090_s27 + $0x1c] sm:$0x1]  ;;  %v221_v14 = vshrl.u32 %v174_v10, 16  ;;  %v224_v15 = vshll.u32 %v174_v10, 16  ;;  %v230_v16 = vshll.u32 %v2096_v12, 16  ;;  %v235_v17 = vshrl.u32 %v175_v11, 16  ;;  %vm2115_vm4 = vmor %vm189_vm1, %vm190_vm2 }
  0x11   : > { %523 = vmatpush.bf16.msrb.mxu2 %v514_v3  ;;  %406 = vmatpush.bf16.msrb.mxu1 %v397_v7  ;;  %v238_v18 = vshll.u32 %v175_v11, 16  ;;  %v244_v19 = vshll.u32 %v2099_v13, 16  ;;  %v176_v20 = vld [vmem:[%s2090_s27 + $0x20] sm:$0xf]  ;;  %v177_v21 = vld [vmem:[%s2090_s27 + $0x28] sm:$0xf] }
  0x12   : > { %606 = vmatpush.bf16.msrb.mxu3 %v597_v6  ;;  %800 = vmatpush.bf16.msrb.mxu0 %v791_v9  ;;  %v223_v22 = vrot.slane %v221_v14, 4  ;;  %v226_v23 = vrot.slane %v224_v15, 5  ;;  %v232_v24 = vrot.slane %v230_v16, 5  ;;  %v237_v25 = vrot.slane %v235_v17, 4  ;;  %v2106_v26 = vld [vmem:[%s2090_s27 + $0x24] sm:$0x1] }
  0x13   : > { %v240_v27 = vrot.slane %v238_v18, 5  ;;  %v246_v28 = vrot.slane %v244_v19, 5  ;;  %v2109_v29 = vld [vmem:[%s2090_s27 + $0x2c] sm:$0x1]  ;;  %v249_v30 = vshrl.u32 %v176_v20, 16  ;;  %v252_v31 = vshll.u32 %v176_v20, 16 }
  0x14   : > { %v227_v32 = vor.u32 %v226_v23, %v223_v22  ;;  %v258_v33 = vshll.u32 %v2106_v26, 16  ;;  %v263_v34 = vshrl.u32 %v177_v21, 16  ;;  %v266_v35 = vshll.u32 %v177_v21, 16  ;;  %v178_v36 = vld [vmem:[%s2090_s27 + $0x30] sm:$0xf]  ;;  %s2003_s11 = sshll.u32 %s2514_s13, 3 }
  0x15   : > { %v241_v38 = vor.u32 %v240_v27, %v237_v25  ;;  %v251_v39 = vrot.slane %v249_v30, 4  ;;  %v254_v40 = vrot.slane %v252_v31, 5  ;;  %v272_v41 = vshll.u32 %v2109_v29, 16  ;;  %v2121_v46 = vld [vmem:[%s2090_s27 + $0x34] sm:$0x1]  ;;  %s2471_s13 = scalar_lea.vmem %s2508_s3, %s2003_s11 }
  0x16   : > { %v228_v42 = vrot.slane %v227_v32, 4  ;;  %v260_v43 = vrot.slane %v258_v33, 5  ;;  %v265_v44 = vrot.slane %v263_v34, 4  ;;  %v268_v45 = vrot.slane %v266_v35, 5  ;;  %v179_v53 = vld [vmem:[%s2090_s27 + $0x38] sm:$0xf] }
  0x17   : > { %v242_v47 = vrot.slane %v241_v38, 4  ;;  %v255_v48 = vor.u32 %v254_v40, %v251_v39  ;;  %v274_v49 = vrot.slane %v272_v41, 5  ;;  %v277_v50 = vshrl.u32 %v178_v36, 16  ;;  %v2127_v54 = vld [vmem:[%s2090_s27 + $0x3c] sm:$0x1] }
  0x18   : > { %vm453_vm6 = vcmask 1046532   ;;  %v233_v51 = vsel %vm2115_vm4, %v228_v42, %v232_v24  ;;  %v269_v52 = vor.u32 %v268_v45, %v265_v44  ;;  %v280_v55 = vshll.u32 %v178_v36, 16  ;;  %v172_v1 = vld [vmem:[%s2090_s27] sm:$0xf]  ;;  %v181_v6 = vld [vmem:[%s2090_s27 + $0x4] sm:$0x1] }
  0x19   : > { %v286_v56 = vshll.u32 %v2121_v46, 16  ;;  %v247_v57 = vsel %vm2115_vm4, %v242_v47, %v246_v28  ;;  %v308_v58 = vunpack.c.l.b16 %v233_v51  ;;  %v256_v59 = vrot.slane %v255_v48, 4  ;;  %v173_v11 = vld [vmem:[%s2090_s27 + $0x8] sm:$0xf]  ;;  %v182_v24 = vld [vmem:[%s2090_s27 + $0xc] sm:$0x1]  ;;  %vm2149_vm7 = vmor %vm452_vm5, %vm453_vm6 }
  0x1a   : > { %v279_v60 = vrot.slane %v277_v50, 4  ;;  %v309_v61 = vunpack.c.l.b16 %v247_v57  ;;  %v270_v62 = vrot.slane %v269_v52, 4  ;;  %v282_v63 = vrot.slane %v280_v55, 5  ;;  %v428_v33 = vld [vmem:[%s2090_s27] sm:$0xe] }
  0x1b   : > { %v288_v0 = vrot.slane %v286_v56, 5  ;;  %v261_v2 = vsel %vm2115_vm4, %v256_v59, %v260_v43  ;;  %v291_v3 = vshrl.u32 %v179_v53, 16  ;;  %v294_v4 = vshll.u32 %v179_v53, 16  ;;  %v429_v39 = vld [vmem:[%s2090_s27 + $0x8] sm:$0xe] }
  0x1c   : > { %v300_v5 = vshll.u32 %v2127_v54, 16  ;;  %v315_v7 = vpack.c.b16 %v309_v61, %v308_v58  ;;  %v275_v8 = vsel %vm2115_vm4, %v270_v62, %v274_v49  ;;  %v310_v9 = vunpack.c.l.b16 %v261_v2  ;;  %v1922_v45 = vld [vmem:[%s2506_s1 + $0x18] sm:$0xf]  ;;  %v1872_v55 = vld [vmem:[%s2090_s27 + $0x8] sm:$0xf] }
  0x1d   : > { %v283_v10 = vor.u32 %v282_v63, %v279_v60  ;;  %v311_v14 = vunpack.c.l.b16 %v275_v8  ;;  %v293_v15 = vrot.slane %v291_v3, 4  ;;  %v296_v16 = vrot.slane %v294_v4, 5  ;;  %v1874_v59 = vld [vmem:[%s2090_s27 + $0x10] sm:$0xf]  ;;  %v2168_v63 = vld [vmem:[%s2090_s27 + $0xc] sm:$0x1] }
  0x1e   : > { %v302_v17 = vrot.slane %v300_v5, 5  ;;  %1807 = vmatmul.msk.bf16.vlgmr.msra.gmra.mxu1 %vm318_vm3, %v315_v7  ;;  %v193_v19 = vshrl.u32 %v172_v1, 16  ;;  %v196_v20 = vshll.u32 %v172_v1, 16  ;;  %v202_v21 = vshll.u32 %v181_v6, 16  ;;  %v1812_v3 = vld [vmem:[%s2090_s27] sm:$0xf] }
  0x1f   : > { %v284_v18 = vrot.slane %v283_v10, 4  ;;  %v316_v22 = vpack.c.b16 %v311_v14, %v310_v9  ;;  %v297_v23 = vor.u32 %v296_v16, %v293_v15  ;;  %v207_v25 = vshrl.u32 %v173_v11, 16  ;;  %v2004_v4 = vld [vmem:[%s2090_s27 + $0x4] sm:$0xf0]  ;;  %v1909_v14 = vld [vmem:[%s2506_s1 + $0x14] sm:$0xf] }
  0x20   : > { %v210_v27 = vshll.u32 %v173_v11, 16  ;;  %v195_v30 = vrot.slane %v193_v19, 4  ;;  %v198_v31 = vrot.slane %v196_v20, 5  ;;  %v204_v32 = vrot.slane %v202_v21, 5  ;;  %v1959_v11 = vld [vmem:[%s2506_s1 + $0x1c] sm:$0xf] }
  0x21   : > { %v289_v28 = vsel %vm2115_vm4, %v284_v18, %v288_v0  ;;  %1808 = vmatmul.msk.bf16.vlgmr.msra.gmra.mxu2 %vm318_vm3, %v316_v22  ;;  %v298_v34 = vrot.slane %v297_v23, 4  ;;  %v209_v36 = vrot.slane %v207_v25, 4  ;;  %v216_v41 = vshll.u32 %v182_v24, 16  ;;  %v2171_v0 = vld [vmem:[%s2090_s27 + $0x14] sm:$0x1] }
  0x22   : > { %v312_v35 = vunpack.c.l.b16 %v289_v28  ;;  %v212_v38 = vrot.slane %v210_v27, 5  ;;  %v199_v40 = vor.u32 %v198_v31, %v195_v30  ;;  %v457_v42 = vrot.slane %v181_v6, 5  ;;  %v1980_v19 = vld [vmem:[%s2506_s1 + $0x20] sm:$0xf] }
  0x23   : > { %v461_v43 = vrot.slane %v182_v24, 5  ;;  %v303_v47 = vsel %vm2115_vm4, %v298_v34, %v302_v17  ;;  %v1830_v49 = vrot.slane %v428_v33, 9  ;;  %v218_v52 = vrot.slane %v216_v41, 5  ;;  %v1878_v41 = vld [vmem:[%s2090_s27 + $0x20] sm:$0xf] }
  0x24   : > { %v213_v48 = vor.u32 %v212_v38, %v209_v36  ;;  %v313_v50 = vunpack.c.l.b16 %v303_v47  ;;  %v200_v51 = vrot.slane %v199_v40, 4  ;;  %v1831_v53 = vrot.slane %v429_v39, 9  ;;  %v1876_v38 = vld [vmem:[%s2090_s27 + $0x18] sm:$0xf]  ;;  %v2008_v47 = vld [vmem:[%s2090_s27 + $0xc] sm:$0xf0] }
  0x25   : > { %v458_v57 = vsel %vm2149_vm7, %v1830_v49, %v457_v42  ;;  %v996_v58 = vsel %vm331_vm0, %v1922_v45, 0  ;;  %v653_v6 = vshrl.u32 %v1872_v55, 16  ;;  %v656_v9 = vshll.u32 %v1872_v55, 16  ;;  %v431_v40 = vld [vmem:[%s2090_s27 + $0x18] sm:$0xe] }
  0x26   : > { %v214_v56 = vrot.slane %v213_v48, 4  ;;  %v317_v60 = vpack.c.b16 %v313_v50, %v312_v35  ;;  %v205_v61 = vsel %vm2115_vm4, %v200_v51, %v204_v32  ;;  %v462_v62 = vsel %vm2149_vm7, %v1831_v53, %v461_v43  ;;  %1005 = vmatpush.bf16.msra.mxu2 %v996_v58  ;;  %v430_v35 = vld [vmem:[%s2090_s27 + $0x10] sm:$0xe]  ;;  %v1854_v45 = vld [vmem:[%s2090_s27 + $0x8] sm:$0xf] }
  0x27   : > { %v306_v2 = vunpack.c.l.b16 %v205_v61  ;;  %v489_v5 = vunpack.c.l.b16 %v458_v57  ;;  %v490_v8 = vunpack.c.l.b16 %v462_v62  ;;  %v667_v10 = vshrl.u32 %v1874_v59, 16 }
  0x28   : > { %v219_v1 = vsel %vm2115_vm4, %v214_v56, %v218_v52  ;;  %1809 = vmatmul.msk.bf16.vlgmr.msra.gmra.mxu3 %vm318_vm3, %v317_v60  ;;  %v655_v15 = vrot.slane %v653_v6, 4  ;;  %v662_v16 = vshll.u32 %v2168_v63, 16  ;;  %v670_v17 = vshll.u32 %v1874_v59, 16  ;;  %v2210_v60 = vld [vmem:[%s2090_s27 + $0x1c] sm:$0x1] }
  0x29   : > { %v307_v7 = vunpack.c.l.b16 %v219_v1  ;;  %v676_v18 = vshll.u32 %v2171_v0, 16  ;;  %v1813_v21 = vor.u32 %v2004_v4, %v1812_v3  ;;  %v658_v22 = vrot.slane %v656_v9, 5  ;;  %v2215_v4 = vld [vmem:[%s2090_s27 + $0x24] sm:$0x1] }
  0x2a   : > { %v669_v23 = vrot.slane %v667_v10, 4  ;;  %v672_v24 = vrot.slane %v670_v17, 5  ;;  %v1190_v27 = vsel %vm331_vm0, %v1959_v11, 0  ;;  %v913_v28 = vsel %vm331_vm0, %v1909_v14, 0  ;;  %v1880_v17 = vld [vmem:[%s2090_s27 + $0x28] sm:$0xf] }
  0x2b   : > { %v314_v20 = vpack.c.b16 %v307_v7, %v306_v2  ;;  %v659_v25 = vor.u32 %v658_v22, %v655_v15  ;;  %v1312_v30 = vsel %vm331_vm0, %v1980_v19, 0  ;;  %v497_v31 = vpack.c.b16 %v490_v8, %v489_v5  ;;  %1199 = vmatpush.bf16.msra.mxu3 %v1190_v27  ;;  %922 = vmatpush.bf16.msra.mxu1 %v913_v28  ;;  %v2005_v5 = vld [vmem:[%s2090_s27 + $0x14] sm:$0xf0]  ;;  %v1882_v22 = vld [vmem:[%s2090_s27 + $0x30] sm:$0xf] }
  0x2c   : > { %v664_v32 = vrot.slane %v662_v16, 5  ;;  %v673_v33 = vor.u32 %v672_v24, %v669_v23  ;;  %v678_v34 = vrot.slane %v676_v18, 5  ;;  %v1832_v42 = vrot.slane %v430_v35, 9  ;;  %v432_v23 = vld [vmem:[%s2090_s27 + $0x20] sm:$0xe] }
  0x2d   : > { %1806 = vmatmul.msk.bf16.vlgmr.msra.gmra.mxu0 %vm318_vm3, %v314_v20  ;;  %v660_v36 = vrot.slane %v659_v25, 4  ;;  %v465_v43 = vrot.slane %v2096_v12, 5  ;;  %v681_v50 = vshrl.u32 %v1876_v38, 16  ;;  %v684_v51 = vshll.u32 %v1876_v38, 16  ;;  %v433_v24 = vld [vmem:[%s2090_s27 + $0x28] sm:$0xe] }
  0x2e   : > { %1826 = vmatmul.msk.bf16.vlgmr.msrb.gmra.mxu1 %vm318_vm3, %v1813_v21  ;;  %1321 = vmatpush.bf16.msra.mxu0 %v1312_v30  ;;  %v674_v39 = vrot.slane %v673_v33, 4  ;;  %v1833_v52 = vrot.slane %v431_v40, 9  ;;  %v469_v53 = vrot.slane %v2099_v13, 5  ;;  %v695_v12 = vshrl.u32 %v1878_v41, 16  ;;  %v1816_v13 = vld [vmem:[%s2090_s27 + $0x10] sm:$0xf] }
  0x2f   : > { %v665_v48 = vsel %vm2115_vm4, %v660_v36, %v664_v32  ;;  %v698_v55 = vshll.u32 %v1878_v41, 16  ;;  %v1855_v56 = vor.u32 %v2008_v47, %v1854_v45  ;;  %v466_v59 = vsel %vm2149_vm7, %v1832_v42, %v465_v43  ;;  %v1858_v28 = vld [vmem:[%s2090_s27 + $0x18] sm:$0xf]  ;;  %v2009_v30 = vld [vmem:[%s2090_s27 + $0x1c] sm:$0xf0] }
  0x30   : > { %v679_v49 = vsel %vm2115_vm4, %v674_v39, %v678_v34  ;;  %v766_v57 = vunpack.c.l.b16 %v665_v48  ;;  %v683_v61 = vrot.slane %v681_v50, 4  ;;  %v686_v62 = vrot.slane %v684_v51, 5  ;;  %v2238_v47 = vld [vmem:[%s2090_s27 + $0x2c] sm:$0x1] }
  0x31   : > { %1839 = vmatmul.msk.bf16.vlgmr.msrb.gmra.mxu2 %vm318_vm3, %v497_v31  ;;  %v767_v58 = vunpack.c.l.b16 %v679_v49  ;;  %v697_v1 = vrot.slane %v695_v12, 4  ;;  %v700_v2 = vrot.slane %v698_v55, 5  ;;  %v470_v3 = vsel %vm2149_vm7, %v1833_v52, %v469_v53  ;;  %v1820_v52 = vld [vmem:[%s2090_s27 + $0x20] sm:$0xf] }
  0x32   : > { %v491_v7 = vunpack.c.l.b16 %v466_v59  ;;  %v690_v8 = vshll.u32 %v2210_v60, 16  ;;  %v492_v9 = vunpack.c.l.b16 %v470_v3  ;;  %v687_v10 = vor.u32 %v686_v62, %v683_v61 }
  0x33   : > { %v774_v6 = vpack.c.b16 %v767_v58, %v766_v57  ;;  %v701_v11 = vor.u32 %v700_v2, %v697_v1  ;;  %v704_v14 = vshll.u32 %v2215_v4, 16  ;;  %v1817_v15 = vor.u32 %v2005_v5, %v1816_v13  ;;  %v434_v2 = vld [vmem:[%s2090_s27 + $0x30] sm:$0xe] }
  0x34   : > { %v692_v16 = vrot.slane %v690_v8, 5  ;;  %v498_v18 = vpack.c.b16 %v492_v9, %v491_v7  ;;  %v688_v19 = vrot.slane %v687_v10, 4  ;;  %v709_v25 = vshrl.u32 %v1880_v17, 16  ;;  %v1884_v7 = vld [vmem:[%s2090_s27 + $0x38] sm:$0xf] }
  0x35   : > { %v702_v20 = vrot.slane %v701_v11, 4  ;;  %v706_v21 = vrot.slane %v704_v14, 5  ;;  %v712_v27 = vshll.u32 %v1880_v17, 16  ;;  %v723_v33 = vshrl.u32 %v1882_v22, 16  ;;  %v1886_v8 = vld [vmem:[%s2090_s27 + $0x40] sm:$0xf] }
  0x36   : > { %v693_v31 = vsel %vm2115_vm4, %v688_v19, %v692_v16  ;;  %v726_v34 = vshll.u32 %v1882_v22, 16  ;;  %v1834_v35 = vrot.slane %v432_v23, 9  ;;  %v473_v36 = vrot.slane %v2106_v26, 5  ;;  %v2245_v26 = vld [vmem:[%s2090_s27 + $0x34] sm:$0x1] }
  0x37   : > { %v707_v32 = vsel %vm2115_vm4, %v702_v20, %v706_v21  ;;  %v1835_v38 = vrot.slane %v433_v24, 9  ;;  %v477_v39 = vrot.slane %v2109_v29, 5  ;;  %v711_v40 = vrot.slane %v709_v25, 4  ;;  %v2006_v29 = vld [vmem:[%s2090_s27 + $0x24] sm:$0xf0] }
  0x38   : > { %1868 = vmatmul.msk.bf16.vlgmr.msrb.gmra.mxu3 %vm318_vm3, %v1855_v56  ;;  %v714_v41 = vrot.slane %v712_v27, 5  ;;  %v1859_v42 = vor.u32 %v2009_v30, %v1858_v28  ;;  %v768_v43 = vunpack.c.l.b16 %v693_v31  ;;  %v769_v45 = vunpack.c.l.b16 %v707_v32  ;;  %v1862_v9 = vld [vmem:[%s2090_s27 + $0x28] sm:$0xf]  ;;  %v2010_v14 = vld [vmem:[%s2090_s27 + $0x2c] sm:$0xf0] }
  0x39   : > { %v725_v48 = vrot.slane %v723_v33, 4  ;;  %v728_v49 = vrot.slane %v726_v34, 5  ;;  %v474_v50 = vsel %vm2149_vm7, %v1834_v35, %v473_v36  ;;  %v478_v51 = vsel %vm2149_vm7, %v1835_v38, %v477_v39  ;;  %v2272_v27 = vld [vmem:[%s2090_s27 + $0x3c] sm:$0x1]  ;;  %v2275_v28 = vld [vmem:[%s2090_s27 + $0x44] sm:$0x1] }
  0x3a   : > { %v715_v53 = vor.u32 %v714_v41, %v711_v40  ;;  %v718_v12 = vshll.u32 %v2238_v47, 16  ;;  %v775_v55 = vpack.c.b16 %v769_v45, %v768_v43  ;;  %v493_v56 = vunpack.c.l.b16 %v474_v50  ;;  %v1824_v34 = vld [vmem:[%s2090_s27 + $0x30] sm:$0xf]  ;;  %v2007_v35 = vld [vmem:[%s2090_s27 + $0x34] sm:$0xf0] }
  0x3b   : > { %v494_v57 = vunpack.c.l.b16 %v478_v51  ;;  %v729_v58 = vor.u32 %v728_v49, %v725_v48  ;;  %v732_v59 = vshll.u32 %v2245_v26, 16  ;;  %v1821_v61 = vor.u32 %v2006_v29, %v1820_v52  ;;  %v1945_v49 = vld [vmem:[%s2090_s27 + $0x18] sm:$0xf] }
  0x3c   : > { %v716_v62 = vrot.slane %v715_v53, 4  ;;  %v720_v1 = vrot.slane %v718_v12, 5  ;;  %v481_v11 = vrot.slane %v2121_v46, 5  ;;  %v485_v17 = vrot.slane %v2127_v54, 5  ;;  %v1893_v12 = vld [vmem:[%s2090_s27 + $0x8] sm:$0xe] }
  0x3d   : > { %1889 = vmatmul.msk.bf16.vlgmr.msrb.gmra.mxu0 %vm318_vm3, %v774_v6  ;;  %v499_v3 = vpack.c.b16 %v494_v57, %v493_v56  ;;  %v730_v13 = vrot.slane %v729_v58, 4  ;;  %v734_v5 = vrot.slane %v732_v59, 5  ;;  %v435_v6 = vld [vmem:[%s2090_s27 + $0x38] sm:$0xe]  ;;  %v740_v20 = vshll.u32 %v1884_v7, 16 }
  0x3e   : > { %1827 = vmatmul.msk.bf16.gmra.mxu1 %vm318_vm3, %v1817_v15  ;;  %v721_v10 = vsel %vm2115_vm4, %v716_v62, %v720_v1  ;;  %v1836_v15 = vrot.slane %v434_v2, 9  ;;  %v1837_v16 = vrot.slane %v435_v6, 9  ;;  %v751_v21 = vshrl.u32 %v1886_v8, 16  ;;  %v1866_v6 = vld [vmem:[%s2090_s27 + $0x38] sm:$0xf] }
  0x3f   : > { %v735_v19 = vsel %vm2115_vm4, %v730_v13, %v734_v5  ;;  %v754_v22 = vshll.u32 %v1886_v8, 16  ;;  %v1863_v23 = vor.u32 %v2010_v14, %v1862_v9  ;;  %v770_v46 = vunpack.c.l.b16 %v721_v10  ;;  %v1944_v5 = vld [vmem:[%s2090_s27 + $0x14] sm:$0x1] }
  0x40   : > { %v771_v24 = vunpack.c.l.b16 %v735_v19  ;;  %v482_v25 = vsel %vm2149_vm7, %v1836_v15, %v481_v11  ;;  %v486_v54 = vsel %vm2149_vm7, %v1837_v16, %v485_v17  ;;  %v742_v31 = vrot.slane %v740_v20, 5 }
  0x41   : > { %1840 = vmatmul.msk.bf16.gmra.mxu2 %vm318_vm3, %v498_v18  ;;  %v737_v18 = vshrl.u32 %v1884_v7, 16  ;;  %v753_v32 = vrot.slane %v751_v21, 4  ;;  %v756_v33 = vrot.slane %v754_v22, 5  ;;  %v495_v36 = vunpack.c.l.b16 %v482_v25  ;;  %v2011_v7 = vld [vmem:[%s2090_s27 + $0x3c] sm:$0xf0] }
  0x42   : > { %v776_v38 = vpack.c.b16 %v771_v24, %v770_v46  ;;  %v496_v39 = vunpack.c.l.b16 %v486_v54  ;;  %v746_v40 = vshll.u32 %v2272_v27, 16  ;;  %v760_v41 = vshll.u32 %v2275_v28, 16  ;;  %v1925_v54 = vld [vmem:[%s2090_s27 + $0x10] sm:$0xf] }
  0x43   : > { %v739_v30 = vrot.slane %v737_v18, 4  ;;  %v757_v45 = vor.u32 %v756_v33, %v753_v32  ;;  %v1825_v48 = vor.u32 %v2007_v35, %v1824_v34  ;;  %v1066_v58 = vshrl.u32 %v1945_v49, 16  ;;  %v2012_v32 = vld [vmem:[%s2090_s27 + $0x14] sm:$0xf0]  ;;  %v1947_v35 = vld [vmem:[%s2090_s27 + $0x20] sm:$0xf] }
  0x44   : > { %v500_v52 = vpack.c.b16 %v496_v39, %v495_v36  ;;  %v748_v29 = vrot.slane %v746_v40, 5  ;;  %v762_v53 = vrot.slane %v760_v41, 5  ;;  %v1069_v59 = vshll.u32 %v1945_v49, 16 }
  0x45   : > { %v743_v43 = vor.u32 %v742_v31, %v739_v30  ;;  %v758_v57 = vrot.slane %v757_v45, 4  ;;  %v860_v62 = vrot.slane %v2171_v0, 5  ;;  %v1901_v1 = vrot.slane %v1893_v12, 9  ;;  %v1946_v0 = vld [vmem:[%s2090_s27 + $0x1c] sm:$0x1] }
  0x46   : > { %v1071_v10 = vrot.slane %v1069_v59, 5  ;;  %v1061_v16 = vshll.u32 %v1944_v5, 16  ;;  %v1867_v17 = vor.u32 %v2011_v7, %v1866_v6  ;;  %v1075_v21 = vshll.u32 %v1946_v0, 16  ;;  %v1964_v30 = vld [vmem:[%s2090_s27 + $0x10] sm:$0xe] }
  0x47   : > { %v744_v56 = vrot.slane %v743_v43, 4  ;;  %v763_v9 = vsel %vm2115_vm4, %v758_v57, %v762_v53  ;;  %v1965_v31 = vld [vmem:[%s2090_s27 + $0x18] sm:$0xe]  ;;  %v1972_v40 = vrot.slane %v1964_v30, 9  ;;  %v1255_v41 = vrot.slane %v1944_v5, 5 }
  0x48   : > { %1869 = vmatmul.msk.bf16.gmra.mxu3 %vm318_vm3, %v1859_v42  ;;  %v1943_v42 = vld [vmem:[%s2090_s27 + $0x10] sm:$0xf]  ;;  %v773_v19 = vunpack.c.l.b16 %v763_v9  ;;  %v1063_v24 = vrot.slane %v1061_v16, 5  ;;  %v1077_v34 = vrot.slane %v1075_v21, 5  ;;  %v1926_v43 = vor.u32 %v2012_v32, %v1925_v54  ;;  %v1895_v45 = vld [vmem:[%s2090_s27 + $0x18] sm:$0xe] }
  0x49   : > { %v1052_v50 = vshrl.u32 %v1943_v42, 16  ;;  %v1055_v51 = vshll.u32 %v1943_v42, 16  ;;  %v749_v8 = vsel %vm2115_vm4, %v744_v56, %v748_v29  ;;  %v1973_v42 = vrot.slane %v1965_v31, 9  ;;  %v1950_v6 = vld [vmem:[%s2090_s27 + $0x2c] sm:$0x1] }
  0x4a   : > { %v772_v18 = vunpack.c.l.b16 %v749_v8  ;;  %v1080_v49 = vshrl.u32 %v1947_v35, 16  ;;  %v864_v56 = vrot.slane %v2210_v60, 5  ;;  %v1929_v16 = vld [vmem:[%s2090_s27 + $0x20] sm:$0xf]  ;;  %v1951_v21 = vld [vmem:[%s2090_s27 + $0x30] sm:$0xf] }
  0x4b   : > { %v1057_v13 = vrot.slane %v1055_v51, 5  ;;  %v1953_v54 = vld [vmem:[%s2090_s27 + $0x38] sm:$0xf]  ;;  %v1108_v31 = vshrl.u32 %v1951_v21, 16  ;;  %v1111_v32 = vshll.u32 %v1951_v21, 16  ;;  %vm1571_vm8 = vcmask 1041408  }
  0x4c   : > { %v777_v25 = vpack.c.b16 %v773_v19, %v772_v18  ;;  %vm1688_vm9 = vcmask 1041409   ;;  %vm1691_vm10 = vcmask 1042434   ;;  %vm1694_vm11 = vcmask 1043459  }
  0x4d   : > { %1890 = vmatmul.msk.bf16.gmra.mxu0 %vm318_vm3, %v775_v55  ;;  %v1894_v55 = vld [vmem:[%s2090_s27 + $0x10] sm:$0xe] }
  0x4e   : > { %1828 = vmatmul.msk.bf16.gmra.mxu1 %vm318_vm3, %v1821_v61  ;;  %v856_v61 = vrot.slane %v2168_v63, 5  ;;  %v1902_v2 = vrot.slane %v1894_v55, 9  ;;  %v1068_v63 = vrot.slane %v1066_v58, 4  ;;  %v1903_v55 = vrot.slane %v1895_v45, 9 }
  0x4f   : > { %v868_v58 = vrot.slane %v2215_v4, 5  ;;  %v872_v45 = vrot.slane %v2238_v47, 5  ;;  %v1954_v47 = vld [vmem:[%s2090_s27 + $0x3c] sm:$0x1] }
  0x50   : > { %v857_v11 = vsel %vm2149_vm7, %v1901_v1, %v856_v61  ;;  %v861_v14 = vsel %vm2149_vm7, %v1902_v2, %v860_v62  ;;  %v1072_v20 = vor.u32 %v1071_v10, %v1068_v63  ;;  %v1256_v61 = vsel %vm2149_vm7, %v1972_v40, %v1255_v41 }
  0x51   : > { %1841 = vmatmul.msk.bf16.gmra.mxu2 %vm318_vm3, %v499_v3  ;;  %v1054_v3 = vrot.slane %v1052_v50, 4  ;;  %v888_v22 = vunpack.c.l.b16 %v857_v11  ;;  %v1083_v50 = vshll.u32 %v1947_v35, 16  ;;  %v1082_v62 = vrot.slane %v1080_v49, 4 }
  0x52   : > { %v1073_v33 = vrot.slane %v1072_v20, 4  ;;  %v1287_v60 = vunpack.c.l.b16 %v1256_v61  ;;  %v865_v4 = vsel %vm2149_vm7, %v1903_v55, %v864_v56  ;;  %v1103_v11 = vshll.u32 %v1950_v6, 16  ;;  %v1966_v20 = vld [vmem:[%s2090_s27 + $0x20] sm:$0xe] }
  0x53   : > { %v1058_v15 = vor.u32 %v1057_v13, %v1054_v3  ;;  %v1085_v1 = vrot.slane %v1083_v50, 5  ;;  %v1948_v3 = vld [vmem:[%s2090_s27 + $0x24] sm:$0x1]  ;;  %v1974_v30 = vrot.slane %v1966_v20, 9  ;;  %v1267_v41 = vrot.slane %v1950_v6, 5 }
  0x54   : > { %v1078_v51 = vsel %vm2115_vm4, %v1073_v33, %v1077_v34  ;;  %v1089_v10 = vshll.u32 %v1948_v3, 16  ;;  %v1263_v35 = vrot.slane %v1948_v3, 5 }
  0x55   : > { %v1059_v46 = vrot.slane %v1058_v15, 4  ;;  %v1166_v59 = vunpack.c.l.b16 %v1078_v51  ;;  %v1086_v63 = vor.u32 %v1085_v1, %v1082_v62  ;;  %v1110_v51 = vrot.slane %v1108_v31, 4 }
  0x56   : > { %v1091_v19 = vrot.slane %v1089_v10, 5  ;;  %v1264_v55 = vsel %vm2149_vm7, %v1974_v30, %v1263_v35  ;;  %v1969_v10 = vld [vmem:[%s2090_s27 + $0x38] sm:$0xe]  ;;  %v1275_v30 = vrot.slane %v1954_v47, 5  ;;  %v880_v35 = vrot.slane %v2272_v27, 5 }
  0x57   : > { %v1064_v39 = vsel %vm2115_vm4, %v1059_v46, %v1063_v24  ;;  %v1087_v18 = vrot.slane %v1086_v63, 4  ;;  %v1105_v46 = vrot.slane %v1103_v11, 5  ;;  %v1967_v24 = vld [vmem:[%s2090_s27 + $0x28] sm:$0xe]  ;;  %v1968_v63 = vld [vmem:[%s2090_s27 + $0x30] sm:$0xe] }
  0x58   : > { %1870 = vmatmul.msk.bf16.gmra.mxu3 %vm318_vm3, %v1863_v23  ;;  %v889_v23 = vunpack.c.l.b16 %v861_v14  ;;  %v1165_v12 = vunpack.c.l.b16 %v1064_v39  ;;  %v890_v14 = vunpack.c.l.b16 %v865_v4  ;;  %v1898_v39 = vld [vmem:[%s2090_s27 + $0x30] sm:$0xe]  ;;  %v1977_v21 = vrot.slane %v1969_v10, 9 }
  0x59   : > { %v1092_v34 = vsel %vm2115_vm4, %v1087_v18, %v1091_v19  ;;  %v1906_v50 = vrot.slane %v1898_v39, 9  ;;  %v1976_v19 = vrot.slane %v1968_v63, 9 }
  0x5a   : > { %v896_v36 = vpack.c.b16 %v889_v23, %v888_v22  ;;  %v1173_v8 = vpack.c.b16 %v1166_v59, %v1165_v12  ;;  %v2013_v22 = vld [vmem:[%s2090_s27 + $0x24] sm:$0xf0]  ;;  %v1952_v12 = vld [vmem:[%s2090_s27 + $0x34] sm:$0x1] }
  0x5b   : > { %v1930_v33 = vor.u32 %v2013_v22, %v1929_v16  ;;  %v1117_v62 = vshll.u32 %v1952_v12, 16  ;;  %v1271_v20 = vrot.slane %v1952_v12, 5 }
  0x5d   : > { %1891 = vmatmul.msk.bf16.gmra.mxu0 %vm318_vm3, %v776_v38  ;;  %v1949_v38 = vld [vmem:[%s2090_s27 + $0x28] sm:$0xf] }
  0x5e   : > { %1829 = vmatmul.msk.bf16.gmra.mxu1 %vm318_vm3, %v1825_v48  ;;  %v1896_v48 = vld [vmem:[%s2090_s27 + $0x20] sm:$0xe]  ;;  %v1094_v29 = vshrl.u32 %v1949_v38, 16  ;;  %v1097_v53 = vshll.u32 %v1949_v38, 16  ;;  %v1897_v38 = vld [vmem:[%s2090_s27 + $0x28] sm:$0xe] }
  0x5f   : > { %v1904_v57 = vrot.slane %v1896_v48, 9  ;;  %v876_v48 = vrot.slane %v2245_v26, 5  ;;  %v1905_v49 = vrot.slane %v1897_v38, 9  ;;  %v884_v38 = vrot.slane %v2275_v28, 5 }
  0x60   : > { %v1096_v13 = vrot.slane %v1094_v29, 4  ;;  %v1099_v5 = vrot.slane %v1097_v53, 5  ;;  %v1167_v29 = vunpack.c.l.b16 %v1092_v34 }
  0x61   : > { %1842 = vmatmul.msk.bf16.gmra.mxu2 %vm318_vm3, %v500_v52  ;;  %v1259_v52 = vrot.slane %v1946_v0, 5  ;;  %v869_v7 = vsel %vm2149_vm7, %v1904_v57, %v868_v58  ;;  %v873_v26 = vsel %vm2149_vm7, %v1905_v49, %v872_v45  ;;  %v877_v59 = vsel %vm2149_vm7, %v1906_v50, %v876_v48  ;;  %v1956_v45 = vld [vmem:[%s2090_s27 + $0x44] sm:$0x1]  ;;  %v1958_v50 = vld [vmem:[%s2090_s27 + $0x4c] sm:$0x1] }
  0x62   : > { %v1100_v0 = vor.u32 %v1099_v5, %v1096_v13  ;;  %v891_v15 = vunpack.c.l.b16 %v869_v7  ;;  %v1131_v5 = vshll.u32 %v1954_v47, 16  ;;  %v892_v6 = vunpack.c.l.b16 %v873_v26 }
  0x63   : > { %v1260_v2 = vsel %vm2149_vm7, %v1973_v42, %v1259_v52  ;;  %v1122_v42 = vshrl.u32 %v1953_v54, 16  ;;  %v1113_v52 = vrot.slane %v1111_v32, 5  ;;  %v1119_v7 = vrot.slane %v1117_v62, 5 }
  0x64   : > { %v1288_v9 = vunpack.c.l.b16 %v1260_v2  ;;  %v1101_v23 = vrot.slane %v1100_v0, 4  ;;  %v1289_v2 = vunpack.c.l.b16 %v1264_v55  ;;  %v2014_v0 = vld [vmem:[%s2090_s27 + $0x34] sm:$0xf0]  ;;  %v1145_v12 = vshll.u32 %v1956_v45, 16 }
  0x65   : > { %v1124_v57 = vrot.slane %v1122_v42, 4  ;;  %v1114_v61 = vor.u32 %v1113_v52, %v1110_v51  ;;  %v1283_v10 = vrot.slane %v1958_v50, 5 }
  0x66   : > { %v1106_v40 = vsel %vm2115_vm4, %v1101_v23, %v1105_v46  ;;  %v1899_v23 = vld [vmem:[%s2090_s27 + $0x38] sm:$0xe]  ;;  %v1900_v46 = vld [vmem:[%s2090_s27 + $0x40] sm:$0xe] }
  0x67   : > { %v1168_v53 = vunpack.c.l.b16 %v1106_v40  ;;  %v1115_v4 = vrot.slane %v1114_v61, 4  ;;  %v1907_v34 = vrot.slane %v1899_v23, 9  ;;  %v1272_v40 = vsel %vm2149_vm7, %v1976_v19, %v1271_v20 }
  0x68   : > { %1871 = vmatmul.msk.bf16.gmra.mxu3 %vm318_vm3, %v1867_v17  ;;  %v1295_v17 = vpack.c.b16 %v1288_v9, %v1287_v60  ;;  %v893_v60 = vunpack.c.l.b16 %v877_v59  ;;  %v1933_v9 = vld [vmem:[%s2090_s27 + $0x30] sm:$0xf]  ;;  %v1291_v51 = vunpack.c.l.b16 %v1272_v40  ;;  %v1147_v59 = vrot.slane %v1145_v12, 5 }
  0x69   : > { %v1174_v1 = vpack.c.b16 %v1168_v53, %v1167_v29  ;;  %v1120_v18 = vsel %vm2115_vm4, %v1115_v4, %v1119_v7  ;;  %v1934_v22 = vor.u32 %v2014_v0, %v1933_v9  ;;  %v881_v27 = vsel %vm2149_vm7, %v1907_v34, %v880_v35 }
  0x6a   : > { %v898_v16 = vpack.c.b16 %v893_v60, %v892_v6  ;;  %v1279_v7 = vrot.slane %v1956_v45, 5 }
  0x6d   : > { %1892 = vmatmul.msk.bf16.gmra.mxu0 %vm318_vm3, %v777_v25  ;;  %v897_v25 = vpack.c.b16 %v891_v15, %v890_v14  ;;  %v1133_v14 = vrot.slane %v1131_v5, 5  ;;  %v1955_v15 = vld [vmem:[%s2090_s27 + $0x40] sm:$0xf]  ;;  %v1971_v5 = vld [vmem:[%s2090_s27 + $0x48] sm:$0xe] }
  0x6e   : > { %1910 = vmatmul.msk.bf16.vlgmr.msra.gmra.mxu1 %vm318_vm3, %v896_v36  ;;  %v1975_v36 = vrot.slane %v1967_v24, 9  ;;  %v1136_v24 = vshrl.u32 %v1955_v15, 16  ;;  %v1979_v63 = vrot.slane %v1971_v5, 9 }
  0x70   : > { %v1268_v56 = vsel %vm2149_vm7, %v1975_v36, %v1267_v41  ;;  %v1908_v36 = vrot.slane %v1900_v46, 9  ;;  %v1138_v41 = vrot.slane %v1136_v24, 4 }
  0x71   : > { %1939 = vmatmul.msk.bf16.vlgmr.msra.gmra.mxu2 %vm318_vm3, %v1926_v43  ;;  %v1125_v43 = vshll.u32 %v1953_v54, 16  ;;  %v1290_v3 = vunpack.c.l.b16 %v1268_v56  ;;  %v1159_v56 = vshll.u32 %v1958_v50, 16 }
  0x72   : > { %v885_v28 = vsel %vm2149_vm7, %v1908_v36, %v884_v38 }
  0x73   : > { %v1127_v58 = vrot.slane %v1125_v43, 5  ;;  %v1276_v43 = vsel %vm2149_vm7, %v1977_v21, %v1275_v30  ;;  %v1161_v62 = vrot.slane %v1159_v56, 5 }
  0x74   : > { %v1292_v29 = vunpack.c.l.b16 %v1276_v43 }
  0x75   : > { %v1128_v13 = vor.u32 %v1127_v58, %v1124_v57  ;;  %v894_v57 = vunpack.c.l.b16 %v881_v27  ;;  %v895_v58 = vunpack.c.l.b16 %v885_v28 }
  0x76   : > { %v1297_v47 = vpack.c.b16 %v1292_v29, %v1291_v51 }
  0x77   : > { %v1129_v11 = vrot.slane %v1128_v13, 4  ;;  %v2015_v13 = vld [vmem:[%s2090_s27 + $0x44] sm:$0xf0] }
  0x78   : > { %1960 = vmatmul.msk.bf16.vlgmr.msra.gmra.mxu3 %vm318_vm3, %v1173_v8  ;;  %v1296_v8 = vpack.c.b16 %v1290_v3, %v1289_v2  ;;  %v899_v2 = vpack.c.b16 %v895_v58, %v894_v57  ;;  %v1937_v3 = vld [vmem:[%s2090_s27 + $0x40] sm:$0xf] }
  0x79   : > { %v1134_v54 = vsel %vm2115_vm4, %v1129_v11, %v1133_v14 }
  0x7a   : > { %v1170_v39 = vunpack.c.l.b16 %v1134_v54 }
  0x7d   : > { %1981 = vmatmul.msk.bf16.vlgmr.msra.gmra.mxu0 %vm318_vm3, %v1295_v17  ;;  %v1957_v17 = vld [vmem:[%s2090_s27 + $0x48] sm:$0xf] }
  0x7e   : > { %1911 = vmatmul.msk.bf16.gmra.mxu1 %vm318_vm3, %v897_v25  ;;  %v1139_v25 = vshll.u32 %v1955_v15, 16  ;;  %v1150_v31 = vshrl.u32 %v1957_v17, 16  ;;  %v1153_v32 = vshll.u32 %v1957_v17, 16  ;;  %v1284_v15 = vsel %vm2149_vm7, %v1979_v63, %v1283_v10 }
  0x7f   : > { %v1294_v37 = vunpack.c.l.b16 %v1284_v15 }
  0x80   : > { %v1141_v42 = vrot.slane %v1139_v25, 5  ;;  %v1152_v48 = vrot.slane %v1150_v31, 4  ;;  %v1155_v49 = vrot.slane %v1153_v32, 5 }
  0x81   : > { %1940 = vmatmul.msk.bf16.gmra.mxu2 %vm318_vm3, %v1930_v33  ;;  %v1169_v33 = vunpack.c.l.b16 %v1120_v18 }
  0x82   : > { %v1142_v53 = vor.u32 %v1141_v42, %v1138_v41  ;;  %v1156_v55 = vor.u32 %v1155_v49, %v1152_v48 }
  0x83   : > { %v1175_v52 = vpack.c.b16 %v1170_v39, %v1169_v33 }
  0x84   : > { %v1143_v26 = vrot.slane %v1142_v53, 4  ;;  %v1157_v61 = vrot.slane %v1156_v55, 4 }
  0x86   : > { %v1148_v60 = vsel %vm2115_vm4, %v1143_v26, %v1147_v59  ;;  %v1162_v9 = vsel %vm2115_vm4, %v1157_v61, %v1161_v62 }
  0x87   : > { %v1171_v0 = vunpack.c.l.b16 %v1148_v60  ;;  %v1172_v11 = vunpack.c.l.b16 %v1162_v9 }
  0x88   : > { %1961 = vmatmul.msk.bf16.gmra.mxu3 %vm318_vm3, %v1174_v1  ;;  %v1970_v1 = vld [vmem:[%s2090_s27 + $0x40] sm:$0xe] }
  0x89   : > { %v1978_v4 = vrot.slane %v1970_v1, 9  ;;  %v1176_v17 = vpack.c.b16 %v1172_v11, %v1171_v0 }
  0x8b   : > { %v1280_v14 = vsel %vm2149_vm7, %v1978_v4, %v1279_v7 }
  0x8c   : > { %v1293_v18 = vunpack.c.l.b16 %v1280_v14 }
  0x8d   : > { %1982 = vmatmul.msk.bf16.gmra.mxu0 %vm318_vm3, %v1296_v8  ;;  %v1938_v8 = vor.u32 %v2015_v13, %v1937_v3 }
  0x8e   : > { %1912 = vmatmul.msk.bf16.gmra.mxu1 %vm318_vm3, %v898_v16  ;;  %v1298_v20 = vpack.c.b16 %v1294_v37, %v1293_v18 }
  0x91   : > { %1941 = vmatmul.msk.bf16.gmra.mxu2 %vm318_vm3, %v1934_v22 }
  0x98   : > { %1962 = vmatmul.msk.bf16.gmra.mxu3 %vm318_vm3, %v1175_v52 }
  0x9b   : > { %v349_v6 = vpop.f32.mrf.mxu1 }
  0x9d   : > { %1983 = vmatmul.msk.bf16.gmra.mxu0 %vm318_vm3, %v1297_v47 }
  0x9e   : > { %1913 = vmatmul.msk.bf16.gmra.mxu1 %vm318_vm3, %v899_v2 }
  0xa1   : > { %1942 = vmatmul.msk.bf16.gmra.mxu2 %vm318_vm3, %v1938_v8 }
  0xa3   : > { %v2403_v16 = vpop.f32.mrf.mxu1 }
  0xa4   : > { %v354_v19 = vpop.f32.mrf.mxu2 }
  0xa8   : > { %1963 = vmatmul.msk.bf16.gmra.mxu3 %vm318_vm3, %v1176_v17 }
  0xaa   : > { %v344_v21 = vpop.f32.mrf.mxu0 }
  0xab   : > { %v359_v22 = vpop.f32.mrf.mxu3  ;;  %v408_v23 = vpop.f32.mrf.mxu1 }
  0xac   : > { %v2407_v46 = vpop.f32.mrf.mxu2  ;;  %v409_v24 = vadd.f32 %v408_v23, %v344_v21 }
  0xad   : > { %1984 = vmatmul.msk.bf16.gmra.mxu0 %vm318_vm3, %v1298_v20 }
  0xb2   : > { %v346_v25 = vpop.f32.mrf.mxu0 }
  0xb3   : > { %v2409_v44 = vpop.f32.mrf.mxu3  ;;  %v410_v54 = vpop.f32.mrf.mxu1 }
  0xb4   : > { %v525_v30 = vpop.f32.mrf.mxu2  ;;  %v411_v10 = vadd.f32 %v410_v54, %v346_v25  ;;  %v2436_v25 = vld [vmem:[%s2507_s2] ss:$0 sm:$0xff] }
  0xb5   : > { %v545_v31 = vadd.f32 %v525_v30, %v409_v24 }
  0xba   : > { %v802_v32 = vpop.f32.mrf.mxu0 }
  0xbb   : > { %v608_v33 = vpop.f32.mrf.mxu3  ;;  %v413_v34 = vpop.f32.mrf.mxu1 }
  0xbc   : > { %v628_v35 = vadd.f32 %v608_v33, %v545_v31  ;;  %v527_v36 = vpop.f32.mrf.mxu2  ;;  %v414_v38 = vadd.f32 %v413_v34, %v349_v6 }
  0xbd   : > { %v546_v14 = vadd.f32 %v527_v36, %v411_v10 }
  0xbe   : > { %v822_v39 = vadd.f32 %v802_v32, %v628_v35 }
  0xc2   : > { %v804_v40 = vpop.f32.mrf.mxu0 }
  0xc3   : > { %v610_v41 = vpop.f32.mrf.mxu3  ;;  %v415_v42 = vpop.f32.mrf.mxu1 }
  0xc4   : > { %v530_v43 = vpop.f32.mrf.mxu2  ;;  %v629_v18 = vadd.f32 %v610_v41, %v546_v14  ;;  %v416_v33 = vadd.f32 %v415_v42, %v2403_v16 }
  0xc5   : > { %v547_v45 = vadd.f32 %v530_v43, %v414_v38 }
  0xca   : > { %v807_v48 = vpop.f32.mrf.mxu0 }
  0xcb   : > { %v613_v49 = vpop.f32.mrf.mxu3  ;;  %v418_v50 = vpop.f32.mrf.mxu1 }
  0xcc   : > { %v630_v51 = vadd.f32 %v613_v49, %v547_v45  ;;  %v532_v27 = vpop.f32.mrf.mxu2  ;;  %v419_v28 = vadd.f32 %v418_v50, %v354_v19 }
  0xce   : > { %v824_v52 = vadd.f32 %v807_v48, %v630_v51 }
  0xd2   : > { %v2411_v29 = vpop.f32.mrf.mxu0 }
  0xd3   : > { %v615_v53 = vpop.f32.mrf.mxu3  ;;  %v2413_v12 = vpop.f32.mrf.mxu1 }
  0xd4   : > { %v535_v55 = vpop.f32.mrf.mxu2 }
  0xd5   : > { %v549_v56 = vadd.f32 %v535_v55, %v419_v28 }
  0xda   : > { %v812_v57 = vpop.f32.mrf.mxu0 }
  0xdb   : > { %v618_v58 = vpop.f32.mrf.mxu3  ;;  %v423_v47 = vpop.f32.mrf.mxu1 }
  0xdc   : > { %v632_v26 = vadd.f32 %v618_v58, %v549_v56  ;;  %v2415_v59 = vpop.f32.mrf.mxu2  ;;  %v424_v61 = vadd.f32 %v423_v47, %v359_v22  ;;  %v823_v22 = vadd.f32 %v804_v40, %v629_v18 }
  0xde   : > { %v2417_v62 = vadd.f32 %v812_v57, %v632_v26 }
  0xe2   : > { %v2419_v1 = vpop.f32.mrf.mxu0 }
  0xe3   : > { %v2421_v2 = vpop.f32.mrf.mxu3  ;;  %v2423_v3 = vpop.f32.mrf.mxu1 }
  0xe4   : > { %v540_v13 = vpop.f32.mrf.mxu2 }
  0xe5   : > { %v551_v5 = vadd.f32 %v540_v13, %v424_v61 }
  0xea   : > { %v817_v6 = vpop.f32.mrf.mxu0 }
  0xeb   : > { %v623_v60 = vpop.f32.mrf.mxu3  ;;  %v924_v4 = vpop.f32.mrf.mxu1 }
  0xec   : > { %v634_v7 = vadd.f32 %v623_v60, %v551_v5  ;;  %v2425_v8 = vpop.f32.mrf.mxu2  ;;  %v944_v17 = vadd.f32 %v924_v4, %v822_v39  ;;  %v548_v39 = vadd.f32 %v532_v27, %v416_v33 }
  0xee   : > { %v2427_v9 = vadd.f32 %v817_v6, %v634_v7  ;;  %v631_v49 = vadd.f32 %v615_v53, %v548_v39 }
  0xf0   : > { %v825_v13 = vadd.f32 %v2411_v29, %v631_v49  ;;  %v421_v29 = vadd.f32 %v2413_v12, %v2407_v46 }
  0xf2   : > { %v2429_v63 = vpop.f32.mrf.mxu0  ;;  %v550_v33 = vadd.f32 %v2415_v59, %v421_v29 }
  0xf3   : > { %v2431_v0 = vpop.f32.mrf.mxu3  ;;  %v926_v11 = vpop.f32.mrf.mxu1 }
  0xf4   : > { %v1007_v15 = vpop.f32.mrf.mxu2  ;;  %v945_v30 = vadd.f32 %v926_v11, %v823_v22 }
  0xf5   : > { %v1027_v37 = vadd.f32 %v1007_v15, %v944_v17 }
  0xfa   : > { %v1323_v19 = vpop.f32.mrf.mxu0 }
  0xfb   : > { %v1201_v20 = vpop.f32.mrf.mxu3  ;;  %v929_v24 = vpop.f32.mrf.mxu1 }
  0xfc   : > { %v1221_v21 = vadd.f32 %v1201_v20, %v1027_v37  ;;  %v1009_v23 = vpop.f32.mrf.mxu2  ;;  %v946_v45 = vadd.f32 %v929_v24, %v824_v52 }
  0xfd   : > { %v1028_v54 = vadd.f32 %v1009_v23, %v945_v30 }
  0xfe   : > { %v1343_v31 = vadd.f32 %v1323_v19, %v1221_v21 }
 0x100   : > { %v1355_v34 = vadd.f32 %v2436_v25, %v1343_v31 }
 0x102   : > { %v1325_v32 = vpop.f32.mrf.mxu0  ;;  %v1363_v43 = vmax.f32 %v1355_v34, 0.0 }
 0x103   : > { %v1203_v35 = vpop.f32.mrf.mxu3  ;;  %v931_v41 = vpop.f32.mrf.mxu1 }
 0x104   : > { %v1222_v36 = vadd.f32 %v1203_v35, %v1028_v54  ;;  %v1012_v38 = vpop.f32.mrf.mxu2  ;;  %v1379_v55 = vrot.slane %v1363_v43, 2  ;;  %v1380_v56 = vrot.slane %v1363_v43, 4  ;;  %v1381_v57 = vrot.slane %v1363_v43, 6 }
 0x105   : > { %v1029_v51 = vadd.f32 %v1012_v38, %v946_v45  ;;  %v947_v4 = vadd.f32 %v931_v41, %v825_v13 }
 0x106   : > { %v1344_v40 = vadd.f32 %v1325_v32, %v1222_v36 }
 0x108   : > { %v1356_v48 = vadd.f32 %v2436_v25, %v1344_v40 }
 0x10a   : > { %v1328_v50 = vpop.f32.mrf.mxu0  ;;  %v1364_v28 = vmax.f32 %v1356_v48, 0.0  ;;  %v633_v48 = vadd.f32 %v2421_v2, %v550_v33 }
 0x10b   : > { %v1206_v16 = vpop.f32.mrf.mxu3  ;;  %v934_v15 = vpop.f32.mrf.mxu1 }
 0x10c   : > { %v1382_v42 = vrot.slane %v1364_v28, 2  ;;  %v1383_v58 = vrot.slane %v1364_v28, 4  ;;  %v1384_v47 = vrot.slane %v1364_v28, 6  ;;  %v1427_v26 = vmax.f32 %v1363_v43, %v1364_v28  ;;  %v1014_v61 = vpop.f32.mrf.mxu2 }
 0x10d   : > { %v1223_v27 = vadd.f32 %v1206_v16, %v1029_v51  ;;  %v1030_v17 = vadd.f32 %v1014_v61, %v947_v4  ;;  %v948_v46 = vadd.f32 %v934_v15, %v2417_v62  ;;  %v426_v62 = vadd.f32 %v2423_v3, %v2409_v44 }
 0x10e   : > { %v1428_v5 = vmax.f32 %v1379_v55, %v1382_v42  ;;  %v1429_v52 = vmax.f32 %v1380_v56, %v1383_v58  ;;  %v1430_v6 = vmax.f32 %v1381_v57, %v1384_v47  ;;  %v1985_v60 = vrot.slane %v1427_v26, 9 }
 0x10f   : > { %v1345_v53 = vadd.f32 %v1328_v50, %v1223_v27  ;;  %v827_v27 = vadd.f32 %v2419_v1, %v633_v48  ;;  %v552_v44 = vadd.f32 %v2425_v8, %v426_v62 }
 0x110   : > { %v1986_v7 = vrot.slane %v1428_v5, 9  ;;  %v1987_v10 = vrot.slane %v1429_v52, 9  ;;  %v1988_v11 = vrot.slane %v1430_v6, 9  ;;  %v1507_v14 = vmax.f32 %v1427_v26, %v1985_v60 }
 0x111   : > { %v1357_v22 = vadd.f32 %v2436_v25, %v1345_v53  ;;  %v635_v62 = vadd.f32 %v2431_v0, %v552_v44 }
 0x112   : > { %v1508_v18 = vmax.f32 %v1428_v5, %v1986_v7  ;;  %v1509_v37 = vmax.f32 %v1429_v52, %v1987_v10  ;;  %v1510_v19 = vmax.f32 %v1430_v6, %v1988_v11  ;;  %v1523_v20 = vpack.c.bf16 %v1507_v14, %v1507_v14  ;;  %v1330_v21 = vpop.f32.mrf.mxu0 }
 0x113   : > { %v1208_v23 = vpop.f32.mrf.mxu3  ;;  %v1365_v45 = vmax.f32 %v1357_v22, 0.0  ;;  %v936_v50 = vpop.f32.mrf.mxu1 }
 0x114   : > { %v1524_v24 = vpack.c.bf16 %v1508_v18, %v1508_v18  ;;  %v1525_v30 = vpack.c.bf16 %v1509_v37, %v1509_v37  ;;  %v1526_v31 = vpack.c.bf16 %v1510_v19, %v1510_v19  ;;  %v1555_v54 = vrot.slane %v1523_v20, 2  ;;  %v1017_v32 = vpop.f32.mrf.mxu2 }
 0x115   : > { %v1224_v34 = vadd.f32 %v1208_v23, %v1030_v17  ;;  %v1031_v49 = vadd.f32 %v1017_v32, %v948_v46  ;;  %v1385_v55 = vrot.slane %v1365_v45, 2  ;;  %v1386_v56 = vrot.slane %v1365_v45, 4 }
 0x116   : > { %v1556_v35 = vrot.slane %v1524_v24, 2  ;;  %v1557_v36 = vrot.slane %v1525_v30, 2  ;;  %v1558_v38 = vrot.slane %v1526_v31, 2  ;;  %v1574_v39 = vsel %vm1571_vm8, %v1523_v20, %v1555_v54 }
 0x117   : > { %1620 = vst [vmem:[#allocation1] ss:$2 sm:$0xff] %v1574_v39  ;;  %v1346_v40 = vadd.f32 %v1330_v21, %v1224_v34  ;;  %v1387_v57 = vrot.slane %v1365_v45, 6  ;;  %v949_v53 = vadd.f32 %v936_v50, %v827_v27 }
 0x118   : > { %v1577_v12 = vsel %vm1571_vm8, %v1524_v24, %v1556_v35  ;;  %v1580_v41 = vsel %vm1571_vm8, %v1525_v30, %v1557_v36  ;;  %v1583_v43 = vsel %vm1571_vm8, %v1526_v31, %v1558_v38 }
 0x119   : > { %1624 = vst [vmem:[#allocation1 + $0x10] ss:$2 sm:$0xff] %v1577_v12  ;;  %v1358_v59 = vadd.f32 %v2436_v25, %v1346_v40 }
 0x11a   : > { %1628 = vst [vmem:[#allocation1 + $0x20] ss:$2 sm:$0xff] %v1580_v41  ;;  %v1333_v16 = vpop.f32.mrf.mxu0 }
 0x11b   : > { %1632 = vst [vmem:[#allocation1 + $0x30] ss:$2 sm:$0xff] %v1583_v43  ;;  %v1366_v51 = vmax.f32 %v1358_v59, 0.0  ;;  %v1211_v28 = vpop.f32.mrf.mxu3  ;;  %v939_v31 = vpop.f32.mrf.mxu1 }
 0x11c   : > { %v1019_v42 = vpop.f32.mrf.mxu2  ;;  %v1225_v2 = vadd.f32 %v1211_v28, %v1031_v49  ;;  %v950_v48 = vadd.f32 %v939_v31, %v2427_v9 }
 0x11d   : > { %v1388_v58 = vrot.slane %v1366_v51, 2  ;;  %v1389_v47 = vrot.slane %v1366_v51, 4  ;;  %v1390_v26 = vrot.slane %v1366_v51, 6  ;;  %v1431_v61 = vmax.f32 %v1365_v45, %v1366_v51 }
 0x11e   : > { %v1621_v3 = vld.sshfl [vmem:[#allocation1] sm:$0xff pattern:$0x75643120]  ;;  %v1347_v37 = vadd.f32 %v1333_v16, %v1225_v2  ;;  %v1032_v19 = vadd.f32 %v1019_v42, %v949_v53 }
 0x11f   : > { %v1432_v13 = vmax.f32 %v1385_v55, %v1388_v58  ;;  %v1433_v5 = vmax.f32 %v1386_v56, %v1389_v47  ;;  %v1434_v52 = vmax.f32 %v1387_v57, %v1390_v26  ;;  %v1989_v6 = vrot.slane %v1431_v61, 9 }
 0x120   : > { %v1625_v60 = vld.sshfl [vmem:[#allocation1 + $0x10] sm:$0xff pattern:$0x75643120]  ;;  %v1671_v22 = vunpack.c.l.b16 %v1621_v3  ;;  %v1359_v38 = vadd.f32 %v2436_v25, %v1347_v37  ;;  %v829_v26 = vadd.f32 %v2429_v63, %v635_v62 }
 0x121   : > { %v1990_v4 = vrot.slane %v1432_v13, 9  ;;  %v1991_v7 = vrot.slane %v1433_v5, 9  ;;  %v1992_v10 = vrot.slane %v1434_v52, 9  ;;  %v1511_v11 = vmax.f32 %v1431_v61, %v1989_v6  ;;  %v1629_v14 = vld.sshfl [vmem:[#allocation1 + $0x20] sm:$0xff pattern:$0x75643120] }
 0x122   : > { %v1633_v15 = vld.sshfl [vmem:[#allocation1 + $0x30] sm:$0xff pattern:$0x75643120]  ;;  %v1672_v17 = vunpack.c.l.b16 %v1625_v60  ;;  %v1673_v18 = vunpack.c.l.b16 %v1629_v14  ;;  %v1335_v39 = vpop.f32.mrf.mxu0  ;;  %v1367_v57 = vmax.f32 %v1359_v38, 0.0 }
 0x123   : > { %v1512_v1 = vmax.f32 %v1432_v13, %v1990_v4  ;;  %v1513_v20 = vmax.f32 %v1433_v5, %v1991_v7  ;;  %v1514_v21 = vmax.f32 %v1434_v52, %v1992_v10  ;;  %v1527_v29 = vpack.c.bf16 %v1511_v11, %v1511_v11  ;;  %v1213_v30 = vpop.f32.mrf.mxu3  ;;  %v941_v61 = vpop.f32.mrf.mxu1 }
 0x124   : > { %v1674_v23 = vunpack.c.l.b16 %v1633_v15  ;;  %v1687_v8 = vrot.slane %v1672_v17, 7  ;;  %v1690_v24 = vrot.slane %v1673_v18, 6  ;;  %v1022_v40 = vpop.f32.mrf.mxu2  ;;  %v1226_v59 = vadd.f32 %v1213_v30, %v1032_v19 }
 0x125   : > { %v1528_v54 = vpack.c.bf16 %v1512_v1, %v1512_v1  ;;  %v1529_v32 = vpack.c.bf16 %v1513_v20, %v1513_v20  ;;  %v1530_v33 = vpack.c.bf16 %v1514_v21, %v1514_v21  ;;  %v1559_v34 = vrot.slane %v1527_v29, 2 }
 0x126   : > { %v1689_v35 = vsel %vm1688_vm9, %v1687_v8, %v1671_v22  ;;  %v1693_v36 = vrot.slane %v1674_v23, 5  ;;  %v1348_v56 = vadd.f32 %v1335_v39, %v1226_v59  ;;  %v1033_v16 = vadd.f32 %v1022_v40, %v950_v48 }
 0x127   : > { %v1560_v46 = vrot.slane %v1528_v54, 2  ;;  %v1561_v12 = vrot.slane %v1529_v32, 2  ;;  %v1562_v41 = vrot.slane %v1530_v33, 2  ;;  %v1586_v43 = vsel %vm1571_vm8, %v1527_v29, %v1559_v34 }
 0x128   : > { %1635 = vst [vmem:[#allocation1] ss:$2 sm:$0xff] %v1586_v43  ;;  %v1692_v45 = vsel %vm1691_vm10, %v1690_v24, %v1689_v35  ;;  %v1360_v42 = vadd.f32 %v2436_v25, %v1348_v56  ;;  %v1391_v2 = vrot.slane %v1367_v57, 2  ;;  %v1392_v27 = vrot.slane %v1367_v57, 4 }
 0x129   : > { %v1589_v49 = vsel %vm1571_vm8, %v1528_v54, %v1560_v46  ;;  %v1592_v50 = vsel %vm1571_vm8, %v1529_v32, %v1561_v12  ;;  %v1595_v51 = vsel %vm1571_vm8, %v1530_v33, %v1562_v41  ;;  %v1695_v28 = vsel %vm1694_vm11, %v1693_v36, %v1692_v45 }
 0x12a   : > { %1638 = vst [vmem:[#allocation1 + $0x10] ss:$2 sm:$0xff] %v1589_v49  ;;  %v1714_v55 = vpack.c.b16 %v1695_v28, %v1695_v28  ;;  %v1368_v47 = vmax.f32 %v1360_v42, 0.0  ;;  %v1393_v13 = vrot.slane %v1367_v57, 6  ;;  %v1338_v60 = vpop.f32.mrf.mxu0  ;;  %v951_v10 = vadd.f32 %v941_v61, %v829_v26 }
 0x12b   : > { %1641 = vst [vmem:[#allocation1 + $0x20] ss:$2 sm:$0xff] %v1592_v50  ;;  %v1216_v0 = vpop.f32.mrf.mxu3 }
 0x12c   : > { %1644 = vst [vmem:[#allocation1 + $0x30] ss:$2 sm:$0xff] %v1595_v51  ;;  %v1718_v9 = vrot.slane %v1714_v55, 2  ;;  %v1227_v5 = vadd.f32 %v1216_v0, %v1033_v16  ;;  %v1394_v52 = vrot.slane %v1368_v47, 2  ;;  %v1395_v6 = vrot.slane %v1368_v47, 4  ;;  %v1024_v53 = vpop.f32.mrf.mxu2 }
 0x12d   : > { %v1396_v44 = vrot.slane %v1368_v47, 6  ;;  %v1435_v3 = vmax.f32 %v1367_v57, %v1368_v47  ;;  %v1034_v20 = vadd.f32 %v1024_v53, %v951_v10 }
 0x12e   : > { %v1724_v58 = vsel %vm1571_vm8, %v1714_v55, %v1718_v9  ;;  %v1436_v11 = vmax.f32 %v1391_v2, %v1394_v52  ;;  %v1437_v14 = vmax.f32 %v1392_v27, %v1395_v6  ;;  %v1349_v1 = vadd.f32 %v1338_v60, %v1227_v5 }
 0x12f   : > { %1738 = vst [vmem:[%s2471_s13] sm:$0x3] %v1724_v58  ;;  %v1636_v4 = vld.sshfl [vmem:[#allocation1] sm:$0xff pattern:$0x75643120]  ;;  %v1438_v15 = vmax.f32 %v1393_v13, %v1396_v44  ;;  %v1993_v17 = vrot.slane %v1435_v3, 9 }
 0x130   : > { %v1994_v21 = vrot.slane %v1436_v11, 9  ;;  %v1995_v29 = vrot.slane %v1437_v14, 9  ;;  %v1675_v8 = vunpack.c.l.b16 %v1636_v4  ;;  %v1361_v36 = vadd.f32 %v2436_v25, %v1349_v1 }
 0x131   : > { %v1639_v7 = vld.sshfl [vmem:[#allocation1 + $0x10] sm:$0xff pattern:$0x75643120]  ;;  %v1996_v22 = vrot.slane %v1438_v15, 9  ;;  %v1515_v23 = vmax.f32 %v1435_v3, %v1993_v17 }
 0x132   : > { %v1642_v63 = vld.sshfl [vmem:[#allocation1 + $0x20] sm:$0xff pattern:$0x75643120]  ;;  %v1676_v37 = vunpack.c.l.b16 %v1639_v7  ;;  %v1516_v54 = vmax.f32 %v1436_v11, %v1994_v21  ;;  %v1517_v32 = vmax.f32 %v1437_v14, %v1995_v29  ;;  %v1340_v51 = vpop.f32.mrf.mxu0  ;;  %v1369_v62 = vmax.f32 %v1361_v36, 0.0 }
 0x133   : > { %v1645_v18 = vld.sshfl [vmem:[#allocation1 + $0x30] sm:$0xff pattern:$0x75643120]  ;;  %v1677_v19 = vunpack.c.l.b16 %v1642_v63  ;;  %v1518_v33 = vmax.f32 %v1438_v15, %v1996_v22  ;;  %v1531_v34 = vpack.c.bf16 %v1515_v23, %v1515_v23  ;;  %v1218_v12 = vpop.f32.mrf.mxu3 }
 0x134   : > { %v1678_v24 = vunpack.c.l.b16 %v1645_v18  ;;  %v1696_v30 = vrot.slane %v1676_v37, 7  ;;  %v1532_v38 = vpack.c.bf16 %v1516_v54, %v1516_v54  ;;  %v1533_v39 = vpack.c.bf16 %v1517_v32, %v1517_v32 }
 0x135   : > { %v1698_v31 = vrot.slane %v1677_v19, 6  ;;  %v1534_v40 = vpack.c.bf16 %v1518_v33, %v1518_v33  ;;  %v1563_v46 = vrot.slane %v1531_v34, 2  ;;  %v1228_v45 = vadd.f32 %v1218_v12, %v1034_v20 }
 0x136   : > { %v1697_v35 = vsel %vm1688_vm9, %v1696_v30, %v1675_v8  ;;  %v1700_v43 = vrot.slane %v1678_v24, 5  ;;  %v1564_v59 = vrot.slane %v1532_v38, 2  ;;  %v1565_v48 = vrot.slane %v1533_v39, 2 }
 0x137   : > { %v1699_v41 = vsel %vm1691_vm10, %v1698_v31, %v1697_v35  ;;  %v1566_v49 = vrot.slane %v1534_v40, 2  ;;  %v1598_v50 = vsel %vm1571_vm8, %v1531_v34, %v1563_v46  ;;  %v1350_v55 = vadd.f32 %v1340_v51, %v1228_v45 }
 0x138   : > { %1647 = vst [vmem:[#allocation1] ss:$2 sm:$0xff] %v1598_v50  ;;  %v1701_v28 = vsel %vm1694_vm11, %v1700_v43, %v1699_v41  ;;  %v1601_v56 = vsel %vm1571_vm8, %v1532_v38, %v1564_v59  ;;  %v1604_v57 = vsel %vm1571_vm8, %v1533_v39, %v1565_v48  ;;  %v1397_v26 = vrot.slane %v1369_v62, 2 }
 0x139   : > { %v1607_v16 = vsel %vm1571_vm8, %v1534_v40, %v1566_v49  ;;  %v1715_v9 = vpack.c.b16 %v1701_v28, %v1701_v28  ;;  %1650 = vst [vmem:[#allocation1 + $0x10] ss:$2 sm:$0xff] %v1601_v56  ;;  %v1362_v42 = vadd.f32 %v2436_v25, %v1350_v55  ;;  %v1398_v61 = vrot.slane %v1369_v62, 4 }
 0x13a   : > { %1653 = vst [vmem:[#allocation1 + $0x20] ss:$2 sm:$0xff] %v1604_v57  ;;  %v1399_v2 = vrot.slane %v1369_v62, 6 }
 0x13b   : > { %v1719_v58 = vrot.slane %v1715_v9, 2  ;;  %1656 = vst [vmem:[#allocation1 + $0x30] ss:$2 sm:$0xff] %v1607_v16  ;;  %v1370_v47 = vmax.f32 %v1362_v42, 0.0 }
 0x13d   : > { %v1727_v0 = vsel %vm1571_vm8, %v1715_v9, %v1719_v58  ;;  %v1400_v27 = vrot.slane %v1370_v47, 2  ;;  %v1401_v13 = vrot.slane %v1370_v47, 4  ;;  %v1402_v5 = vrot.slane %v1370_v47, 6 }
 0x13e   : > { %1739 = vst [vmem:[%s2471_s13 + $0x2] sm:$0x3] %v1727_v0  ;;  %v1439_v52 = vmax.f32 %v1369_v62, %v1370_v47 }
 0x13f   : > { %v1440_v6 = vmax.f32 %v1397_v26, %v1400_v27  ;;  %v1441_v44 = vmax.f32 %v1398_v61, %v1401_v13  ;;  %v1442_v3 = vmax.f32 %v1399_v2, %v1402_v5  ;;  %v1648_v53 = vld.sshfl [vmem:[#allocation1] sm:$0xff pattern:$0x75643120] }
 0x140   : > { %v1997_v60 = vrot.slane %v1439_v52, 9  ;;  %v1651_v25 = vld.sshfl [vmem:[#allocation1 + $0x10] sm:$0xff pattern:$0x75643120]  ;;  %v1679_v20 = vunpack.c.l.b16 %v1648_v53 }
 0x141   : > { %v1998_v4 = vrot.slane %v1440_v6, 9  ;;  %v1999_v7 = vrot.slane %v1441_v44, 9  ;;  %v2000_v10 = vrot.slane %v1442_v3, 9  ;;  %v1654_v14 = vld.sshfl [vmem:[#allocation1 + $0x20] sm:$0xff pattern:$0x75643120]  ;;  %v1680_v17 = vunpack.c.l.b16 %v1651_v25 }
 0x142   : > { %v1519_v11 = vmax.f32 %v1439_v52, %v1997_v60  ;;  %v1657_v15 = vld.sshfl [vmem:[#allocation1 + $0x30] sm:$0xff pattern:$0x75643120]  ;;  %v1681_v63 = vunpack.c.l.b16 %v1654_v14 }
 0x143   : > { %v1520_v18 = vmax.f32 %v1440_v6, %v1998_v4  ;;  %v1521_v37 = vmax.f32 %v1441_v44, %v1999_v7  ;;  %v1522_v19 = vmax.f32 %v1442_v3, %v2000_v10  ;;  %v1682_v21 = vunpack.c.l.b16 %v1657_v15 }
 0x144   : > { %v1535_v1 = vpack.c.bf16 %v1519_v11, %v1519_v11  ;;  %v1702_v29 = vrot.slane %v1680_v17, 7  ;;  %v1704_v22 = vrot.slane %v1681_v63, 6 }
 0x145   : > { %v1536_v23 = vpack.c.bf16 %v1520_v18, %v1520_v18  ;;  %v1537_v8 = vpack.c.bf16 %v1521_v37, %v1521_v37  ;;  %v1538_v24 = vpack.c.bf16 %v1522_v19, %v1522_v19  ;;  %v1706_v54 = vrot.slane %v1682_v21, 5 }
 0x146   : > { %v1567_v30 = vrot.slane %v1535_v1, 2  ;;  %v1703_v31 = vsel %vm1688_vm9, %v1702_v29, %v1679_v20 }
 0x147   : > { %v1568_v32 = vrot.slane %v1536_v23, 2  ;;  %v1569_v33 = vrot.slane %v1537_v8, 2  ;;  %v1570_v34 = vrot.slane %v1538_v24, 2  ;;  %v1705_v36 = vsel %vm1691_vm10, %v1704_v22, %v1703_v31 }
 0x148   : > { %v1610_v35 = vsel %vm1571_vm8, %v1535_v1, %v1567_v30  ;;  %v1707_v46 = vsel %vm1694_vm11, %v1706_v54, %v1705_v36 }
 0x149   : > { %1659 = vst [vmem:[#allocation1] ss:$2 sm:$0xff] %v1610_v35  ;;  %v1613_v38 = vsel %vm1571_vm8, %v1536_v23, %v1568_v32  ;;  %v1616_v39 = vsel %vm1571_vm8, %v1537_v8, %v1569_v33  ;;  %v1619_v40 = vsel %vm1571_vm8, %v1538_v24, %v1570_v34  ;;  %v1716_v12 = vpack.c.b16 %v1707_v46, %v1707_v46 }
 0x14a   : > { %1662 = vst [vmem:[#allocation1 + $0x10] ss:$2 sm:$0xff] %v1613_v38 }
 0x14b   : > { %1665 = vst [vmem:[#allocation1 + $0x20] ss:$2 sm:$0xff] %v1616_v39  ;;  %v1720_v41 = vrot.slane %v1716_v12, 2 }
 0x14c   : > { %1668 = vst [vmem:[#allocation1 + $0x30] ss:$2 sm:$0xff] %v1619_v40 }
 0x14d   : > { %v1730_v43 = vsel %vm1571_vm8, %v1716_v12, %v1720_v41 }
 0x14e   : > { %1740 = vst [vmem:[%s2471_s13 + $0x4] sm:$0x3] %v1730_v43 }
 0x150   : > { %v1660_v45 = vld.sshfl [vmem:[#allocation1] sm:$0xff pattern:$0x75643120] }
 0x151   : > { %v1663_v59 = vld.sshfl [vmem:[#allocation1 + $0x10] sm:$0xff pattern:$0x75643120]  ;;  %v1683_v28 = vunpack.c.l.b16 %v1660_v45 }
 0x152   : > { %v1666_v48 = vld.sshfl [vmem:[#allocation1 + $0x20] sm:$0xff pattern:$0x75643120]  ;;  %v1684_v49 = vunpack.c.l.b16 %v1663_v59 }
 0x153   : > { %v1669_v50 = vld.sshfl [vmem:[#allocation1 + $0x30] sm:$0xff pattern:$0x75643120]  ;;  %v1685_v51 = vunpack.c.l.b16 %v1666_v48 }
 0x154   : > { %v1686_v62 = vunpack.c.l.b16 %v1669_v50  ;;  %v1708_v55 = vrot.slane %v1684_v49, 7 }
 0x155   : > { %v1710_v56 = vrot.slane %v1685_v51, 6 }
 0x156   : > { %v1709_v57 = vsel %vm1688_vm9, %v1708_v55, %v1683_v28  ;;  %v1712_v16 = vrot.slane %v1686_v62, 5 }
 0x157   : > { %v1711_v9 = vsel %vm1691_vm10, %v1710_v56, %v1709_v57 }
 0x158   : > { %v1713_v42 = vsel %vm1694_vm11, %v1712_v16, %v1711_v9 }
 0x159   : > { %v1717_v58 = vpack.c.b16 %v1713_v42, %v1713_v42 }
 0x15b   : > { %v1721_v47 = vrot.slane %v1717_v58, 2 }
 0x15d   : > { %v1733_v0 = vsel %vm1571_vm8, %v1717_v58, %v1721_v47 }
 0x15e   : > { %1741 = vst [vmem:[%s2471_s13 + $0x6] sm:$0x3] %v1733_v0 }
 0x15f PF: > { %s13_s12 = sadd.s32 1, %s2035_s12  }
 0x160   : > { %p10_p4 = scmp.ge.s32.totalorder %s13_s12, 4  }
 0x162   :  { %12 = sbr.rel (!%p10_p4) target bundleno = 1 (0x1), region = 75 }

// kernel: _lambda_.9
= control target key start
LH: loop header
LB: loop body
LE: loop exit
PB: predicated region body
PF: predicated region fallthrough
CT: control target
= control target key end

     0   :  { %s398_s0 = inlined_call_operand.vmem [shape: bf16[2,256], index: 0, kind: input, shape index: {}]   ;;  %s399_s1 = inlined_call_operand.vmem [shape: bf16[256,128], index: 1, kind: input, shape index: {}]   ;;  %s400_s2 = inlined_call_operand.vmem [shape: f32[1,128], index: 2, kind: input, shape index: {}]   ;;  %s401_s3 = inlined_call_operand.hbm [shape: f32[2,128], index: 3, kind: output, shape index: {}]  }
   0x1   :  { %v281_v0 = vld [vmem:[%s399_s1 + $0x38] sm:$0xff]  ;;  %v280_v2 = vld [vmem:[%s399_s1 + $0x30] sm:$0xff]  ;;  %v21_v4 = vld [vmem:[%s398_s0] sm:$0x3] }
   0x2   :  { %v289_v1 = vld [vmem:[%s399_s1 + $0x78] sm:$0xff]  ;;  %156 = vmatpush.bf16.msra.mxu0 %v281_v0  ;;  %v288_v3 = vld [vmem:[%s399_s1 + $0x70] sm:$0xff] }
   0x3   :  { %169 = vmatpush.bf16.msra.mxu1 %v289_v1 }
   0x4   :  { %8 = vsyncpa [#allocation4], 0  ;;  %v279_v5 = vld [vmem:[%s399_s1 + $0x28] sm:$0xff]  ;;  %55 = vst [vmem:[#allocation1] ss:$9 sm:$0xff] %v21_v4  ;;  %v278_v7 = vld [vmem:[%s399_s1 + $0x20] sm:$0xff] }
   0x5   :  { %v287_v6 = vld [vmem:[%s399_s1 + $0x68] sm:$0xff]  ;;  %v286_v8 = vld [vmem:[%s399_s1 + $0x60] sm:$0xff]  ;;  %v277_v9 = vld [vmem:[%s399_s1 + $0x18] sm:$0xff]  ;;  %v319_v19 = vmov 0.0   ;;  %s201_s23 = sshll.u32 %s401_s3, 4  ;;  %s202_s23 = int_to_ptr.hbm [resolvable:$true] %s201_s23 }
   0x6   :  { %157 = vmatpush.bf16.msra.mxu0 %v280_v2  ;;  %v285_v10 = vld [vmem:[%s399_s1 + $0x58] sm:$0xff]  ;;  %v276_v11 = vld [vmem:[%s399_s1 + $0x10] sm:$0xff]  ;;  %v275_v13 = vld [vmem:[%s399_s1 + $0x8] sm:$0xff]  ;;  %19 = vst [vmem:[#allocation2] sm:$0x3] %v319_v19 }
   0x7   :  { %170 = vmatpush.bf16.msra.mxu1 %v288_v3  ;;  %v284_v12 = vld [vmem:[%s399_s1 + $0x50] sm:$0xff]  ;;  %v283_v14 = vld [vmem:[%s399_s1 + $0x48] sm:$0xff]  ;;  %v274_v15 = vld [vmem:[%s399_s1] sm:$0xff] }
   0x8   :  { %v282_v16 = vld [vmem:[%s399_s1 + $0x40] sm:$0xff]  ;;  %s320_s1 = smov [#allocation3]  }
   0x9   :  { %v292_v27 = vld [vmem:[%s400_s2] ss:$0 sm:$0xff]  ;;  %s199_s20 = sshll.u32 %s320_s1, 4  ;;  %s200_s20 = int_to_ptr.vmem [resolvable:$true] %s199_s20 }
   0xa   :  { %158 = vmatpush.bf16.msra.mxu0 %v279_v5 }
   0xb   :  { %171 = vmatpush.bf16.msra.mxu1 %v287_v6  ;;  %v56_v17 = vld [vmem:[#allocation1] sm:$0xff]  ;;  %v57_v18 = vld [vmem:[#allocation1 + $0x9] sm:$0xff] }
   0xd   :  { %v20_v21 = vld [vmem:[#allocation2] sm:$0x3] }
   0xe   :  { %159 = vmatpush.bf16.msra.mxu0 %v278_v7 }
   0xf   :  { %172 = vmatpush.bf16.msra.mxu1 %v286_v8 }
  0x12   :  { %160 = vmatpush.bf16.msra.mxu0 %v277_v9 }
  0x13   :  { %173 = vmatpush.bf16.msra.mxu1 %v285_v10 }
  0x16   :  { %161 = vmatpush.bf16.msra.mxu0 %v276_v11 }
  0x17   :  { %174 = vmatpush.bf16.msra.mxu1 %v284_v12 }
  0x1a   :  { %162 = vmatpush.bf16.msra.mxu0 %v275_v13 }
  0x1b   :  { %175 = vmatpush.bf16.msra.mxu1 %v283_v14 }
  0x1e   :  { %163 = vmatpush.bf16.msra.mxu0 %v274_v15 }
  0x1f   :  { %176 = vmatpush.bf16.msra.mxu1 %v282_v16 }
  0x21   :  { %164 = vmatmul.bf16.vlgmr.msra.gmra.mxu0 %v56_v17 }
  0x22   :  { %177 = vmatmul.bf16.vlgmr.msra.gmra.mxu1 %v57_v18 }
  0x9e   :  { %v165_v20 = vpop.f32.mrf.mxu0 }
  0x9f   :  { %v178_v22 = vpop.f32.mrf.mxu1 }
  0xa0   :  { %v179_v23 = vadd.f32 %v178_v22, %v165_v20 }
  0xa2   :  { %v182_v24 = vadd.f32 %v179_v23, %v20_v21 }
  0xa4   :  { %183 = vst [vmem:[#allocation2] sm:$0x3] %v182_v24 }
  0xa6   :  { %v167_v25 = vpop.f32.mrf.mxu0 }
  0xa7   :  { %v180_v26 = vpop.f32.mrf.mxu1 }
  0xab   :  { %v187_v28 = vld [vmem:[#allocation2] sm:$0x3] }
  0xac   :  { %v192_v29 = vadd.f32 %v292_v27, %v187_v28 }
  0xae   :  { %193 = vst [vmem:[#allocation3] sm:$0x3] %v192_v29 }
  0xaf   :  { %204 = dma.vmem_to_hbm [thread:$0]  %s200_s20, 32, %s202_s23, [#allocation4]  }
  0xb0   :  { %317 = dma.done.wait [#allocation4], 32  }
  0xb1   :  { %318 = vsyncadd [#allocation4], 4294967264 }
  0xb2   :  { %209 = vsyncpa [#allocation4], 1 }

// kernel: _lambda_.5
= control target key start
LH: loop header
LB: loop body
LE: loop exit
PB: predicated region body
PF: predicated region fallthrough
CT: control target
= control target key end

     0   :  { %s5953_s12 = smov 0   ;;  %s7596_s0 = inlined_call_operand.vmem [shape: bf16[2,18,18,3], index: 0, kind: input, shape index: {}]   ;;  %s7597_s1 = inlined_call_operand.vmem [shape: bf16[9,3,128], index: 1, kind: input, shape index: {}]   ;;  %s7598_s2 = inlined_call_operand.vmem [shape: f32[1,128], index: 2, kind: input, shape index: {}]   ;;  %s7599_s3 = inlined_call_operand.vmem [shape: bf16[2,8,8,128], index: 3, kind: output, shape index: {}]  }
   0x1 LB: > { %s5152_s13 = sadd.s32 4294967295, %s5930_s12   ;;  %p5156_p0 = scmp.ge.s32.totalorder %s5930_s12, 1  ;;  %s5930_s12 = sphi %s5953_s12, %s13_s12  }
   0x2   : > { %p137_p1 = scmp.lt.s32.totalorder %s5930_s12, 3 }
   0x4   : > { %p138_p2 = pnand %p5156_p0, %p137_p1 }
   0x6   : > { %141 = sbr.rel (%p138_p2) target bundleno = 798 (0x31e), region = 32 }
   0xb   : > { %v5160_v0 = vld [vmem:[%s7597_s1 + $0x2] sm:$0x3]  ;;  %vm707_vm0 = vcmask 1040384   ;;  %vm708_vm1 = vcmask 1041408   ;;  %p161_p3 = scmp.lt.s32.totalorder %s5152_s13, 1  ;;  %v5932_v1 = vmov 65535  }
   0xc   : > { %v709_v2 = vsel %vm707_vm0, 4294967295, %v5932_v1  ;;  %v5273_v4 = vld [vmem:[%s7597_s1 + $0x4] sm:$0x3]  ;;  %v5322_v7 = vld [vmem:[%s7597_s1 + $0x6] sm:$0x3]  ;;  %vm658_vm5 = vcmask 23552  }
   0xd   : > { %v5964_v3 = vsel %vm708_vm1, %v709_v2, 0  ;;  %s7630_s13 = smov (!%p161_p3, %s5152_s13), 1  ;;  %v204_v8 = vld [vmem:[%s7597_s1] sm:$0x3]  ;;  %v5451_v9 = vld [vmem:[%s7597_s1 + $0x8] sm:$0x3] }
   0xe   : > { %v712_v5 = vand.u32 %v5160_v0, %v5964_v3  ;;  %v1285_v6 = vand.u32 %v5273_v4, %v5964_v3  ;;  %s5862_s24 = smul.u32 216, %s7630_s13  ;;  %v1572_v10 = vand.u32 %v5322_v7, %v5964_v3  ;;  %v932_v11 = vand.u32 %v5964_v3, %v204_v8  ;;  %s5810_s11 = sshll.u32 %s7630_s13, 5 }
   0xf   : > { %v2226_v12 = vand.u32 %v5451_v9, %v5964_v3  ;;  %vm221_vm2 = vsmask.f32 3328  ;;  %vm222_vm3 = vsmask.f32 7440  ;;  %vm1071_vm6 = vcmask 1042432   ;;  %s7276_s15 = scalar_lea.vmem %s7599_s3, %s5810_s11 }
  0x10   : > { %5859 = vmatpush.bf16.msra.mxu1 %v712_v5  ;;  %5860 = vmatpush.bf16.msra.mxu2 %v712_v5  ;;  %s5989_s27 = scalar_lea.vmem %s7596_s0, %s5862_s24  ;;  %vm6001_vm4 = vmor %vm221_vm2, %vm222_vm3  ;;  %vm1072_vm7 = vcmask 1046532   ;;  %vm4955_vm9 = vcmask 1041409   ;;  %vm4958_vm10 = vcmask 1042434   ;;  %vm4961_vm11 = vcmask 1043459  }
  0x11   : > { %5861 = vmatpush.bf16.msra.mxu3 %v712_v5  ;;  %721 = vmatpush.bf16.msra.mxu0 %v712_v5  ;;  %v180_v13 = vld [vmem:[%s5989_s27 + $0x30] sm:$0xf]  ;;  %v181_v14 = vld [vmem:[%s5989_s27 + $0x34] sm:$0xf]  ;;  %v209_v15 = vld [vmem:[%s5989_s27 + $0x38] sm:$0x1] }
  0x12   : > { %v321_v16 = vshrl.u32 %v180_v13, 16  ;;  %v324_v17 = vshll.u32 %v180_v13, 16  ;;  %v330_v18 = vshll.u32 %v181_v14, 16  ;;  %v334_v19 = vshrl.u32 %v181_v14, 16  ;;  %v188_v20 = vld [vmem:[%s5989_s27 + $0x60] sm:$0xf]  ;;  %vm6175_vm8 = vmor %vm1071_vm6, %vm1072_vm7 }
  0x13   : > { %v340_v21 = vshll.u32 %v209_v15, 16  ;;  %v189_v22 = vld [vmem:[%s5989_s27 + $0x64] sm:$0xf]  ;;  %v213_v23 = vld [vmem:[%s5989_s27 + $0x68] sm:$0x1]  ;;  %v417_v24 = vshrl.u32 %v188_v20, 16 }
  0x14   : > { %1294 = vmatpush.bf16.msrb.mxu2 %v1285_v6  ;;  %941 = vmatpush.bf16.msrb.mxu1 %v932_v11  ;;  %v323_v25 = vrot.slane %v321_v16, 4  ;;  %v326_v26 = vrot.slane %v324_v17, 5  ;;  %v332_v27 = vrot.slane %v330_v18, 5  ;;  %v336_v28 = vrot.slane %v334_v19, 4  ;;  %v196_v29 = vld [vmem:[%s5989_s27 + $0x90] sm:$0xf] }
  0x15   : > { %1581 = vmatpush.bf16.msrb.mxu3 %v1572_v10  ;;  %2235 = vmatpush.bf16.msrb.mxu0 %v2226_v12  ;;  %v342_v30 = vrot.slane %v340_v21, 5  ;;  %v419_v31 = vrot.slane %v417_v24, 4  ;;  %v420_v32 = vshll.u32 %v188_v20, 16  ;;  %v426_v33 = vshll.u32 %v189_v22, 16  ;;  %v197_v38 = vld [vmem:[%s5989_s27 + $0x94] sm:$0xf] }
  0x16   : > { %v327_v34 = vor.u32 %v326_v26, %v323_v25  ;;  %v337_v35 = vor.u32 %v336_v28, %v332_v27  ;;  %v430_v36 = vshrl.u32 %v189_v22, 16  ;;  %v436_v37 = vshll.u32 %v213_v23, 16  ;;  %v217_v48 = vld [vmem:[%s5989_s27 + $0x98] sm:$0x1]  ;;  %v172_v0 = vld [vmem:[%s5989_s27] sm:$0xf] }
  0x17   : > { %v422_v40 = vrot.slane %v420_v32, 5  ;;  %v428_v41 = vrot.slane %v426_v33, 5  ;;  %v513_v42 = vshrl.u32 %v196_v29, 16  ;;  %v516_v50 = vshll.u32 %v196_v29, 16  ;;  %v6014_v5 = vld [vmem:[%s5989_s27 + $0x4] sm:$0xf] }
  0x18   : > { %v328_v43 = vrot.slane %v327_v34, 4  ;;  %v338_v44 = vrot.slane %v337_v35, 4  ;;  %v432_v45 = vrot.slane %v430_v36, 4  ;;  %v438_v46 = vrot.slane %v436_v37, 5  ;;  %v6017_v6 = vld [vmem:[%s5989_s27 + $0x8] sm:$0x1] }
  0x19   : > { %v423_v47 = vor.u32 %v422_v40, %v419_v31  ;;  %v515_v49 = vrot.slane %v513_v42, 4  ;;  %v522_v51 = vshll.u32 %v197_v38, 16  ;;  %v526_v55 = vshrl.u32 %v197_v38, 16  ;;  %v182_v23 = vld [vmem:[%s5989_s27 + $0x3c] sm:$0xf] }
  0x1a   : > { %v333_v52 = vsel %vm6001_vm4, %v328_v43, %v332_v27  ;;  %v343_v53 = vsel %vm6001_vm4, %v338_v44, %v342_v30  ;;  %v433_v54 = vor.u32 %v432_v45, %v428_v41  ;;  %v518_v59 = vrot.slane %v516_v50, 5  ;;  %v6029_v24 = vld [vmem:[%s5989_s27 + $0x40] sm:$0xf]  ;;  %v6034_v29 = vld [vmem:[%s5989_s27 + $0x44] sm:$0x1] }
  0x1b   : > { %v618_v56 = vunpack.c.l.b16 %v333_v52  ;;  %v619_v57 = vunpack.c.l.b16 %v343_v53  ;;  %v424_v58 = vrot.slane %v423_v47, 4  ;;  %v524_v61 = vrot.slane %v522_v51, 5  ;;  %v190_v37 = vld [vmem:[%s5989_s27 + $0x6c] sm:$0xf]  ;;  %v191_v47 = vld [vmem:[%s5989_s27 + $0x70] sm:$0xf] }
  0x1c   : > { %v434_v60 = vrot.slane %v433_v54, 4  ;;  %v528_v62 = vrot.slane %v526_v55, 4  ;;  %v532_v63 = vshll.u32 %v217_v48, 16  ;;  %v519_v4 = vor.u32 %v518_v59, %v515_v49  ;;  %v214_v51 = vld [vmem:[%s5989_s27 + $0x74] sm:$0x1] }
  0x1d   : > { %v646_v1 = vpack.c.b16 %v619_v57, %v618_v56  ;;  %v429_v2 = vsel %vm6001_vm4, %v424_v58, %v428_v41  ;;  %v225_v13 = vshrl.u32 %v172_v0, 16  ;;  %v228_v14 = vshll.u32 %v172_v0, 16 }
  0x1e   : > { %v439_v7 = vsel %vm6001_vm4, %v434_v60, %v438_v46  ;;  %v626_v8 = vunpack.c.l.b16 %v429_v2  ;;  %v529_v9 = vor.u32 %v528_v62, %v524_v61  ;;  %v534_v10 = vrot.slane %v532_v63, 5 }
  0x1f   : > { %5165 = vmatmul.msk.bf16.vlgmr.msra.gmra.mxu1 %vm658_vm5, %v646_v1  ;;  %v627_v11 = vunpack.c.l.b16 %v439_v7  ;;  %v520_v12 = vrot.slane %v519_v4, 4  ;;  %v234_v16 = vshll.u32 %v6014_v5, 16  ;;  %v238_v17 = vshrl.u32 %v6014_v5, 16  ;;  %v198_v1 = vld [vmem:[%s5989_s27 + $0x9c] sm:$0xf] }
  0x20   : > { %v530_v15 = vrot.slane %v529_v9, 4  ;;  %v244_v18 = vshll.u32 %v6017_v6, 16  ;;  %v227_v21 = vrot.slane %v225_v13, 4  ;;  %v230_v22 = vrot.slane %v228_v14, 5  ;;  %v218_v13 = vld [vmem:[%s5989_s27 + $0xa4] sm:$0x1] }
  0x21   : > { %v650_v19 = vpack.c.b16 %v627_v11, %v626_v8  ;;  %v525_v20 = vsel %vm6001_vm4, %v520_v12, %v524_v61  ;;  %v236_v27 = vrot.slane %v234_v16, 5  ;;  %v240_v28 = vrot.slane %v238_v17, 4  ;;  %v199_v8 = vld [vmem:[%s5989_s27 + $0xa0] sm:$0xf] }
  0x22   : > { %v535_v25 = vsel %vm6001_vm4, %v530_v15, %v534_v10  ;;  %v634_v26 = vunpack.c.l.b16 %v525_v20  ;;  %v231_v31 = vor.u32 %v230_v22, %v227_v21  ;;  %v246_v32 = vrot.slane %v244_v18, 5 }
  0x23   : > { %5169 = vmatmul.msk.bf16.vlgmr.msra.gmra.mxu2 %vm658_vm5, %v650_v19  ;;  %v635_v30 = vunpack.c.l.b16 %v535_v25  ;;  %v241_v33 = vor.u32 %v240_v28, %v236_v27  ;;  %v345_v34 = vshrl.u32 %v182_v23, 16  ;;  %v348_v35 = vshll.u32 %v182_v23, 16 }
  0x24   : > { %v354_v36 = vshll.u32 %v6029_v24, 16  ;;  %v232_v40 = vrot.slane %v231_v31, 4  ;;  %v358_v41 = vshrl.u32 %v6029_v24, 16  ;;  %v364_v42 = vshll.u32 %v6034_v29, 16 }
  0x25   : > { %v654_v38 = vpack.c.b16 %v635_v30, %v634_v26  ;;  %v242_v43 = vrot.slane %v241_v33, 4  ;;  %v347_v44 = vrot.slane %v345_v34, 4  ;;  %v350_v45 = vrot.slane %v348_v35, 5  ;;  %v6060_v33 = vld [vmem:[%s5989_s27 + $0x10] sm:$0xf] }
  0x26   : > { %v356_v46 = vrot.slane %v354_v36, 5  ;;  %v237_v48 = vsel %vm6001_vm4, %v232_v40, %v236_v27  ;;  %v360_v49 = vrot.slane %v358_v41, 4  ;;  %v366_v50 = vrot.slane %v364_v42, 5  ;;  %v174_v27 = vld [vmem:[%s5989_s27 + $0xc] sm:$0xf] }
  0x27   : > { %5173 = vmatmul.msk.bf16.vlgmr.msra.gmra.mxu3 %vm658_vm5, %v654_v38  ;;  %v441_v52 = vshrl.u32 %v190_v37, 16  ;;  %v247_v53 = vsel %vm6001_vm4, %v242_v43, %v246_v32  ;;  %v610_v54 = vunpack.c.l.b16 %v237_v48  ;;  %v351_v55 = vor.u32 %v350_v45, %v347_v44 }
  0x28   : > { %v444_v56 = vshll.u32 %v190_v37, 16  ;;  %v611_v57 = vunpack.c.l.b16 %v247_v53  ;;  %v361_v58 = vor.u32 %v360_v49, %v356_v46  ;;  %v450_v60 = vshll.u32 %v191_v47, 16  ;;  %v6063_v37 = vld [vmem:[%s5989_s27 + $0x14] sm:$0x1] }
  0x29   : > { %v443_v59 = vrot.slane %v441_v52, 4  ;;  %v352_v61 = vrot.slane %v351_v55, 4  ;;  %v454_v63 = vshrl.u32 %v191_v47, 16  ;;  %v460_v0 = vshll.u32 %v214_v51, 16  ;;  %v184_v47 = vld [vmem:[%s5989_s27 + $0x48] sm:$0xf] }
  0x2a   : > { %v446_v62 = vrot.slane %v444_v56, 5  ;;  %v642_v2 = vpack.c.b16 %v611_v57, %v610_v54  ;;  %v362_v4 = vrot.slane %v361_v58, 4  ;;  %v452_v7 = vrot.slane %v450_v60, 5  ;;  %v6073_v52 = vld [vmem:[%s5989_s27 + $0x4c] sm:$0xf] }
  0x2b   : > { %v357_v9 = vsel %vm6001_vm4, %v352_v61, %v356_v46  ;;  %v456_v11 = vrot.slane %v454_v63, 4  ;;  %v462_v12 = vrot.slane %v460_v0, 5  ;;  %v537_v16 = vshrl.u32 %v198_v1, 16  ;;  %v6078_v61 = vld [vmem:[%s5989_s27 + $0x50] sm:$0x1] }
  0x2c   : > { %v447_v10 = vor.u32 %v446_v62, %v443_v59  ;;  %5161 = vmatmul.msk.bf16.vlgmr.msra.gmra.mxu0 %vm658_vm5, %v642_v2  ;;  %v367_v14 = vsel %vm6001_vm4, %v362_v4, %v366_v50  ;;  %v620_v15 = vunpack.c.l.b16 %v357_v9  ;;  %v540_v17 = vshll.u32 %v198_v1, 16  ;;  %v192_v9 = vld [vmem:[%s5989_s27 + $0x78] sm:$0xf] }
  0x2d   : > { %v621_v18 = vunpack.c.l.b16 %v367_v14  ;;  %v457_v20 = vor.u32 %v456_v11, %v452_v7  ;;  %v546_v21 = vshll.u32 %v199_v8, 16  ;;  %v539_v22 = vrot.slane %v537_v16, 4  ;;  %v193_v14 = vld [vmem:[%s5989_s27 + $0x7c] sm:$0xf] }
  0x2e   : > { %v448_v19 = vrot.slane %v447_v10, 4  ;;  %v542_v23 = vrot.slane %v540_v17, 5  ;;  %v550_v25 = vshrl.u32 %v199_v8, 16  ;;  %v556_v26 = vshll.u32 %v218_v13, 16 }
  0x2f   : > { %v647_v28 = vpack.c.b16 %v621_v18, %v620_v15  ;;  %v458_v31 = vrot.slane %v457_v20, 4  ;;  %v548_v32 = vrot.slane %v546_v21, 5  ;;  %v249_v41 = vshrl.u32 %v174_v27, 16 }
  0x30   : > { %v453_v30 = vsel %vm6001_vm4, %v448_v19, %v452_v7  ;;  %v543_v35 = vor.u32 %v542_v23, %v539_v22  ;;  %v552_v36 = vrot.slane %v550_v25, 4  ;;  %v558_v40 = vrot.slane %v556_v26, 5  ;;  %v215_v22 = vld [vmem:[%s5989_s27 + $0x80] sm:$0x1] }
  0x31   : > { %v628_v34 = vunpack.c.l.b16 %v453_v30  ;;  %5166 = vmatmul.msk.bf16.gmra.mxu1 %vm658_vm5, %v647_v28  ;;  %v463_v38 = vsel %vm6001_vm4, %v458_v31, %v462_v12  ;;  %v252_v42 = vshll.u32 %v174_v27, 16  ;;  %v258_v46 = vshll.u32 %v6060_v33, 16 }
  0x32   : > { %v629_v43 = vunpack.c.l.b16 %v463_v38  ;;  %v544_v44 = vrot.slane %v543_v35, 4  ;;  %v553_v45 = vor.u32 %v552_v36, %v548_v32  ;;  %v251_v48 = vrot.slane %v249_v41, 4  ;;  %v200_v41 = vld [vmem:[%s5989_s27 + $0xa8] sm:$0xf] }
  0x33   : > { %v254_v49 = vrot.slane %v252_v42, 5  ;;  %v262_v50 = vshrl.u32 %v6060_v33, 16  ;;  %v268_v51 = vshll.u32 %v6063_v37, 16  ;;  %v260_v56 = vrot.slane %v258_v46, 5  ;;  %v219_v46 = vld [vmem:[%s5989_s27 + $0xb0] sm:$0x1] }
  0x34   : > { %v651_v53 = vpack.c.b16 %v629_v43, %v628_v34  ;;  %v549_v54 = vsel %vm6001_vm4, %v544_v44, %v548_v32  ;;  %v554_v55 = vrot.slane %v553_v45, 4  ;;  %v369_v63 = vshrl.u32 %v184_v47, 16  ;;  %v201_v45 = vld [vmem:[%s5989_s27 + $0xac] sm:$0xf] }
  0x35   : > { %v636_v57 = vunpack.c.l.b16 %v549_v54  ;;  %v255_v58 = vor.u32 %v254_v49, %v251_v48  ;;  %v264_v59 = vrot.slane %v262_v50, 4  ;;  %v270_v60 = vrot.slane %v268_v51, 5 }
  0x36   : > { %5170 = vmatmul.msk.bf16.gmra.mxu2 %vm658_vm5, %v651_v53  ;;  %v559_v62 = vsel %vm6001_vm4, %v554_v55, %v558_v40  ;;  %v372_v0 = vshll.u32 %v184_v47, 16  ;;  %v378_v1 = vshll.u32 %v6073_v52, 16  ;;  %v382_v8 = vshrl.u32 %v6073_v52, 16 }
  0x37   : > { %v637_v2 = vunpack.c.l.b16 %v559_v62  ;;  %v256_v4 = vrot.slane %v255_v58, 4  ;;  %v265_v7 = vor.u32 %v264_v59, %v260_v56  ;;  %v371_v10 = vrot.slane %v369_v63, 4 }
  0x38   : > { %v374_v11 = vrot.slane %v372_v0, 5  ;;  %v380_v12 = vrot.slane %v378_v1, 5  ;;  %v388_v13 = vshll.u32 %v6078_v61, 16  ;;  %v384_v18 = vrot.slane %v382_v8, 4  ;;  %v176_v1 = vld [vmem:[%s5989_s27 + $0x18] sm:$0xf] }
  0x39   : > { %v655_v15 = vpack.c.b16 %v637_v2, %v636_v57  ;;  %v261_v16 = vsel %vm6001_vm4, %v256_v4, %v260_v56  ;;  %v266_v17 = vrot.slane %v265_v7, 4  ;;  %v465_v23 = vshrl.u32 %v192_v9, 16  ;;  %v6106_v8 = vld [vmem:[%s5989_s27 + $0x1c] sm:$0xf] }
  0x3a   : > { %v612_v19 = vunpack.c.l.b16 %v261_v16  ;;  %v375_v20 = vor.u32 %v374_v11, %v371_v10  ;;  %v390_v21 = vrot.slane %v388_v13, 5  ;;  %v385_v26 = vor.u32 %v384_v18, %v380_v12 }
  0x3b   : > { %5174 = vmatmul.msk.bf16.gmra.mxu3 %vm658_vm5, %v655_v15  ;;  %v271_v25 = vsel %vm6001_vm4, %v266_v17, %v270_v60  ;;  %v468_v27 = vshll.u32 %v192_v9, 16  ;;  %v474_v28 = vshll.u32 %v193_v14, 16  ;;  %v467_v32 = vrot.slane %v465_v23, 4  ;;  %v6109_v9 = vld [vmem:[%s5989_s27 + $0x20] sm:$0x1] }
  0x3c   : > { %v613_v30 = vunpack.c.l.b16 %v271_v25  ;;  %v376_v31 = vrot.slane %v375_v20, 4  ;;  %v478_v34 = vshrl.u32 %v193_v14, 16  ;;  %v386_v35 = vrot.slane %v385_v26, 4 }
  0x3d   : > { %v470_v36 = vrot.slane %v468_v27, 5  ;;  %v476_v38 = vrot.slane %v474_v28, 5  ;;  %v484_v40 = vshll.u32 %v215_v22, 16  ;;  %v561_v54 = vshrl.u32 %v200_v41, 16  ;;  %v186_v22 = vld [vmem:[%s5989_s27 + $0x54] sm:$0xf] }
  0x3e   : > { %v643_v42 = vpack.c.b16 %v613_v30, %v612_v19  ;;  %v381_v43 = vsel %vm6001_vm4, %v376_v31, %v380_v12  ;;  %v480_v44 = vrot.slane %v478_v34, 4  ;;  %v391_v47 = vsel %vm6001_vm4, %v386_v35, %v390_v21  ;;  %v6119_v28 = vld [vmem:[%s5989_s27 + $0x58] sm:$0xf]  ;;  %v6124_v35 = vld [vmem:[%s5989_s27 + $0x5c] sm:$0x1] }
  0x3f   : > { %v622_v48 = vunpack.c.l.b16 %v381_v43  ;;  %v471_v49 = vor.u32 %v470_v36, %v467_v32  ;;  %v486_v50 = vrot.slane %v484_v40, 5  ;;  %v623_v51 = vunpack.c.l.b16 %v391_v47 }
  0x40   : > { %5162 = vmatmul.msk.bf16.gmra.mxu0 %vm658_vm5, %v643_v42  ;;  %v481_v53 = vor.u32 %v480_v44, %v476_v38  ;;  %v564_v55 = vshll.u32 %v200_v41, 16  ;;  %v570_v57 = vshll.u32 %v201_v45, 16  ;;  %v574_v58 = vshrl.u32 %v201_v45, 16 }
  0x41   : > { %v472_v56 = vrot.slane %v471_v49, 4  ;;  %v580_v59 = vshll.u32 %v219_v46, 16  ;;  %v648_v60 = vpack.c.b16 %v623_v51, %v622_v48  ;;  %v563_v63 = vrot.slane %v561_v54, 4  ;;  %v194_v46 = vld [vmem:[%s5989_s27 + $0x84] sm:$0xf] }
  0x42   : > { %v482_v62 = vrot.slane %v481_v53, 4  ;;  %v566_v0 = vrot.slane %v564_v55, 5  ;;  %v572_v4 = vrot.slane %v570_v57, 5  ;;  %v576_v7 = vrot.slane %v574_v58, 4 }
  0x43   : > { %v477_v2 = vsel %vm6001_vm4, %v472_v56, %v476_v38  ;;  %5167 = vmatmul.msk.bf16.gmra.mxu1 %vm658_vm5, %v648_v60  ;;  %v582_v13 = vrot.slane %v580_v59, 5  ;;  %v273_v16 = vshrl.u32 %v176_v1, 16  ;;  %v276_v17 = vshll.u32 %v176_v1, 16  ;;  %v195_v56 = vld [vmem:[%s5989_s27 + $0x88] sm:$0xf] }
  0x44   : > { %v487_v10 = vsel %vm6001_vm4, %v482_v62, %v486_v50  ;;  %v630_v11 = vunpack.c.l.b16 %v477_v2  ;;  %v567_v12 = vor.u32 %v566_v0, %v563_v63  ;;  %v577_v15 = vor.u32 %v576_v7, %v572_v4  ;;  %v216_v60 = vld [vmem:[%s5989_s27 + $0x8c] sm:$0x1] }
  0x45   : > { %v631_v14 = vunpack.c.l.b16 %v487_v10  ;;  %v282_v19 = vshll.u32 %v6106_v8, 16  ;;  %v286_v20 = vshrl.u32 %v6106_v8, 16  ;;  %v292_v21 = vshll.u32 %v6109_v9, 16 }
  0x46   : > { %v568_v18 = vrot.slane %v567_v12, 4  ;;  %v578_v25 = vrot.slane %v577_v15, 4  ;;  %v275_v26 = vrot.slane %v273_v16, 4  ;;  %v278_v27 = vrot.slane %v276_v17, 5  ;;  %v202_v16 = vld [vmem:[%s5989_s27 + $0xb4] sm:$0xf] }
  0x47   : > { %v652_v23 = vpack.c.b16 %v631_v14, %v630_v11  ;;  %v284_v31 = vrot.slane %v282_v19, 5  ;;  %v288_v32 = vrot.slane %v286_v20, 4  ;;  %v294_v34 = vrot.slane %v292_v21, 5  ;;  %v203_v20 = vld [vmem:[%s5989_s27 + $0xb8] sm:$0xf] }
  0x48   : > { %v573_v30 = vsel %vm6001_vm4, %v568_v18, %v572_v4  ;;  %v583_v36 = vsel %vm6001_vm4, %v578_v25, %v582_v13  ;;  %v279_v40 = vor.u32 %v278_v27, %v275_v26  ;;  %v393_v41 = vshrl.u32 %v186_v22, 16  ;;  %v220_v26 = vld [vmem:[%s5989_s27 + $0xbc] sm:$0x1] }
  0x49   : > { %5171 = vmatmul.msk.bf16.gmra.mxu2 %vm658_vm5, %v652_v23  ;;  %v638_v38 = vunpack.c.l.b16 %v573_v30  ;;  %v639_v42 = vunpack.c.l.b16 %v583_v36  ;;  %v289_v43 = vor.u32 %v288_v32, %v284_v31  ;;  %v396_v44 = vshll.u32 %v186_v22, 16 }
  0x4a   : > { %v402_v45 = vshll.u32 %v6119_v28, 16  ;;  %v280_v47 = vrot.slane %v279_v40, 4  ;;  %v395_v48 = vrot.slane %v393_v41, 4  ;;  %v406_v49 = vshrl.u32 %v6119_v28, 16 }
  0x4b   : > { %v412_v50 = vshll.u32 %v6124_v35, 16  ;;  %v656_v51 = vpack.c.b16 %v639_v42, %v638_v38  ;;  %v290_v53 = vrot.slane %v289_v43, 4  ;;  %v398_v54 = vrot.slane %v396_v44, 5 }
  0x4c   : > { %v404_v55 = vrot.slane %v402_v45, 5  ;;  %v285_v57 = vsel %vm6001_vm4, %v280_v47, %v284_v31  ;;  %v408_v58 = vrot.slane %v406_v49, 4  ;;  %v489_v62 = vshrl.u32 %v194_v46, 16  ;;  %v178_v45 = vld [vmem:[%s5989_s27 + $0x24] sm:$0xf] }
  0x4d   : > { %v414_v59 = vrot.slane %v412_v50, 5  ;;  %5175 = vmatmul.msk.bf16.gmra.mxu3 %vm658_vm5, %v656_v51  ;;  %v295_v63 = vsel %vm6001_vm4, %v290_v53, %v294_v34  ;;  %v614_v0 = vunpack.c.l.b16 %v285_v57  ;;  %v399_v1 = vor.u32 %v398_v54, %v395_v48  ;;  %v6152_v50 = vld [vmem:[%s5989_s27 + $0x28] sm:$0xf] }
  0x4e   : > { %v492_v2 = vshll.u32 %v194_v46, 16  ;;  %v615_v4 = vunpack.c.l.b16 %v295_v63  ;;  %v409_v7 = vor.u32 %v408_v58, %v404_v55  ;;  %v491_v10 = vrot.slane %v489_v62, 4 }
  0x4f   : > { %v498_v11 = vshll.u32 %v195_v56, 16  ;;  %v400_v12 = vrot.slane %v399_v1, 4  ;;  %v502_v14 = vshrl.u32 %v195_v56, 16  ;;  %v508_v15 = vshll.u32 %v216_v60, 16  ;;  %v6156_v56 = vld [vmem:[%s5989_s27 + $0x2c] sm:$0x1] }
  0x50   : > { %v494_v13 = vrot.slane %v492_v2, 5  ;;  %v644_v17 = vpack.c.b16 %v615_v4, %v614_v0  ;;  %v410_v18 = vrot.slane %v409_v7, 4  ;;  %v585_v31 = vshrl.u32 %v202_v16, 16 }
  0x51   : > { %v500_v19 = vrot.slane %v498_v11, 5  ;;  %v405_v21 = vsel %vm6001_vm4, %v400_v12, %v404_v55  ;;  %v504_v23 = vrot.slane %v502_v14, 4  ;;  %v510_v25 = vrot.slane %v508_v15, 5  ;;  %v5403_v15 = vld [vmem:[%s5989_s27 + $0xc] sm:$0xf] }
  0x52   : > { %v495_v22 = vor.u32 %v494_v13, %v491_v10  ;;  %5163 = vmatmul.msk.bf16.gmra.mxu0 %vm658_vm5, %v644_v17  ;;  %v415_v27 = vsel %vm6001_vm4, %v410_v18, %v414_v59  ;;  %v624_v30 = vunpack.c.l.b16 %v405_v21  ;;  %v588_v32 = vshll.u32 %v202_v16, 16  ;;  %v1023_v10 = vld [vmem:[%s5989_s27] sm:$0xe]  ;;  %v5404_v21 = vld [vmem:[%s5989_s27 + $0x10] sm:$0xf] }
  0x53   : > { %v625_v34 = vunpack.c.l.b16 %v415_v27  ;;  %v505_v38 = vor.u32 %v504_v23, %v500_v19  ;;  %v594_v40 = vshll.u32 %v203_v20, 16  ;;  %v587_v41 = vrot.slane %v585_v31, 4 }
  0x54   : > { %v496_v36 = vrot.slane %v495_v22, 4  ;;  %v590_v42 = vrot.slane %v588_v32, 5  ;;  %v598_v43 = vshrl.u32 %v203_v20, 16  ;;  %v604_v44 = vshll.u32 %v220_v26, 16  ;;  %v5549_v20 = vld [vmem:[%s7597_s1 + $0xc] sm:$0x3] }
  0x55   : > { %v649_v46 = vpack.c.b16 %v625_v34, %v624_v30  ;;  %v506_v48 = vrot.slane %v505_v38, 4  ;;  %v596_v49 = vrot.slane %v594_v40, 5  ;;  %v1079_v51 = vrot.slane %v6017_v6, 5 }
  0x56   : > { %v501_v47 = vsel %vm6001_vm4, %v496_v36, %v500_v19  ;;  %v591_v54 = vor.u32 %v590_v42, %v587_v41  ;;  %v600_v55 = vrot.slane %v598_v43, 4  ;;  %v606_v58 = vrot.slane %v604_v44, 5 }
  0x57   : > { %v632_v53 = vunpack.c.l.b16 %v501_v47  ;;  %5168 = vmatmul.msk.bf16.gmra.mxu1 %vm658_vm5, %v649_v46  ;;  %v511_v57 = vsel %vm6001_vm4, %v506_v48, %v510_v25  ;;  %v297_v59 = vshrl.u32 %v178_v45, 16  ;;  %v300_v60 = vshll.u32 %v178_v45, 16  ;;  %v5405_v47 = vld [vmem:[%s5989_s27 + $0x14] sm:$0x1] }
  0x58   : > { %v633_v62 = vunpack.c.l.b16 %v511_v57  ;;  %v592_v63 = vrot.slane %v591_v54, 4  ;;  %v601_v0 = vor.u32 %v600_v55, %v596_v49  ;;  %v306_v6 = vshll.u32 %v6152_v50, 16  ;;  %v5678_v55 = vld [vmem:[%s7597_s1 + $0xe] sm:$0x3] }
  0x59   : > { %v299_v1 = vrot.slane %v297_v59, 4  ;;  %v302_v2 = vrot.slane %v300_v60, 5  ;;  %v310_v4 = vshrl.u32 %v6152_v50, 16  ;;  %v316_v7 = vshll.u32 %v6156_v56, 16  ;;  %v5500_v59 = vld [vmem:[%s7597_s1 + $0xa] sm:$0x3] }
  0x5a   : > { %v653_v11 = vpack.c.b16 %v633_v62, %v632_v53  ;;  %v597_v12 = vsel %vm6001_vm4, %v592_v63, %v596_v49  ;;  %v602_v13 = vrot.slane %v601_v0, 4  ;;  %v308_v14 = vrot.slane %v306_v6, 5  ;;  %v5811_v60 = vld [vmem:[%s5989_s27] sm:$0xff] }
  0x5b   : > { %v640_v16 = vunpack.c.l.b16 %v597_v12  ;;  %v303_v17 = vor.u32 %v302_v2, %v299_v1  ;;  %v312_v18 = vrot.slane %v310_v4, 4  ;;  %v318_v19 = vrot.slane %v316_v7, 5  ;;  %v5727_v1 = vld [vmem:[%s7597_s1 + $0x10] sm:$0x3] }
  0x5c   : > { %5172 = vmatmul.msk.bf16.gmra.mxu2 %vm658_vm5, %v653_v11  ;;  %v607_v22 = vsel %vm6001_vm4, %v602_v13, %v606_v58  ;;  %v5257_v23 = vrot.slane %v1023_v10, 9  ;;  %v1076_v31 = vrot.slane %v6014_v5, 5  ;;  %v2911_v32 = vand.u32 %v5549_v20, %v5964_v3 }
  0x5d   : > { %v641_v25 = vunpack.c.l.b16 %v607_v22  ;;  %v304_v26 = vrot.slane %v303_v17, 4  ;;  %v313_v27 = vor.u32 %v312_v18, %v308_v14  ;;  %v1744_v34 = vshrl.u32 %v5403_v15, 16  ;;  %v1024_v18 = vld [vmem:[%s5989_s27 + $0xc] sm:$0xe] }
  0x5e   : > { %v1747_v36 = vshll.u32 %v5403_v15, 16  ;;  %v1753_v38 = vshll.u32 %v5404_v21, 16  ;;  %v1077_v43 = vsel %vm6175_vm8, %v5257_v23, %v1076_v31  ;;  %v1078_v45 = vrot.slane %v1076_v31, 4  ;;  %2920 = vmatpush.bf16.msra.mxu2 %v2911_v32  ;;  %v5406_v15 = vld [vmem:[%s5989_s27 + $0x18] sm:$0xf] }
  0x5f   : > { %v657_v40 = vpack.c.b16 %v641_v25, %v640_v16  ;;  %v309_v41 = vsel %vm6001_vm4, %v304_v26, %v308_v14  ;;  %v314_v42 = vrot.slane %v313_v27, 4  ;;  %v1188_v46 = vunpack.c.l.b16 %v1077_v43  ;;  %v5407_v16 = vld [vmem:[%s5989_s27 + $0x1c] sm:$0xf]  ;;  %v5827_v25 = vld [vmem:[%s5989_s27 + $0xc] sm:$0xff] }
  0x60   : > { %v616_v44 = vunpack.c.l.b16 %v309_v41  ;;  %v1746_v5 = vrot.slane %v1744_v34, 4  ;;  %v1749_v49 = vrot.slane %v1747_v36, 5  ;;  %v1755_v53 = vrot.slane %v1753_v38, 5  ;;  %v5408_v41 = vld [vmem:[%s5989_s27 + $0x20] sm:$0x1] }
  0x61   : > { %5176 = vmatmul.msk.bf16.gmra.mxu3 %vm658_vm5, %v657_v40  ;;  %v319_v48 = vsel %vm6001_vm4, %v314_v42, %v318_v19  ;;  %v1757_v54 = vshrl.u32 %v5404_v21, 16  ;;  %v1080_v58 = vsel %vm6175_vm8, %v1078_v45, %v1079_v51  ;;  %v1763_v6 = vshll.u32 %v5405_v47, 16  ;;  %v5812_v45 = vld [vmem:[%s5989_s27 + $0xc] sm:$0xff] }
  0x62   : > { %v617_v57 = vunpack.c.l.b16 %v319_v48  ;;  %v1189_v62 = vunpack.c.l.b16 %v1080_v58  ;;  %v1750_v63 = vor.u32 %v1749_v49, %v1746_v5  ;;  %v3565_v4 = vand.u32 %v5678_v55, %v5964_v3 }
  0x63   : > { %v1759_v0 = vrot.slane %v1757_v54, 4  ;;  %v2624_v10 = vand.u32 %v5500_v59, %v5964_v3  ;;  %v3963_v11 = vand.u32 %v5727_v1, %v5964_v3  ;;  %v1765_v14 = vrot.slane %v1763_v6, 5  ;;  %v1025_v59 = vld [vmem:[%s5989_s27 + $0x18] sm:$0xe] }
  0x64   : > { %v645_v2 = vpack.c.b16 %v617_v57, %v616_v44  ;;  %v1220_v51 = vpack.c.b16 %v1189_v62, %v1188_v46  ;;  %3574 = vmatpush.bf16.msra.mxu3 %v3565_v4  ;;  %v1751_v12 = vrot.slane %v1750_v63, 4  ;;  %v1083_v17 = vrot.slane %v6060_v33, 5  ;;  %v5410_v57 = vld [vmem:[%s5989_s27 + $0x28] sm:$0xf] }
  0x65   : > { %v1760_v7 = vor.u32 %v1759_v0, %v1755_v53  ;;  %2633 = vmatpush.bf16.msra.mxu1 %v2624_v10  ;;  %3972 = vmatpush.bf16.msra.mxu0 %v3963_v11  ;;  %v1768_v19 = vshrl.u32 %v5406_v15, 16  ;;  %v1771_v20 = vshll.u32 %v5406_v15, 16  ;;  %v1777_v22 = vshll.u32 %v5407_v16, 16 }
  0x66   : > { %5164 = vmatmul.msk.bf16.gmra.mxu0 %vm658_vm5, %v645_v2  ;;  %v1756_v21 = vsel %vm6001_vm4, %v1751_v12, %v1755_v53  ;;  %v1781_v23 = vshrl.u32 %v5407_v16, 16  ;;  %v5258_v26 = vrot.slane %v1024_v18, 9  ;;  %v1085_v27 = vrot.slane %v1083_v17, 4  ;;  %v5409_v53 = vld [vmem:[%s5989_s27 + $0x24] sm:$0xf] }
  0x67   : > { %5241 = vmatmul.msk.bf16.vlgmr.msrb.gmra.mxu1 %vm658_vm5, %v5811_v60  ;;  %v1761_v13 = vrot.slane %v1760_v7, 4  ;;  %v1086_v33 = vrot.slane %v6063_v37, 5  ;;  %v2129_v31 = vunpack.c.l.b16 %v1756_v21  ;;  %v1770_v34 = vrot.slane %v1768_v19, 4  ;;  %v5411_v16 = vld [vmem:[%s5989_s27 + $0x2c] sm:$0x1] }
  0x68   : > { %v1773_v36 = vrot.slane %v1771_v20, 5  ;;  %v1779_v38 = vrot.slane %v1777_v22, 5  ;;  %v1783_v40 = vrot.slane %v1781_v23, 4  ;;  %v1084_v42 = vsel %vm6175_vm8, %v5258_v26, %v1083_v17 }
  0x69   : > { %v1766_v3 = vsel %vm6001_vm4, %v1761_v13, %v1765_v14  ;;  %v1087_v43 = vsel %vm6175_vm8, %v1085_v27, %v1086_v33  ;;  %v1787_v47 = vshll.u32 %v5408_v41, 16  ;;  %v1190_v5 = vunpack.c.l.b16 %v1084_v42 }
  0x6a   : > { %v2130_v32 = vunpack.c.l.b16 %v1766_v3  ;;  %v1774_v37 = vor.u32 %v1773_v36, %v1770_v34  ;;  %v1784_v46 = vor.u32 %v1783_v40, %v1779_v38  ;;  %v1191_v48 = vunpack.c.l.b16 %v1087_v43  ;;  %v5813_v3 = vld [vmem:[%s5989_s27 + $0x18] sm:$0xff]  ;;  %v1026_v40 = vld [vmem:[%s5989_s27 + $0x24] sm:$0xe] }
  0x6b   : > { %v1789_v55 = vrot.slane %v1787_v47, 5  ;;  %v1090_v60 = vrot.slane %v6106_v8, 5  ;;  %v1792_v62 = vshrl.u32 %v5409_v53, 16  ;;  %v1795_v0 = vshll.u32 %v5409_v53, 16 }
  0x6c   : > { %5274 = vmatmul.msk.bf16.vlgmr.msrb.gmra.mxu2 %vm658_vm5, %v1220_v51  ;;  %v2161_v44 = vpack.c.b16 %v2130_v32, %v2129_v31  ;;  %v1775_v49 = vrot.slane %v1774_v37, 4  ;;  %v1785_v54 = vrot.slane %v1784_v46, 4  ;;  %v1221_v58 = vpack.c.b16 %v1191_v48, %v1190_v5  ;;  %v5828_v51 = vld [vmem:[%s5989_s27 + $0x18] sm:$0xff]  ;;  %v5412_v31 = vld [vmem:[%s5989_s27 + $0x30] sm:$0xf]  ;;  %v5829_v37 = vld [vmem:[%s5989_s27 + $0x24] sm:$0xff] }
  0x6d   : > { %v1801_v6 = vshll.u32 %v5410_v57, 16  ;;  %v1805_v1 = vshrl.u32 %v5410_v57, 16  ;;  %v5259_v4 = vrot.slane %v1025_v59, 9  ;;  %v1092_v10 = vrot.slane %v1090_v60, 4  ;;  %v5413_v32 = vld [vmem:[%s5989_s27 + $0x34] sm:$0xf] }
  0x6e   : > { %v1780_v63 = vsel %vm6001_vm4, %v1775_v49, %v1779_v38  ;;  %v1790_v2 = vsel %vm6001_vm4, %v1785_v54, %v1789_v55  ;;  %v1093_v8 = vrot.slane %v6109_v9, 5  ;;  %v1794_v11 = vrot.slane %v1792_v62, 4  ;;  %v5414_v55 = vld [vmem:[%s5989_s27 + $0x38] sm:$0x1] }
  0x6f   : > { %v2131_v7 = vunpack.c.l.b16 %v1780_v63  ;;  %v2132_v12 = vunpack.c.l.b16 %v1790_v2  ;;  %v1797_v13 = vrot.slane %v1795_v0, 5  ;;  %v1803_v14 = vrot.slane %v1801_v6, 5  ;;  %v5416_v2 = vld [vmem:[%s5989_s27 + $0x40] sm:$0xf] }
  0x70   : > { %v1807_v15 = vrot.slane %v1805_v1, 4  ;;  %v1091_v17 = vsel %vm6175_vm8, %v5259_v4, %v1090_v60  ;;  %v1094_v18 = vsel %vm6175_vm8, %v1092_v10, %v1093_v8  ;;  %v1811_v9 = vshll.u32 %v5411_v16, 16  ;;  %v5415_v1 = vld [vmem:[%s5989_s27 + $0x3c] sm:$0xf]  ;;  %v5873_v8 = vld [vmem:[%s5989_s27 + $0x34] sm:$0xf] }
  0x71   : > { %5387 = vmatmul.msk.bf16.vlgmr.msrb.gmra.mxu3 %vm658_vm5, %v5827_v25  ;;  %v2162_v19 = vpack.c.b16 %v2132_v12, %v2131_v7  ;;  %v1798_v20 = vor.u32 %v1797_v13, %v1794_v11  ;;  %v1192_v22 = vunpack.c.l.b16 %v1091_v17  ;;  %v1193_v23 = vunpack.c.l.b16 %v1094_v18  ;;  %v1027_v12 = vld [vmem:[%s5989_s27 + $0x30] sm:$0xe] }
  0x72   : > { %v1808_v21 = vor.u32 %v1807_v15, %v1803_v14  ;;  %v1813_v27 = vrot.slane %v1811_v9, 5  ;;  %v1097_v34 = vrot.slane %v6152_v50, 5  ;;  %v1816_v41 = vshrl.u32 %v5412_v31, 16  ;;  %v5874_v9 = vld [vmem:[%s5989_s27 + $0x38] sm:$0x1] }
  0x73   : > { %v1799_v25 = vrot.slane %v1798_v20, 4  ;;  %v1222_v33 = vpack.c.b16 %v1193_v23, %v1192_v22  ;;  %v1819_v42 = vshll.u32 %v5412_v31, 16  ;;  %v1825_v43 = vshll.u32 %v5413_v32, 16  ;;  %v5830_v22 = vld [vmem:[%s5989_s27 + $0x30] sm:$0xff] }
  0x74   : > { %v1809_v26 = vrot.slane %v1808_v21, 4  ;;  %v1099_v46 = vrot.slane %v1097_v34, 4  ;;  %v1100_v50 = vrot.slane %v6156_v56, 5  ;;  %v1818_v48 = vrot.slane %v1816_v41, 4  ;;  %v5814_v56 = vld [vmem:[%s5989_s27 + $0x24] sm:$0xff] }
  0x75   : > { %v1804_v36 = vsel %vm6001_vm4, %v1799_v25, %v1803_v14  ;;  %v1821_v49 = vrot.slane %v1819_v42, 5  ;;  %v1827_v53 = vrot.slane %v1825_v43, 5  ;;  %v1835_v63 = vshll.u32 %v5414_v55, 16  ;;  %v5815_v43 = vld [vmem:[%s5989_s27 + $0x30] sm:$0xff] }
  0x76   : > { %5452 = vmatmul.msk.bf16.vlgmr.msrb.gmra.mxu0 %vm658_vm5, %v2161_v44  ;;  %v1814_v38 = vsel %vm6001_vm4, %v1809_v26, %v1813_v27  ;;  %v1829_v44 = vshrl.u32 %v5413_v32, 16  ;;  %v2133_v47 = vunpack.c.l.b16 %v1804_v36  ;;  %v1104_v11 = vrot.slane %v5873_v8, 5  ;;  %v5417_v32 = vld [vmem:[%s5989_s27 + $0x44] sm:$0x1] }
  0x77   : > { %5242 = vmatmul.msk.bf16.gmra.mxu1 %vm658_vm5, %v5812_v45  ;;  %v5260_v45 = vrot.slane %v1026_v40, 9  ;;  %v2134_v5 = vunpack.c.l.b16 %v1814_v38  ;;  %v1822_v60 = vor.u32 %v1821_v49, %v1818_v48  ;;  %v1837_v7 = vrot.slane %v1835_v63, 5  ;;  %v5418_v48 = vld [vmem:[%s5989_s27 + $0x48] sm:$0xf]  ;;  %v5419_v49 = vld [vmem:[%s5989_s27 + $0x4c] sm:$0xf] }
  0x78   : > { %v1831_v54 = vrot.slane %v1829_v44, 4  ;;  %v1840_v13 = vshrl.u32 %v5415_v1, 16  ;;  %v1843_v14 = vshll.u32 %v5415_v1, 16  ;;  %v1849_v15 = vshll.u32 %v5416_v2, 16  ;;  %v5831_v1 = vld [vmem:[%s5989_s27 + $0x3c] sm:$0xff] }
  0x79   : > { %v1098_v57 = vsel %vm6175_vm8, %v5260_v45, %v1097_v34  ;;  %v2163_v59 = vpack.c.b16 %v2134_v5, %v2133_v47  ;;  %v1823_v4 = vrot.slane %v1822_v60, 4  ;;  %v1853_v16 = vshrl.u32 %v5416_v2, 16 }
  0x7a   : > { %v1832_v62 = vor.u32 %v1831_v54, %v1827_v53  ;;  %v1194_v0 = vunpack.c.l.b16 %v1098_v57  ;;  %v5261_v20 = vrot.slane %v1027_v12, 9  ;;  %v1106_v21 = vrot.slane %v1104_v11, 4 }
  0x7b   : > { %v1828_v18 = vsel %vm6001_vm4, %v1823_v4, %v1827_v53  ;;  %v1842_v23 = vrot.slane %v1840_v13, 4  ;;  %v1845_v25 = vrot.slane %v1843_v14, 5  ;;  %v1851_v26 = vrot.slane %v1849_v15, 5  ;;  %v5420_v14 = vld [vmem:[%s5989_s27 + $0x50] sm:$0x1] }
  0x7c   : > { %5275 = vmatmul.msk.bf16.gmra.mxu2 %vm658_vm5, %v1221_v58  ;;  %v1101_v58 = vsel %vm6175_vm8, %v1099_v46, %v1100_v50  ;;  %v1855_v27 = vrot.slane %v1853_v16, 4  ;;  %v1105_v34 = vsel %vm6175_vm8, %v5261_v20, %v1104_v11  ;;  %v1859_v41 = vshll.u32 %v5417_v32, 16 }
  0x7d   : > { %v1195_v6 = vunpack.c.l.b16 %v1101_v58  ;;  %v1846_v38 = vor.u32 %v1845_v25, %v1842_v23  ;;  %v1864_v60 = vshrl.u32 %v5418_v48, 16  ;;  %v1873_v63 = vshll.u32 %v5419_v49, 16 }
  0x7e   : > { %v1856_v40 = vor.u32 %v1855_v27, %v1851_v26  ;;  %v1861_v5 = vrot.slane %v1859_v41, 5  ;;  %vm4964_vm12 = vcmask 1044484   ;;  %vm4967_vm13 = vcmask 1045509  }
  0x7f   : > { %v1223_v10 = vpack.c.b16 %v1195_v6, %v1194_v0  ;;  %v1847_v50 = vrot.slane %v1846_v38, 4  ;;  %v1877_v0 = vshrl.u32 %v5419_v49, 16  ;;  %v1875_v12 = vrot.slane %v1873_v63, 5 }
  0x80   : > { %v1857_v47 = vrot.slane %v1856_v40, 4  ;;  %v1118_v38 = vrot.slane %v6073_v52, 5  ;;  %vm4970_vm14 = vcmask 1046534   ;;  %vm4973_vm15 = vcmask 1047559  }
  0x81   : > { %5388 = vmatmul.msk.bf16.gmra.mxu3 %vm658_vm5, %v5828_v51  ;;  %v1833_v51 = vrot.slane %v1832_v62, 4  ;;  %v1852_v55 = vsel %vm6001_vm4, %v1847_v50, %v1851_v26  ;;  %v1867_v62 = vshll.u32 %v5418_v48, 16  ;;  %v1879_v13 = vrot.slane %v1877_v0, 4  ;;  %v5423_v0 = vld [vmem:[%s5989_s27 + $0x5c] sm:$0x1] }
  0x82   : > { %v1862_v57 = vsel %vm6001_vm4, %v1857_v47, %v1861_v5  ;;  %v2137_v6 = vunpack.c.l.b16 %v1852_v55  ;;  %v5832_v5 = vld [vmem:[%s5989_s27 + $0x48] sm:$0xff]  ;;  %v1120_v49 = vrot.slane %v1118_v38, 4 }
  0x83   : > { %v2138_v2 = vunpack.c.l.b16 %v1862_v57  ;;  %v1869_v11 = vrot.slane %v1867_v62, 5  ;;  %v1880_v20 = vor.u32 %v1879_v13, %v1875_v12 }
  0x85   : > { %v1881_v26 = vrot.slane %v1880_v20, 4 }
  0x86   : > { %5453 = vmatmul.msk.bf16.gmra.mxu0 %vm658_vm5, %v2162_v19  ;;  %v1838_v19 = vsel %vm6001_vm4, %v1833_v51, %v1837_v7 }
  0x87   : > { %5243 = vmatmul.msk.bf16.gmra.mxu1 %vm658_vm5, %v5813_v3  ;;  %v1107_v3 = vrot.slane %v5874_v9, 5  ;;  %v2136_v31 = vunpack.c.l.b16 %v1838_v19 }
  0x89   : > { %v1108_v36 = vsel %vm6175_vm8, %v1106_v21, %v1107_v3  ;;  %v1883_v21 = vshll.u32 %v5420_v14, 16  ;;  %v5816_v3 = vld [vmem:[%s5989_s27 + $0x3c] sm:$0xff] }
  0x8a   : > { %v1197_v45 = vunpack.c.l.b16 %v1108_v36  ;;  %v5422_v36 = vld [vmem:[%s5989_s27 + $0x58] sm:$0xf]  ;;  %v5424_v14 = vld [vmem:[%s5989_s27 + $0x60] sm:$0xf] }
  0x8b   : > { %v1885_v27 = vrot.slane %v1883_v21, 5  ;;  %v1901_v50 = vshrl.u32 %v5422_v36, 16 }
  0x8c   : > { %5276 = vmatmul.msk.bf16.gmra.mxu2 %vm658_vm5, %v1222_v33  ;;  %v2135_v33 = vunpack.c.l.b16 %v1828_v18  ;;  %v2165_v18 = vpack.c.b16 %v2138_v2, %v2137_v6 }
  0x8d   : > { %v1886_v41 = vsel %vm6001_vm4, %v1881_v26, %v1885_v27  ;;  %v1903_v62 = vrot.slane %v1901_v50, 4 }
  0x8e   : > { %v2164_v42 = vpack.c.b16 %v2136_v31, %v2135_v33  ;;  %v2140_v57 = vunpack.c.l.b16 %v1886_v41 }
  0x91   : > { %5389 = vmatmul.msk.bf16.gmra.mxu3 %vm658_vm5, %v5829_v37  ;;  %v1196_v37 = vunpack.c.l.b16 %v1105_v34  ;;  %v5421_v34 = vld [vmem:[%s5989_s27 + $0x54] sm:$0xf] }
  0x93   : > { %v1224_v54 = vpack.c.b16 %v1197_v45, %v1196_v37  ;;  %v1891_v37 = vshll.u32 %v5421_v34, 16  ;;  %v1897_v45 = vshll.u32 %v5422_v36, 16 }
  0x96   : > { %5454 = vmatmul.msk.bf16.gmra.mxu0 %vm658_vm5, %v2163_v59  ;;  %v1111_v59 = vrot.slane %v6029_v24, 5  ;;  %v1866_v24 = vrot.slane %v1864_v60, 4  ;;  %v1899_v60 = vrot.slane %v1897_v45, 5  ;;  %v1128_v45 = vrot.slane %v6124_v35, 5 }
  0x97   : > { %5244 = vmatmul.msk.bf16.gmra.mxu1 %vm658_vm5, %v5814_v56  ;;  %v1028_v56 = vld [vmem:[%s5989_s27 + $0x3c] sm:$0xe] }
  0x98   : > { %v5262_v51 = vrot.slane %v1028_v56, 9  ;;  %v1113_v7 = vrot.slane %v1111_v59, 4  ;;  %v1893_v56 = vrot.slane %v1891_v37, 5 }
  0x9a   : > { %v1112_v15 = vsel %vm6175_vm8, %v5262_v51, %v1111_v59  ;;  %v5817_v51 = vld [vmem:[%s5989_s27 + $0x48] sm:$0xff] }
  0x9c   : > { %v6270_v17 = vpop.f32.mrf.mxu1  ;;  %5277 = vmatmul.msk.bf16.gmra.mxu2 %vm658_vm5, %v1223_v10  ;;  %v1114_v10 = vrot.slane %v6034_v29, 5  ;;  %v1870_v29 = vor.u32 %v1869_v11, %v1866_v24  ;;  %v1907_v24 = vshll.u32 %v5423_v0, 16  ;;  %v5818_v0 = vld [vmem:[%s5989_s27 + $0x54] sm:$0xff] }
  0x9e   : > { %v1115_v16 = vsel %vm6175_vm8, %v1113_v7, %v1114_v10  ;;  %v1871_v25 = vrot.slane %v1870_v29, 4  ;;  %v1904_v10 = vor.u32 %v1903_v62, %v1899_v60  ;;  %v1909_v20 = vrot.slane %v1907_v24, 5 }
  0x9f   : > { %v1199_v23 = vunpack.c.l.b16 %v1115_v16 }
  0xa0   : > { %v1876_v40 = vsel %vm6001_vm4, %v1871_v25, %v1875_v12  ;;  %v1905_v29 = vrot.slane %v1904_v10, 4  ;;  %v1125_v25 = vrot.slane %v6119_v28, 5 }
  0xa1   : > { %5390 = vmatmul.msk.bf16.gmra.mxu3 %vm658_vm5, %v5830_v22  ;;  %v1198_v22 = vunpack.c.l.b16 %v1112_v15  ;;  %v2139_v55 = vunpack.c.l.b16 %v1876_v40  ;;  %v5425_v15 = vld [vmem:[%s5989_s27 + $0x64] sm:$0xf] }
  0xa2   : > { %v1925_v26 = vshrl.u32 %v5425_v15, 16  ;;  %v1910_v36 = vsel %vm6001_vm4, %v1905_v29, %v1909_v20  ;;  %v1127_v37 = vrot.slane %v1125_v25, 4  ;;  %v5875_v20 = vld [vmem:[%s5989_s27 + $0x64] sm:$0xf] }
  0xa3   : > { %v1225_v31 = vpack.c.b16 %v1199_v23, %v1198_v22  ;;  %v2166_v2 = vpack.c.b16 %v2140_v57, %v2139_v55  ;;  %v1915_v22 = vshll.u32 %v5424_v14, 16  ;;  %v1921_v23 = vshll.u32 %v5425_v15, 16 }
  0xa4   : > { %v6286_v44 = vpop.f32.mrf.mxu1  ;;  %v1927_v50 = vrot.slane %v1925_v26, 4 }
  0xa5   : > { %v1917_v41 = vrot.slane %v1915_v22, 5  ;;  %v1031_v22 = vld [vmem:[%s5989_s27 + $0x60] sm:$0xe] }
  0xa6   : > { %v6288_v46 = vpop.f32.mrf.mxu2  ;;  %5455 = vmatmul.msk.bf16.gmra.mxu0 %vm658_vm5, %v2164_v42  ;;  %v1029_v42 = vld [vmem:[%s5989_s27 + $0x48] sm:$0xe] }
  0xa7   : > { %5245 = vmatmul.msk.bf16.gmra.mxu1 %vm658_vm5, %v5815_v43  ;;  %v1888_v43 = vshrl.u32 %v5421_v34, 16  ;;  %v5263_v52 = vrot.slane %v1029_v42, 9  ;;  %v1923_v42 = vrot.slane %v1921_v23, 5 }
  0xa9   : > { %v6294_v53 = vpop.f32.mrf.mxu0  ;;  %v1890_v59 = vrot.slane %v1888_v43, 4  ;;  %v5833_v43 = vld [vmem:[%s5989_s27 + $0x54] sm:$0xff]  ;;  %v1928_v35 = vor.u32 %v1927_v50, %v1923_v42 }
  0xaa   : > { %v6300_v58 = vpop.f32.mrf.mxu3 }
  0xab   : > { %v1894_v7 = vor.u32 %v1893_v56, %v1890_v59  ;;  %v1129_v56 = vsel %vm6175_vm8, %v1127_v37, %v1128_v45  ;;  %v1929_v10 = vrot.slane %v1928_v35, 4 }
  0xac   : > { %5278 = vmatmul.msk.bf16.gmra.mxu2 %vm658_vm5, %v1224_v54  ;;  %v1121_v54 = vrot.slane %v6078_v61, 5 }
  0xae   : > { %v6306_v4 = vpop.f32.mrf.mxu1  ;;  %v6309_v8 = vpop.f32.mrf.mxu2  ;;  %v1122_v61 = vsel %vm6175_vm8, %v1120_v49, %v1121_v54  ;;  %v5426_v49 = vld [vmem:[%s5989_s27 + $0x68] sm:$0x1] }
  0xaf   : > { %v1201_v12 = vunpack.c.l.b16 %v1122_v61 }
  0xb1   : > { %5391 = vmatmul.msk.bf16.gmra.mxu3 %vm658_vm5, %v5831_v1  ;;  %v6317_v19 = vpop.f32.mrf.mxu0  ;;  %v1119_v1 = vsel %vm6175_vm8, %v5263_v52, %v1118_v38  ;;  %v2142_v52 = vunpack.c.l.b16 %v1910_v36 }
  0xb2   : > { %v6319_v9 = vpop.f32.mrf.mxu3  ;;  %v1200_v11 = vunpack.c.l.b16 %v1119_v1 }
  0xb4   : > { %v1226_v21 = vpack.c.b16 %v1201_v12, %v1200_v11  ;;  %v5427_v11 = vld [vmem:[%s5989_s27 + $0x6c] sm:$0xf]  ;;  %v5428_v12 = vld [vmem:[%s5989_s27 + $0x70] sm:$0xf] }
  0xb5   : > { %v1936_v23 = vshrl.u32 %v5427_v11, 16  ;;  %v1945_v26 = vshll.u32 %v5428_v12, 16 }
  0xb6   : > { %5456 = vmatmul.msk.bf16.gmra.mxu0 %vm658_vm5, %v2165_v18  ;;  %v6323_v33 = vpop.f32.mrf.mxu1  ;;  %v1895_v18 = vrot.slane %v1894_v7, 4 }
  0xb7   : > { %5246 = vmatmul.msk.bf16.gmra.mxu1 %vm658_vm5, %v5816_v3  ;;  %v1912_v3 = vshrl.u32 %v5424_v14, 16  ;;  %v1938_v45 = vrot.slane %v1936_v23, 4  ;;  %v5431_v23 = vld [vmem:[%s5989_s27 + $0x7c] sm:$0xf] }
  0xb8   : > { %v1900_v34 = vsel %vm6001_vm4, %v1895_v18, %v1899_v60  ;;  %v1931_v60 = vshll.u32 %v5426_v49, 16 }
  0xb9   : > { %v6326_v32 = vpop.f32.mrf.mxu2  ;;  %v1914_v40 = vrot.slane %v1912_v3, 4 }
  0xba   : > { %v1933_v24 = vrot.slane %v1931_v60, 5 }
  0xbb   : > { %v1918_v57 = vor.u32 %v1917_v41, %v1914_v40  ;;  %v5834_v41 = vld [vmem:[%s5989_s27 + $0x60] sm:$0xff] }
  0xbc   : > { %5279 = vmatmul.msk.bf16.gmra.mxu2 %vm658_vm5, %v1225_v31  ;;  %v1030_v31 = vld [vmem:[%s5989_s27 + $0x54] sm:$0xe]  ;;  %v1934_v29 = vsel %vm6001_vm4, %v1929_v10, %v1933_v24 }
  0xbd   : > { %v6336_v47 = vpop.f32.mrf.mxu0  ;;  %v5264_v28 = vrot.slane %v1030_v31, 9  ;;  %v1919_v7 = vrot.slane %v1918_v57, 4  ;;  %v1949_v31 = vshrl.u32 %v5428_v12, 16  ;;  %v5429_v57 = vld [vmem:[%s5989_s27 + $0x74] sm:$0x1] }
  0xbe   : > { %v6340_v48 = vpop.f32.mrf.mxu3 }
  0xbf   : > { %v1126_v59 = vsel %vm6175_vm8, %v5264_v28, %v1125_v25  ;;  %v1924_v18 = vsel %vm6001_vm4, %v1919_v7, %v1923_v42  ;;  %v1939_v25 = vshll.u32 %v5427_v11, 16  ;;  %v5265_v28 = vrot.slane %v1031_v22, 9  ;;  %v5430_v22 = vld [vmem:[%s5989_s27 + $0x78] sm:$0xf] }
  0xc0   : > { %v6343_v63 = vpop.f32.mrf.mxu1  ;;  %v1202_v61 = vunpack.c.l.b16 %v1126_v59  ;;  %v2143_v42 = vunpack.c.l.b16 %v1924_v18 }
  0xc1   : > { %5392 = vmatmul.msk.bf16.gmra.mxu3 %vm658_vm5, %v5832_v5  ;;  %v6347_v6 = vpop.f32.mrf.mxu2  ;;  %v2141_v5 = vunpack.c.l.b16 %v1900_v34  ;;  %v5876_v34 = vld [vmem:[%s5989_s27 + $0x68] sm:$0x1]  ;;  %v1941_v50 = vrot.slane %v1939_v25, 5  ;;  %v5877_v25 = vld [vmem:[%s5989_s27 + $0x70] sm:$0xf] }
  0xc2   : > { %v1135_v36 = vrot.slane %v5876_v34, 5  ;;  %v1032_v34 = vld [vmem:[%s5989_s27 + $0x6c] sm:$0xe] }
  0xc3   : > { %v2167_v62 = vpack.c.b16 %v2142_v52, %v2141_v5  ;;  %v1947_v5 = vrot.slane %v1945_v26, 5  ;;  %v1951_v52 = vrot.slane %v1949_v31, 4  ;;  %v1942_v60 = vor.u32 %v1941_v50, %v1938_v45  ;;  %v5878_v50 = vld [vmem:[%s5989_s27 + $0x74] sm:$0x1] }
  0xc4   : > { %v1139_v26 = vrot.slane %v5877_v25, 5 }
  0xc5   : > { %v6354_v13 = vpop.f32.mrf.mxu0 }
  0xc6   : > { %5457 = vmatmul.msk.bf16.gmra.mxu0 %vm658_vm5, %v2166_v2  ;;  %v6359_v16 = vpop.f32.mrf.mxu3  ;;  %v1203_v2 = vunpack.c.l.b16 %v1129_v56 }
  0xc7   : > { %5247 = vmatmul.msk.bf16.gmra.mxu1 %vm658_vm5, %v5817_v51 }
  0xc8   : > { %v6363_v27 = vpop.f32.mrf.mxu1  ;;  %v1227_v14 = vpack.c.b16 %v1203_v2, %v1202_v61  ;;  %v5819_v2 = vld [vmem:[%s5989_s27 + $0x60] sm:$0xff] }
  0xcc   : > { %v6370_v38 = vpop.f32.mrf.mxu2  ;;  %5280 = vmatmul.msk.bf16.gmra.mxu2 %vm658_vm5, %v1226_v21  ;;  %v1132_v21 = vrot.slane %v5875_v20, 5 }
  0xce   : > { %v1134_v37 = vrot.slane %v1132_v21, 4  ;;  %v1133_v59 = vsel %vm6175_vm8, %v5265_v28, %v1132_v21  ;;  %v1973_v28 = vshrl.u32 %v5431_v23, 16 }
  0xcf   : > { %v6376_v54 = vpop.f32.mrf.mxu0  ;;  %v1204_v24 = vunpack.c.l.b16 %v1133_v59  ;;  %v5266_v59 = vrot.slane %v1032_v34, 9 }
  0xd0   : > { %v6378_v55 = vpop.f32.mrf.mxu3  ;;  %v1136_v56 = vsel %vm6175_vm8, %v1134_v37, %v1135_v36 }
  0xd1   : > { %5393 = vmatmul.msk.bf16.gmra.mxu3 %vm658_vm5, %v5833_v43  ;;  %v2144_v43 = vunpack.c.l.b16 %v1934_v29  ;;  %v1205_v11 = vunpack.c.l.b16 %v1136_v56  ;;  %v1141_v56 = vrot.slane %v1139_v26, 4 }
  0xd3   : > { %v2168_v35 = vpack.c.b16 %v2144_v43, %v2143_v42  ;;  %v1228_v21 = vpack.c.b16 %v1205_v11, %v1204_v24  ;;  %v1963_v42 = vshll.u32 %v5430_v22, 16  ;;  %v1969_v43 = vshll.u32 %v5431_v23, 16 }
  0xd4   : > { %v6386_v1 = vpop.f32.mrf.mxu1  ;;  %v6388_v51 = vpop.f32.mrf.mxu2  ;;  %v1975_v24 = vrot.slane %v1973_v28, 4 }
  0xd6   : > { %5458 = vmatmul.msk.bf16.gmra.mxu0 %vm658_vm5, %v2167_v62  ;;  %v1952_v62 = vor.u32 %v1951_v52, %v1947_v5  ;;  %v1142_v52 = vrot.slane %v5878_v50, 5 }
  0xd7   : > { %5248 = vmatmul.msk.bf16.gmra.mxu1 %vm658_vm5, %v5818_v0  ;;  %v6394_v15 = vpop.f32.mrf.mxu0  ;;  %v1955_v0 = vshll.u32 %v5429_v57, 16  ;;  %v5835_v57 = vld [vmem:[%s5989_s27 + $0x6c] sm:$0xff] }
  0xd8   : > { %v6401_v3 = vpop.f32.mrf.mxu3  ;;  %v1953_v18 = vrot.slane %v1952_v62, 4 }
  0xd9   : > { %v1957_v29 = vrot.slane %v1955_v0, 5 }
  0xdc   : > { %5281 = vmatmul.msk.bf16.gmra.mxu2 %vm658_vm5, %v1227_v14  ;;  %v6406_v40 = vpop.f32.mrf.mxu1  ;;  %v1943_v14 = vrot.slane %v1942_v60, 4 }
  0xde   : > { %v1948_v31 = vsel %vm6001_vm4, %v1943_v14, %v1947_v5  ;;  %v5432_v14 = vld [vmem:[%s5989_s27 + $0x80] sm:$0x1] }
  0xdf   : > { %v6409_v49 = vpop.f32.mrf.mxu2 }
  0xe1   : > { %5394 = vmatmul.msk.bf16.gmra.mxu3 %vm658_vm5, %v5834_v41  ;;  %v1960_v41 = vshrl.u32 %v5430_v22, 16  ;;  %v5820_v22 = vld [vmem:[%s5989_s27 + $0x6c] sm:$0xff] }
  0xe3   : > { %v6417_v61 = vpop.f32.mrf.mxu0  ;;  %v1962_v0 = vrot.slane %v1960_v41, 4 }
  0xe4   : > { %v6420_v7 = vpop.f32.mrf.mxu3  ;;  %v943_v10 = vpop.f32.mrf.mxu1 }
  0xe5   : > { %v944_v12 = vadd.f32 %v943_v10, %v6294_v53  ;;  %v1958_v53 = vsel %vm6001_vm4, %v1953_v18, %v1957_v29  ;;  %v1971_v10 = vrot.slane %v1969_v43, 5  ;;  %v1140_v18 = vsel %vm6175_vm8, %v5266_v59, %v1139_v26 }
  0xe6   : > { %5459 = vmatmul.msk.bf16.gmra.mxu0 %vm658_vm5, %v2168_v35  ;;  %v2145_v35 = vunpack.c.l.b16 %v1948_v31  ;;  %v2146_v60 = vunpack.c.l.b16 %v1958_v53  ;;  %v1979_v31 = vshll.u32 %v5432_v14, 16 }
  0xe7   : > { %v6424_v20 = vpop.f32.mrf.mxu2  ;;  %5249 = vmatmul.msk.bf16.gmra.mxu1 %vm658_vm5, %v5819_v2  ;;  %v1965_v2 = vrot.slane %v1963_v42, 5  ;;  %v1976_v25 = vor.u32 %v1975_v24, %v1971_v10 }
  0xe8   : > { %v2169_v29 = vpack.c.b16 %v2146_v60, %v2145_v35  ;;  %v1981_v50 = vrot.slane %v1979_v31, 5  ;;  %v5434_v35 = vld [vmem:[%s5989_s27 + $0x88] sm:$0xf]  ;;  %v5879_v60 = vld [vmem:[%s5989_s27 + $0x7c] sm:$0xf] }
  0xe9   : > { %v1966_v23 = vor.u32 %v1965_v2, %v1962_v0  ;;  %v1033_v0 = vld [vmem:[%s5989_s27 + $0x78] sm:$0xe] }
  0xeb   : > { %v6435_v36 = vpop.f32.mrf.mxu0  ;;  %v1967_v28 = vrot.slane %v1966_v23, 4 }
  0xec   : > { %v6437_v37 = vpop.f32.mrf.mxu3  ;;  %5282 = vmatmul.msk.bf16.gmra.mxu2 %vm658_vm5, %v1228_v21  ;;  %v945_v45 = vpop.f32.mrf.mxu1 }
  0xed   : > { %v946_v5 = vadd.f32 %v945_v45, %v6317_v19  ;;  %v1143_v19 = vsel %vm6175_vm8, %v1141_v56, %v1142_v52  ;;  %v1977_v45 = vrot.slane %v1976_v25, 4  ;;  %v5433_v52 = vld [vmem:[%s5989_s27 + $0x84] sm:$0xf]  ;;  %v5836_v25 = vld [vmem:[%s5989_s27 + $0x78] sm:$0xff] }
  0xee   : > { %v1207_v41 = vunpack.c.l.b16 %v1143_v19  ;;  %v1987_v2 = vshll.u32 %v5433_v52, 16  ;;  %v1997_v19 = vshrl.u32 %v5434_v35, 16 }
  0xef   : > { %v1296_v62 = vpop.f32.mrf.mxu2  ;;  %v1982_v14 = vsel %vm6001_vm4, %v1977_v45, %v1981_v50 }
  0xf0   : > { %v1376_v11 = vadd.f32 %v1296_v62, %v944_v12  ;;  %v1206_v12 = vunpack.c.l.b16 %v1140_v18  ;;  %v1146_v62 = vrot.slane %v5879_v60, 5  ;;  %v1993_v18 = vshll.u32 %v5434_v35, 16 }
  0xf1   : > { %5395 = vmatmul.msk.bf16.gmra.mxu3 %vm658_vm5, %v5835_v57  ;;  %v1999_v45 = vrot.slane %v1997_v19, 4 }
  0xf2   : > { %v1229_v56 = vpack.c.b16 %v1207_v41, %v1206_v12 }
  0xf3   : > { %v2237_v21 = vpop.f32.mrf.mxu0 }
  0xf4   : > { %v1583_v53 = vpop.f32.mrf.mxu3  ;;  %v948_v34 = vpop.f32.mrf.mxu1 }
  0xf5   : > { %v1663_v42 = vadd.f32 %v1583_v53, %v1376_v11  ;;  %v949_v26 = vadd.f32 %v948_v34, %v6336_v47  ;;  %v1984_v47 = vshrl.u32 %v5433_v52, 16  ;;  %v1972_v11 = vsel %vm6001_vm4, %v1967_v28, %v1971_v10 }
  0xf6   : > { %5460 = vmatmul.msk.bf16.gmra.mxu0 %vm658_vm5, %v2169_v29  ;;  %v5880_v29 = vld [vmem:[%s5989_s27 + $0x80] sm:$0x1]  ;;  %v5267_v53 = vrot.slane %v1033_v0, 9  ;;  %v1148_v34 = vrot.slane %v1146_v62, 4  ;;  %v2147_v12 = vunpack.c.l.b16 %v1972_v11  ;;  %v2148_v10 = vunpack.c.l.b16 %v1982_v14 }
  0xf7   : > { %v1298_v43 = vpop.f32.mrf.mxu2  ;;  %5250 = vmatmul.msk.bf16.gmra.mxu1 %vm658_vm5, %v5820_v22  ;;  %v6454_v57 = vadd.f32 %v2237_v21, %v1663_v42  ;;  %v1149_v21 = vrot.slane %v5880_v29, 5  ;;  %v1986_v41 = vrot.slane %v1984_v47, 4  ;;  %v1989_v42 = vrot.slane %v1987_v2, 5  ;;  %v5821_v47 = vld [vmem:[%s5989_s27 + $0x78] sm:$0xff] }
  0xf8   : > { %v1377_v59 = vadd.f32 %v1298_v43, %v946_v5  ;;  %v1995_v28 = vrot.slane %v1993_v18, 5  ;;  %v2170_v35 = vpack.c.b16 %v2148_v10, %v2147_v12  ;;  %v5437_v12 = vld [vmem:[%s5989_s27 + $0x94] sm:$0xf]  ;;  %v5881_v10 = vld [vmem:[%s5989_s27 + $0x88] sm:$0xf] }
  0xf9   : > { %v1990_v60 = vor.u32 %v1989_v42, %v1986_v41  ;;  %v1153_v41 = vrot.slane %v5881_v10, 5  ;;  %v1034_v42 = vld [vmem:[%s5989_s27 + $0x84] sm:$0xe] }
  0xfa   : > { %v2000_v2 = vor.u32 %v1999_v45, %v1995_v28 }
  0xfb   : > { %v2239_v24 = vpop.f32.mrf.mxu0  ;;  %v1991_v29 = vrot.slane %v1990_v60, 4 }
  0xfc   : > { %v1585_v5 = vpop.f32.mrf.mxu3  ;;  %5283 = vmatmul.msk.bf16.gmra.mxu2 %vm658_vm5, %v1229_v56  ;;  %v950_v22 = vpop.f32.mrf.mxu1  ;;  %v5435_v56 = vld [vmem:[%s5989_s27 + $0x8c] sm:$0x1] }
  0xfd   : > { %v1664_v23 = vadd.f32 %v1585_v5, %v1377_v59  ;;  %v951_v31 = vadd.f32 %v950_v22, %v6354_v13  ;;  %v1147_v59 = vsel %vm6175_vm8, %v5267_v53, %v1146_v62  ;;  %v1150_v13 = vsel %vm6175_vm8, %v1148_v34, %v1149_v21 }
  0xfe   : > { %v2003_v11 = vshll.u32 %v5435_v56, 16  ;;  %v1209_v18 = vunpack.c.l.b16 %v1150_v13  ;;  %v2001_v5 = vrot.slane %v2000_v2, 4  ;;  %v2021_v13 = vshrl.u32 %v5437_v12, 16  ;;  %v5837_v2 = vld [vmem:[%s5989_s27 + $0x84] sm:$0xff] }
  0xff   : > { %v1301_v43 = vpop.f32.mrf.mxu2  ;;  %v6467_v50 = vadd.f32 %v2239_v24, %v1664_v23  ;;  %v5436_v23 = vld [vmem:[%s5989_s27 + $0x90] sm:$0xf] }
 0x100   : > { %v1378_v52 = vadd.f32 %v1301_v43, %v949_v26  ;;  %v1208_v26 = vunpack.c.l.b16 %v1147_v59  ;;  %v2005_v22 = vrot.slane %v2003_v11, 5  ;;  %v2008_v43 = vshrl.u32 %v5436_v23, 16 }
 0x101   : > { %5396 = vmatmul.msk.bf16.gmra.mxu3 %vm658_vm5, %v5836_v25  ;;  %v2011_v56 = vshll.u32 %v5436_v23, 16  ;;  %v2017_v59 = vshll.u32 %v5437_v12, 16  ;;  %v5268_v11 = vrot.slane %v1034_v42, 9 }
 0x102   : > { %v1230_v34 = vpack.c.b16 %v1209_v18, %v1208_v26  ;;  %v2010_v18 = vrot.slane %v2008_v43, 4 }
 0x103   : > { %v2242_v0 = vpop.f32.mrf.mxu0 }
 0x104   : > { %v1588_v14 = vpop.f32.mrf.mxu3  ;;  %v953_v24 = vpop.f32.mrf.mxu1 }
 0x105   : > { %v1665_v19 = vadd.f32 %v1588_v14, %v1378_v52  ;;  %v954_v62 = vadd.f32 %v953_v24, %v6376_v54  ;;  %v1996_v54 = vsel %vm6001_vm4, %v1991_v29, %v1995_v28  ;;  %v2006_v52 = vsel %vm6001_vm4, %v2001_v5, %v2005_v22 }
 0x106   : > { %5461 = vmatmul.msk.bf16.gmra.mxu0 %vm658_vm5, %v2170_v35  ;;  %v5882_v35 = vld [vmem:[%s5989_s27 + $0x8c] sm:$0x1]  ;;  %v1155_v14 = vrot.slane %v1153_v41, 4  ;;  %v2149_v24 = vunpack.c.l.b16 %v1996_v54  ;;  %v2150_v26 = vunpack.c.l.b16 %v2006_v52  ;;  %v2013_v29 = vrot.slane %v2011_v56, 5  ;;  %v5822_v54 = vld [vmem:[%s5989_s27 + $0x84] sm:$0xff] }
 0x107   : > { %v1303_v21 = vpop.f32.mrf.mxu2  ;;  %5251 = vmatmul.msk.bf16.gmra.mxu1 %vm658_vm5, %v5821_v47  ;;  %v6480_v25 = vadd.f32 %v2242_v0, %v1665_v19  ;;  %v1156_v60 = vrot.slane %v5882_v35, 5  ;;  %v2023_v5 = vrot.slane %v2021_v13, 4 }
 0x108   : > { %v1379_v53 = vadd.f32 %v1303_v21, %v951_v31  ;;  %v2019_v21 = vrot.slane %v2017_v59, 5  ;;  %v2171_v12 = vpack.c.b16 %v2150_v26, %v2149_v24  ;;  %v2014_v42 = vor.u32 %v2013_v29, %v2010_v18  ;;  %v5440_v24 = vld [vmem:[%s5989_s27 + $0xa0] sm:$0xf]  ;;  %v1035_v29 = vld [vmem:[%s5989_s27 + $0x90] sm:$0xe] }
 0x10a   : > { %v2024_v43 = vor.u32 %v2023_v5, %v2019_v21 }
 0x10b   : > { %v2244_v45 = vpop.f32.mrf.mxu0 }
 0x10c   : > { %v1590_v31 = vpop.f32.mrf.mxu3  ;;  %5284 = vmatmul.msk.bf16.gmra.mxu2 %vm658_vm5, %v1230_v34  ;;  %v955_v0 = vpop.f32.mrf.mxu1  ;;  %v5438_v34 = vld [vmem:[%s5989_s27 + $0x98] sm:$0x1] }
 0x10d   : > { %v1666_v47 = vadd.f32 %v1590_v31, %v1379_v53  ;;  %v956_v28 = vadd.f32 %v955_v0, %v6394_v15  ;;  %v1154_v15 = vsel %vm6175_vm8, %v5268_v11, %v1153_v41  ;;  %v1157_v53 = vsel %vm6175_vm8, %v1155_v14, %v1156_v60  ;;  %v5439_v41 = vld [vmem:[%s5989_s27 + $0x9c] sm:$0xf] }
 0x10e   : > { %v2027_v52 = vshll.u32 %v5438_v34, 16  ;;  %v1211_v59 = vunpack.c.l.b16 %v1157_v53  ;;  %v2015_v31 = vrot.slane %v2014_v42, 4  ;;  %v2025_v0 = vrot.slane %v2024_v43, 4 }
 0x10f   : > { %v1306_v19 = vpop.f32.mrf.mxu2  ;;  %v6493_v22 = vadd.f32 %v2244_v45, %v1666_v47  ;;  %v2032_v26 = vshrl.u32 %v5439_v41, 16  ;;  %v2035_v18 = vshll.u32 %v5439_v41, 16  ;;  %v2045_v53 = vshrl.u32 %v5440_v24, 16 }
 0x110   : > { %v1380_v23 = vadd.f32 %v1306_v19, %v954_v62  ;;  %v1210_v62 = vunpack.c.l.b16 %v1154_v15  ;;  %v2029_v47 = vrot.slane %v2027_v52, 5  ;;  %v5883_v19 = vld [vmem:[%s5989_s27 + $0x94] sm:$0xf]  ;;  %v2041_v15 = vshll.u32 %v5440_v24, 16 }
 0x111   : > { %5397 = vmatmul.msk.bf16.gmra.mxu3 %vm658_vm5, %v5837_v2  ;;  %v2034_v42 = vrot.slane %v2032_v26, 4  ;;  %v2037_v43 = vrot.slane %v2035_v18, 5 }
 0x112   : > { %v1231_v14 = vpack.c.b16 %v1211_v59, %v1210_v62  ;;  %v2030_v34 = vsel %vm6001_vm4, %v2025_v0, %v2029_v47  ;;  %v5269_v62 = vrot.slane %v1035_v29, 9 }
 0x113   : > { %v2247_v10 = vpop.f32.mrf.mxu0  ;;  %v2038_v24 = vor.u32 %v2037_v43, %v2034_v42  ;;  %v5443_v42 = vld [vmem:[%s5989_s27 + $0xac] sm:$0xf] }
 0x114   : > { %v1593_v56 = vpop.f32.mrf.mxu3  ;;  %v958_v45 = vpop.f32.mrf.mxu1 }
 0x115   : > { %v1667_v13 = vadd.f32 %v1593_v56, %v1380_v23  ;;  %v959_v35 = vadd.f32 %v958_v45, %v6417_v61  ;;  %v1160_v61 = vrot.slane %v5883_v19, 5  ;;  %v2020_v23 = vsel %vm6001_vm4, %v2015_v31, %v2019_v21  ;;  %v5838_v56 = vld [vmem:[%s5989_s27 + $0x90] sm:$0xff] }
 0x116   : > { %5462 = vmatmul.msk.bf16.gmra.mxu0 %vm658_vm5, %v2171_v12  ;;  %v5884_v12 = vld [vmem:[%s5989_s27 + $0x98] sm:$0x1]  ;;  %v2151_v59 = vunpack.c.l.b16 %v2020_v23  ;;  %v2047_v31 = vrot.slane %v2045_v53, 4  ;;  %v5823_v19 = vld [vmem:[%s5989_s27 + $0x90] sm:$0xff] }
 0x117   : > { %v1308_v60 = vpop.f32.mrf.mxu2  ;;  %5252 = vmatmul.msk.bf16.gmra.mxu1 %vm658_vm5, %v5822_v54  ;;  %v6506_v2 = vadd.f32 %v2247_v10, %v1667_v13  ;;  %v1163_v10 = vrot.slane %v5884_v12, 5  ;;  %v1162_v21 = vrot.slane %v1160_v61, 4  ;;  %v2152_v13 = vunpack.c.l.b16 %v2030_v34 }
 0x118   : > { %v1381_v11 = vadd.f32 %v1308_v60, %v956_v28  ;;  %v2043_v60 = vrot.slane %v2041_v15, 5  ;;  %v2039_v12 = vrot.slane %v2038_v24, 4  ;;  %v5886_v24 = vld [vmem:[%s5989_s27 + $0xa4] sm:$0x1] }
 0x119   : > { %v2172_v26 = vpack.c.b16 %v2152_v13, %v2151_v59  ;;  %v5885_v59 = vld [vmem:[%s5989_s27 + $0xa0] sm:$0xf] }
 0x11a   : > { %v2048_v29 = vor.u32 %v2047_v31, %v2043_v60  ;;  %v1167_v13 = vrot.slane %v5885_v59, 5  ;;  %v1036_v31 = vld [vmem:[%s5989_s27 + $0x9c] sm:$0xe] }
 0x11b   : > { %v2249_v5 = vpop.f32.mrf.mxu0 }
 0x11c   : > { %v1595_v28 = vpop.f32.mrf.mxu3  ;;  %5285 = vmatmul.msk.bf16.gmra.mxu2 %vm658_vm5, %v1231_v14  ;;  %v960_v54 = vpop.f32.mrf.mxu1  ;;  %v5441_v14 = vld [vmem:[%s5989_s27 + $0xa4] sm:$0x1] }
 0x11d   : > { %v1668_v52 = vadd.f32 %v1595_v28, %v1381_v11  ;;  %v961_v45 = vadd.f32 %v960_v54, %v6435_v36  ;;  %v1161_v11 = vsel %vm6175_vm8, %v5269_v62, %v1160_v61  ;;  %v1164_v36 = vsel %vm6175_vm8, %v1162_v21, %v1163_v10  ;;  %v5442_v28 = vld [vmem:[%s5989_s27 + $0xa8] sm:$0xf] }
 0x11e   : > { %v2051_v23 = vshll.u32 %v5441_v14, 16  ;;  %v1213_v15 = vunpack.c.l.b16 %v1164_v36  ;;  %v2049_v10 = vrot.slane %v2048_v29, 4  ;;  %v2056_v62 = vshrl.u32 %v5442_v28, 16 }
 0x11f   : > { %v1311_v41 = vpop.f32.mrf.mxu2  ;;  %v6519_v0 = vadd.f32 %v2249_v5, %v1668_v52  ;;  %v2044_v21 = vsel %vm6001_vm4, %v2039_v12, %v2043_v60  ;;  %v2069_v14 = vshrl.u32 %v5443_v42, 16 }
 0x120   : > { %v1382_v47 = vadd.f32 %v1311_v41, %v959_v35  ;;  %v1212_v35 = vunpack.c.l.b16 %v1161_v11  ;;  %v2053_v54 = vrot.slane %v2051_v23, 5  ;;  %v2059_v41 = vshll.u32 %v5442_v28, 16  ;;  %v5839_v23 = vld [vmem:[%s5989_s27 + $0x9c] sm:$0xff] }
 0x121   : > { %5398 = vmatmul.msk.bf16.gmra.mxu3 %vm658_vm5, %v5838_v56  ;;  %v2058_v60 = vrot.slane %v2056_v62, 4 }
 0x122   : > { %v1232_v56 = vpack.c.b16 %v1213_v15, %v1212_v35  ;;  %v2054_v36 = vsel %vm6001_vm4, %v2049_v10, %v2053_v54  ;;  %v1169_v35 = vrot.slane %v1167_v13, 4  ;;  %v2061_v15 = vrot.slane %v2059_v41, 5  ;;  %v5444_v54 = vld [vmem:[%s5989_s27 + $0xb0] sm:$0x1] }
 0x123   : > { %v2252_v18 = vpop.f32.mrf.mxu0  ;;  %v2154_v12 = vunpack.c.l.b16 %v2054_v36 }
 0x124   : > { %v1598_v5 = vpop.f32.mrf.mxu3  ;;  %v963_v34 = vpop.f32.mrf.mxu1  ;;  %v2062_v62 = vor.u32 %v2061_v15, %v2058_v60 }
 0x125   : > { %v1669_v53 = vadd.f32 %v1598_v5, %v1382_v47  ;;  %v2065_v47 = vshll.u32 %v5443_v42, 16  ;;  %v5270_v5 = vrot.slane %v1036_v31, 9  ;;  %v5824_v31 = vld [vmem:[%s5989_s27 + $0x9c] sm:$0xff] }
 0x126   : > { %5463 = vmatmul.msk.bf16.gmra.mxu0 %vm658_vm5, %v2172_v26  ;;  %v1170_v26 = vrot.slane %v5886_v24, 5 }
 0x127   : > { %v1313_v61 = vpop.f32.mrf.mxu2  ;;  %5253 = vmatmul.msk.bf16.gmra.mxu1 %vm658_vm5, %v5823_v19  ;;  %v6532_v43 = vadd.f32 %v2252_v18, %v1669_v53  ;;  %v2153_v18 = vunpack.c.l.b16 %v2044_v21  ;;  %v964_v53 = vadd.f32 %v963_v34, %v6270_v17  ;;  %v2067_v28 = vrot.slane %v2065_v47, 5 }
 0x128   : > { %v1383_v52 = vadd.f32 %v1313_v61, %v961_v45  ;;  %v2071_v61 = vrot.slane %v2069_v14, 4  ;;  %v2075_v21 = vshll.u32 %v5444_v54, 16 }
 0x129   : > { %v2173_v17 = vpack.c.b16 %v2154_v12, %v2153_v18  ;;  %v5445_v18 = vld [vmem:[%s5989_s27 + $0xb4] sm:$0xf] }
 0x12a   : > { %v2072_v34 = vor.u32 %v2071_v61, %v2067_v28  ;;  %v2077_v60 = vrot.slane %v2075_v21, 5  ;;  %v2083_v54 = vshll.u32 %v5445_v18, 16 }
 0x12b   : > { %v2254_v11 = vpop.f32.mrf.mxu0 }
 0x12c   : > { %v1600_v45 = vpop.f32.mrf.mxu3  ;;  %5286 = vmatmul.msk.bf16.gmra.mxu2 %vm658_vm5, %v1232_v56  ;;  %v965_v19 = vpop.f32.mrf.mxu1  ;;  %v1171_v56 = vsel %vm6175_vm8, %v1169_v35, %v1170_v26  ;;  %v2073_v26 = vrot.slane %v2072_v34, 4 }
 0x12d   : > { %v1670_v29 = vadd.f32 %v1600_v45, %v1383_v52  ;;  %v1168_v52 = vsel %vm6175_vm8, %v5270_v5, %v1167_v13  ;;  %v1215_v36 = vunpack.c.l.b16 %v1171_v56  ;;  %v2063_v45 = vrot.slane %v2062_v62, 4  ;;  %v5888_v62 = vld [vmem:[%s5989_s27 + $0xb0] sm:$0x1] }
 0x12e   : > { %v966_v13 = vadd.f32 %v965_v19, %v6286_v44  ;;  %v2080_v44 = vshrl.u32 %v5445_v18, 16  ;;  %v2078_v19 = vsel %vm6001_vm4, %v2073_v26, %v2077_v60 }
 0x12f   : > { %v1316_v10 = vpop.f32.mrf.mxu2  ;;  %v6545_v42 = vadd.f32 %v2254_v11, %v1670_v29  ;;  %v1214_v11 = vunpack.c.l.b16 %v1168_v52  ;;  %v2068_v61 = vsel %vm6001_vm4, %v2063_v45, %v2067_v28 }
 0x130   : > { %v1384_v59 = vadd.f32 %v1316_v10, %v964_v53  ;;  %v5887_v53 = vld [vmem:[%s5989_s27 + $0xac] sm:$0xf]  ;;  %v1037_v10 = vld [vmem:[%s5989_s27 + $0xa8] sm:$0xe] }
 0x131   : > { %5399 = vmatmul.msk.bf16.gmra.mxu3 %vm658_vm5, %v5839_v23  ;;  %v5446_v23 = vld [vmem:[%s5989_s27 + $0xb8] sm:$0xf]  ;;  %v1233_v15 = vpack.c.b16 %v1215_v36, %v1214_v11  ;;  %v1174_v12 = vrot.slane %v5887_v53, 5  ;;  %v2155_v11 = vunpack.c.l.b16 %v2068_v61  ;;  %v2156_v36 = vunpack.c.l.b16 %v2078_v19  ;;  %v5447_v53 = vld [vmem:[%s5989_s27 + $0xbc] sm:$0x1] }
 0x132   : > { %v2093_v52 = vshrl.u32 %v5446_v23, 16 }
 0x133   : > { %v2257_v41 = vpop.f32.mrf.mxu0 }
 0x134   : > { %v1603_v47 = vpop.f32.mrf.mxu3  ;;  %v968_v14 = vpop.f32.mrf.mxu1  ;;  %v2095_v60 = vrot.slane %v2093_v52, 4 }
 0x135   : > { %v1671_v24 = vadd.f32 %v1603_v47, %v1384_v59  ;;  %v2089_v59 = vshll.u32 %v5446_v23, 16  ;;  %v5840_v47 = vld [vmem:[%s5989_s27 + $0xa8] sm:$0xff]  ;;  %v969_v45 = vadd.f32 %v968_v14, %v6306_v4  ;;  %v2174_v4 = vpack.c.b16 %v2156_v36, %v2155_v11 }
 0x136   : > { %5464 = vmatmul.msk.bf16.gmra.mxu0 %vm658_vm5, %v2173_v17  ;;  %v1177_v17 = vrot.slane %v5888_v62, 5 }
 0x137   : > { %v1318_v29 = vpop.f32.mrf.mxu2  ;;  %5254 = vmatmul.msk.bf16.gmra.mxu1 %vm658_vm5, %v5824_v31  ;;  %v6558_v5 = vadd.f32 %v2257_v41, %v1671_v24  ;;  %v5271_v41 = vrot.slane %v1037_v10, 9  ;;  %v1176_v31 = vrot.slane %v1174_v12, 4  ;;  %v2082_v24 = vrot.slane %v2080_v44, 4  ;;  %v5825_v44 = vld [vmem:[%s5989_s27 + $0xa8] sm:$0xff] }
 0x138   : > { %v1385_v35 = vadd.f32 %v1318_v29, %v966_v13  ;;  %v2085_v13 = vrot.slane %v2083_v54, 5  ;;  %v6570_v26 = vrot.slane %v2089_v59, 5  ;;  %v2099_v59 = vshll.u32 %v5447_v53, 16 }
 0x13a   : > { %v2086_v14 = vor.u32 %v2085_v13, %v2082_v24  ;;  %v2096_v61 = vor.u32 %v2095_v60, %v6570_v26  ;;  %v2101_v24 = vrot.slane %v2099_v59, 5 }
 0x13b   : > { %v2259_v56 = vpop.f32.mrf.mxu0 }
 0x13c   : > { %v1605_v34 = vpop.f32.mrf.mxu3  ;;  %5287 = vmatmul.msk.bf16.gmra.mxu2 %vm658_vm5, %v1233_v15  ;;  %v970_v21 = vpop.f32.mrf.mxu1  ;;  %v1175_v15 = vsel %vm6175_vm8, %v5271_v41, %v1174_v12  ;;  %v5448_v12 = vld [vmem:[%s5989_s27 + $0xc0] sm:$0xf]  ;;  %v5889_v41 = vld [vmem:[%s5989_s27 + $0x10] sm:$0xf] }
 0x13d   : > { %v1672_v28 = vadd.f32 %v1605_v34, %v1385_v35  ;;  %v1178_v35 = vsel %vm6175_vm8, %v1176_v31, %v1177_v17  ;;  %v1216_v19 = vunpack.c.l.b16 %v1175_v15  ;;  %v5449_v34 = vld [vmem:[%s5989_s27 + $0xc4] sm:$0xf]  ;;  %v2415_v17 = vrot.slane %v5889_v41, 5 }
 0x13e   : > { %v1217_v54 = vunpack.c.l.b16 %v1178_v35  ;;  %v971_v31 = vadd.f32 %v970_v21, %v6323_v33  ;;  %v2107_v13 = vshll.u32 %v5448_v12, 16  ;;  %v5890_v35 = vld [vmem:[%s5989_s27 + $0xb8] sm:$0xf]  ;;  %v1038_v21 = vld [vmem:[%s5989_s27 + $0xb4] sm:$0xe] }
 0x13f   : > { %v1321_v18 = vpop.f32.mrf.mxu2  ;;  %v6572_v29 = vadd.f32 %v2259_v56, %v1672_v28  ;;  %v2087_v28 = vrot.slane %v2086_v14, 4  ;;  %v1181_v53 = vrot.slane %v5890_v35, 5  ;;  %v2417_v14 = vrot.slane %v2415_v17, 4  ;;  %v5841_v35 = vld [vmem:[%s5989_s27 + $0xb4] sm:$0xff] }
 0x140   : > { %v1386_v23 = vadd.f32 %v1321_v18, %v969_v45  ;;  %v1234_v36 = vpack.c.b16 %v1217_v54, %v1216_v19  ;;  %v2104_v45 = vshrl.u32 %v5448_v12, 16  ;;  %v2113_v18 = vshll.u32 %v5449_v34, 16 }
 0x141   : > { %5400 = vmatmul.msk.bf16.gmra.mxu3 %vm658_vm5, %v5840_v47  ;;  %v2097_v47 = vrot.slane %v2096_v61, 4  ;;  %v5892_v61 = vld [vmem:[%s5989_s27 + $0x14] sm:$0x1]  ;;  %v2092_v19 = vsel %vm6001_vm4, %v2087_v28, %v6570_v26 }
 0x142   : > { %v2106_v12 = vrot.slane %v2104_v45, 4  ;;  %v2157_v28 = vunpack.c.l.b16 %v2092_v19 }
 0x143   : > { %v2262_v10 = vpop.f32.mrf.mxu0  ;;  %v2102_v54 = vsel %vm6001_vm4, %v2097_v47, %v2101_v24 }
 0x144   : > { %v1608_v52 = vpop.f32.mrf.mxu3  ;;  %v973_v56 = vpop.f32.mrf.mxu1  ;;  %v2158_v47 = vunpack.c.l.b16 %v2102_v54 }
 0x145   : > { %v1673_v62 = vadd.f32 %v1608_v52, %v1386_v23  ;;  %v2117_v23 = vshrl.u32 %v5449_v34, 16  ;;  %v2418_v52 = vrot.slane %v5892_v61, 5  ;;  %v6600_v34 = vrot.slane %v2113_v18, 5 }
 0x146   : > { %5465 = vmatmul.msk.bf16.gmra.mxu0 %vm658_vm5, %v2174_v4  ;;  %v5891_v4 = vld [vmem:[%s5989_s27 + $0xbc] sm:$0x1]  ;;  %v1183_v61 = vrot.slane %v1181_v53, 4  ;;  %v974_v26 = vadd.f32 %v973_v56, %v6343_v63 }
 0x147   : > { %v1323_v11 = vpop.f32.mrf.mxu2  ;;  %5255 = vmatmul.msk.bf16.gmra.mxu1 %vm658_vm5, %v5825_v44  ;;  %v6588_v15 = vadd.f32 %v2262_v10, %v1673_v62  ;;  %v1184_v33 = vrot.slane %v5891_v4, 5  ;;  %v2109_v62 = vrot.slane %v2107_v13, 5  ;;  %v2119_v41 = vrot.slane %v2117_v23, 4 }
 0x148   : > { %v1387_v60 = vadd.f32 %v1323_v11, %v971_v31  ;;  %v5468_v31 = vld [vmem:[%s5989_s27 + $0xc] sm:$0xe]  ;;  %v5272_v4 = vrot.slane %v1038_v21, 9  ;;  %v2419_v13 = vsel %vm6175_vm8, %v2417_v14, %v2418_v52  ;;  %v5630_v14 = vld [vmem:[%s5989_s27 + $0x18] sm:$0xf] }
 0x149   : > { %7604 = vst [vmem:[#allocation2_spill] sm:$0xff] %v6588_v15  ;;  %v5484_v15 = vrot.slane %v5468_v31, 9  ;;  %v2110_v18 = vor.u32 %v2109_v62, %v2106_v12  ;;  %v2528_v21 = vunpack.c.l.b16 %v2419_v13  ;;  %v1185_v56 = vsel %vm6175_vm8, %v1183_v61, %v1184_v33  ;;  %v5826_v12 = vld [vmem:[%s5989_s27 + $0xb4] sm:$0xff]  ;;  %v6623_v62 = vld [vmem:[%s5989_s27 + $0x1c] sm:$0xf] }
 0x14a   : > { %v1182_v63 = vsel %vm6175_vm8, %v5272_v4, %v1181_v53  ;;  %v2120_v19 = vor.u32 %v2119_v41, %v6600_v34  ;;  %v1219_v53 = vunpack.c.l.b16 %v1185_v56  ;;  %v3083_v61 = vshrl.u32 %v5630_v14, 16 }
 0x14b   : > { %v2264_v44 = vpop.f32.mrf.mxu0  ;;  %v2416_v45 = vsel %vm6175_vm8, %v5484_v15, %v2415_v17  ;;  %v2175_v17 = vpack.c.b16 %v2158_v47, %v2157_v28  ;;  %v2111_v4 = vrot.slane %v2110_v18, 4  ;;  %v3086_v41 = vshll.u32 %v5630_v14, 16 }
 0x14c   : > { %v1610_v10 = vpop.f32.mrf.mxu3  ;;  %5288 = vmatmul.msk.bf16.gmra.mxu2 %vm658_vm5, %v1234_v36  ;;  %v975_v59 = vpop.f32.mrf.mxu1  ;;  %v5450_v36 = vld [vmem:[%s5989_s27 + $0xc8] sm:$0x1]  ;;  %v2527_v23 = vunpack.c.l.b16 %v2416_v45  ;;  %v2121_v33 = vrot.slane %v2120_v19, 4  ;;  %v3096_v47 = vshrl.u32 %v6623_v62, 16  ;;  %v3085_v18 = vrot.slane %v3083_v61, 4 }
 0x14d   : > { %v1674_v11 = vadd.f32 %v1610_v10, %v1387_v60  ;;  %v2123_v15 = vshll.u32 %v5450_v36, 16  ;;  %v976_v28 = vadd.f32 %v975_v59, %v6363_v27  ;;  %v2116_v27 = vsel %vm6001_vm4, %v2111_v4, %v6600_v34  ;;  %v5632_v19 = vld [vmem:[%s5989_s27 + $0x20] sm:$0x1]  ;;  %v5633_v61 = vld [vmem:[%s5989_s27 + $0x24] sm:$0xf] }
 0x14e   : > { %v6616_v54 = vpack.c.b16 %v2528_v21, %v2527_v23  ;;  %v3088_v23 = vrot.slane %v3086_v41, 5  ;;  %v3102_v4 = vshll.u32 %v5632_v19, 16  ;;  %v6643_v41 = vld [vmem:[%s5989_s27 + $0x28] sm:$0xf] }
 0x14f   : > { %v1326_v24 = vpop.f32.mrf.mxu2  ;;  %v6619_v52 = vadd.f32 %v2264_v44, %v1674_v11  ;;  %v2125_v44 = vrot.slane %v2123_v15, 5  ;;  %v3092_v11 = vshll.u32 %v6623_v62, 16 }
 0x150   : > { %v1388_v60 = vadd.f32 %v1326_v24, %v974_v26  ;;  %v1218_v26 = vunpack.c.l.b16 %v1182_v63  ;;  %v3098_v63 = vrot.slane %v3096_v47, 4  ;;  %v3104_v47 = vrot.slane %v3102_v4, 5 }
 0x151   : > { %5401 = vmatmul.msk.bf16.gmra.mxu3 %vm658_vm5, %v5841_v35  ;;  %v2126_v59 = vsel %vm6001_vm4, %v2121_v33, %v2125_v44  ;;  %v3094_v21 = vrot.slane %v3092_v11, 5 }
 0x152   : > { %v1235_v13 = vpack.c.b16 %v1219_v53, %v1218_v26  ;;  %v3089_v26 = vor.u32 %v3088_v23, %v3085_v18  ;;  %v3110_v18 = vshll.u32 %v5633_v61, 16  ;;  %v3116_v23 = vshll.u32 %v6643_v41, 16 }
 0x153   : > { %v2267_v10 = vpop.f32.mrf.mxu0  ;;  %v3099_v53 = vor.u32 %v3098_v63, %v3094_v21 }
 0x154   : > { %v1613_v31 = vpop.f32.mrf.mxu3  ;;  %v978_v35 = vpop.f32.mrf.mxu1  ;;  %v3090_v44 = vrot.slane %v3089_v26, 4 }
 0x155   : > { %v1675_v24 = vadd.f32 %v1613_v31, %v1388_v60  ;;  %v2160_v31 = vunpack.c.l.b16 %v2126_v59  ;;  %v979_v34 = vadd.f32 %v978_v35, %v6386_v1  ;;  %v3100_v11 = vrot.slane %v3099_v53, 4 }
 0x156   : > { %5466 = vmatmul.msk.bf16.gmra.mxu0 %vm658_vm5, %v2175_v17 }
 0x157   : > { %v1328_v36 = vpop.f32.mrf.mxu2  ;;  %5256 = vmatmul.msk.bf16.gmra.mxu1 %vm658_vm5, %v5826_v12  ;;  %v6630_v60 = vadd.f32 %v2267_v10, %v1675_v24  ;;  %v5842_v10 = vld [vmem:[%s5989_s27 + $0xc0] sm:$0xff]  ;;  %v2159_v12 = vunpack.c.l.b16 %v2116_v27  ;;  %v3120_v27 = vshrl.u32 %v6643_v41, 16  ;;  %v3105_v53 = vsel %vm6001_vm4, %v3100_v11, %v3104_v47  ;;  %v6669_v47 = vld [vmem:[%s5989_s27 + $0x2c] sm:$0x1] }
 0x158   : > { %v1389_v45 = vadd.f32 %v1328_v36, %v976_v28  ;;  %v5695_v36 = vld [vmem:[%s5989_s27 + $0x18] sm:$0xe]  ;;  %v3469_v11 = vunpack.c.l.b16 %v3105_v53 }
 0x159   : > { %v2176_v28 = vpack.c.b16 %v2160_v31, %v2159_v12  ;;  %v5894_v12 = vld [vmem:[%s5989_s27 + $0x20] sm:$0x1] }
 0x15a   : > { %v2425_v31 = vrot.slane %v5894_v12, 5 }
 0x15b   : > { %v2269_v56 = vpop.f32.mrf.mxu0 }
 0x15c   : > { %v1615_v17 = vpop.f32.mrf.mxu3  ;;  %5289 = vmatmul.msk.bf16.gmra.mxu2 %vm658_vm5, %v1235_v13  ;;  %v980_v15 = vpop.f32.mrf.mxu1  ;;  %v3107_v13 = vshrl.u32 %v5633_v61, 16 }
 0x15d   : > { %v1676_v14 = vadd.f32 %v1615_v17, %v1389_v45  ;;  %v3754_v45 = vrot.slane %v6623_v62, 5  ;;  %v5893_v17 = vld [vmem:[%s5989_s27 + $0x1c] sm:$0xf]  ;;  %v3095_v62 = vsel %vm6001_vm4, %v3090_v44, %v3094_v21  ;;  %v3122_v21 = vrot.slane %v3120_v27, 4 }
 0x15f   : > { %v1331_v24 = vpop.f32.mrf.mxu2  ;;  %v6648_v1 = vadd.f32 %v2269_v56, %v1676_v14  ;;  %v5711_v56 = vrot.slane %v5695_v36, 9  ;;  %v5469_v14 = vld [vmem:[%s5989_s27 + $0x18] sm:$0xe]  ;;  %v3756_v4 = vrot.slane %v3754_v45, 4 }
 0x160   : > { %v1390_v33 = vadd.f32 %v1331_v24, %v979_v34  ;;  %v981_v34 = vadd.f32 %v980_v15, %v6406_v40  ;;  %v3757_v24 = vrot.slane %v5632_v19, 5  ;;  %v5843_v36 = vld [vmem:[%s5989_s27 + $0x18] sm:$0xff]  ;;  %v3468_v15 = vunpack.c.l.b16 %v3095_v62 }
 0x161   : > { %5402 = vmatmul.msk.bf16.gmra.mxu3 %vm658_vm5, %v5842_v10  ;;  %7605 = vst [vmem:[#allocation3_spill] sm:$0xff] %v6648_v1  ;;  %v2422_v10 = vrot.slane %v5893_v17, 5  ;;  %v6663_v17 = vrot.slane %v3116_v23, 5  ;;  %v3755_v1 = vsel %vm6175_vm8, %v5711_v56, %v3754_v45  ;;  %v3126_v45 = vshll.u32 %v6669_v47, 16 }
 0x162   : > { %v3500_v56 = vpack.c.b16 %v3469_v11, %v3468_v15  ;;  %v5895_v15 = vld [vmem:[%s5989_s27 + $0x28] sm:$0xf] }
 0x163   : > { %v2272_v35 = vpop.f32.mrf.mxu0  ;;  %v2424_v12 = vrot.slane %v2422_v10, 4  ;;  %v2429_v11 = vrot.slane %v5895_v15, 5 }
 0x164   : > { %v1618_v59 = vpop.f32.mrf.mxu3  ;;  %v983_v63 = vpop.f32.mrf.mxu1 }
 0x165   : > { %v1677_v26 = vadd.f32 %v1618_v59, %v1390_v33  ;;  %v3109_v33 = vrot.slane %v3107_v13, 4  ;;  %v3112_v59 = vrot.slane %v3110_v18, 5  ;;  %v2426_v27 = vsel %vm6175_vm8, %v2424_v12, %v2425_v31  ;;  %v6688_v12 = vld [vmem:[%s5989_s27 + $0x34] sm:$0xf] }
 0x166   : > { %5467 = vmatmul.msk.bf16.gmra.mxu0 %vm658_vm5, %v2176_v28  ;;  %v5485_v28 = vrot.slane %v5469_v14, 9  ;;  %v984_v14 = vadd.f32 %v983_v63, %v6288_v46 }
 0x167   : > { %v1333_v61 = vpop.f32.mrf.mxu2  ;;  %5501 = vmatmul.msk.bf16.vlgmr.msra.gmra.mxu1 %vm658_vm5, %v6616_v54  ;;  %v6666_v40 = vadd.f32 %v2272_v35, %v1677_v26  ;;  %v3758_v54 = vsel %vm6175_vm8, %v3756_v4, %v3757_v24  ;;  %v3113_v13 = vor.u32 %v3112_v59, %v3109_v33  ;;  %v3123_v26 = vor.u32 %v3122_v21, %v6663_v17  ;;  %v5696_v21 = vld [vmem:[%s5989_s27 + $0x24] sm:$0xe] }
 0x168   : > { %v1391_v44 = vadd.f32 %v1333_v61, %v981_v34  ;;  %v2423_v35 = vsel %vm6175_vm8, %v5485_v28, %v2422_v10  ;;  %v3866_v34 = vunpack.c.l.b16 %v3755_v1  ;;  %v3867_v53 = vunpack.c.l.b16 %v3758_v54 }
 0x169   : > { %v2529_v24 = vunpack.c.l.b16 %v2423_v35  ;;  %v2530_v10 = vunpack.c.l.b16 %v2426_v27  ;;  %v3114_v33 = vrot.slane %v3113_v13, 4  ;;  %v3124_v31 = vrot.slane %v3123_v26, 4 }
 0x16a   : > { %v3128_v59 = vrot.slane %v3126_v45, 5  ;;  %v3761_v28 = vrot.slane %v6643_v41, 5  ;;  %v5712_v27 = vrot.slane %v5696_v21, 9  ;;  %v5470_v41 = vld [vmem:[%s5989_s27 + $0x24] sm:$0xe] }
 0x16b   : > { %v2274_v19 = vpop.f32.mrf.mxu0  ;;  %v2560_v63 = vpack.c.b16 %v2530_v10, %v2529_v24 }
 0x16c   : > { %v1620_v18 = vpop.f32.mrf.mxu3  ;;  %5614 = vmatmul.msk.bf16.vlgmr.msra.gmra.mxu2 %vm658_vm5, %v5843_v36  ;;  %v985_v23 = vpop.f32.mrf.mxu1  ;;  %v5636_v36 = vld [vmem:[%s5989_s27 + $0x30] sm:$0xf]  ;;  %v3129_v35 = vsel %vm6001_vm4, %v3124_v31, %v3128_v59  ;;  %v5844_v59 = vld [vmem:[%s5989_s27 + $0x24] sm:$0xff] }
 0x16d   : > { %v1678_v62 = vadd.f32 %v1620_v18, %v1391_v44  ;;  %v3898_v44 = vpack.c.b16 %v3867_v53, %v3866_v34  ;;  %v3119_v18 = vsel %vm6001_vm4, %v3114_v33, %v6663_v17  ;;  %v3131_v26 = vshrl.u32 %v5636_v36, 16  ;;  %v5896_v53 = vld [vmem:[%s5989_s27 + $0x2c] sm:$0x1] }
 0x16e   : > { %v3763_v34 = vrot.slane %v3761_v28, 4  ;;  %v3764_v17 = vrot.slane %v6669_v47, 5  ;;  %v3470_v10 = vunpack.c.l.b16 %v3119_v18  ;;  %v2431_v33 = vrot.slane %v2429_v11, 4 }
 0x16f   : > { %v1336_v4 = vpop.f32.mrf.mxu2  ;;  %v6690_v46 = vadd.f32 %v2274_v19, %v1678_v62  ;;  %v3134_v19 = vshll.u32 %v5636_v36, 16  ;;  %v3140_v62 = vshll.u32 %v6688_v12, 16  ;;  %v3471_v21 = vunpack.c.l.b16 %v3129_v35 }
 0x170   : > { %v1392_v61 = vadd.f32 %v1336_v4, %v984_v14  ;;  %v986_v14 = vadd.f32 %v985_v23, %v6309_v8  ;;  %v2432_v4 = vrot.slane %v5896_v53, 5  ;;  %v3762_v36 = vsel %vm6175_vm8, %v5712_v27, %v3761_v28 }
 0x171   : > { %5679 = vmatmul.msk.bf16.vlgmr.msra.gmra.mxu3 %vm658_vm5, %v3500_v56  ;;  %v3144_v56 = vshrl.u32 %v6688_v12, 16  ;;  %v3133_v8 = vrot.slane %v3131_v26, 4  ;;  %v3136_v23 = vrot.slane %v3134_v19, 5  ;;  %v6711_v47 = vrot.slane %v3140_v62, 5 }
 0x172   : > { %v2433_v35 = vsel %vm6175_vm8, %v2431_v33, %v2432_v4  ;;  %v3868_v27 = vunpack.c.l.b16 %v3762_v36  ;;  %v5697_v36 = vld [vmem:[%s5989_s27 + $0x30] sm:$0xe] }
 0x173   : > { %v2277_v1 = vpop.f32.mrf.mxu0  ;;  %v3146_v15 = vrot.slane %v3144_v56, 4  ;;  %v3137_v62 = vor.u32 %v3136_v23, %v3133_v8 }
 0x174   : > { %v1623_v54 = vpop.f32.mrf.mxu3  ;;  %v988_v13 = vpop.f32.mrf.mxu1 }
 0x175   : > { %v1679_v45 = vadd.f32 %v1623_v54, %v1392_v61  ;;  %v5486_v61 = vrot.slane %v5470_v41, 9  ;;  %v6720_v41 = vld [vmem:[%s5989_s27 + $0x38] sm:$0x1]  ;;  %v3147_v56 = vor.u32 %v3146_v15, %v6711_v47  ;;  %v3138_v33 = vrot.slane %v3137_v62, 4 }
 0x176   : > { %5728 = vmatmul.msk.bf16.vlgmr.msra.gmra.mxu0 %vm658_vm5, %v3898_v44 }
 0x177   : > { %v1338_v24 = vpop.f32.mrf.mxu2  ;;  %5502 = vmatmul.msk.bf16.gmra.mxu1 %vm658_vm5, %v2560_v63  ;;  %v6709_v44 = vadd.f32 %v2277_v1, %v1679_v45  ;;  %v3765_v63 = vsel %vm6175_vm8, %v3763_v34, %v3764_v17  ;;  %v2430_v18 = vsel %vm6175_vm8, %v5486_v61, %v2429_v11  ;;  %v3501_v1 = vpack.c.b16 %v3471_v21, %v3470_v10  ;;  %v6728_v61 = vld [vmem:[%s5989_s27 + $0x40] sm:$0xf] }
 0x178   : > { %v1393_v31 = vadd.f32 %v1338_v24, %v986_v14  ;;  %v3869_v19 = vunpack.c.l.b16 %v3765_v63  ;;  %v989_v11 = vadd.f32 %v988_v13, %v6326_v32  ;;  %v2531_v14 = vunpack.c.l.b16 %v2430_v18  ;;  %v5639_v24 = vld [vmem:[%s5989_s27 + $0x3c] sm:$0xf] }
 0x179   : > { %v2532_v34 = vunpack.c.l.b16 %v2433_v35  ;;  %v3150_v17 = vshll.u32 %v6720_v41, 16  ;;  %v3768_v32 = vrot.slane %v6688_v12, 5  ;;  %v3155_v23 = vshrl.u32 %v5639_v24, 16 }
 0x17a   : > { %v3899_v10 = vpack.c.b16 %v3869_v19, %v3868_v27  ;;  %v3158_v15 = vshll.u32 %v5639_v24, 16  ;;  %v3164_v63 = vshll.u32 %v6728_v61, 16  ;;  %v3168_v18 = vshrl.u32 %v6728_v61, 16  ;;  %v5898_v19 = vld [vmem:[%s5989_s27 + $0x38] sm:$0x1] }
 0x17b   : > { %v2279_v54 = vpop.f32.mrf.mxu0  ;;  %v3152_v21 = vrot.slane %v3150_v17, 5  ;;  %v2439_v62 = vrot.slane %v5898_v19, 5  ;;  %v3771_v12 = vrot.slane %v6720_v41, 5  ;;  %v3770_v17 = vrot.slane %v3768_v32, 4  ;;  %v6755_v19 = vld [vmem:[%s5989_s27 + $0x44] sm:$0x1] }
 0x17c   : > { %v1625_v28 = vpop.f32.mrf.mxu3  ;;  %5615 = vmatmul.msk.bf16.gmra.mxu2 %vm658_vm5, %v5844_v59  ;;  %v990_v26 = vpop.f32.mrf.mxu1  ;;  %v2561_v59 = vpack.c.b16 %v2532_v34, %v2531_v14  ;;  %v3143_v14 = vsel %vm6001_vm4, %v3138_v33, %v6711_v47  ;;  %v3160_v24 = vrot.slane %v3158_v15, 5  ;;  %v6749_v41 = vrot.slane %v3164_v63, 5 }
 0x17d   : > { %v1680_v45 = vadd.f32 %v1625_v28, %v1393_v31  ;;  %v3148_v31 = vrot.slane %v3147_v56, 4  ;;  %v3472_v47 = vunpack.c.l.b16 %v3143_v14 }
 0x17f   : > { %v1341_v53 = vpop.f32.mrf.mxu2  ;;  %v6733_v13 = vadd.f32 %v2279_v54, %v1680_v45  ;;  %v5471_v54 = vld [vmem:[%s5989_s27 + $0x30] sm:$0xe]  ;;  %v991_v45 = vadd.f32 %v990_v26, %v6347_v6  ;;  %v3153_v34 = vsel %vm6001_vm4, %v3148_v31, %v3152_v21 }
 0x180   : > { %v1394_v4 = vadd.f32 %v1341_v53, %v989_v11  ;;  %v5713_v11 = vrot.slane %v5697_v36, 9  ;;  %v3170_v36 = vrot.slane %v3168_v18, 4  ;;  %v5487_v6 = vrot.slane %v5471_v54, 9 }
 0x181   : > { %5680 = vmatmul.msk.bf16.gmra.mxu3 %vm658_vm5, %v3501_v1  ;;  %v5897_v1 = vld [vmem:[%s5989_s27 + $0x34] sm:$0xf]  ;;  %v3473_v33 = vunpack.c.l.b16 %v3153_v34 }
 0x182   : > { %v2436_v27 = vrot.slane %v5897_v1, 5  ;;  %v3769_v21 = vsel %vm6175_vm8, %v5713_v11, %v3768_v32  ;;  %v3174_v32 = vshll.u32 %v6755_v19, 16 }
 0x183   : > { %v2282_v8 = vpop.f32.mrf.mxu0  ;;  %v3502_v54 = vpack.c.b16 %v3473_v33, %v3472_v47  ;;  %v5899_v33 = vld [vmem:[%s5989_s27 + $0x40] sm:$0xf] }
 0x184   : > { %v1628_v35 = vpop.f32.mrf.mxu3  ;;  %v993_v28 = vpop.f32.mrf.mxu1  ;;  %v2438_v26 = vrot.slane %v2436_v27, 4 }
 0x185   : > { %v1681_v56 = vadd.f32 %v1628_v35, %v1394_v4  ;;  %v3157_v4 = vrot.slane %v3155_v23, 4  ;;  %v5845_v35 = vld [vmem:[%s5989_s27 + $0x30] sm:$0xff] }
 0x186   : > { %5729 = vmatmul.msk.bf16.gmra.mxu0 %vm658_vm5, %v3899_v10  ;;  %v2440_v18 = vsel %vm6175_vm8, %v2438_v26, %v2439_v62  ;;  %v6774_v26 = vld [vmem:[%s5989_s27 + $0x4c] sm:$0xf] }
 0x187   : > { %v1343_v53 = vpop.f32.mrf.mxu2  ;;  %5503 = vmatmul.msk.bf16.gmra.mxu1 %vm658_vm5, %v2561_v59  ;;  %v6752_v1 = vadd.f32 %v2282_v8, %v1681_v56  ;;  %v3772_v59 = vsel %vm6175_vm8, %v3770_v17, %v3771_v12  ;;  %v3161_v23 = vor.u32 %v3160_v24, %v3157_v4  ;;  %v2437_v8 = vsel %vm6175_vm8, %v5487_v6, %v2436_v27 }
 0x188   : > { %v1395_v10 = vadd.f32 %v1343_v53, %v991_v45  ;;  %v3171_v56 = vor.u32 %v3170_v36, %v6749_v41  ;;  %v994_v12 = vadd.f32 %v993_v28, %v6370_v38  ;;  %v3870_v45 = vunpack.c.l.b16 %v3769_v21  ;;  %v5698_v36 = vld [vmem:[%s5989_s27 + $0x3c] sm:$0xe] }
 0x189   : > { %v3871_v14 = vunpack.c.l.b16 %v3772_v59  ;;  %v2533_v17 = vunpack.c.l.b16 %v2437_v8  ;;  %v2534_v27 = vunpack.c.l.b16 %v2440_v18  ;;  %v3162_v4 = vrot.slane %v3161_v23, 4 }
 0x18a   : > { %v3172_v62 = vrot.slane %v3171_v56, 4  ;;  %v3176_v24 = vrot.slane %v3174_v32, 5  ;;  %v3775_v6 = vrot.slane %v6728_v61, 5  ;;  %v2443_v21 = vrot.slane %v5899_v33, 5  ;;  %v5472_v61 = vld [vmem:[%s5989_s27 + $0x3c] sm:$0xe] }
 0x18b   : > { %v2284_v31 = vpop.f32.mrf.mxu0  ;;  %v2562_v47 = vpack.c.b16 %v2534_v27, %v2533_v17  ;;  %v5714_v18 = vrot.slane %v5698_v36, 9 }
 0x18c   : > { %v1630_v15 = vpop.f32.mrf.mxu3  ;;  %5616 = vmatmul.msk.bf16.gmra.mxu2 %vm658_vm5, %v5845_v35  ;;  %v995_v63 = vpop.f32.mrf.mxu1  ;;  %v5642_v35 = vld [vmem:[%s5989_s27 + $0x48] sm:$0xf]  ;;  %v3177_v8 = vsel %vm6001_vm4, %v3172_v62, %v3176_v24  ;;  %v5846_v24 = vld [vmem:[%s5989_s27 + $0x3c] sm:$0xff] }
 0x18d   : > { %v1682_v11 = vadd.f32 %v1630_v15, %v1395_v10  ;;  %v3900_v10 = vpack.c.b16 %v3871_v14, %v3870_v45  ;;  %v3167_v15 = vsel %vm6001_vm4, %v3162_v4, %v6749_v41  ;;  %v3179_v56 = vshrl.u32 %v5642_v35, 16  ;;  %v5900_v14 = vld [vmem:[%s5989_s27 + $0x44] sm:$0x1] }
 0x18e   : > { %v3777_v45 = vrot.slane %v3775_v6, 4  ;;  %v3778_v41 = vrot.slane %v6755_v19, 5  ;;  %v3474_v27 = vunpack.c.l.b16 %v3167_v15  ;;  %v2445_v4 = vrot.slane %v2443_v21, 4 }
 0x18f   : > { %v1346_v34 = vpop.f32.mrf.mxu2  ;;  %v6776_v38 = vadd.f32 %v2284_v31, %v1682_v11  ;;  %v3182_v31 = vshll.u32 %v5642_v35, 16  ;;  %v3188_v11 = vshll.u32 %v6774_v26, 16  ;;  %v3475_v36 = vunpack.c.l.b16 %v3177_v8 }
 0x190   : > { %v1396_v53 = vadd.f32 %v1346_v34, %v994_v12  ;;  %v996_v12 = vadd.f32 %v995_v63, %v6388_v51  ;;  %v2446_v34 = vrot.slane %v5900_v14, 5  ;;  %v3776_v35 = vsel %vm6175_vm8, %v5714_v18, %v3775_v6 }
 0x191   : > { %5681 = vmatmul.msk.bf16.gmra.mxu3 %vm658_vm5, %v3502_v54  ;;  %v3192_v54 = vshrl.u32 %v6774_v26, 16  ;;  %v3181_v51 = vrot.slane %v3179_v56, 4  ;;  %v3184_v63 = vrot.slane %v3182_v31, 5  ;;  %v6797_v19 = vrot.slane %v3188_v11, 5 }
 0x192   : > { %v2447_v8 = vsel %vm6175_vm8, %v2445_v4, %v2446_v34  ;;  %v3872_v18 = vunpack.c.l.b16 %v3776_v35  ;;  %v5699_v35 = vld [vmem:[%s5989_s27 + $0x48] sm:$0xe] }
 0x193   : > { %v2287_v28 = vpop.f32.mrf.mxu0  ;;  %v3194_v33 = vrot.slane %v3192_v54, 4  ;;  %v3185_v11 = vor.u32 %v3184_v63, %v3181_v51 }
 0x194   : > { %v1633_v59 = vpop.f32.mrf.mxu3  ;;  %v998_v23 = vpop.f32.mrf.mxu1 }
 0x195   : > { %v1683_v32 = vadd.f32 %v1633_v59, %v1396_v53  ;;  %v5488_v53 = vrot.slane %v5472_v61, 9  ;;  %v6806_v61 = vld [vmem:[%s5989_s27 + $0x50] sm:$0x1]  ;;  %v3195_v54 = vor.u32 %v3194_v33, %v6797_v19  ;;  %v3186_v4 = vrot.slane %v3185_v11, 4 }
 0x196   : > { %5730 = vmatmul.msk.bf16.gmra.mxu0 %vm658_vm5, %v3900_v10 }
 0x197   : > { %v1348_v17 = vpop.f32.mrf.mxu2  ;;  %5504 = vmatmul.msk.bf16.gmra.mxu1 %vm658_vm5, %v2562_v47  ;;  %v6795_v10 = vadd.f32 %v2287_v28, %v1683_v32  ;;  %v3779_v47 = vsel %vm6175_vm8, %v3777_v45, %v3778_v41  ;;  %v2444_v15 = vsel %vm6175_vm8, %v5488_v53, %v2443_v21  ;;  %v3503_v28 = vpack.c.b16 %v3475_v36, %v3474_v27  ;;  %v6814_v53 = vld [vmem:[%s5989_s27 + $0x58] sm:$0xf] }
 0x198   : > { %v1397_v62 = vadd.f32 %v1348_v17, %v996_v12  ;;  %v3873_v31 = vunpack.c.l.b16 %v3779_v47  ;;  %v999_v21 = vadd.f32 %v998_v23, %v6409_v49  ;;  %v2535_v12 = vunpack.c.l.b16 %v2444_v15  ;;  %v5645_v17 = vld [vmem:[%s5989_s27 + $0x54] sm:$0xf] }
 0x199   : > { %v2536_v45 = vunpack.c.l.b16 %v2447_v8  ;;  %v3198_v41 = vshll.u32 %v6806_v61, 16  ;;  %v3782_v49 = vrot.slane %v6774_v26, 5  ;;  %v3203_v63 = vshrl.u32 %v5645_v17, 16 }
 0x19a   : > { %v3901_v27 = vpack.c.b16 %v3873_v31, %v3872_v18  ;;  %v3206_v33 = vshll.u32 %v5645_v17, 16  ;;  %v3212_v47 = vshll.u32 %v6814_v53, 16  ;;  %v3216_v15 = vshrl.u32 %v6814_v53, 16  ;;  %v5902_v31 = vld [vmem:[%s5989_s27 + $0x50] sm:$0x1] }
 0x19b   : > { %v2289_v59 = vpop.f32.mrf.mxu0  ;;  %v3200_v36 = vrot.slane %v3198_v41, 5  ;;  %v2453_v11 = vrot.slane %v5902_v31, 5  ;;  %v3785_v26 = vrot.slane %v6806_v61, 5  ;;  %v3784_v41 = vrot.slane %v3782_v49, 4  ;;  %v6841_v31 = vld [vmem:[%s5989_s27 + $0x5c] sm:$0x1] }
 0x19c   : > { %v1635_v6 = vpop.f32.mrf.mxu3  ;;  %5617 = vmatmul.msk.bf16.gmra.mxu2 %vm658_vm5, %v5846_v24  ;;  %v1000_v56 = vpop.f32.mrf.mxu1  ;;  %v2563_v24 = vpack.c.b16 %v2536_v45, %v2535_v12  ;;  %v3191_v12 = vsel %vm6001_vm4, %v3186_v4, %v6797_v19  ;;  %v3208_v17 = vrot.slane %v3206_v33, 5  ;;  %v6835_v61 = vrot.slane %v3212_v47, 5 }
 0x19d   : > { %v1684_v32 = vadd.f32 %v1635_v6, %v1397_v62  ;;  %v3196_v62 = vrot.slane %v3195_v54, 4  ;;  %v3476_v19 = vunpack.c.l.b16 %v3191_v12 }
 0x19f   : > { %v1351_v14 = vpop.f32.mrf.mxu2  ;;  %v6819_v23 = vadd.f32 %v2289_v59, %v1684_v32  ;;  %v5473_v59 = vld [vmem:[%s5989_s27 + $0x48] sm:$0xe]  ;;  %v1001_v32 = vadd.f32 %v1000_v56, %v6424_v20  ;;  %v3201_v45 = vsel %vm6001_vm4, %v3196_v62, %v3200_v36 }
 0x1a0   : > { %v1398_v34 = vadd.f32 %v1351_v14, %v999_v21  ;;  %v5715_v21 = vrot.slane %v5699_v35, 9  ;;  %v3218_v35 = vrot.slane %v3216_v15, 4  ;;  %v5489_v20 = vrot.slane %v5473_v59, 9 }
 0x1a1   : > { %5682 = vmatmul.msk.bf16.gmra.mxu3 %vm658_vm5, %v3503_v28  ;;  %v5901_v28 = vld [vmem:[%s5989_s27 + $0x4c] sm:$0xf]  ;;  %v3477_v4 = vunpack.c.l.b16 %v3201_v45 }
 0x1a2   : > { %v2450_v18 = vrot.slane %v5901_v28, 5  ;;  %v3783_v36 = vsel %vm6175_vm8, %v5715_v21, %v3782_v49  ;;  %v3222_v49 = vshll.u32 %v6841_v31, 16 }
 0x1a3   : > { %v2292_v51 = vpop.f32.mrf.mxu0  ;;  %v3504_v59 = vpack.c.b16 %v3477_v4, %v3476_v19  ;;  %v5903_v4 = vld [vmem:[%s5989_s27 + $0x58] sm:$0xf] }
 0x1a4   : > { %v1638_v8 = vpop.f32.mrf.mxu3  ;;  %v1003_v6 = vpop.f32.mrf.mxu1  ;;  %v2452_v56 = vrot.slane %v2450_v18, 4 }
 0x1a5   : > { %v1685_v54 = vadd.f32 %v1638_v8, %v1398_v34  ;;  %v3205_v34 = vrot.slane %v3203_v63, 4  ;;  %v5847_v8 = vld [vmem:[%s5989_s27 + $0x48] sm:$0xff] }
 0x1a6   : > { %5731 = vmatmul.msk.bf16.gmra.mxu0 %vm658_vm5, %v3901_v27  ;;  %v2454_v15 = vsel %vm6175_vm8, %v2452_v56, %v2453_v11  ;;  %v6860_v56 = vld [vmem:[%s5989_s27 + $0x64] sm:$0xf] }
 0x1a7   : > { %v1353_v14 = vpop.f32.mrf.mxu2  ;;  %5505 = vmatmul.msk.bf16.gmra.mxu1 %vm658_vm5, %v2563_v24  ;;  %v6838_v28 = vadd.f32 %v2292_v51, %v1685_v54  ;;  %v3786_v24 = vsel %vm6175_vm8, %v3784_v41, %v3785_v26  ;;  %v3209_v63 = vor.u32 %v3208_v17, %v3205_v34  ;;  %v2451_v51 = vsel %vm6175_vm8, %v5489_v20, %v2450_v18 }
 0x1a8   : > { %v1399_v27 = vadd.f32 %v1353_v14, %v1001_v32  ;;  %v3219_v54 = vor.u32 %v3218_v35, %v6835_v61  ;;  %v1004_v26 = vadd.f32 %v1003_v6, %v6300_v58  ;;  %v3874_v32 = vunpack.c.l.b16 %v3783_v36  ;;  %v5700_v35 = vld [vmem:[%s5989_s27 + $0x54] sm:$0xe] }
 0x1a9   : > { %v3875_v12 = vunpack.c.l.b16 %v3786_v24  ;;  %v2537_v41 = vunpack.c.l.b16 %v2451_v51  ;;  %v2538_v18 = vunpack.c.l.b16 %v2454_v15  ;;  %v3210_v34 = vrot.slane %v3209_v63, 4 }
 0x1aa   : > { %v3220_v11 = vrot.slane %v3219_v54, 4  ;;  %v3224_v17 = vrot.slane %v3222_v49, 5  ;;  %v3789_v20 = vrot.slane %v6814_v53, 5  ;;  %v2457_v36 = vrot.slane %v5903_v4, 5  ;;  %v5474_v53 = vld [vmem:[%s5989_s27 + $0x54] sm:$0xe] }
 0x1ab   : > { %v2294_v62 = vpop.f32.mrf.mxu0  ;;  %v2564_v19 = vpack.c.b16 %v2538_v18, %v2537_v41  ;;  %v5716_v15 = vrot.slane %v5700_v35, 9 }
 0x1ac   : > { %v1640_v33 = vpop.f32.mrf.mxu3  ;;  %5618 = vmatmul.msk.bf16.gmra.mxu2 %vm658_vm5, %v5847_v8  ;;  %v1005_v47 = vpop.f32.mrf.mxu1  ;;  %v5648_v8 = vld [vmem:[%s5989_s27 + $0x60] sm:$0xf]  ;;  %v3225_v51 = vsel %vm6001_vm4, %v3220_v11, %v3224_v17  ;;  %v5848_v17 = vld [vmem:[%s5989_s27 + $0x54] sm:$0xff] }
 0x1ad   : > { %v1686_v21 = vadd.f32 %v1640_v33, %v1399_v27  ;;  %v3902_v27 = vpack.c.b16 %v3875_v12, %v3874_v32  ;;  %v3215_v33 = vsel %vm6001_vm4, %v3210_v34, %v6835_v61  ;;  %v3227_v54 = vshrl.u32 %v5648_v8, 16  ;;  %v5904_v12 = vld [vmem:[%s5989_s27 + $0x5c] sm:$0x1] }
 0x1ae   : > { %v3791_v32 = vrot.slane %v3789_v20, 4  ;;  %v3792_v61 = vrot.slane %v6841_v31, 5  ;;  %v3478_v18 = vunpack.c.l.b16 %v3215_v33  ;;  %v2459_v34 = vrot.slane %v2457_v36, 4 }
 0x1af   : > { %v1356_v45 = vpop.f32.mrf.mxu2  ;;  %v6862_v58 = vadd.f32 %v2294_v62, %v1686_v21  ;;  %v3230_v62 = vshll.u32 %v5648_v8, 16  ;;  %v3236_v21 = vshll.u32 %v6860_v56, 16  ;;  %v3479_v35 = vunpack.c.l.b16 %v3225_v51 }
 0x1b0   : > { %v1400_v14 = vadd.f32 %v1356_v45, %v1004_v26  ;;  %v1006_v26 = vadd.f32 %v1005_v47, %v6319_v9  ;;  %v2460_v45 = vrot.slane %v5904_v12, 5  ;;  %v3790_v8 = vsel %vm6175_vm8, %v5716_v15, %v3789_v20 }
 0x1b1   : > { %5683 = vmatmul.msk.bf16.gmra.mxu3 %vm658_vm5, %v3504_v59  ;;  %v3240_v59 = vshrl.u32 %v6860_v56, 16  ;;  %v3229_v9 = vrot.slane %v3227_v54, 4  ;;  %v3232_v47 = vrot.slane %v3230_v62, 5  ;;  %v6883_v31 = vrot.slane %v3236_v21, 5 }
 0x1b2   : > { %v2461_v51 = vsel %vm6175_vm8, %v2459_v34, %v2460_v45  ;;  %v3876_v15 = vunpack.c.l.b16 %v3790_v8  ;;  %v5701_v8 = vld [vmem:[%s5989_s27 + $0x60] sm:$0xe] }
 0x1b3   : > { %v2297_v6 = vpop.f32.mrf.mxu0  ;;  %v3242_v4 = vrot.slane %v3240_v59, 4  ;;  %v3233_v21 = vor.u32 %v3232_v47, %v3229_v9 }
 0x1b4   : > { %v1643_v24 = vpop.f32.mrf.mxu3  ;;  %v1008_v63 = vpop.f32.mrf.mxu1 }
 0x1b5   : > { %v1687_v49 = vadd.f32 %v1643_v24, %v1400_v14  ;;  %v5490_v14 = vrot.slane %v5474_v53, 9  ;;  %v6892_v53 = vld [vmem:[%s5989_s27 + $0x68] sm:$0x1]  ;;  %v3243_v59 = vor.u32 %v3242_v4, %v6883_v31  ;;  %v3234_v34 = vrot.slane %v3233_v21, 4 }
 0x1b6   : > { %5732 = vmatmul.msk.bf16.gmra.mxu0 %vm658_vm5, %v3902_v27 }
 0x1b7   : > { %v1358_v41 = vpop.f32.mrf.mxu2  ;;  %5506 = vmatmul.msk.bf16.gmra.mxu1 %vm658_vm5, %v2564_v19  ;;  %v6881_v27 = vadd.f32 %v2297_v6, %v1687_v49  ;;  %v3793_v19 = vsel %vm6175_vm8, %v3791_v32, %v3792_v61  ;;  %v2458_v33 = vsel %vm6175_vm8, %v5490_v14, %v2457_v36  ;;  %v3505_v6 = vpack.c.b16 %v3479_v35, %v3478_v18  ;;  %v6900_v14 = vld [vmem:[%s5989_s27 + $0x70] sm:$0xf] }
 0x1b8   : > { %v1401_v11 = vadd.f32 %v1358_v41, %v1006_v26  ;;  %v3877_v62 = vunpack.c.l.b16 %v3793_v19  ;;  %v1009_v36 = vadd.f32 %v1008_v63, %v6340_v48  ;;  %v2539_v26 = vunpack.c.l.b16 %v2458_v33  ;;  %v5651_v41 = vld [vmem:[%s5989_s27 + $0x6c] sm:$0xf] }
 0x1b9   : > { %v2540_v32 = vunpack.c.l.b16 %v2461_v51  ;;  %v3246_v61 = vshll.u32 %v6892_v53, 16  ;;  %v3796_v48 = vrot.slane %v6860_v56, 5  ;;  %v3251_v47 = vshrl.u32 %v5651_v41, 16 }
 0x1ba   : > { %v3903_v18 = vpack.c.b16 %v3877_v62, %v3876_v15  ;;  %v3254_v4 = vshll.u32 %v5651_v41, 16  ;;  %v3260_v19 = vshll.u32 %v6900_v14, 16  ;;  %v3264_v33 = vshrl.u32 %v6900_v14, 16  ;;  %v5906_v62 = vld [vmem:[%s5989_s27 + $0x68] sm:$0x1] }
 0x1bb   : > { %v2299_v24 = vpop.f32.mrf.mxu0  ;;  %v3248_v35 = vrot.slane %v3246_v61, 5  ;;  %v2467_v21 = vrot.slane %v5906_v62, 5  ;;  %v3799_v56 = vrot.slane %v6892_v53, 5  ;;  %v3798_v61 = vrot.slane %v3796_v48, 4  ;;  %v6927_v62 = vld [vmem:[%s5989_s27 + $0x74] sm:$0x1] }
 0x1bc   : > { %v1645_v20 = vpop.f32.mrf.mxu3  ;;  %5619 = vmatmul.msk.bf16.gmra.mxu2 %vm658_vm5, %v5848_v17  ;;  %v1010_v54 = vpop.f32.mrf.mxu1  ;;  %v2565_v17 = vpack.c.b16 %v2540_v32, %v2539_v26  ;;  %v3239_v26 = vsel %vm6001_vm4, %v3234_v34, %v6883_v31  ;;  %v3256_v41 = vrot.slane %v3254_v4, 5  ;;  %v6921_v53 = vrot.slane %v3260_v19, 5 }
 0x1bd   : > { %v1688_v49 = vadd.f32 %v1645_v20, %v1401_v11  ;;  %v3244_v11 = vrot.slane %v3243_v59, 4  ;;  %v3480_v31 = vunpack.c.l.b16 %v3239_v26 }
 0x1bf   : > { %v1361_v12 = vpop.f32.mrf.mxu2  ;;  %v6905_v63 = vadd.f32 %v2299_v24, %v1688_v49  ;;  %v5475_v24 = vld [vmem:[%s5989_s27 + $0x60] sm:$0xe]  ;;  %v1011_v49 = vadd.f32 %v1010_v54, %v6359_v16  ;;  %v3249_v32 = vsel %vm6001_vm4, %v3244_v11, %v3248_v35 }
 0x1c0   : > { %v1402_v45 = vadd.f32 %v1361_v12, %v1009_v36  ;;  %v5717_v36 = vrot.slane %v5701_v8, 9  ;;  %v3266_v8 = vrot.slane %v3264_v33, 4  ;;  %v5491_v16 = vrot.slane %v5475_v24, 9 }
 0x1c1   : > { %5684 = vmatmul.msk.bf16.gmra.mxu3 %vm658_vm5, %v3505_v6  ;;  %7606 = vst [vmem:[#allocation4_spill] sm:$0xff] %v6905_v63  ;;  %v5905_v6 = vld [vmem:[%s5989_s27 + $0x64] sm:$0xf]  ;;  %v3481_v34 = vunpack.c.l.b16 %v3249_v32  ;;  %v5654_v32 = vld [vmem:[%s5989_s27 + $0x78] sm:$0xf] }
 0x1c2   : > { %v2464_v15 = vrot.slane %v5905_v6, 5  ;;  %v3797_v11 = vsel %vm6175_vm8, %v5717_v36, %v3796_v48  ;;  %v3270_v48 = vshll.u32 %v6927_v62, 16 }
 0x1c3   : > { %v2302_v9 = vpop.f32.mrf.mxu0  ;;  %v3878_v24 = vunpack.c.l.b16 %v3797_v11 }
 0x1c4   : > { %v1648_v51 = vpop.f32.mrf.mxu3  ;;  %v1013_v20 = vpop.f32.mrf.mxu1  ;;  %v2466_v54 = vrot.slane %v2464_v15, 4 }
 0x1c5   : > { %v1689_v59 = vadd.f32 %v1648_v51, %v1402_v45  ;;  %v3253_v45 = vrot.slane %v3251_v47, 4  ;;  %v5849_v51 = vld [vmem:[%s5989_s27 + $0x60] sm:$0xff]  ;;  %v1014_v26 = vadd.f32 %v1013_v20, %v6378_v55  ;;  %v3278_v55 = vshll.u32 %v5654_v32, 16 }
 0x1c6   : > { %5733 = vmatmul.msk.bf16.gmra.mxu0 %vm658_vm5, %v3903_v18  ;;  %v2468_v33 = vsel %vm6175_vm8, %v2466_v54, %v2467_v21  ;;  %v3803_v54 = vrot.slane %v6900_v14, 5 }
 0x1c7   : > { %v1363_v12 = vpop.f32.mrf.mxu2  ;;  %5507 = vmatmul.msk.bf16.gmra.mxu1 %vm658_vm5, %v2565_v17  ;;  %v6924_v6 = vadd.f32 %v2302_v9, %v1689_v59  ;;  %v3800_v17 = vsel %vm6175_vm8, %v3798_v61, %v3799_v56  ;;  %v3257_v47 = vor.u32 %v3256_v41, %v3253_v45  ;;  %v2465_v9 = vsel %vm6175_vm8, %v5491_v16, %v2464_v15  ;;  %v6943_v41 = vld [vmem:[%s5989_s27 + $0x7c] sm:$0xf] }
 0x1c8   : > { %v1403_v18 = vadd.f32 %v1363_v12, %v1011_v49  ;;  %v3267_v59 = vor.u32 %v3266_v8, %v6921_v53  ;;  %v3506_v56 = vpack.c.b16 %v3481_v34, %v3480_v31  ;;  %v3879_v49 = vunpack.c.l.b16 %v3800_v17 }
 0x1c9   : > { %7607 = vst [vmem:[#allocation5_spill] sm:$0xff] %v6924_v6  ;;  %v2541_v12 = vunpack.c.l.b16 %v2465_v9  ;;  %v2542_v45 = vunpack.c.l.b16 %v2468_v33  ;;  %v3272_v16 = vrot.slane %v3270_v48, 5  ;;  %v3275_v31 = vshrl.u32 %v5654_v32, 16  ;;  %v5476_v48 = vld [vmem:[%s5989_s27 + $0x6c] sm:$0xe] }
 0x1ca   : > { %v3268_v21 = vrot.slane %v3267_v59, 4  ;;  %v3904_v8 = vpack.c.b16 %v3879_v49, %v3878_v24  ;;  %v3284_v20 = vshll.u32 %v6943_v41, 16  ;;  %v3288_v34 = vshrl.u32 %v6943_v41, 16 }
 0x1cb   : > { %v2304_v35 = vpop.f32.mrf.mxu0  ;;  %v3280_v32 = vrot.slane %v3278_v55, 5 }
 0x1cc   : > { %v1650_v4 = vpop.f32.mrf.mxu3  ;;  %5620 = vmatmul.msk.bf16.gmra.mxu2 %vm658_vm5, %v5849_v51  ;;  %v1015_v19 = vpop.f32.mrf.mxu1  ;;  %v3258_v51 = vrot.slane %v3257_v47, 4  ;;  %v2566_v47 = vpack.c.b16 %v2542_v45, %v2541_v12  ;;  %v3273_v59 = vsel %vm6001_vm4, %v3268_v21, %v3272_v16  ;;  %v3290_v12 = vrot.slane %v3288_v34, 4  ;;  %v6966_v16 = vld [vmem:[%s5989_s27 + $0x80] sm:$0x1] }
 0x1cd   : > { %v1690_v36 = vadd.f32 %v1650_v4, %v1403_v18  ;;  %v5702_v18 = vld [vmem:[%s5989_s27 + $0x6c] sm:$0xe]  ;;  %v5492_v21 = vrot.slane %v5476_v48, 9 }
 0x1ce   : > { %v3263_v33 = vsel %vm6001_vm4, %v3258_v51, %v6921_v53  ;;  %v5718_v14 = vrot.slane %v5702_v18, 9  ;;  %v1016_v53 = vadd.f32 %v1015_v19, %v6401_v3  ;;  %v5850_v18 = vld [vmem:[%s5989_s27 + $0x6c] sm:$0xff] }
 0x1cf   : > { %v1366_v61 = vpop.f32.mrf.mxu2  ;;  %v6950_v11 = vadd.f32 %v2304_v35, %v1690_v36  ;;  %v3805_v35 = vrot.slane %v3803_v54, 4  ;;  %v3806_v36 = vrot.slane %v6927_v62, 5  ;;  %v3482_v51 = vunpack.c.l.b16 %v3263_v33  ;;  %v6980_v33 = vld [vmem:[%s5989_s27 + $0x88] sm:$0xf] }
 0x1d0   : > { %v1404_v15 = vadd.f32 %v1366_v61, %v1014_v26  ;;  %v3277_v26 = vrot.slane %v3275_v31, 4  ;;  %v6962_v61 = vrot.slane %v3284_v20, 5  ;;  %v3804_v19 = vsel %vm6175_vm8, %v5718_v14, %v3803_v54 }
 0x1d1   : > { %5685 = vmatmul.msk.bf16.gmra.mxu3 %vm658_vm5, %v3506_v56  ;;  %7608 = vst [vmem:[#allocation6_spill] sm:$0xff] %v6950_v11  ;;  %v5907_v56 = vld [vmem:[%s5989_s27 + $0x70] sm:$0xf]  ;;  %v3807_v55 = vsel %vm6175_vm8, %v3805_v35, %v3806_v36 }
 0x1d2   : > { %v2471_v24 = vrot.slane %v5907_v56, 5  ;;  %v5657_v56 = vld [vmem:[%s5989_s27 + $0x84] sm:$0xf]  ;;  %v3281_v20 = vor.u32 %v3280_v32, %v3277_v26  ;;  %v3291_v34 = vor.u32 %v3290_v12, %v6962_v61  ;;  %v3881_v36 = vunpack.c.l.b16 %v3807_v55 }
 0x1d3   : > { %v2307_v17 = vpop.f32.mrf.mxu0  ;;  %v3299_v48 = vshrl.u32 %v5657_v56, 16  ;;  %v3308_v26 = vshll.u32 %v6980_v33, 16  ;;  %v3312_v32 = vshrl.u32 %v6980_v33, 16 }
 0x1d4   : > { %v1653_v4 = vpop.f32.mrf.mxu3  ;;  %v1018_v9 = vpop.f32.mrf.mxu1  ;;  %v2473_v31 = vrot.slane %v2471_v24, 4  ;;  %v2472_v54 = vsel %vm6175_vm8, %v5492_v21, %v2471_v24 }
 0x1d5   : > { %v1691_v49 = vadd.f32 %v1653_v4, %v1404_v15  ;;  %v3483_v15 = vunpack.c.l.b16 %v3273_v59  ;;  %v1019_v12 = vadd.f32 %v1018_v9, %v6420_v7  ;;  %v3301_v24 = vrot.slane %v3299_v48, 4 }
 0x1d6   : > { %5734 = vmatmul.msk.bf16.gmra.mxu0 %vm658_vm5, %v3904_v8  ;;  %v5908_v8 = vld [vmem:[%s5989_s27 + $0x74] sm:$0x1]  ;;  %v3314_v55 = vrot.slane %v3312_v32, 4  ;;  %v3810_v9 = vrot.slane %v6943_v41, 5  ;;  %v3813_v32 = vrot.slane %v6966_v16, 5 }
 0x1d7   : > { %v1368_v45 = vpop.f32.mrf.mxu2  ;;  %5508 = vmatmul.msk.bf16.gmra.mxu1 %vm658_vm5, %v2566_v47  ;;  %v2474_v4 = vrot.slane %v5908_v8, 5  ;;  %v6971_v3 = vadd.f32 %v2307_v17, %v1691_v49  ;;  %v3294_v47 = vshll.u32 %v6966_v16, 16  ;;  %v3507_v17 = vpack.c.b16 %v3483_v15, %v3482_v51 }
 0x1d8   : > { %v1405_v62 = vadd.f32 %v1368_v45, %v1016_v53  ;;  %v3302_v53 = vshll.u32 %v5657_v56, 16  ;;  %v3880_v49 = vunpack.c.l.b16 %v3804_v19  ;;  %v3282_v56 = vrot.slane %v3281_v20, 4  ;;  %v6999_v20 = vld [vmem:[%s5989_s27 + $0x8c] sm:$0x1] }
 0x1d9   : > { %7609 = vst [vmem:[#allocation7_spill] sm:$0xff] %v6971_v3  ;;  %v2475_v14 = vsel %vm6175_vm8, %v2473_v31, %v2474_v4  ;;  %v3292_v51 = vrot.slane %v3291_v34, 4  ;;  %v3296_v15 = vrot.slane %v3294_v47, 5  ;;  %v2543_v19 = vunpack.c.l.b16 %v2472_v54 }
 0x1da   : > { %v2544_v3 = vunpack.c.l.b16 %v2475_v14  ;;  %v3304_v21 = vrot.slane %v3302_v53, 5  ;;  %v6992_v4 = vrot.slane %v3308_v26, 5  ;;  %v3287_v7 = vsel %vm6001_vm4, %v3282_v56, %v6962_v61  ;;  %v5477_v61 = vld [vmem:[%s5989_s27 + $0x78] sm:$0xe] }
 0x1db   : > { %v2309_v59 = vpop.f32.mrf.mxu0  ;;  %v3297_v53 = vsel %vm6001_vm4, %v3292_v51, %v3296_v15  ;;  %v3812_v51 = vrot.slane %v3810_v9, 4  ;;  %v5660_v15 = vld [vmem:[%s5989_s27 + $0x90] sm:$0xf]  ;;  %v5493_v16 = vrot.slane %v5477_v61, 9 }
 0x1dc   : > { %v1655_v45 = vpop.f32.mrf.mxu3  ;;  %5621 = vmatmul.msk.bf16.gmra.mxu2 %vm658_vm5, %v5850_v18  ;;  %v1020_v8 = vpop.f32.mrf.mxu1  ;;  %v2567_v48 = vpack.c.b16 %v2544_v3, %v2543_v19  ;;  %v3318_v3 = vshll.u32 %v6999_v20, 16  ;;  %v3485_v56 = vunpack.c.l.b16 %v3297_v53  ;;  %v5704_v53 = vld [vmem:[%s5989_s27 + $0x84] sm:$0xe] }
 0x1dd   : > { %v1692_v35 = vadd.f32 %v1655_v45, %v1405_v62  ;;  %v5703_v62 = vld [vmem:[%s5989_s27 + $0x78] sm:$0xe]  ;;  %v3905_v45 = vpack.c.b16 %v3881_v36, %v3880_v49  ;;  %v3305_v49 = vor.u32 %v3304_v21, %v3301_v24  ;;  %v5910_v21 = vld [vmem:[%s5989_s27 + $0x80] sm:$0x1] }
 0x1de   : > { %v5719_v26 = vrot.slane %v5703_v62, 9 }
 0x1df   : > { %v1371_v18 = vpop.f32.mrf.mxu2  ;;  %v7001_v34 = vadd.f32 %v2309_v59, %v1692_v35  ;;  %v3315_v59 = vor.u32 %v3314_v55, %v6992_v4  ;;  %v1021_v35 = vadd.f32 %v1020_v8, %v6437_v37  ;;  %v3306_v62 = vrot.slane %v3305_v49, 4 }
 0x1e0   : > { %v1406_v31 = vadd.f32 %v1371_v18, %v1019_v12  ;;  %v3484_v12 = vunpack.c.l.b16 %v3287_v7  ;;  %v7014_v18 = vld [vmem:[%s5989_s27 + $0x94] sm:$0xf]  ;;  %v3320_v7 = vrot.slane %v3318_v3, 5  ;;  %v3814_v49 = vsel %vm6175_vm8, %v3812_v51, %v3813_v32 }
 0x1e1   : > { %5686 = vmatmul.msk.bf16.gmra.mxu3 %vm658_vm5, %v3507_v17  ;;  %7610 = vst [vmem:[#allocation8_spill] sm:$0xff] %v7001_v34  ;;  %v5909_v17 = vld [vmem:[%s5989_s27 + $0x7c] sm:$0xf]  ;;  %v3316_v8 = vrot.slane %v3315_v59, 4  ;;  %v3332_v34 = vshll.u32 %v7014_v18, 16  ;;  %v3336_v11 = vshrl.u32 %v7014_v18, 16 }
 0x1e2   : > { %v2478_v54 = vrot.slane %v5909_v17, 5  ;;  %v5851_v17 = vld [vmem:[%s5989_s27 + $0x78] sm:$0xff]  ;;  %v3508_v6 = vpack.c.b16 %v3485_v56, %v3484_v12 }
 0x1e3   : > { %v2312_v47 = vpop.f32.mrf.mxu0  ;;  %v3321_v56 = vsel %vm6001_vm4, %v3316_v8, %v3320_v7  ;;  %v7039_v51 = vrot.slane %v3332_v34, 5 }
 0x1e4   : > { %v1658_v14 = vpop.f32.mrf.mxu3  ;;  %v2635_v36 = vpop.f32.mrf.mxu1  ;;  %v2480_v24 = vrot.slane %v2478_v54, 4  ;;  %v7050_v34 = vunpack.c.l.b16 %v3321_v56 }
 0x1e5   : > { %v1693_v41 = vadd.f32 %v1658_v14, %v1406_v31  ;;  %v2481_v31 = vrot.slane %v5910_v21, 5  ;;  %v3326_v14 = vshll.u32 %v5660_v15, 16  ;;  %v5478_v21 = vld [vmem:[%s5989_s27 + $0x84] sm:$0xe] }
 0x1e6   : > { %5735 = vmatmul.msk.bf16.gmra.mxu0 %vm658_vm5, %v3905_v45  ;;  %v3323_v45 = vshrl.u32 %v5660_v15, 16 }
 0x1e7   : > { %v1373_v19 = vpop.f32.mrf.mxu2  ;;  %5509 = vmatmul.msk.bf16.gmra.mxu1 %vm658_vm5, %v2567_v48  ;;  %v7019_v37 = vadd.f32 %v2312_v47, %v1693_v41  ;;  %v3811_v48 = vsel %vm6175_vm8, %v5719_v26, %v3810_v9  ;;  %v2482_v47 = vsel %vm6175_vm8, %v2480_v24, %v2481_v31  ;;  %v3817_v41 = vrot.slane %v6980_v33, 5  ;;  %v7043_v31 = vld [vmem:[%s5989_s27 + $0x98] sm:$0x1] }
 0x1e8   : > { %v1407_v55 = vadd.f32 %v1373_v19, %v1021_v35  ;;  %v2479_v35 = vsel %vm6175_vm8, %v5493_v16, %v2478_v54  ;;  %v3311_v9 = vsel %vm6001_vm4, %v3306_v62, %v6992_v4  ;;  %v5720_v26 = vrot.slane %v5704_v53, 9 }
 0x1e9   : > { %7611 = vst [vmem:[#allocation9_spill] sm:$0xff] %v7019_v37  ;;  %v3325_v32 = vrot.slane %v3323_v45, 4  ;;  %v3328_v12 = vrot.slane %v3326_v14, 5  ;;  %v3338_v33 = vrot.slane %v3336_v11, 4  ;;  %v3882_v15 = vunpack.c.l.b16 %v3811_v48 }
 0x1ea   : > { %v3883_v19 = vunpack.c.l.b16 %v3814_v49  ;;  %v2545_v16 = vunpack.c.l.b16 %v2479_v35  ;;  %v2546_v24 = vunpack.c.l.b16 %v2482_v47  ;;  %v2715_v4 = vadd.f32 %v2635_v36, %v6454_v57 }
 0x1eb   : > { %v2314_v61 = vpop.f32.mrf.mxu0  ;;  %v3820_v45 = vrot.slane %v6999_v20, 5  ;;  %v7048_v8 = vunpack.c.l.b16 %v3311_v9  ;;  %v7054_v11 = vsel %vm6175_vm8, %v5720_v26, %v3817_v41  ;;  %v3329_v7 = vor.u32 %v3328_v12, %v3325_v32  ;;  %v5912_v9 = vld [vmem:[%s5989_s27 + $0x8c] sm:$0x1]  ;;  %v5705_v32 = vld [vmem:[%s5989_s27 + $0x90] sm:$0xe] }
 0x1ec   : > { %v1660_v59 = vpop.f32.mrf.mxu3  ;;  %5622 = vmatmul.msk.bf16.gmra.mxu2 %vm658_vm5, %v5851_v17  ;;  %v2637_v3 = vpop.f32.mrf.mxu1  ;;  %v3819_v17 = vrot.slane %v3817_v41, 4  ;;  %v5494_v36 = vrot.slane %v5478_v21, 9  ;;  %v3339_v53 = vor.u32 %v3338_v33, %v7039_v51  ;;  %v3342_v20 = vshll.u32 %v7043_v31, 16  ;;  %v5706_v33 = vld [vmem:[%s5989_s27 + $0x9c] sm:$0xe] }
 0x1ed   : > { %v1694_v54 = vadd.f32 %v1660_v59, %v1407_v55  ;;  %v5911_v55 = vld [vmem:[%s5989_s27 + $0x88] sm:$0xf]  ;;  %v3906_v48 = vpack.c.b16 %v3883_v19, %v3882_v15  ;;  %v2568_v49 = vpack.c.b16 %v2546_v24, %v2545_v16  ;;  %v2488_v26 = vrot.slane %v5912_v9, 5 }
 0x1ee   : > { %v2485_v14 = vrot.slane %v5911_v55, 5  ;;  %v7063_v59 = vsel %vm6175_vm8, %v3819_v17, %v3820_v45  ;;  %v3340_v16 = vrot.slane %v3339_v53, 4  ;;  %v3344_v24 = vrot.slane %v3342_v20, 5  ;;  %v5663_v17 = vld [vmem:[%s5989_s27 + $0x9c] sm:$0xf] }
 0x1ef   : > { %v2922_v62 = vpop.f32.mrf.mxu2  ;;  %v7059_v35 = vadd.f32 %v2314_v61, %v1694_v54  ;;  %v3330_v54 = vrot.slane %v3329_v7, 4  ;;  %v3885_v21 = vunpack.c.l.b16 %v7063_v59  ;;  %v7081_v45 = vld [vmem:[%s5989_s27 + $0xa0] sm:$0xf] }
 0x1f0   : > { %v3002_v57 = vadd.f32 %v2922_v62, %v2715_v4  ;;  %v2487_v41 = vrot.slane %v2485_v14, 4  ;;  %v7073_v19 = vsel %vm6175_vm8, %v5494_v36, %v2485_v14  ;;  %v5721_v4 = vrot.slane %v5705_v32, 9  ;;  %v7103_v32 = vld [vmem:[%s5989_s27 + $0xa4] sm:$0x1] }
 0x1f1   : > { %5687 = vmatmul.msk.bf16.gmra.mxu3 %vm658_vm5, %v3508_v6  ;;  %7612 = vst [vmem:[#allocation10_spill] sm:$0xff] %v7059_v35  ;;  %v3824_v6 = vrot.slane %v7014_v18, 5  ;;  %v2716_v18 = vadd.f32 %v2637_v3, %v6467_v50  ;;  %v3827_v62 = vrot.slane %v7043_v31, 5  ;;  %v3350_v36 = vshll.u32 %v5663_v17, 16  ;;  %v7089_v50 = vld [vmem:[%s7598_s2] ss:$0 sm:$0xff] }
 0x1f2   : > { %v2489_v14 = vsel %vm6175_vm8, %v2487_v41, %v2488_v26  ;;  %v5852_v3 = vld [vmem:[%s5989_s27 + $0x84] sm:$0xff]  ;;  %v2547_v31 = vunpack.c.l.b16 %v7073_v19  ;;  %v3356_v20 = vshll.u32 %v7081_v45, 16  ;;  %v3335_v59 = vsel %vm6001_vm4, %v3330_v54, %v7039_v51 }
 0x1f3   : > { %v3974_v47 = vpop.f32.mrf.mxu0  ;;  %v3826_v7 = vrot.slane %v3824_v6, 4  ;;  %v3345_v9 = vsel %vm6001_vm4, %v3340_v16, %v3344_v24  ;;  %v3825_v26 = vsel %vm6175_vm8, %v5721_v4, %v3824_v6  ;;  %v7110_v24 = vunpack.c.l.b16 %v3335_v59  ;;  %v5479_v4 = vld [vmem:[%s5989_s27 + $0x90] sm:$0xe] }
 0x1f4   : > { %v3576_v12 = vpop.f32.mrf.mxu3  ;;  %v2640_v56 = vpop.f32.mrf.mxu1 }
 0x1f5   : > { %v3656_v15 = vadd.f32 %v3576_v12, %v3002_v57  ;;  %v3347_v57 = vshrl.u32 %v5663_v17, 16  ;;  %v3358_v12 = vrot.slane %v3356_v20, 5  ;;  %v2548_v17 = vunpack.c.l.b16 %v2489_v14 }
 0x1f6   : > { %5736 = vmatmul.msk.bf16.gmra.mxu0 %vm658_vm5, %v3906_v48  ;;  %v3360_v48 = vshrl.u32 %v7081_v45, 16  ;;  %v3366_v14 = vshll.u32 %v7103_v32, 16 }
 0x1f7   : > { %v2924_v55 = vpop.f32.mrf.mxu2  ;;  %5510 = vmatmul.msk.bf16.gmra.mxu1 %vm658_vm5, %v2568_v49  ;;  %v4054_v53 = vadd.f32 %v3974_v47, %v3656_v15  ;;  %v3349_v41 = vrot.slane %v3347_v57, 4  ;;  %v3352_v47 = vrot.slane %v3350_v36, 5 }
 0x1f8   : > { %v3003_v49 = vadd.f32 %v2924_v55, %v2716_v18  ;;  %v3362_v15 = vrot.slane %v3360_v48, 4  ;;  %v3828_v18 = vsel %vm6175_vm8, %v3826_v7, %v3827_v62  ;;  %v5913_v55 = vld [vmem:[%s5989_s27 + $0x94] sm:$0xf]  ;;  %v2717_v62 = vadd.f32 %v2640_v56, %v6480_v25 }
 0x1f9   : > { %v2492_v51 = vrot.slane %v5913_v55, 5  ;;  %v3353_v54 = vor.u32 %v3352_v47, %v3349_v41  ;;  %v4090_v57 = vadd.f32 %v7089_v50, %v4054_v53  ;;  %v7115_v7 = vunpack.c.l.b16 %v3345_v9  ;;  %v5914_v55 = vld [vmem:[%s5989_s27 + $0x98] sm:$0x1] }
 0x1fa   : > { %v3363_v36 = vor.u32 %v3362_v15, %v3358_v12  ;;  %v3886_v48 = vunpack.c.l.b16 %v3825_v26  ;;  %v3887_v41 = vunpack.c.l.b16 %v3828_v18  ;;  %v5495_v47 = vrot.slane %v5479_v4, 9 }
 0x1fb   : > { %v3976_v19 = vpop.f32.mrf.mxu0  ;;  %v2494_v53 = vrot.slane %v2492_v51, 4  ;;  %v2495_v61 = vrot.slane %v5914_v55, 5  ;;  %v3354_v59 = vrot.slane %v3353_v54, 4  ;;  %v3368_v63 = vrot.slane %v3366_v14, 5  ;;  %v5916_v55 = vld [vmem:[%s5989_s27 + $0xa4] sm:$0x1] }
 0x1fc   : > { %v3578_v16 = vpop.f32.mrf.mxu3  ;;  %5623 = vmatmul.msk.bf16.gmra.mxu2 %vm658_vm5, %v5852_v3  ;;  %v2642_v6 = vpop.f32.mrf.mxu1  ;;  %v3364_v37 = vrot.slane %v3363_v36, 4  ;;  %v7119_v15 = vmax.f32 %v4090_v57, 0.0  ;;  %v5722_v56 = vrot.slane %v5706_v33, 9  ;;  %v7613_v26 = vpack.c.b16 %v7050_v34, %v7048_v8 }
 0x1fd   : > { %v3657_v20 = vadd.f32 %v3578_v16, %v3003_v49  ;;  %v2493_v49 = vsel %vm6175_vm8, %v5495_v47, %v2492_v51  ;;  %v2496_v25 = vsel %vm6175_vm8, %v2494_v53, %v2495_v61  ;;  %v2569_v57 = vpack.c.b16 %v2548_v17, %v2547_v31  ;;  %v5666_v47 = vld [vmem:[%s5989_s27 + $0xa8] sm:$0xf]  ;;  %v7161_v53 = vld [vmem:[%s5989_s27 + $0xac] sm:$0xf] }
 0x1fe   : > { %v2549_v16 = vunpack.c.l.b16 %v2493_v49  ;;  %v2550_v4 = vunpack.c.l.b16 %v2496_v25  ;;  %v3831_v51 = vrot.slane %v7081_v45, 5  ;;  %v3834_v36 = vrot.slane %v7103_v32, 5  ;;  %v5853_v49 = vld [vmem:[%s5989_s27 + $0x90] sm:$0xff] }
 0x1ff   : > { %v4055_v3 = vadd.f32 %v3976_v19, %v3657_v20  ;;  %v2927_v35 = vpop.f32.mrf.mxu2  ;;  %v7614_v19 = vunpack.c.l.b16 %v7054_v11  ;;  %v3510_v14 = vpack.c.b16 %v7115_v7, %v7110_v24  ;;  %v3359_v8 = vsel %vm6001_vm4, %v3354_v59, %v3358_v12 }
 0x200   : > { %v3004_v54 = vadd.f32 %v2927_v35, %v2717_v62  ;;  %v3369_v34 = vsel %vm6001_vm4, %v3364_v37, %v3368_v63  ;;  %v4186_v11 = vrot.slane %v7119_v15, 2  ;;  %v7143_v45 = vpack.c.b16 %v3887_v41, %v3886_v48 }
 0x201   : > { %v4091_v9 = vadd.f32 %v7089_v50, %v4055_v3  ;;  %5688 = vmatmul.msk.bf16.gmra.mxu3 %vm658_vm5, %v7613_v26  ;;  %v3907_v18 = vpack.c.b16 %v3885_v21, %v7614_v19  ;;  %v3832_v31 = vsel %vm6175_vm8, %v5722_v56, %v3831_v51  ;;  %v3833_v32 = vrot.slane %v3831_v51, 4 }
 0x202   : > { %v4187_v17 = vrot.slane %v7119_v15, 4  ;;  %v4188_v20 = vrot.slane %v7119_v15, 6  ;;  %v2718_v63 = vadd.f32 %v2642_v6, %v6493_v22  ;;  %v7151_v37 = vpack.c.b16 %v2550_v4, %v2549_v16 }
 0x203   : > { %v7134_v61 = vmax.f32 %v4091_v9, 0.0  ;;  %v3979_v33 = vpop.f32.mrf.mxu0  ;;  %v7153_v62 = vunpack.c.l.b16 %v3359_v8  ;;  %v7155_v48 = vunpack.c.l.b16 %v3369_v34  ;;  %v3835_v41 = vsel %vm6175_vm8, %v3833_v32, %v3834_v36  ;;  %v5915_v32 = vld [vmem:[%s5989_s27 + $0xa0] sm:$0xf] }
 0x204   : > { %v3581_v35 = vpop.f32.mrf.mxu3  ;;  %v2645_v21 = vpop.f32.mrf.mxu1  ;;  %v3888_v22 = vunpack.c.l.b16 %v3832_v31  ;;  %v3371_v6 = vshrl.u32 %v5666_v47, 16  ;;  %v3889_v25 = vunpack.c.l.b16 %v3835_v41  ;;  %v3374_v56 = vshll.u32 %v5666_v47, 16 }
 0x205   : > { %v3658_v12 = vadd.f32 %v3581_v35, %v3004_v54  ;;  %v3380_v9 = vshll.u32 %v7161_v53, 16  ;;  %v3384_v26 = vshrl.u32 %v7161_v53, 16  ;;  %v2719_v35 = vadd.f32 %v2645_v21, %v6506_v2 }
 0x206   : > { %5737 = vmatmul.msk.bf16.gmra.mxu0 %vm658_vm5, %v3907_v18  ;;  %v3373_v16 = vrot.slane %v3371_v6, 4  ;;  %v3376_v51 = vrot.slane %v3374_v56, 5 }
 0x207   : > { %v4056_v3 = vadd.f32 %v3979_v33, %v3658_v12  ;;  %v2929_v59 = vpop.f32.mrf.mxu2  ;;  %5511 = vmatmul.msk.bf16.gmra.mxu1 %vm658_vm5, %v2569_v57  ;;  %v7172_v57 = vld [vmem:[%s5989_s27 + $0xb0] sm:$0x1]  ;;  %v7174_v36 = vrot.slane %v3380_v9, 5  ;;  %v3386_v33 = vrot.slane %v3384_v26, 4  ;;  %v2499_v12 = vrot.slane %v5915_v32, 5 }
 0x208   : > { %v3005_v4 = vadd.f32 %v2929_v59, %v2718_v63  ;;  %v7181_v63 = vpack.c.b16 %v3889_v25, %v3888_v22  ;;  %v3377_v59 = vor.u32 %v3376_v51, %v3373_v16 }
 0x209   : > { %v4092_v54 = vadd.f32 %v7089_v50, %v4056_v3  ;;  %v5480_v3 = vld [vmem:[%s5989_s27 + $0x9c] sm:$0xe]  ;;  %v3387_v6 = vor.u32 %v3386_v33, %v7174_v36  ;;  %v2501_v31 = vrot.slane %v2499_v12, 4 }
 0x20b   : > { %v4124_v8 = vmax.f32 %v4092_v54, 0.0  ;;  %v3981_v34 = vpop.f32.mrf.mxu0 }
 0x20c   : > { %v3583_v41 = vpop.f32.mrf.mxu3  ;;  %5624 = vmatmul.msk.bf16.gmra.mxu2 %vm658_vm5, %v5853_v49  ;;  %v2647_v47 = vpop.f32.mrf.mxu1  ;;  %v5496_v49 = vrot.slane %v5480_v3, 9 }
 0x20d   : > { %v4192_v9 = vrot.slane %v4124_v8, 2  ;;  %v4193_v26 = vrot.slane %v4124_v8, 4  ;;  %v4194_v2 = vrot.slane %v4124_v8, 6  ;;  %v4378_v21 = vmax.f32 %v7119_v15, %v4124_v8 }
 0x20e   : > { %v3659_v54 = vadd.f32 %v3583_v41, %v3005_v4  ;;  %v7188_v32 = vadd.f32 %v2647_v47, %v6519_v0  ;;  %v7192_v19 = vsel %vm6175_vm8, %v5496_v49, %v2499_v12  ;;  %v2502_v15 = vrot.slane %v5916_v55, 5 }
 0x20f   : > { %v4379_v22 = vmax.f32 %v4186_v11, %v4192_v9  ;;  %v4380_v25 = vmax.f32 %v4187_v17, %v4193_v26  ;;  %v4381_v18 = vmax.f32 %v4188_v20, %v4194_v2  ;;  %v5744_v16 = vrot.slane %v4378_v21, 9  ;;  %v2932_v51 = vpop.f32.mrf.mxu2 }
 0x210   : > { %v4057_v33 = vadd.f32 %v3981_v34, %v3659_v54  ;;  %v3006_v56 = vadd.f32 %v2932_v51, %v2719_v35  ;;  %v7202_v17 = vsel %vm6175_vm8, %v2501_v31, %v2502_v15  ;;  %v2551_v20 = vunpack.c.l.b16 %v7192_v19 }
 0x211   : > { %v5745_v4 = vrot.slane %v4379_v22, 9  ;;  %v5746_v8 = vrot.slane %v4380_v25, 9  ;;  %v5747_v0 = vrot.slane %v4381_v18, 9  ;;  %v4698_v41 = vmax.f32 %v4378_v21, %v5744_v16  ;;  %5689 = vmatmul.msk.bf16.gmra.mxu3 %vm658_vm5, %v3510_v14 }
 0x212   : > { %v4093_v11 = vadd.f32 %v7089_v50, %v4057_v33  ;;  %v7205_v55 = vrot.slane %v3377_v59, 4  ;;  %v2552_v14 = vunpack.c.l.b16 %v7202_v17  ;;  %v7212_v26 = vrot.slane %v3387_v6, 4 }
 0x213   : > { %v4699_v34 = vmax.f32 %v4379_v22, %v5745_v4  ;;  %v4700_v35 = vmax.f32 %v4380_v25, %v5746_v8  ;;  %v4701_v12 = vmax.f32 %v4381_v18, %v5747_v0  ;;  %v4762_v47 = vpack.c.bf16 %v4698_v41, %v4698_v41  ;;  %v3984_v3 = vpop.f32.mrf.mxu0 }
 0x214   : > { %v4125_v9 = vmax.f32 %v4093_v11, 0.0  ;;  %v3586_v24 = vpop.f32.mrf.mxu3  ;;  %v2650_v7 = vpop.f32.mrf.mxu1  ;;  %v3383_v31 = vsel %vm6001_vm4, %v7205_v55, %v7174_v36  ;;  %v7615_v6 = vrot.slane %v7134_v61, 2  ;;  %v7616_v0 = vrot.slane %v7134_v61, 4  ;;  %v5481_v55 = vld [vmem:[%s5989_s27 + $0xa8] sm:$0xe] }
 0x215   : > { %v4763_v2 = vpack.c.bf16 %v4699_v34, %v4699_v34  ;;  %v4764_v59 = vpack.c.bf16 %v4700_v35, %v4700_v35  ;;  %v4765_v21 = vpack.c.bf16 %v4701_v12, %v4701_v12  ;;  %v4890_v54 = vunpack.c.l.b16 %v4762_v47 }
 0x216   : > { %v4195_v49 = vrot.slane %v4125_v9, 2  ;;  %v4196_v18 = vrot.slane %v4125_v9, 4  ;;  %v4197_v22 = vrot.slane %v4125_v9, 6  ;;  %v4382_v25 = vmax.f32 %v7134_v61, %v4125_v9  ;;  %5738 = vmatmul.msk.bf16.gmra.mxu0 %vm658_vm5, %v7143_v45  ;;  %v5854_v45 = vld [vmem:[%s5989_s27 + $0x9c] sm:$0xff] }
 0x217   : > { %v4891_v16 = vunpack.c.l.b16 %v4763_v2  ;;  %v4892_v51 = vunpack.c.l.b16 %v4764_v59  ;;  %v4893_v33 = vunpack.c.l.b16 %v4765_v21  ;;  %v3660_v15 = vadd.f32 %v3586_v24, %v3006_v56  ;;  %v2934_v4 = vpop.f32.mrf.mxu2  ;;  %5512 = vmatmul.msk.bf16.gmra.mxu1 %vm658_vm5, %v7151_v37 }
 0x218   : > { %v4383_v8 = vmax.f32 %v7615_v6, %v4195_v49  ;;  %v4384_v41 = vmax.f32 %v7616_v0, %v4196_v18  ;;  %v7617_v11 = vrot.slane %v7134_v61, 6  ;;  %v5748_v35 = vrot.slane %v4382_v25, 9 }
 0x219   : > { %v4954_v12 = vrot.slane %v4891_v16, 7  ;;  %v4957_v47 = vrot.slane %v4892_v51, 6  ;;  %v4960_v9 = vrot.slane %v4893_v33, 5  ;;  %v4058_v56 = vadd.f32 %v3984_v3, %v3660_v15 }
 0x21a   : > { %v4385_v34 = vmax.f32 %v7617_v11, %v4197_v22  ;;  %v5749_v24 = vrot.slane %v4383_v8, 9  ;;  %v5750_v2 = vrot.slane %v4384_v41, 9  ;;  %v4702_v59 = vmax.f32 %v4382_v25, %v5748_v35 }
 0x21b   : > { %v4956_v21 = vsel %vm4955_vm9, %v4954_v12, %v4890_v54  ;;  %v4094_v49 = vadd.f32 %v7089_v50, %v4058_v56  ;;  %v3986_v61 = vpop.f32.mrf.mxu0  ;;  %v3007_v18 = vadd.f32 %v2934_v4, %v7188_v32  ;;  %v2721_v22 = vadd.f32 %v2650_v7, %v6532_v43 }
 0x21c   : > { %v5751_v37 = vrot.slane %v4385_v34, 9  ;;  %v4959_v16 = vsel %vm4958_vm10, %v4957_v47, %v4956_v21  ;;  %v4703_v51 = vmax.f32 %v4383_v8, %v5749_v24  ;;  %v4704_v33 = vmax.f32 %v4384_v41, %v5750_v2  ;;  %v3588_v15 = vpop.f32.mrf.mxu3  ;;  %5625 = vmatmul.msk.bf16.gmra.mxu2 %vm658_vm5, %v5854_v45  ;;  %v2652_v25 = vpop.f32.mrf.mxu1  ;;  %v5707_v24 = vld [vmem:[%s5989_s27 + $0xa8] sm:$0xe] }
 0x21d   : > { %v4962_v6 = vsel %vm4961_vm11, %v4960_v9, %v4959_v16  ;;  %v4766_v54 = vpack.c.bf16 %v4702_v59, %v4702_v59  ;;  %v7233_v0 = vmax.f32 %v4094_v49, 0.0  ;;  %v3661_v11 = vadd.f32 %v3588_v15, %v3007_v18 }
 0x21e   : > { %v4705_v3 = vmax.f32 %v4385_v34, %v5751_v37  ;;  %v4767_v35 = vpack.c.bf16 %v4703_v51, %v4703_v51  ;;  %v4768_v32 = vpack.c.bf16 %v4704_v33, %v4704_v33  ;;  %v2722_v43 = vadd.f32 %v2652_v25, %v6545_v42 }
 0x21f   : > { %v4894_v7 = vunpack.c.l.b16 %v4766_v54  ;;  %v4198_v8 = vrot.slane %v7233_v0, 2  ;;  %v4199_v41 = vrot.slane %v7233_v0, 4  ;;  %v4200_v34 = vrot.slane %v7233_v0, 6  ;;  %v2937_v45 = vpop.f32.mrf.mxu2 }
 0x220   : > { %v4769_v4 = vpack.c.bf16 %v4705_v3, %v4705_v3  ;;  %v4895_v12 = vunpack.c.l.b16 %v4767_v35  ;;  %v4896_v47 = vunpack.c.l.b16 %v4768_v32  ;;  %v4059_v56 = vadd.f32 %v3986_v61, %v3661_v11 }
 0x221   : > { %v4963_v2 = vrot.slane %v4894_v7, 4  ;;  %v7618_v37 = vpack.c.b16 %v7155_v48, %v7153_v62  ;;  %v3008_v42 = vadd.f32 %v2937_v45, %v2721_v22  ;;  %v2571_v59 = vpack.c.b16 %v2552_v14, %v2551_v20 }
 0x222   : > { %v4897_v9 = vunpack.c.l.b16 %v4769_v4  ;;  %v7619_v21 = vshll.u32 %v7172_v57, 16  ;;  %v4966_v18 = vrot.slane %v4895_v12, 3  ;;  %v4969_v16 = vrot.slane %v4896_v47, 2  ;;  %v7291_v12 = vld [vmem:[%s5989_s27 + $0xb8] sm:$0xf] }
 0x223   : > { %5690 = vmatmul.msk.bf16.gmra.mxu3 %vm658_vm5, %v7618_v37  ;;  %v4095_v61 = vadd.f32 %v7089_v50, %v4059_v56  ;;  %v4965_v62 = vsel %vm4964_vm12, %v4963_v2, %v4962_v6  ;;  %v3989_v48 = vpop.f32.mrf.mxu0  ;;  %v7261_v17 = vunpack.c.l.b16 %v3383_v31  ;;  %v5723_v20 = vrot.slane %v5707_v24, 9  ;;  %v5917_v37 = vld [vmem:[%s5989_s27 + $0xac] sm:$0xf] }
 0x224   : > { %v3392_v49 = vrot.slane %v7619_v21, 5  ;;  %v4972_v51 = vrot.slane %v4897_v9, 1  ;;  %v4968_v14 = vsel %vm4967_vm13, %v4966_v18, %v4965_v62  ;;  %v3591_v33 = vpop.f32.mrf.mxu3  ;;  %v2655_v3 = vpop.f32.mrf.mxu1  ;;  %v3838_v25 = vrot.slane %v7161_v53, 5  ;;  %v5855_v9 = vld [vmem:[%s5989_s27 + $0xa8] sm:$0xff]  ;;  %v5918_v21 = vld [vmem:[%s5989_s27 + $0xb0] sm:$0x1] }
 0x225   : > { %v7264_v22 = vmax.f32 %v4095_v61, 0.0  ;;  %v3662_v6 = vadd.f32 %v3591_v33, %v3008_v42  ;;  %v2723_v54 = vadd.f32 %v2655_v3, %v6558_v5  ;;  %v3841_v36 = vrot.slane %v7172_v57, 5  ;;  %v5669_v5 = vld [vmem:[%s5989_s27 + $0xb4] sm:$0xf] }
 0x226   : > { %v3393_v19 = vsel %vm6001_vm4, %v7212_v26, %v3392_v49  ;;  %v4971_v26 = vsel %vm4970_vm14, %v4969_v16, %v4968_v14  ;;  %5739 = vmatmul.msk.bf16.gmra.mxu0 %vm658_vm5, %v7181_v63  ;;  %v3839_v45 = vsel %vm6175_vm8, %v5723_v20, %v3838_v25  ;;  %v3840_v56 = vrot.slane %v3838_v25, 4 }
 0x227   : > { %v7266_v15 = vunpack.c.l.b16 %v3393_v19  ;;  %v4974_v31 = vsel %vm4973_vm15, %v4972_v51, %v4971_v26  ;;  %v4201_v11 = vrot.slane %v7264_v22, 2  ;;  %v4202_v53 = vrot.slane %v7264_v22, 4  ;;  %v2939_v4 = vpop.f32.mrf.mxu2  ;;  %5513 = vmatmul.msk.bf16.gmra.mxu1 %vm658_vm5, %v2571_v59 }
 0x228   : > { %v4203_v35 = vrot.slane %v7264_v22, 6  ;;  %v5073_v57 = vpack.c.b16 %v4974_v31, %v4974_v31  ;;  %v4060_v32 = vadd.f32 %v3989_v48, %v3662_v6  ;;  %v3009_v47 = vadd.f32 %v2939_v4, %v2722_v43 }
 0x229   : > { %v3512_v7 = vpack.c.b16 %v7266_v15, %v7261_v17  ;;  %v3890_v63 = vunpack.c.l.b16 %v3839_v45  ;;  %v5497_v24 = vrot.slane %v5481_v55, 9  ;;  %v2506_v42 = vrot.slane %v5917_v37, 5 }
 0x22a   : > { %5089 = vst [vmem:[%s7276_s15] sm:$0xf] %v5073_v57  ;;  %v4096_v2 = vadd.f32 %v7089_v50, %v4060_v32  ;;  %v2509_v59 = vrot.slane %v5918_v21, 5  ;;  %v3395_v49 = vshrl.u32 %v5669_v5, 16  ;;  %v3842_v18 = vsel %vm6175_vm8, %v3840_v56, %v3841_v36 }
 0x22b   : > { %v3398_v16 = vshll.u32 %v5669_v5, 16  ;;  %v3404_v51 = vshll.u32 %v7291_v12, 16  ;;  %v3408_v43 = vshrl.u32 %v7291_v12, 16  ;;  %v3991_v62 = vpop.f32.mrf.mxu0  ;;  %v3891_v48 = vunpack.c.l.b16 %v3842_v18 }
 0x22c   : > { %v4128_v61 = vmax.f32 %v4096_v2, 0.0  ;;  %v2507_v19 = vsel %vm6175_vm8, %v5497_v24, %v2506_v42  ;;  %v2508_v17 = vrot.slane %v2506_v42, 4  ;;  %v3593_v20 = vpop.f32.mrf.mxu3  ;;  %5626 = vmatmul.msk.bf16.gmra.mxu2 %vm658_vm5, %v5855_v9  ;;  %v2657_v14 = vpop.f32.mrf.mxu1  ;;  %v3397_v3 = vrot.slane %v3395_v49, 4 }
 0x22d   : > { %v2553_v33 = vunpack.c.l.b16 %v2507_v19  ;;  %v3400_v15 = vrot.slane %v3398_v16, 5  ;;  %v7305_v25 = vrot.slane %v3404_v51, 5  ;;  %v3663_v31 = vadd.f32 %v3593_v20, %v3009_v47 }
 0x22e   : > { %v4204_v26 = vrot.slane %v4128_v61, 2  ;;  %v4205_v6 = vrot.slane %v4128_v61, 4  ;;  %v4206_v36 = vrot.slane %v4128_v61, 6  ;;  %v4386_v55 = vmax.f32 %v7233_v0, %v4128_v61 }
 0x22f   : > { %v3910_v5 = vpack.c.b16 %v3891_v48, %v3890_v63  ;;  %v7309_v57 = vadd.f32 %v2657_v14, %v6572_v29  ;;  %v2510_v32 = vsel %vm6175_vm8, %v2508_v17, %v2509_v59  ;;  %v2942_v24 = vpop.f32.mrf.mxu2  ;;  %v4061_v47 = vadd.f32 %v3991_v62, %v3663_v31  ;;  %v7321_v59 = vld [vmem:[%s5989_s27 + $0xbc] sm:$0x1] }
 0x230   : > { %v4387_v4 = vmax.f32 %v4198_v8, %v4204_v26  ;;  %v4388_v45 = vmax.f32 %v4199_v41, %v4205_v6  ;;  %v4389_v9 = vmax.f32 %v4200_v34, %v4206_v36  ;;  %v5752_v56 = vrot.slane %v4386_v55, 9 }
 0x231   : > { %v3010_v63 = vadd.f32 %v2942_v24, %v2723_v54  ;;  %v2554_v2 = vunpack.c.l.b16 %v2510_v32  ;;  %v3401_v29 = vor.u32 %v3400_v15, %v3397_v3  ;;  %v4097_v8 = vadd.f32 %v7089_v50, %v4061_v47  ;;  %v5856_v47 = vld [vmem:[%s5989_s27 + $0xb4] sm:$0xff] }
 0x232   : > { %v5753_v37 = vrot.slane %v4387_v4, 9  ;;  %v5754_v42 = vrot.slane %v4388_v45, 9  ;;  %v5755_v21 = vrot.slane %v4389_v9, 9  ;;  %v4706_v49 = vmax.f32 %v4386_v55, %v5752_v56 }
 0x233   : > { %5691 = vmatmul.msk.bf16.gmra.mxu3 %vm658_vm5, %v3512_v7  ;;  %v2572_v41 = vpack.c.b16 %v2554_v2, %v2553_v33  ;;  %v7324_v18 = vrot.slane %v3401_v29, 4  ;;  %v3410_v0 = vrot.slane %v3408_v43, 4  ;;  %v3994_v61 = vpop.f32.mrf.mxu0  ;;  %v4129_v62 = vmax.f32 %v4097_v8, 0.0 }
 0x234   : > { %v4707_v34 = vmax.f32 %v4387_v4, %v5753_v37  ;;  %v4708_v16 = vmax.f32 %v4388_v45, %v5754_v42  ;;  %v4709_v51 = vmax.f32 %v4389_v9, %v5755_v21  ;;  %v4770_v54 = vpack.c.bf16 %v4706_v49, %v4706_v49  ;;  %v3596_v48 = vpop.f32.mrf.mxu3  ;;  %v2660_v19 = vpop.f32.mrf.mxu1 }
 0x235   : > { %v3407_v7 = vsel %vm6001_vm4, %v7324_v18, %v7305_v25  ;;  %v3411_v17 = vor.u32 %v3410_v0, %v7305_v25  ;;  %v3414_v20 = vshll.u32 %v7321_v59, 16  ;;  %v4207_v15 = vrot.slane %v4129_v62, 2  ;;  %v7620_v18 = vld [vmem:[#allocation2_spill] sm:$0xff] }
 0x236   : > { %v4771_v14 = vpack.c.bf16 %v4707_v34, %v4707_v34  ;;  %v4772_v33 = vpack.c.bf16 %v4708_v16, %v4708_v16  ;;  %v4773_v43 = vpack.c.bf16 %v4709_v51, %v4709_v51  ;;  %v4898_v3 = vunpack.c.l.b16 %v4770_v54  ;;  %5740 = vmatmul.msk.bf16.gmra.mxu0 %vm658_vm5, %v3910_v5 }
 0x237   : > { %v4208_v26 = vrot.slane %v4129_v62, 4  ;;  %v4209_v6 = vrot.slane %v4129_v62, 6  ;;  %v4390_v36 = vmax.f32 %v7264_v22, %v4129_v62  ;;  %v3664_v4 = vadd.f32 %v3596_v48, %v3010_v63  ;;  %v2944_v45 = vpop.f32.mrf.mxu2  ;;  %5514 = vmatmul.msk.bf16.gmra.mxu1 %vm658_vm5, %v2572_v41 }
 0x238   : > { %v4899_v55 = vunpack.c.l.b16 %v4771_v14  ;;  %v4900_v31 = vunpack.c.l.b16 %v4772_v33  ;;  %v4901_v32 = vunpack.c.l.b16 %v4773_v43  ;;  %v4391_v25 = vmax.f32 %v4201_v11, %v4207_v15 }
 0x239   : > { %v4392_v9 = vmax.f32 %v4202_v53, %v4208_v26  ;;  %v4393_v56 = vmax.f32 %v4203_v35, %v4209_v6  ;;  %v5756_v24 = vrot.slane %v4390_v36, 9  ;;  %v4062_v37 = vadd.f32 %v3994_v61, %v3664_v4 }
 0x23a   : > { %v4975_v2 = vrot.slane %v4899_v55, 7  ;;  %v4977_v5 = vrot.slane %v4900_v31, 6  ;;  %v4979_v29 = vrot.slane %v4901_v32, 5  ;;  %v5757_v42 = vrot.slane %v4391_v25, 9 }
 0x23b   : > { %v5758_v63 = vrot.slane %v4392_v9, 9  ;;  %v5759_v21 = vrot.slane %v4393_v56, 9  ;;  %v4710_v49 = vmax.f32 %v4390_v36, %v5756_v24  ;;  %v4098_v11 = vadd.f32 %v7089_v50, %v4062_v37  ;;  %v3996_v41 = vpop.f32.mrf.mxu0 }
 0x23c   : > { %v4976_v8 = vsel %vm4955_vm9, %v4975_v2, %v4898_v3  ;;  %v3011_v53 = vadd.f32 %v2944_v45, %v7309_v57  ;;  %v2725_v22 = vadd.f32 %v2660_v19, %v7620_v18  ;;  %v4711_v0 = vmax.f32 %v4391_v25, %v5757_v42  ;;  %v3598_v51 = vpop.f32.mrf.mxu3  ;;  %5627 = vmatmul.msk.bf16.gmra.mxu2 %vm658_vm5, %v5856_v47  ;;  %v2662_v54 = vpop.f32.mrf.mxu1  ;;  %v5708_v3 = vld [vmem:[%s5989_s27 + $0xb4] sm:$0xe] }
 0x23d   : > { %v4978_v35 = vsel %vm4958_vm10, %v4977_v5, %v4976_v8  ;;  %v4712_v34 = vmax.f32 %v4392_v9, %v5758_v63  ;;  %v4713_v16 = vmax.f32 %v4393_v56, %v5759_v21  ;;  %v4774_v62 = vpack.c.bf16 %v4710_v49, %v4710_v49 }
 0x23e   : > { %v4980_v61 = vsel %vm4961_vm11, %v4979_v29, %v4978_v35  ;;  %v7349_v48 = vmax.f32 %v4098_v11, 0.0  ;;  %v3665_v14 = vadd.f32 %v3598_v51, %v3011_v53  ;;  %v4775_v33 = vpack.c.bf16 %v4711_v0, %v4711_v0  ;;  %v5672_v0 = vld [vmem:[%s5989_s27 + $0xc0] sm:$0xf]  ;;  %v5482_v51 = vld [vmem:[%s5989_s27 + $0xb4] sm:$0xe] }
 0x23f   : > { %v4776_v57 = vpack.c.bf16 %v4712_v34, %v4712_v34  ;;  %v4777_v43 = vpack.c.bf16 %v4713_v16, %v4713_v16  ;;  %v3412_v19 = vrot.slane %v3411_v17, 4  ;;  %v4902_v15 = vunpack.c.l.b16 %v4774_v62  ;;  %v2947_v55 = vpop.f32.mrf.mxu2 }
 0x240   : > { %v4210_v26 = vrot.slane %v7349_v48, 2  ;;  %v4211_v6 = vrot.slane %v7349_v48, 4  ;;  %v4212_v36 = vrot.slane %v7349_v48, 6  ;;  %v4903_v31 = vunpack.c.l.b16 %v4775_v33  ;;  %v7377_v33 = vld [vmem:[%s5989_s27 + $0xc4] sm:$0xf] }
 0x241   : > { %v4904_v32 = vunpack.c.l.b16 %v4776_v57  ;;  %v4905_v4 = vunpack.c.l.b16 %v4777_v43  ;;  %v4063_v45 = vadd.f32 %v3996_v41, %v3665_v14  ;;  %v4981_v25 = vrot.slane %v4902_v15, 4  ;;  %v5857_v15 = vld [vmem:[%s5989_s27 + $0xc0] sm:$0xff] }
 0x242   : > { %v3416_v9 = vrot.slane %v3414_v20, 5  ;;  %v3494_v56 = vunpack.c.l.b16 %v3407_v7  ;;  %v5724_v24 = vrot.slane %v5708_v3, 9  ;;  %v4983_v47 = vrot.slane %v4903_v31, 3  ;;  %v5919_v31 = vld [vmem:[%s5989_s27 + $0xb8] sm:$0xf] }
 0x243   : > { %v4985_v2 = vrot.slane %v4904_v32, 2  ;;  %v4987_v17 = vrot.slane %v4905_v4, 1  ;;  %v4099_v5 = vadd.f32 %v7089_v50, %v4063_v45  ;;  %v4982_v29 = vsel %vm4964_vm12, %v4981_v25, %v4980_v61  ;;  %v3999_v37 = vpop.f32.mrf.mxu0  ;;  %v5920_v4 = vld [vmem:[%s5989_s27 + $0xbc] sm:$0x1] }
 0x244   : > { %v3417_v42 = vsel %vm6001_vm4, %v3412_v19, %v3416_v9  ;;  %v3845_v63 = vrot.slane %v7291_v12, 5  ;;  %v3848_v21 = vrot.slane %v7321_v59, 5  ;;  %v4984_v7 = vsel %vm4967_vm13, %v4983_v47, %v4982_v29  ;;  %v3601_v11 = vpop.f32.mrf.mxu3  ;;  %v2665_v41 = vpop.f32.mrf.mxu1 }
 0x245   : > { %v7362_v20 = vmax.f32 %v4099_v5, 0.0  ;;  %v3495_v49 = vunpack.c.l.b16 %v3417_v42  ;;  %v3012_v8 = vadd.f32 %v2947_v55, %v2725_v22  ;;  %v4986_v53 = vsel %vm4970_vm14, %v4985_v2, %v4984_v7 }
 0x246   : > { %v3846_v18 = vsel %vm6175_vm8, %v5724_v24, %v3845_v63  ;;  %v3847_v35 = vrot.slane %v3845_v63, 4  ;;  %v2726_v12 = vadd.f32 %v2662_v54, %v6619_v52  ;;  %v4988_v59 = vsel %vm4973_vm15, %v4987_v17, %v4986_v53  ;;  %v7388_v24 = vld [vmem:[%s5989_s27 + $0xc8] sm:$0x1]  ;;  %v5709_v63 = vld [vmem:[%s5989_s27 + $0xc0] sm:$0xe] }
 0x247   : > { %v4213_v34 = vrot.slane %v7362_v20, 2  ;;  %v4214_v22 = vrot.slane %v7362_v20, 4  ;;  %v4215_v16 = vrot.slane %v7362_v20, 6  ;;  %v5074_v61 = vpack.c.b16 %v4988_v59, %v4988_v59  ;;  %v2949_v54 = vpop.f32.mrf.mxu2 }
 0x248   : > { %v3513_v62 = vpack.c.b16 %v3495_v49, %v3494_v56  ;;  %v3849_v14 = vsel %vm6175_vm8, %v3847_v35, %v3848_v21  ;;  %v3892_v52 = vunpack.c.l.b16 %v3846_v18  ;;  %v3666_v43 = vadd.f32 %v3601_v11, %v3012_v8 }
 0x249   : > { %v3893_v57 = vunpack.c.l.b16 %v3849_v14  ;;  %v3013_v19 = vadd.f32 %v2949_v54, %v2726_v12  ;;  %v7380_v3 = vadd.f32 %v2665_v41, %v6630_v60  ;;  %5090 = vst [vmem:[%s7276_s15 + $0x4] sm:$0xf] %v5074_v61  ;;  %v5498_v55 = vrot.slane %v5482_v51, 9 }
 0x24a   : > { %5692 = vmatmul.msk.bf16.gmra.mxu3 %vm658_vm5, %v3513_v62  ;;  %v2513_v32 = vrot.slane %v5919_v31, 5  ;;  %v2516_v45 = vrot.slane %v5920_v4, 5  ;;  %v3419_v25 = vshrl.u32 %v5672_v0, 16  ;;  %v4064_v56 = vadd.f32 %v3999_v37, %v3666_v43 }
 0x24b   : > { %v3911_v9 = vpack.c.b16 %v3893_v57, %v3892_v52  ;;  %v3422_v47 = vshll.u32 %v5672_v0, 16  ;;  %v3428_v2 = vshll.u32 %v7377_v33, 16  ;;  %v4001_v60 = vpop.f32.mrf.mxu0  ;;  %v3432_v42 = vshrl.u32 %v7377_v33, 16 }
 0x24c   : > { %v2514_v17 = vsel %vm6175_vm8, %v5498_v55, %v2513_v32  ;;  %v2515_v5 = vrot.slane %v2513_v32, 4  ;;  %v3421_v29 = vrot.slane %v3419_v25, 4  ;;  %v4100_v21 = vadd.f32 %v7089_v50, %v4064_v56  ;;  %v3603_v7 = vpop.f32.mrf.mxu3  ;;  %5628 = vmatmul.msk.bf16.gmra.mxu2 %vm658_vm5, %v5857_v15  ;;  %v7400_v11 = vpop.f32.mrf.mxu1 }
 0x24d   : > { %5741 = vmatmul.msk.bf16.gmra.mxu0 %vm658_vm5, %v3911_v9  ;;  %v2555_v37 = vunpack.c.l.b16 %v2514_v17  ;;  %v3424_v49 = vrot.slane %v3422_v47, 5  ;;  %v7398_v8 = vrot.slane %v3428_v2, 5  ;;  %v3667_v41 = vadd.f32 %v3603_v7, %v3013_v19 }
 0x24e   : > { %v2517_v53 = vsel %vm6175_vm8, %v2515_v5, %v2516_v45  ;;  %v3434_v18 = vrot.slane %v3432_v42, 4  ;;  %v3438_v35 = vshll.u32 %v7388_v24, 16  ;;  %v4132_v12 = vmax.f32 %v4100_v21, 0.0 }
 0x24f   : > { %v2556_v0 = vunpack.c.l.b16 %v2517_v53  ;;  %v3425_v59 = vor.u32 %v3424_v49, %v3421_v29  ;;  %v5725_v51 = vrot.slane %v5709_v63, 9  ;;  %v4065_v61 = vadd.f32 %v4001_v60, %v3667_v41  ;;  %v7407_v54 = vpop.f32.mrf.mxu2 }
 0x250   : > { %v3435_v62 = vor.u32 %v3434_v18, %v7398_v8  ;;  %v3440_v14 = vrot.slane %v3438_v35, 5  ;;  %v3852_v52 = vrot.slane %v7377_v33, 5  ;;  %v4216_v57 = vrot.slane %v4132_v12, 2 }
 0x251   : > { %v4217_v43 = vrot.slane %v4132_v12, 4  ;;  %v4218_v19 = vrot.slane %v4132_v12, 6  ;;  %v4394_v15 = vmax.f32 %v7349_v48, %v4132_v12  ;;  %v4101_v55 = vadd.f32 %v7089_v50, %v4065_v61 }
 0x252   : > { %v2573_v31 = vpack.c.b16 %v2556_v0, %v2555_v37  ;;  %v3426_v32 = vrot.slane %v3425_v59, 4  ;;  %v3436_v4 = vrot.slane %v3435_v62, 4  ;;  %v4395_v45 = vmax.f32 %v4210_v26, %v4216_v57 }
 0x253   : > { %v4396_v25 = vmax.f32 %v4211_v6, %v4217_v43  ;;  %v4397_v9 = vmax.f32 %v4212_v36, %v4218_v19  ;;  %v5760_v56 = vrot.slane %v4394_v15, 9  ;;  %v4133_v47 = vmax.f32 %v4101_v55, 0.0  ;;  %v7417_v2 = vpop.f32.mrf.mxu0 }
 0x254   : > { %5515 = vmatmul.msk.bf16.gmra.mxu1 %vm658_vm5, %v2573_v31  ;;  %v3431_v50 = vsel %vm6001_vm4, %v3426_v32, %v7398_v8  ;;  %v3441_v60 = vsel %vm6001_vm4, %v3436_v4, %v3440_v14  ;;  %v7429_v26 = vsel %vm6175_vm8, %v5725_v51, %v3852_v52  ;;  %v5761_v48 = vrot.slane %v4395_v45, 9  ;;  %v7431_v5 = vpop.f32.mrf.mxu3  ;;  %v7433_v29 = vpop.f32.mrf.mxu1  ;;  %v5858_v14 = vld [vmem:[%s5989_s27 + $0xcc] sm:$0xff] }
 0x255   : > { %v5762_v6 = vrot.slane %v4396_v25, 9  ;;  %v5763_v36 = vrot.slane %v4397_v9, 9  ;;  %v4714_v17 = vmax.f32 %v4394_v15, %v5760_v56  ;;  %v4219_v42 = vrot.slane %v4133_v47, 2 }
 0x256   : > { %v4220_v63 = vrot.slane %v4133_v47, 4  ;;  %v4221_v21 = vrot.slane %v4133_v47, 6  ;;  %v4398_v7 = vmax.f32 %v7362_v20, %v4133_v47  ;;  %v4715_v37 = vmax.f32 %v4395_v45, %v5761_v48 }
 0x257   : > { %v4716_v49 = vmax.f32 %v4396_v25, %v5762_v6  ;;  %v4717_v8 = vmax.f32 %v4397_v9, %v5763_v36  ;;  %v4778_v41 = vpack.c.bf16 %v4714_v17, %v4714_v17  ;;  %v4399_v53 = vmax.f32 %v4213_v34, %v4219_v42  ;;  %v2954_v0 = vpop.f32.mrf.mxu2 }
 0x258   : > { %v4400_v18 = vmax.f32 %v4214_v22, %v4220_v63  ;;  %v4401_v35 = vmax.f32 %v4215_v16, %v4221_v21  ;;  %v5764_v12 = vrot.slane %v4398_v7, 9  ;;  %v4779_v59 = vpack.c.bf16 %v4715_v37, %v4715_v37 }
 0x259   : > { %v4780_v51 = vpack.c.bf16 %v4716_v49, %v4716_v49  ;;  %v4781_v61 = vpack.c.bf16 %v4717_v8, %v4717_v8  ;;  %v4906_v62 = vunpack.c.l.b16 %v4778_v41  ;;  %v5765_v57 = vrot.slane %v4399_v53, 9 }
 0x25a   : > { %v5766_v43 = vrot.slane %v4400_v18, 9  ;;  %v5767_v19 = vrot.slane %v4401_v35, 9  ;;  %v4718_v15 = vmax.f32 %v4398_v7, %v5764_v12  ;;  %v4907_v55 = vunpack.c.l.b16 %v4779_v59 }
 0x25b   : > { %v4908_v31 = vunpack.c.l.b16 %v4780_v51  ;;  %v4909_v34 = vunpack.c.l.b16 %v4781_v61  ;;  %v3496_v32 = vunpack.c.l.b16 %v3431_v50  ;;  %v4719_v4 = vmax.f32 %v4399_v53, %v5765_v57  ;;  %v7443_v16 = vpop.f32.mrf.mxu0  ;;  %v7621_v57 = vld [vmem:[#allocation3_spill] sm:$0xff] }
 0x25c   : > { %v4720_v22 = vmax.f32 %v4400_v18, %v5766_v43  ;;  %v4721_v45 = vmax.f32 %v4401_v35, %v5767_v19  ;;  %v4782_v20 = vpack.c.bf16 %v4718_v15, %v4718_v15  ;;  %v4989_v25 = vrot.slane %v4907_v55, 7  ;;  %v3608_v48 = vpop.f32.mrf.mxu3  ;;  %5629 = vmatmul.msk.bf16.gmra.mxu2 %vm658_vm5, %v5858_v14  ;;  %v7446_v6 = vpop.f32.mrf.mxu1  ;;  %v5675_v19 = vld [vmem:[%s5989_s27 + $0xcc] sm:$0xf] }
 0x25d   : > { %v4991_v9 = vrot.slane %v4908_v31, 6  ;;  %v4993_v56 = vrot.slane %v4909_v34, 5  ;;  %v3497_v47 = vunpack.c.l.b16 %v3441_v60  ;;  %v4783_v36 = vpack.c.bf16 %v4719_v4, %v4719_v4  ;;  %v5921_v34 = vld [vmem:[%s5989_s27 + $0xc4] sm:$0xf] }
 0x25e   : > { %v4784_v17 = vpack.c.bf16 %v4720_v22, %v4720_v22  ;;  %v4785_v42 = vpack.c.bf16 %v4721_v45, %v4721_v45  ;;  %v4910_v50 = vunpack.c.l.b16 %v4782_v20  ;;  %v4990_v63 = vsel %vm4955_vm9, %v4989_v25, %v4906_v62  ;;  %v5922_v45 = vld [vmem:[%s5989_s27 + $0xc8] sm:$0x1] }
 0x25f   : > { %v3514_v21 = vpack.c.b16 %v3497_v47, %v3496_v32  ;;  %v3854_v7 = vrot.slane %v3852_v52, 4  ;;  %v3855_v37 = vrot.slane %v7388_v24, 5  ;;  %v4992_v60 = vsel %vm4958_vm10, %v4991_v9, %v4990_v63  ;;  %v7453_v53 = vpop.f32.mrf.mxu2  ;;  %v5483_v24 = vld [vmem:[%s5989_s27 + $0xc0] sm:$0xe] }
 0x260   : > { %v4911_v49 = vunpack.c.l.b16 %v4783_v36  ;;  %v4912_v8 = vunpack.c.l.b16 %v4784_v17  ;;  %v4913_v41 = vunpack.c.l.b16 %v4785_v42  ;;  %v4994_v18 = vsel %vm4961_vm11, %v4993_v56, %v4992_v60  ;;  %v5677_v42 = vld [vmem:[%s5989_s27 + $0xd4] sm:$0x1] }
 0x261   : > { %v4995_v35 = vrot.slane %v4910_v50, 4  ;;  %5693 = vmatmul.msk.bf16.gmra.mxu3 %vm658_vm5, %v3514_v21  ;;  %v3856_v33 = vsel %vm6175_vm8, %v3854_v7, %v3855_v37  ;;  %v3894_v52 = vunpack.c.l.b16 %v7429_v26  ;;  %v3014_v14 = vadd.f32 %v7407_v54, %v7380_v3  ;;  %v5676_v3 = vld [vmem:[%s5989_s27 + $0xd0] sm:$0xf]  ;;  %v5710_v50 = vld [vmem:[%s5989_s27 + $0xcc] sm:$0xe] }
 0x262   : > { %v4997_v12 = vrot.slane %v4911_v49, 3  ;;  %v4999_v59 = vrot.slane %v4912_v8, 2  ;;  %v3895_v51 = vunpack.c.l.b16 %v3856_v33  ;;  %v5001_v62 = vrot.slane %v4913_v41, 1 }
 0x263   : > { %v4996_v61 = vsel %vm4964_vm12, %v4995_v35, %v4994_v18  ;;  %v2728_v43 = vadd.f32 %v7400_v11, %v7621_v57  ;;  %v7468_v26 = vpop.f32.mrf.mxu0  ;;  %v5499_v31 = vrot.slane %v5483_v24, 9  ;;  %v2520_v32 = vrot.slane %v5921_v34, 5  ;;  %v7496_v34 = vld [vmem:[%s7598_s2] ss:$0 sm:$0xff] }
 0x264   : > { %v4998_v15 = vsel %vm4967_vm13, %v4997_v12, %v4996_v61  ;;  %v3912_v55 = vpack.c.b16 %v3895_v51, %v3894_v52  ;;  %v2523_v20 = vrot.slane %v5922_v45, 5  ;;  %v3611_v54 = vpop.f32.mrf.mxu3  ;;  %v7474_v25 = vpop.f32.mrf.mxu1  ;;  %v3443_v47 = vshrl.u32 %v5675_v19, 16 }
 0x265   : > { %v5000_v4 = vsel %vm4970_vm14, %v4999_v59, %v4998_v15  ;;  %v3015_v22 = vadd.f32 %v2954_v0, %v2728_v43  ;;  %v2521_v9 = vsel %vm6175_vm8, %v5499_v31, %v2520_v32  ;;  %v2522_v56 = vrot.slane %v2520_v32, 4 }
 0x266   : > { %v5002_v11 = vsel %vm4973_vm15, %v5001_v62, %v5000_v4  ;;  %5742 = vmatmul.msk.bf16.gmra.mxu0 %vm658_vm5, %v3912_v55  ;;  %v3668_v17 = vadd.f32 %v7431_v5, %v3014_v14  ;;  %v2557_v0 = vunpack.c.l.b16 %v2521_v9  ;;  %v3445_v21 = vrot.slane %v3443_v47, 4 }
 0x267   : > { %v5075_v36 = vpack.c.b16 %v5002_v11, %v5002_v11  ;;  %v2524_v63 = vsel %vm6175_vm8, %v2522_v56, %v2523_v20  ;;  %v3446_v7 = vshll.u32 %v5675_v19, 16  ;;  %v3452_v37 = vshll.u32 %v5676_v3, 16  ;;  %v2959_v60 = vpop.f32.mrf.mxu2 }
 0x268   : > { %v3669_v49 = vadd.f32 %v3608_v48, %v3015_v22  ;;  %v2558_v8 = vunpack.c.l.b16 %v2524_v63  ;;  %v3456_v41 = vshrl.u32 %v5676_v3, 16  ;;  %v3462_v33 = vshll.u32 %v5677_v42, 16 }
 0x269   : > { %5091 = vst [vmem:[%s7276_s15 + $0x8] sm:$0xf] %v5075_v36  ;;  %v3448_v18 = vrot.slane %v3446_v7, 5  ;;  %v3454_v35 = vrot.slane %v3452_v37, 5  ;;  %v5726_v52 = vrot.slane %v5710_v50, 9  ;;  %v4066_v5 = vadd.f32 %v7417_v2, %v3668_v17 }
 0x26a   : > { %v2574_v24 = vpack.c.b16 %v2558_v8, %v2557_v0  ;;  %v3458_v12 = vrot.slane %v3456_v41, 4  ;;  %v3859_v51 = vrot.slane %v5676_v3, 5  ;;  %v3862_v61 = vrot.slane %v5677_v42, 5 }
 0x26b   : > { %v3449_v59 = vor.u32 %v3448_v18, %v3445_v21  ;;  %v4011_v62 = vpop.f32.mrf.mxu0  ;;  %v4067_v14 = vadd.f32 %v7443_v16, %v3669_v49  ;;  %v2729_v57 = vadd.f32 %v7433_v29, %v6666_v40  ;;  %v3464_v48 = vrot.slane %v3462_v33, 5 }
 0x26c   : > { %5516 = vmatmul.msk.bf16.gmra.mxu1 %vm658_vm5, %v2574_v24  ;;  %v3613_v43 = vpop.f32.mrf.mxu3  ;;  %v2677_v19 = vpop.f32.mrf.mxu1  ;;  %v3459_v55 = vor.u32 %v3458_v12, %v3454_v35  ;;  %v3860_v2 = vsel %vm6175_vm8, %v5726_v52, %v3859_v51  ;;  %v3861_v31 = vrot.slane %v3859_v51, 4  ;;  %v4102_v16 = vadd.f32 %v7496_v34, %v4066_v5 }
 0x26d   : > { %v3450_v15 = vrot.slane %v3449_v59, 4  ;;  %v3896_v32 = vunpack.c.l.b16 %v3860_v2  ;;  %v3016_v22 = vadd.f32 %v7453_v53, %v2729_v57  ;;  %v4103_v20 = vadd.f32 %v7496_v34, %v4067_v14 }
 0x26e   : > { %v3460_v29 = vrot.slane %v3459_v55, 4  ;;  %v3863_v4 = vsel %vm6175_vm8, %v3861_v31, %v3862_v61  ;;  %v2730_v9 = vadd.f32 %v7446_v6, %v6690_v46  ;;  %v4134_v42 = vmax.f32 %v4102_v16, 0.0 }
 0x26f   : > { %v3455_v40 = vsel %vm6001_vm4, %v3450_v15, %v3454_v35  ;;  %v2962_v45 = vpop.f32.mrf.mxu2  ;;  %v3897_v11 = vunpack.c.l.b16 %v3863_v4  ;;  %v3670_v47 = vadd.f32 %v3611_v54, %v3016_v22  ;;  %v4135_v53 = vmax.f32 %v4103_v20, 0.0 }
 0x270   : > { %v3498_v3 = vunpack.c.l.b16 %v3455_v40  ;;  %v3465_v56 = vsel %vm6001_vm4, %v3460_v29, %v3464_v48  ;;  %v3017_v0 = vadd.f32 %v2959_v60, %v2730_v9  ;;  %v2731_v7 = vadd.f32 %v7474_v25, %v6709_v44 }
 0x271   : > { %v3499_v36 = vunpack.c.l.b16 %v3465_v56  ;;  %v3913_v17 = vpack.c.b16 %v3897_v11, %v3896_v32  ;;  %v4068_v30 = vadd.f32 %v7468_v26, %v3670_v47  ;;  %v4222_v54 = vrot.slane %v4134_v42, 2 }
 0x272   : > { %v3671_v21 = vadd.f32 %v3613_v43, %v3017_v0  ;;  %v3018_v6 = vadd.f32 %v2962_v45, %v2731_v7  ;;  %v4223_v26 = vrot.slane %v4134_v42, 4  ;;  %v4224_v41 = vrot.slane %v4134_v42, 6 }
 0x273   : > { %v4014_v50 = vpop.f32.mrf.mxu0  ;;  %v3515_v63 = vpack.c.b16 %v3499_v36, %v3498_v3  ;;  %v4104_v39 = vadd.f32 %v7496_v34, %v4068_v30  ;;  %v4225_v18 = vrot.slane %v4135_v53, 2  ;;  %v4226_v35 = vrot.slane %v4135_v53, 4 }
 0x274   : > { %v3616_v37 = vpop.f32.mrf.mxu3  ;;  %v7512_v49 = vpop.f32.mrf.mxu1  ;;  %v4069_v46 = vadd.f32 %v4011_v62, %v3671_v21  ;;  %v4227_v24 = vrot.slane %v4135_v53, 6  ;;  %v2732_v51 = vadd.f32 %v2677_v19, %v6733_v13 }
 0x275   : > { %5694 = vmatmul.msk.bf16.gmra.mxu3 %vm658_vm5, %v3515_v63  ;;  %v4136_v60 = vmax.f32 %v4104_v39, 0.0  ;;  %v3672_v59 = vadd.f32 %v3616_v37, %v3018_v6 }
 0x276   : > { %5743 = vmatmul.msk.bf16.gmra.mxu0 %vm658_vm5, %v3913_v17  ;;  %v4105_v44 = vadd.f32 %v7496_v34, %v4069_v46 }
 0x277   : > { %v2964_v8 = vpop.f32.mrf.mxu2  ;;  %v4228_v25 = vrot.slane %v4136_v60, 2  ;;  %v4229_v33 = vrot.slane %v4136_v60, 4  ;;  %v4230_v52 = vrot.slane %v4136_v60, 6  ;;  %v4402_v5 = vmax.f32 %v4134_v42, %v4136_v60 }
 0x278   : > { %v4137_v12 = vmax.f32 %v4105_v44, 0.0  ;;  %v4070_v9 = vadd.f32 %v4014_v50, %v3672_v59 }
 0x279   : > { %v4403_v61 = vmax.f32 %v4222_v54, %v4228_v25  ;;  %v4404_v62 = vmax.f32 %v4223_v26, %v4229_v33  ;;  %v4405_v14 = vmax.f32 %v4224_v41, %v4230_v52  ;;  %v5768_v57 = vrot.slane %v4402_v5, 9 }
 0x27a   : > { %v4231_v43 = vrot.slane %v4137_v12, 2  ;;  %v4232_v15 = vrot.slane %v4137_v12, 4  ;;  %v4233_v55 = vrot.slane %v4137_v12, 6  ;;  %v4406_v2 = vmax.f32 %v4135_v53, %v4137_v12 }
 0x27b   : > { %v4016_v48 = vpop.f32.mrf.mxu0  ;;  %v5769_v32 = vrot.slane %v4403_v61, 9  ;;  %v5770_v40 = vrot.slane %v4404_v62, 9  ;;  %v5771_v29 = vrot.slane %v4405_v14, 9  ;;  %v4722_v4 = vmax.f32 %v4402_v5, %v5768_v57 }
 0x27c   : > { %v3618_v31 = vpop.f32.mrf.mxu3  ;;  %v2682_v16 = vpop.f32.mrf.mxu1  ;;  %v4407_v22 = vmax.f32 %v4225_v18, %v4231_v43  ;;  %v4408_v45 = vmax.f32 %v4226_v35, %v4232_v15  ;;  %v4409_v20 = vmax.f32 %v4227_v24, %v4233_v55  ;;  %v5772_v3 = vrot.slane %v4406_v2, 9 }
 0x27d   : > { %v4723_v13 = vmax.f32 %v4403_v61, %v5769_v32  ;;  %v4724_v19 = vmax.f32 %v4404_v62, %v5770_v40  ;;  %v4725_v11 = vmax.f32 %v4405_v14, %v5771_v29  ;;  %v4786_v42 = vpack.c.bf16 %v4722_v4, %v4722_v4 }
 0x27e   : > { %v5773_v47 = vrot.slane %v4407_v22, 9  ;;  %v5774_v36 = vrot.slane %v4408_v45, 9  ;;  %v5775_v17 = vrot.slane %v4409_v20, 9  ;;  %v4726_v0 = vmax.f32 %v4406_v2, %v5772_v3 }
 0x27f   : > { %v2967_v56 = vpop.f32.mrf.mxu2  ;;  %v4787_v30 = vpack.c.bf16 %v4723_v13, %v4723_v13  ;;  %v4788_v53 = vpack.c.bf16 %v4724_v19, %v4724_v19  ;;  %v4789_v63 = vpack.c.bf16 %v4725_v11, %v4725_v11  ;;  %v3019_v26 = vadd.f32 %v2964_v8, %v2732_v51 }
 0x280   : > { %v4727_v21 = vmax.f32 %v4407_v22, %v5773_v47  ;;  %v4728_v7 = vmax.f32 %v4408_v45, %v5774_v36  ;;  %v4729_v37 = vmax.f32 %v4409_v20, %v5775_v17  ;;  %v4790_v39 = vpack.c.bf16 %v4726_v0, %v4726_v0 }
 0x281   : > { %v4915_v46 = vunpack.c.l.b16 %v4787_v30  ;;  %v4916_v6 = vunpack.c.l.b16 %v4788_v53  ;;  %v4917_v54 = vunpack.c.l.b16 %v4789_v63  ;;  %v4914_v25 = vunpack.c.l.b16 %v4786_v42 }
 0x282   : > { %v4791_v41 = vpack.c.bf16 %v4727_v21, %v4727_v21  ;;  %v4792_v50 = vpack.c.bf16 %v4728_v7, %v4728_v7  ;;  %v4793_v18 = vpack.c.bf16 %v4729_v37, %v4729_v37  ;;  %v4918_v35 = vunpack.c.l.b16 %v4790_v39 }
 0x283   : > { %v4019_v60 = vpop.f32.mrf.mxu0  ;;  %v5003_v33 = vrot.slane %v4915_v46, 7  ;;  %v5005_v52 = vrot.slane %v4916_v6, 6  ;;  %v2733_v61 = vadd.f32 %v7512_v49, %v6752_v1  ;;  %v5007_v14 = vrot.slane %v4917_v54, 5 }
 0x284   : > { %v3621_v44 = vpop.f32.mrf.mxu3  ;;  %v2685_v5 = vpop.f32.mrf.mxu1  ;;  %v4919_v24 = vunpack.c.l.b16 %v4791_v41  ;;  %v4920_v12 = vunpack.c.l.b16 %v4792_v50  ;;  %v5009_v59 = vrot.slane %v4918_v35, 4  ;;  %v4921_v8 = vunpack.c.l.b16 %v4793_v18 }
 0x285   : > { %v5004_v62 = vsel %vm4955_vm9, %v5003_v33, %v4914_v25  ;;  %v3673_v51 = vadd.f32 %v3618_v31, %v3019_v26  ;;  %v4106_v2 = vadd.f32 %v7496_v34, %v4070_v9  ;;  %v3020_v29 = vadd.f32 %v2967_v56, %v2733_v61 }
 0x286   : > { %v5006_v43 = vsel %vm4958_vm10, %v5005_v52, %v5004_v62  ;;  %v5011_v15 = vrot.slane %v4919_v24, 3  ;;  %v5013_v55 = vrot.slane %v4920_v12, 2  ;;  %v2734_v4 = vadd.f32 %v2682_v16, %v6776_v38 }
 0x287   : > { %v2969_v57 = vpop.f32.mrf.mxu2  ;;  %v5008_v32 = vsel %vm4961_vm11, %v5007_v14, %v5006_v43  ;;  %v4071_v40 = vadd.f32 %v4016_v48, %v3673_v51  ;;  %v5015_v22 = vrot.slane %v4921_v8, 1  ;;  %v3674_v31 = vadd.f32 %v3621_v44, %v3020_v29 }
 0x288   : > { %v5010_v1 = vsel %vm4964_vm12, %v5009_v59, %v5008_v32  ;;  %v3021_v20 = vadd.f32 %v2969_v57, %v2734_v4  ;;  %v4138_v48 = vmax.f32 %v4106_v2, 0.0  ;;  %v2735_v7 = vadd.f32 %v2685_v5, %v6795_v10 }
 0x289   : > { %v5012_v49 = vsel %vm4967_vm13, %v5011_v15, %v5010_v1  ;;  %v4107_v13 = vadd.f32 %v7496_v34, %v4071_v40  ;;  %v4072_v9 = vadd.f32 %v4019_v60, %v3674_v31 }
 0x28a   : > { %v5014_v3 = vsel %vm4970_vm14, %v5013_v55, %v5012_v49  ;;  %v4234_v42 = vrot.slane %v4138_v48, 2  ;;  %v4235_v30 = vrot.slane %v4138_v48, 4  ;;  %v4236_v63 = vrot.slane %v4138_v48, 6 }
 0x28b   : > { %v4021_v45 = vpop.f32.mrf.mxu0  ;;  %v5016_v11 = vsel %vm4973_vm15, %v5015_v22, %v5014_v3  ;;  %v4108_v16 = vadd.f32 %v7496_v34, %v4072_v9  ;;  %v4139_v17 = vmax.f32 %v4107_v13, 0.0 }
 0x28c   : > { %v3623_v19 = vpop.f32.mrf.mxu3  ;;  %v5076_v38 = vpack.c.b16 %v5016_v11, %v5016_v11  ;;  %v2687_v36 = vpop.f32.mrf.mxu1 }
 0x28d   : > { %v3675_v56 = vadd.f32 %v3623_v19, %v3021_v20  ;;  %v4140_v53 = vmax.f32 %v4108_v16, 0.0  ;;  %v7536_v37 = vadd.f32 %v2687_v36, %v6819_v23  ;;  %v4237_v60 = vrot.slane %v4139_v17, 2 }
 0x28e   : > { %5092 = vst [vmem:[%s7276_s15 + $0xc] sm:$0xf] %v5076_v38  ;;  %v4238_v41 = vrot.slane %v4139_v17, 4  ;;  %v4239_v50 = vrot.slane %v4139_v17, 6 }
 0x28f   : > { %v2972_v47 = vpop.f32.mrf.mxu2  ;;  %v4073_v0 = vadd.f32 %v4021_v45, %v3675_v56  ;;  %v4240_v39 = vrot.slane %v4140_v53, 2  ;;  %v4241_v46 = vrot.slane %v4140_v53, 4  ;;  %v4242_v6 = vrot.slane %v4140_v53, 6 }
 0x290   : > { %v4410_v54 = vmax.f32 %v4138_v48, %v4140_v53  ;;  %v3022_v32 = vadd.f32 %v2972_v47, %v2735_v7 }
 0x291   : > { %v4109_v21 = vadd.f32 %v7496_v34, %v4073_v0  ;;  %v4411_v44 = vmax.f32 %v4234_v42, %v4240_v39  ;;  %v4412_v25 = vmax.f32 %v4235_v30, %v4241_v46  ;;  %v4413_v33 = vmax.f32 %v4236_v63, %v4242_v6 }
 0x292   : > { %v5776_v52 = vrot.slane %v4410_v54, 9 }
 0x293   : > { %v4024_v26 = vpop.f32.mrf.mxu0  ;;  %v4141_v18 = vmax.f32 %v4109_v21, 0.0  ;;  %v5777_v23 = vrot.slane %v4411_v44, 9  ;;  %v5778_v59 = vrot.slane %v4412_v25, 9  ;;  %v5779_v61 = vrot.slane %v4413_v33, 9 }
 0x294   : > { %v3626_v35 = vpop.f32.mrf.mxu3  ;;  %v4730_v62 = vmax.f32 %v4410_v54, %v5776_v52  ;;  %v2690_v40 = vpop.f32.mrf.mxu1 }
 0x295   : > { %v4243_v24 = vrot.slane %v4141_v18, 2  ;;  %v4244_v12 = vrot.slane %v4141_v18, 4  ;;  %v4245_v10 = vrot.slane %v4141_v18, 6  ;;  %v4414_v5 = vmax.f32 %v4139_v17, %v4141_v18 }
 0x296   : > { %v4731_v15 = vmax.f32 %v4411_v44, %v5777_v23  ;;  %v4732_v55 = vmax.f32 %v4412_v25, %v5778_v59  ;;  %v4733_v2 = vmax.f32 %v4413_v33, %v5779_v61  ;;  %v4794_v22 = vpack.c.bf16 %v4730_v62, %v4730_v62 }
 0x297   : > { %v2974_v14 = vpop.f32.mrf.mxu2  ;;  %v4415_v8 = vmax.f32 %v4237_v60, %v4243_v24  ;;  %v4416_v51 = vmax.f32 %v4238_v41, %v4244_v12  ;;  %v4417_v57 = vmax.f32 %v4239_v50, %v4245_v10  ;;  %v5780_v43 = vrot.slane %v4414_v5, 9 }
 0x298   : > { %v4795_v31 = vpack.c.bf16 %v4731_v15, %v4731_v15  ;;  %v4796_v45 = vpack.c.bf16 %v4732_v55, %v4732_v55  ;;  %v4797_v20 = vpack.c.bf16 %v4733_v2, %v4733_v2  ;;  %v3676_v36 = vadd.f32 %v3626_v35, %v3022_v32 }
 0x299   : > { %v5781_v29 = vrot.slane %v4415_v8, 9  ;;  %v5782_v4 = vrot.slane %v4416_v51, 9  ;;  %v5783_v1 = vrot.slane %v4417_v57, 9  ;;  %v4734_v49 = vmax.f32 %v4414_v5, %v5780_v43 }
 0x29a   : > { %v4923_v56 = vunpack.c.l.b16 %v4795_v31  ;;  %v4924_v38 = vunpack.c.l.b16 %v4796_v45  ;;  %v4925_v16 = vunpack.c.l.b16 %v4797_v20  ;;  %v4922_v30 = vunpack.c.l.b16 %v4794_v22 }
 0x29b   : > { %v4026_v3 = vpop.f32.mrf.mxu0  ;;  %v4735_v13 = vmax.f32 %v4415_v8, %v5781_v29  ;;  %v4736_v19 = vmax.f32 %v4416_v51, %v5782_v4  ;;  %v4737_v11 = vmax.f32 %v4417_v57, %v5783_v1  ;;  %v4798_v48 = vpack.c.bf16 %v4734_v49, %v4734_v49 }
 0x29c   : > { %v3628_v9 = vpop.f32.mrf.mxu3  ;;  %v5017_v53 = vrot.slane %v4923_v56, 7  ;;  %v5019_v63 = vrot.slane %v4924_v38, 6  ;;  %v5021_v21 = vrot.slane %v4925_v16, 5  ;;  %v4074_v54 = vadd.f32 %v4024_v26, %v3676_v36  ;;  %v2692_v12 = vpop.f32.mrf.mxu1 }
 0x29d   : > { %v4799_v47 = vpack.c.bf16 %v4735_v13, %v4735_v13  ;;  %v4800_v17 = vpack.c.bf16 %v4736_v19, %v4736_v19  ;;  %v4801_v0 = vpack.c.bf16 %v4737_v11, %v4737_v11  ;;  %v4926_v42 = vunpack.c.l.b16 %v4798_v48 }
 0x29e   : > { %v5018_v60 = vsel %vm4955_vm9, %v5017_v53, %v4922_v30  ;;  %v3023_v50 = vadd.f32 %v2974_v14, %v7536_v37  ;;  %v2737_v18 = vadd.f32 %v2690_v40, %v6838_v28  ;;  %v4110_v37 = vadd.f32 %v7496_v34, %v4074_v54 }
 0x29f   : > { %v2977_v7 = vpop.f32.mrf.mxu2  ;;  %v4927_v39 = vunpack.c.l.b16 %v4799_v47  ;;  %v4928_v46 = vunpack.c.l.b16 %v4800_v17  ;;  %v5023_v6 = vrot.slane %v4926_v42, 4  ;;  %v4929_v41 = vunpack.c.l.b16 %v4801_v0 }
 0x2a0   : > { %v5020_v35 = vsel %vm4958_vm10, %v5019_v63, %v5018_v60  ;;  %v3677_v52 = vadd.f32 %v3628_v9, %v3023_v50  ;;  %v3024_v24 = vadd.f32 %v2977_v7, %v2737_v18  ;;  %v2738_v8 = vadd.f32 %v2692_v12, %v6862_v58 }
 0x2a1   : > { %v5025_v44 = vrot.slane %v4927_v39, 3  ;;  %v5027_v25 = vrot.slane %v4928_v46, 2  ;;  %v5022_v33 = vsel %vm4961_vm11, %v5021_v21, %v5020_v35  ;;  %v5029_v59 = vrot.slane %v4929_v41, 1 }
 0x2a2   : > { %v5024_v10 = vsel %vm4964_vm12, %v5023_v6, %v5022_v33  ;;  %v4075_v14 = vadd.f32 %v4026_v3, %v3677_v52  ;;  %v4142_v15 = vmax.f32 %v4110_v37, 0.0 }
 0x2a3   : > { %v4029_v26 = vpop.f32.mrf.mxu0  ;;  %v5026_v23 = vsel %vm4967_vm13, %v5025_v44, %v5024_v10 }
 0x2a4   : > { %v5028_v28 = vsel %vm4970_vm14, %v5027_v25, %v5026_v23  ;;  %v4111_v32 = vadd.f32 %v7496_v34, %v4075_v14  ;;  %v4246_v4 = vrot.slane %v4142_v15, 2  ;;  %v4247_v1 = vrot.slane %v4142_v15, 4  ;;  %v2695_v11 = vpop.f32.mrf.mxu1 }
 0x2a5   : > { %v5030_v62 = vsel %vm4973_vm15, %v5029_v59, %v5028_v28  ;;  %v4248_v49 = vrot.slane %v4142_v15, 6 }
 0x2a6   : > { %v3631_v5 = vpop.f32.mrf.mxu3  ;;  %v5077_v57 = vpack.c.b16 %v5030_v62, %v5030_v62  ;;  %v4143_v13 = vmax.f32 %v4111_v32, 0.0 }
 0x2a7   : > { %v3678_v61 = vadd.f32 %v3631_v5, %v3024_v24  ;;  %v2979_v51 = vpop.f32.mrf.mxu2 }
 0x2a8   : > { %v3025_v55 = vadd.f32 %v2979_v51, %v2738_v8  ;;  %5093 = vst [vmem:[%s7276_s15 + $0x10] sm:$0xf] %v5077_v57  ;;  %v4249_v30 = vrot.slane %v4143_v13, 2  ;;  %v4250_v53 = vrot.slane %v4143_v13, 4  ;;  %v4251_v21 = vrot.slane %v4143_v13, 6 }
 0x2a9   : > { %v4076_v43 = vadd.f32 %v4029_v26, %v3678_v61 }
 0x2ab   : > { %v4112_v2 = vadd.f32 %v7496_v34, %v4076_v43  ;;  %v4031_v3 = vpop.f32.mrf.mxu0 }
 0x2ac   : > { %v2697_v62 = vpop.f32.mrf.mxu1 }
 0x2ad   : > { %v4144_v40 = vmax.f32 %v4112_v2, 0.0 }
 0x2ae   : > { %v3633_v29 = vpop.f32.mrf.mxu3 }
 0x2af   : > { %v3679_v22 = vadd.f32 %v3633_v29, %v3025_v55  ;;  %v4252_v31 = vrot.slane %v4144_v40, 2  ;;  %v4253_v45 = vrot.slane %v4144_v40, 4  ;;  %v4254_v20 = vrot.slane %v4144_v40, 6  ;;  %v2982_v36 = vpop.f32.mrf.mxu2 }
 0x2b0   : > { %v4418_v58 = vmax.f32 %v4142_v15, %v4144_v40 }
 0x2b1   : > { %v4077_v19 = vadd.f32 %v4031_v3, %v3679_v22  ;;  %v4419_v48 = vmax.f32 %v4246_v4, %v4252_v31  ;;  %v4420_v9 = vmax.f32 %v4247_v1, %v4253_v45  ;;  %v4421_v56 = vmax.f32 %v4248_v49, %v4254_v20 }
 0x2b2   : > { %v5784_v38 = vrot.slane %v4418_v58, 9  ;;  %v2739_v45 = vadd.f32 %v2695_v11, %v6881_v27 }
 0x2b3   : > { %v4113_v16 = vadd.f32 %v7496_v34, %v4077_v19  ;;  %v5785_v47 = vrot.slane %v4419_v48, 9  ;;  %v5786_v17 = vrot.slane %v4420_v9, 9  ;;  %v5787_v0 = vrot.slane %v4421_v56, 9  ;;  %v4034_v61 = vpop.f32.mrf.mxu0 }
 0x2b4   : > { %v4738_v42 = vmax.f32 %v4418_v58, %v5784_v38  ;;  %v3026_v19 = vadd.f32 %v2982_v36, %v2739_v45 }
 0x2b5   : > { %v4145_v63 = vmax.f32 %v4113_v16, 0.0  ;;  %v4739_v7 = vmax.f32 %v4419_v48, %v5785_v47  ;;  %v4740_v39 = vmax.f32 %v4420_v9, %v5786_v17  ;;  %v4741_v46 = vmax.f32 %v4421_v56, %v5787_v0  ;;  %v2700_v0 = vpop.f32.mrf.mxu1 }
 0x2b6   : > { %v4802_v50 = vpack.c.bf16 %v4738_v42, %v4738_v42  ;;  %v3636_v5 = vpop.f32.mrf.mxu3 }
 0x2b7   : > { %v4255_v6 = vrot.slane %v4145_v63, 2  ;;  %v4256_v54 = vrot.slane %v4145_v63, 4  ;;  %v4257_v60 = vrot.slane %v4145_v63, 6  ;;  %v4422_v41 = vmax.f32 %v4143_v13, %v4145_v63  ;;  %v2984_v2 = vpop.f32.mrf.mxu2  ;;  %v7622_v63 = vld [vmem:[#allocation4_spill] sm:$0xff] }
 0x2b8   : > { %v4803_v18 = vpack.c.bf16 %v4739_v7, %v4739_v7  ;;  %v4804_v35 = vpack.c.bf16 %v4740_v39, %v4740_v39  ;;  %v4805_v44 = vpack.c.bf16 %v4741_v46, %v4741_v46  ;;  %v4930_v14 = vunpack.c.l.b16 %v4802_v50 }
 0x2b9   : > { %v4423_v25 = vmax.f32 %v4249_v30, %v4255_v6  ;;  %v4424_v33 = vmax.f32 %v4250_v53, %v4256_v54  ;;  %v4425_v52 = vmax.f32 %v4251_v21, %v4257_v60  ;;  %v5788_v24 = vrot.slane %v4422_v41, 9  ;;  %v7623_v21 = vld [vmem:[#allocation5_spill] sm:$0xff] }
 0x2ba   : > { %v4931_v12 = vunpack.c.l.b16 %v4803_v18  ;;  %v4932_v10 = vunpack.c.l.b16 %v4804_v35  ;;  %v4933_v26 = vunpack.c.l.b16 %v4805_v44  ;;  %v3680_v30 = vadd.f32 %v3636_v5, %v3026_v19 }
 0x2bb   : > { %v5789_v23 = vrot.slane %v4423_v25, 9  ;;  %v5790_v59 = vrot.slane %v4424_v33, 9  ;;  %v5791_v37 = vrot.slane %v4425_v52, 9  ;;  %v4742_v28 = vmax.f32 %v4422_v41, %v5788_v24  ;;  %v4036_v17 = vpop.f32.mrf.mxu0  ;;  %v7624_v24 = vld [vmem:[#allocation6_spill] sm:$0xff] }
 0x2bc   : > { %v5031_v8 = vrot.slane %v4931_v12, 7  ;;  %v5033_v51 = vrot.slane %v4932_v10, 6  ;;  %v5035_v40 = vrot.slane %v4933_v26, 5  ;;  %v2740_v36 = vadd.f32 %v2697_v62, %v7622_v63 }
 0x2bd   : > { %v4743_v57 = vmax.f32 %v4423_v25, %v5789_v23  ;;  %v4744_v43 = vmax.f32 %v4424_v33, %v5790_v59  ;;  %v4745_v15 = vmax.f32 %v4425_v52, %v5791_v37  ;;  %v4806_v55 = vpack.c.bf16 %v4742_v28, %v4742_v28  ;;  %v2702_v35 = vpop.f32.mrf.mxu1 }
 0x2be   : > { %v5032_v32 = vsel %vm4955_vm9, %v5031_v8, %v4930_v14  ;;  %v3638_v38 = vpop.f32.mrf.mxu3  ;;  %v2741_v7 = vadd.f32 %v2700_v0, %v7623_v21  ;;  %v4078_v39 = vadd.f32 %v4034_v61, %v3680_v30  ;;  %v3027_v46 = vadd.f32 %v2984_v2, %v2740_v36 }
 0x2bf   : > { %v5034_v29 = vsel %vm4958_vm10, %v5033_v51, %v5032_v32  ;;  %v4807_v4 = vpack.c.bf16 %v4743_v57, %v4743_v57  ;;  %v4808_v1 = vpack.c.bf16 %v4744_v43, %v4744_v43  ;;  %v4809_v49 = vpack.c.bf16 %v4745_v15, %v4745_v15  ;;  %v2987_v11 = vpop.f32.mrf.mxu2 }
 0x2c0   : > { %v5036_v22 = vsel %vm4961_vm11, %v5035_v40, %v5034_v29  ;;  %v4934_v31 = vunpack.c.l.b16 %v4806_v55  ;;  %v3028_v6 = vadd.f32 %v2987_v11, %v2741_v7  ;;  %v4114_v54 = vadd.f32 %v7496_v34, %v4078_v39 }
 0x2c1   : > { %v4935_v20 = vunpack.c.l.b16 %v4807_v4  ;;  %v4936_v58 = vunpack.c.l.b16 %v4808_v1  ;;  %v4937_v3 = vunpack.c.l.b16 %v4809_v49  ;;  %v3681_v60 = vadd.f32 %v3638_v38, %v3027_v46 }
 0x2c2   : > { %v5037_v13 = vrot.slane %v4934_v31, 4  ;;  %v4146_v33 = vmax.f32 %v4114_v54, 0.0  ;;  %v2742_v12 = vadd.f32 %v2702_v35, %v7624_v24 }
 0x2c3   : > { %v5039_v48 = vrot.slane %v4935_v20, 3  ;;  %v5041_v9 = vrot.slane %v4936_v58, 2  ;;  %v5043_v47 = vrot.slane %v4937_v3, 1  ;;  %v4079_v52 = vadd.f32 %v4036_v17, %v3681_v60 }
 0x2c4   : > { %v5038_v56 = vsel %vm4964_vm12, %v5037_v13, %v5036_v22  ;;  %v4258_v23 = vrot.slane %v4146_v33, 2  ;;  %v4259_v59 = vrot.slane %v4146_v33, 4  ;;  %v4260_v37 = vrot.slane %v4146_v33, 6 }
 0x2c5   : > { %v5040_v16 = vsel %vm4967_vm13, %v5039_v48, %v5038_v56  ;;  %v4115_v28 = vadd.f32 %v7496_v34, %v4079_v52 }
 0x2c6   : > { %v5042_v42 = vsel %vm4970_vm14, %v5041_v9, %v5040_v16 }
 0x2c7   : > { %v5044_v27 = vsel %vm4973_vm15, %v5043_v47, %v5042_v42  ;;  %v2989_v25 = vpop.f32.mrf.mxu2  ;;  %v4147_v40 = vmax.f32 %v4115_v28, 0.0 }
 0x2c8   : > { %v5078_v53 = vpack.c.b16 %v5044_v27, %v5044_v27  ;;  %v3029_v26 = vadd.f32 %v2989_v25, %v2742_v12 }
 0x2c9   : > { %v4261_v3 = vrot.slane %v4147_v40, 2  ;;  %v4262_v13 = vrot.slane %v4147_v40, 4  ;;  %v4263_v19 = vrot.slane %v4147_v40, 6 }
 0x2ca   : > { %5094 = vst [vmem:[%s7276_s15 + $0x14] sm:$0xf] %v5078_v53  ;;  %v4039_v50 = vpop.f32.mrf.mxu0 }
 0x2cd   : > { %v3641_v41 = vpop.f32.mrf.mxu3 }
 0x2ce   : > { %v3682_v18 = vadd.f32 %v3641_v41, %v3028_v6 }
 0x2cf   : > { %v2992_v27 = vpop.f32.mrf.mxu2 }
 0x2d0   : > { %v4080_v44 = vadd.f32 %v4039_v50, %v3682_v18 }
 0x2d1   : > { %v2705_v9 = vpop.f32.mrf.mxu1 }
 0x2d2   : > { %v4116_v10 = vadd.f32 %v7496_v34, %v4080_v44  ;;  %v4041_v32 = vpop.f32.mrf.mxu0 }
 0x2d4   : > { %v4148_v5 = vmax.f32 %v4116_v10, 0.0 }
 0x2d5   : > { %v3643_v51 = vpop.f32.mrf.mxu3 }
 0x2d6   : > { %v4264_v61 = vrot.slane %v4148_v5, 2  ;;  %v4265_v62 = vrot.slane %v4148_v5, 4  ;;  %v4266_v14 = vrot.slane %v4148_v5, 6  ;;  %v4426_v8 = vmax.f32 %v4146_v33, %v4148_v5 }
 0x2d7   : > { %v3683_v57 = vadd.f32 %v3643_v51, %v3029_v26  ;;  %v2994_v51 = vpop.f32.mrf.mxu2 }
 0x2d8   : > { %v4427_v43 = vmax.f32 %v4258_v23, %v4264_v61  ;;  %v4428_v15 = vmax.f32 %v4259_v59, %v4265_v62  ;;  %v4429_v55 = vmax.f32 %v4260_v37, %v4266_v14  ;;  %v5792_v2 = vrot.slane %v4426_v8, 9 }
 0x2d9   : > { %v4081_v29 = vadd.f32 %v4041_v32, %v3683_v57  ;;  %v2707_v28 = vpop.f32.mrf.mxu1 }
 0x2da   : > { %v5793_v4 = vrot.slane %v4427_v43, 9  ;;  %v5794_v1 = vrot.slane %v4428_v15, 9  ;;  %v5795_v49 = vrot.slane %v4429_v55, 9  ;;  %v4746_v22 = vmax.f32 %v4426_v8, %v5792_v2  ;;  %v7625_v2 = vld [vmem:[#allocation7_spill] sm:$0xff] }
 0x2db   : > { %v4117_v31 = vadd.f32 %v7496_v34, %v4081_v29  ;;  %v2743_v32 = vadd.f32 %v2705_v9, %v7625_v2 }
 0x2dc   : > { %v4747_v45 = vmax.f32 %v4427_v43, %v5793_v4  ;;  %v4748_v20 = vmax.f32 %v4428_v15, %v5794_v1  ;;  %v4749_v58 = vmax.f32 %v4429_v55, %v5795_v49  ;;  %v4810_v56 = vpack.c.bf16 %v4746_v22, %v4746_v22 }
 0x2dd   : > { %v4149_v48 = vmax.f32 %v4117_v31, 0.0  ;;  %v3030_v1 = vadd.f32 %v2992_v27, %v2743_v32 }
 0x2de   : > { %v4811_v38 = vpack.c.bf16 %v4747_v45, %v4747_v45  ;;  %v4812_v16 = vpack.c.bf16 %v4748_v20, %v4748_v20  ;;  %v4813_v47 = vpack.c.bf16 %v4749_v58, %v4749_v58  ;;  %v4938_v46 = vunpack.c.l.b16 %v4810_v56 }
 0x2df   : > { %v4267_v17 = vrot.slane %v4149_v48, 2  ;;  %v4268_v0 = vrot.slane %v4149_v48, 4  ;;  %v4269_v42 = vrot.slane %v4149_v48, 6  ;;  %v4430_v30 = vmax.f32 %v4147_v40, %v4149_v48  ;;  %v7627_v48 = vld [vmem:[#allocation9_spill] sm:$0xff] }
 0x2e0   : > { %v4939_v11 = vunpack.c.l.b16 %v4811_v38  ;;  %v4940_v53 = vunpack.c.l.b16 %v4812_v16  ;;  %v4941_v63 = vunpack.c.l.b16 %v4813_v47 }
 0x2e1   : > { %v4431_v36 = vmax.f32 %v4261_v3, %v4267_v17  ;;  %v4432_v21 = vmax.f32 %v4262_v13, %v4268_v0  ;;  %v4433_v7 = vmax.f32 %v4263_v19, %v4269_v42  ;;  %v5796_v39 = vrot.slane %v4430_v30, 9  ;;  %v2997_v3 = vpop.f32.mrf.mxu2  ;;  %v7626_v13 = vld [vmem:[#allocation8_spill] sm:$0xff] }
 0x2e2   : > { %v5045_v6 = vrot.slane %v4939_v11, 7  ;;  %v5047_v54 = vrot.slane %v4940_v53, 6  ;;  %v5049_v44 = vrot.slane %v4941_v63, 5  ;;  %v2744_v19 = vadd.f32 %v2707_v28, %v7626_v13 }
 0x2e3   : > { %v5797_v60 = vrot.slane %v4431_v36, 9  ;;  %v5798_v41 = vrot.slane %v4432_v21, 9  ;;  %v5799_v50 = vrot.slane %v4433_v7, 9  ;;  %v4750_v18 = vmax.f32 %v4430_v30, %v5796_v39  ;;  %v4044_v37 = vpop.f32.mrf.mxu0 }
 0x2e4   : > { %v5046_v35 = vsel %vm4955_vm9, %v5045_v6, %v4938_v46  ;;  %v3646_v26 = vpop.f32.mrf.mxu3  ;;  %v3031_v38 = vadd.f32 %v2994_v51, %v2744_v19 }
 0x2e5   : > { %v5048_v25 = vsel %vm4958_vm10, %v5047_v54, %v5046_v35  ;;  %v4751_v33 = vmax.f32 %v4431_v36, %v5797_v60  ;;  %v4752_v52 = vmax.f32 %v4432_v21, %v5798_v41  ;;  %v4753_v24 = vmax.f32 %v4433_v7, %v5799_v50  ;;  %v7628_v21 = vld [vmem:[#allocation10_spill] sm:$0xff] }
 0x2e6   : > { %v5050_v12 = vsel %vm4961_vm11, %v5049_v44, %v5048_v25  ;;  %v4814_v10 = vpack.c.bf16 %v4750_v18, %v4750_v18  ;;  %v3684_v58 = vadd.f32 %v3646_v26, %v3030_v1 }
 0x2e7   : > { %v4815_v5 = vpack.c.bf16 %v4751_v33, %v4751_v33  ;;  %v4816_v23 = vpack.c.bf16 %v4752_v52, %v4752_v52  ;;  %v4817_v59 = vpack.c.bf16 %v4753_v24, %v4753_v24 }
 0x2e8   : > { %v4942_v61 = vunpack.c.l.b16 %v4814_v10  ;;  %v4082_v9 = vadd.f32 %v4044_v37, %v3684_v58 }
 0x2e9   : > { %v4943_v62 = vunpack.c.l.b16 %v4815_v5  ;;  %v4944_v14 = vunpack.c.l.b16 %v4816_v23  ;;  %v4945_v8 = vunpack.c.l.b16 %v4817_v59  ;;  %v2710_v20 = vpop.f32.mrf.mxu1  ;;  %v2999_v53 = vpop.f32.mrf.mxu2 }
 0x2ea   : > { %v5051_v57 = vrot.slane %v4942_v61, 4  ;;  %v2745_v56 = vadd.f32 %v2710_v20, %v7627_v48  ;;  %v4118_v47 = vadd.f32 %v7496_v34, %v4082_v9 }
 0x2eb   : > { %v5053_v43 = vrot.slane %v4943_v62, 3  ;;  %v5055_v15 = vrot.slane %v4944_v14, 2  ;;  %v5057_v29 = vrot.slane %v4945_v8, 1  ;;  %v4046_v45 = vpop.f32.mrf.mxu0 }
 0x2ec   : > { %v5052_v55 = vsel %vm4964_vm12, %v5051_v57, %v5050_v12  ;;  %v3648_v31 = vpop.f32.mrf.mxu3  ;;  %v3032_v16 = vadd.f32 %v2997_v3, %v2745_v56  ;;  %v4150_v63 = vmax.f32 %v4118_v47, 0.0 }
 0x2ed   : > { %v5054_v40 = vsel %vm4967_vm13, %v5053_v43, %v5052_v55  ;;  %v3685_v17 = vadd.f32 %v3648_v31, %v3031_v38 }
 0x2ee   : > { %v5056_v4 = vsel %vm4970_vm14, %v5055_v15, %v5054_v40  ;;  %v4270_v54 = vrot.slane %v4150_v63, 2  ;;  %v4271_v60 = vrot.slane %v4150_v63, 4  ;;  %v4272_v41 = vrot.slane %v4150_v63, 6 }
 0x2ef   : > { %v5058_v49 = vsel %vm4973_vm15, %v5057_v29, %v5056_v4  ;;  %v4083_v36 = vadd.f32 %v4046_v45, %v3685_v17 }
 0x2f0   : > { %v5079_v22 = vpack.c.b16 %v5058_v49, %v5058_v49 }
 0x2f1   : > { %v2712_v27 = vpop.f32.mrf.mxu1  ;;  %v4119_v50 = vadd.f32 %v7496_v34, %v4083_v36 }
 0x2f2   : > { %5095 = vst [vmem:[%s7276_s15 + $0x18] sm:$0xf] %v5079_v22  ;;  %v2746_v7 = vadd.f32 %v2712_v27, %v7628_v21 }
 0x2f3   : > { %v4049_v42 = vpop.f32.mrf.mxu0  ;;  %v4151_v23 = vmax.f32 %v4119_v50, 0.0 }
 0x2f4   : > { %v3033_v46 = vadd.f32 %v2999_v53, %v2746_v7 }
 0x2f5   : > { %v4273_v43 = vrot.slane %v4151_v23, 2  ;;  %v4274_v15 = vrot.slane %v4151_v23, 4  ;;  %v4275_v55 = vrot.slane %v4151_v23, 6 }
 0x2f8   : > { %v3651_v0 = vpop.f32.mrf.mxu3 }
 0x2f9   : > { %v3686_v30 = vadd.f32 %v3651_v0, %v3032_v16 }
 0x2fb   : > { %v4084_v11 = vadd.f32 %v4049_v42, %v3686_v30  ;;  %v4051_v5 = vpop.f32.mrf.mxu0 }
 0x2fd   : > { %v4120_v39 = vadd.f32 %v7496_v34, %v4084_v11 }
 0x2ff   : > { %v4152_v6 = vmax.f32 %v4120_v39, 0.0 }
 0x300   : > { %v3653_v33 = vpop.f32.mrf.mxu3 }
 0x301   : > { %v4276_v18 = vrot.slane %v4152_v6, 2  ;;  %v4277_v35 = vrot.slane %v4152_v6, 4  ;;  %v4278_v44 = vrot.slane %v4152_v6, 6  ;;  %v4434_v25 = vmax.f32 %v4150_v63, %v4152_v6 }
 0x302   : > { %v3687_v52 = vadd.f32 %v3653_v33, %v3033_v46 }
 0x303   : > { %v4435_v24 = vmax.f32 %v4270_v54, %v4276_v18  ;;  %v4436_v12 = vmax.f32 %v4271_v60, %v4277_v35  ;;  %v4437_v10 = vmax.f32 %v4272_v41, %v4278_v44  ;;  %v5800_v26 = vrot.slane %v4434_v25, 9 }
 0x304   : > { %v4085_v59 = vadd.f32 %v4051_v5, %v3687_v52 }
 0x305   : > { %v5801_v37 = vrot.slane %v4435_v24, 9  ;;  %v5802_v28 = vrot.slane %v4436_v12, 9  ;;  %v5803_v61 = vrot.slane %v4437_v10, 9  ;;  %v4754_v62 = vmax.f32 %v4434_v25, %v5800_v26 }
 0x306   : > { %v4121_v14 = vadd.f32 %v7496_v34, %v4085_v59 }
 0x307   : > { %v4755_v8 = vmax.f32 %v4435_v24, %v5801_v37  ;;  %v4756_v51 = vmax.f32 %v4436_v12, %v5802_v28  ;;  %v4757_v57 = vmax.f32 %v4437_v10, %v5803_v61  ;;  %v4818_v32 = vpack.c.bf16 %v4754_v62, %v4754_v62 }
 0x308   : > { %v4153_v2 = vmax.f32 %v4121_v14, 0.0 }
 0x309   : > { %v4819_v40 = vpack.c.bf16 %v4755_v8, %v4755_v8  ;;  %v4820_v29 = vpack.c.bf16 %v4756_v51, %v4756_v51  ;;  %v4821_v4 = vpack.c.bf16 %v4757_v57, %v4757_v57  ;;  %v4946_v48 = vunpack.c.l.b16 %v4818_v32 }
 0x30a   : > { %v4279_v1 = vrot.slane %v4153_v2, 2  ;;  %v4280_v49 = vrot.slane %v4153_v2, 4  ;;  %v4281_v22 = vrot.slane %v4153_v2, 6  ;;  %v4438_v31 = vmax.f32 %v4151_v23, %v4153_v2 }
 0x30b   : > { %v4947_v45 = vunpack.c.l.b16 %v4819_v40  ;;  %v4948_v20 = vunpack.c.l.b16 %v4820_v29  ;;  %v4949_v58 = vunpack.c.l.b16 %v4821_v4 }
 0x30c   : > { %v4439_v3 = vmax.f32 %v4273_v43, %v4279_v1  ;;  %v4440_v34 = vmax.f32 %v4274_v15, %v4280_v49  ;;  %v4441_v13 = vmax.f32 %v4275_v55, %v4281_v22  ;;  %v5804_v19 = vrot.slane %v4438_v31, 9 }
 0x30d   : > { %v5059_v56 = vrot.slane %v4947_v45, 7  ;;  %v5061_v9 = vrot.slane %v4948_v20, 6  ;;  %v5063_v42 = vrot.slane %v4949_v58, 5 }
 0x30e   : > { %v5805_v38 = vrot.slane %v4439_v3, 9  ;;  %v5806_v16 = vrot.slane %v4440_v34, 9  ;;  %v5807_v47 = vrot.slane %v4441_v13, 9  ;;  %v4758_v17 = vmax.f32 %v4438_v31, %v5804_v19 }
 0x30f   : > { %v5060_v0 = vsel %vm4955_vm9, %v5059_v56, %v4946_v48 }
 0x310   : > { %v5062_v30 = vsel %vm4958_vm10, %v5061_v9, %v5060_v0  ;;  %v4759_v27 = vmax.f32 %v4439_v3, %v5805_v38  ;;  %v4760_v11 = vmax.f32 %v4440_v34, %v5806_v16  ;;  %v4761_v53 = vmax.f32 %v4441_v13, %v5807_v47 }
 0x311   : > { %v5064_v63 = vsel %vm4961_vm11, %v5063_v42, %v5062_v30  ;;  %v4822_v36 = vpack.c.bf16 %v4758_v17, %v4758_v17 }
 0x312   : > { %v4823_v21 = vpack.c.bf16 %v4759_v27, %v4759_v27  ;;  %v4824_v7 = vpack.c.bf16 %v4760_v11, %v4760_v11  ;;  %v4825_v39 = vpack.c.bf16 %v4761_v53, %v4761_v53 }
 0x313   : > { %v4950_v46 = vunpack.c.l.b16 %v4822_v36 }
 0x314   : > { %v4951_v6 = vunpack.c.l.b16 %v4823_v21  ;;  %v4952_v54 = vunpack.c.l.b16 %v4824_v7  ;;  %v4953_v60 = vunpack.c.l.b16 %v4825_v39 }
 0x315   : > { %v5065_v41 = vrot.slane %v4950_v46, 4 }
 0x316   : > { %v5067_v50 = vrot.slane %v4951_v6, 3  ;;  %v5069_v18 = vrot.slane %v4952_v54, 2  ;;  %v5071_v25 = vrot.slane %v4953_v60, 1 }
 0x317   : > { %v5066_v35 = vsel %vm4964_vm12, %v5065_v41, %v5064_v63 }
 0x318   : > { %v5068_v44 = vsel %vm4967_vm13, %v5067_v50, %v5066_v35 }
 0x319   : > { %v5070_v33 = vsel %vm4970_vm14, %v5069_v18, %v5068_v44 }
 0x31a   : > { %v5072_v52 = vsel %vm4973_vm15, %v5071_v25, %v5070_v33 }
 0x31b   : > { %v5080_v24 = vpack.c.b16 %v5072_v52, %v5072_v52 }
 0x31d   : > { %5096 = vst [vmem:[%s7276_s15 + $0x1c] sm:$0xf] %v5080_v24 }
 0x31e PF: > { %s13_s12 = sadd.s32 1, %s5930_s12  }
 0x31f   : > { %p10_p4 = scmp.ge.s32.totalorder %s13_s12, 4  }
 0x321   :  { %12 = sbr.rel (!%p10_p4) target bundleno = 1 (0x1), region = 72 }

</bundles_post_ra>
